<compile_context>
chip_gen: v6e
topology: v6e:2x2x1
jax: 0.10.0
libtpu: 0.0.40
codegen_flags: <defaults>
</compile_context>

<pallas_src>
import jax
import jax.numpy as jnp
from jax.experimental import pallas as pl
from jax.experimental.pallas import tpu as pltpu

# Keep the pure-JAX reference (and the in-kernel MXU f32 matmuls) at full f32
# precision so the correctness check is meaningful.
jax.config.update("jax_default_matmul_precision", "highest")

LANE = 128


def predictor_kernel(x_ref, y_ref,
                     w0_ref, b0_ref, w1_ref, b1_ref, w2_ref, b2_ref, ut_ref,
                     pred_ref, loss_ref):
    # ---- MLP: Linear -> ReLU -> Linear -> ReLU -> Linear (padded to 128 out cols) ----
    h = jnp.dot(x_ref[...], w0_ref[...], preferred_element_type=jnp.float32) + b0_ref[...]
    h = jnp.maximum(h, 0.0)
    h = jnp.dot(h, w1_ref[...], preferred_element_type=jnp.float32) + b1_ref[...]
    h = jnp.maximum(h, 0.0)
    out = jnp.dot(h, w2_ref[...], preferred_element_type=jnp.float32) + b2_ref[...]

    # ---- pred = |out|; padded columns of W2/b2 are zero so padded pred cols are 0 ----
    pred = jnp.abs(out)
    pred_ref[...] = pred                       # lane-dense (tb, 128) store

    # ---- row-normalize pred and Y (EUP approximate reciprocal + VPU multiply) ----
    y = y_ref[...]
    inv_p = pl.reciprocal(jnp.sum(pred, axis=1, keepdims=True), approx=True)
    inv_y = pl.reciprocal(jnp.sum(y, axis=1, keepdims=True), approx=True)
    diff = pred * inv_p - y * inv_y            # padded columns stay exactly 0

    # ---- EMD: sum(|cumsum(diff, dim=1)|) via matmul with precomputed U ----
    # U[k, j] = 1 if k <= j < d (zero in padded rows/cols), so padded cumsum cols = 0.
    csum = jnp.dot(diff, ut_ref[...], preferred_element_type=jnp.float32)
    emd = jnp.sum(jnp.abs(csum))

    # ---- MSE (reduction='sum') ----
    mse = jnp.sum(diff * diff)

    # ---- per-block partial losses, packed into one lane-dense (1, 8, 128) tile ----
    lane = jax.lax.broadcasted_iota(jnp.int32, (1, 8, LANE), 2)
    emd_v = jnp.full((1, 8, LANE), emd, jnp.float32)
    mse_v = jnp.full((1, 8, LANE), mse, jnp.float32)
    loss_ref[...] = jnp.where(lane == 0, emd_v,
                              jnp.where(lane == 1, mse_v, jnp.zeros_like(emd_v)))


def predictor_forward(x, y, w0, b0, w1, b1, w2, b2, *, block_b=1024):
    B, in_dim = x.shape
    h0 = w0.shape[1]
    h1 = w1.shape[1]
    d = w2.shape[1]
    d_pad = max(LANE, pl.cdiv(d, LANE) * LANE)

    tb = min(block_b, B)
    assert B % tb == 0, "batch must be divisible by the batch tile"
    n_blocks = B // tb

    # Zero-pad the output-feature dim to a full lane width (lane-dense stores,
    # better MXU N-utilization). Padded columns contribute exactly 0 everywhere.
    w2p = jnp.zeros((h1, d_pad), jnp.float32).at[:, :d].set(w2.astype(jnp.float32))
    b2p = jnp.zeros((1, d_pad), jnp.float32).at[:, :d].set(b2.astype(jnp.float32))
    yp = jnp.zeros((B, d_pad), jnp.float32).at[:, :d].set(y.astype(jnp.float32))
    ut = jnp.zeros((d_pad, d_pad), jnp.float32).at[:d, :d].set(
        jnp.triu(jnp.ones((d, d), jnp.float32)))

    # Full-array blocks with a constant index_map -> VMEM-resident across grid.
    resident = lambda shape: pl.BlockSpec(shape, lambda i: (0, 0))

    flops = 2 * B * (in_dim * h0 + h0 * h1 + h1 * d_pad + d_pad * d_pad)
    bytes_accessed = 4 * (B * in_dim + 2 * B * d_pad                # x, y, pred
                          + in_dim * h0 + h0 * h1 + h1 * d_pad     # weights
                          + h0 + h1 + d_pad                        # biases
                          + d_pad * d_pad                          # U
                          + n_blocks * 8 * LANE)                   # loss tiles

    grid_spec = pltpu.PrefetchScalarGridSpec(
        num_scalar_prefetch=0,
        grid=(n_blocks,),
        in_specs=[
            pl.BlockSpec((tb, in_dim), lambda i: (i, 0)),   # x tile
            pl.BlockSpec((tb, d_pad), lambda i: (i, 0)),    # y tile (padded)
            resident((in_dim, h0)), resident((1, h0)),      # layer 0
            resident((h0, h1)), resident((1, h1)),          # layer 1
            resident((h1, d_pad)), resident((1, d_pad)),    # layer 2 (padded)
            resident((d_pad, d_pad)),                       # upper-tri cumsum matrix
        ],
        out_specs=[
            pl.BlockSpec((tb, d_pad), lambda i: (i, 0)),    # pred tile (lane-dense)
            pl.BlockSpec((1, 8, LANE), lambda i: (i, 0, 0)),  # per-block loss tile
        ],
    )

    pred_pad, loss = pl.pallas_call(
        predictor_kernel,
        out_shape=(
            jax.ShapeDtypeStruct((B, d_pad), jnp.float32),
            jax.ShapeDtypeStruct((n_blocks, 8, LANE), jnp.float32),
        ),
        grid_spec=grid_spec,
        compiler_params=pltpu.CompilerParams(
            # No carried state -> batch axis can be sharded across TensorCores.
            dimension_semantics=("parallel",),
            vmem_limit_bytes=32 * 1024 * 1024,
        ),
        cost_estimate=pl.CostEstimate(
            flops=flops, transcendentals=2 * B, bytes_accessed=bytes_accessed),
    )(x, yp, w0, b0, w1, b1, w2p, b2p, ut)

    pred = pred_pad[:, :d]
    emd_loss = jnp.sum(loss[:, 0, 0])
    mse_loss = jnp.sum(loss[:, 0, 1])
    return pred, emd_loss, mse_loss


def _init_linear(key, fan_in, fan_out):
    # Deterministic init mimicking PyTorch's uniform(-1/sqrt(in), 1/sqrt(in)).
    kw, kb = jax.random.split(key)
    bound = 1.0 / jnp.sqrt(jnp.float32(fan_in))
    w = jax.random.uniform(kw, (fan_in, fan_out), jnp.float32, -bound, bound)
    b = jax.random.uniform(kb, (1, fan_out), jnp.float32, -bound, bound)
    return w, b


def _reference(x, y, w0, b0, w1, b1, w2, b2):
    h = jnp.maximum(x @ w0 + b0, 0.0)
    h = jnp.maximum(h @ w1 + b1, 0.0)
    pred = jnp.abs(h @ w2 + b2)
    np_ = pred / jnp.sum(pred, axis=1, keepdims=True)
    ny = y / jnp.sum(y, axis=1, keepdims=True)
    diff = np_ - ny
    emd = jnp.sum(jnp.abs(jnp.cumsum(diff, axis=1)))
    mse = jnp.sum(diff * diff)
    return pred, emd, mse


if __name__ == "__main__":
    B, input_dim, layers_dim, output_dim = 256, 32, (64, 32), 16

    key = jax.random.PRNGKey(0)
    kx, ky, k0, k1, k2 = jax.random.split(key, 5)

    x = jax.random.normal(kx, (B, input_dim), jnp.float32)
    # Y is a positive distribution-like target (normalization divides by its row sum).
    y = jnp.abs(jax.random.normal(ky, (B, output_dim), jnp.float32)) + 0.1

    w0, b0 = _init_linear(k0, input_dim, layers_dim[0])
    w1, b1 = _init_linear(k1, layers_dim[0], layers_dim[1])
    w2, b2 = _init_linear(k2, layers_dim[1], output_dim)

    pred, emd_loss, mse_loss = predictor_forward(x, y, w0, b0, w1, b1, w2, b2)
    jax.block_until_ready((pred, emd_loss, mse_loss))

    # Sanity check against a pure-JAX reference.
    # Loss tolerances account for the EUP approximate reciprocal (~12-bit).
    pred_ref, emd_ref, mse_ref = _reference(x, y, w0, b0, w1, b1, w2, b2)
    assert jnp.allclose(pred, pred_ref, rtol=5e-4, atol=1e-4)
    assert jnp.allclose(emd_loss, emd_ref, rtol=1e-2, atol=1e-2)
    assert jnp.allclose(mse_loss, mse_ref, rtol=1e-2, atol=1e-3)

    print("KERNEL_OK")
</pallas_src>

<mosaic_0001>
module attributes {stable_mosaic.version = 11 : i64} {
  func.func @predictor_kernel(%arg0: i32, %arg1: memref<256x32xf32, #tpu.memory_space<vmem>>, %arg2: memref<256x128xf32, #tpu.memory_space<vmem>>, %arg3: memref<32x64xf32, #tpu.memory_space<vmem>>, %arg4: memref<1x64xf32, #tpu.memory_space<vmem>>, %arg5: memref<64x32xf32, #tpu.memory_space<vmem>>, %arg6: memref<1x32xf32, #tpu.memory_space<vmem>>, %arg7: memref<32x128xf32, #tpu.memory_space<vmem>>, %arg8: memref<1x128xf32, #tpu.memory_space<vmem>>, %arg9: memref<128x128xf32, #tpu.memory_space<vmem>>, %arg10: memref<256x128xf32, #tpu.memory_space<vmem>>, %arg11: memref<1x8x128xf32, #tpu.memory_space<vmem>>) attributes {dimension_semantics = [#tpu.dimension_semantics<parallel>], iteration_bounds = array<i64: 1>, scalar_prefetch = 0 : i64, scratch_operands = 0 : i64, tpu.core_type = #tpu.core_type<tc>, window_params = [{transform_indices = @transform_0, window_bounds = array<i64: 256, 32>}, {transform_indices = @transform_1, window_bounds = array<i64: 256, 128>}, {pipeline_mode = #tpu.pipeline_mode<synchronous>, transform_indices = @transform_2, window_bounds = array<i64: 32, 64>}, {pipeline_mode = #tpu.pipeline_mode<synchronous>, transform_indices = @transform_3, window_bounds = array<i64: 1, 64>}, {pipeline_mode = #tpu.pipeline_mode<synchronous>, transform_indices = @transform_4, window_bounds = array<i64: 64, 32>}, {pipeline_mode = #tpu.pipeline_mode<synchronous>, transform_indices = @transform_5, window_bounds = array<i64: 1, 32>}, {pipeline_mode = #tpu.pipeline_mode<synchronous>, transform_indices = @transform_6, window_bounds = array<i64: 32, 128>}, {pipeline_mode = #tpu.pipeline_mode<synchronous>, transform_indices = @transform_7, window_bounds = array<i64: 1, 128>}, {pipeline_mode = #tpu.pipeline_mode<synchronous>, transform_indices = @transform_8, window_bounds = array<i64: 128, 128>}, {transform_indices = @transform_9, window_bounds = array<i64: 256, 128>}, {transform_indices = @transform_10, window_bounds = array<i64: 1, 8, 128>}]} {
    %c0 = arith.constant 0 : index
    %c0_0 = arith.constant 0 : index
    %0 = vector.load %arg1[%c0, %c0_0] : memref<256x32xf32, #tpu.memory_space<vmem>>, vector<256x32xf32>
    %c0_1 = arith.constant 0 : index
    %c0_2 = arith.constant 0 : index
    %1 = vector.load %arg3[%c0_1, %c0_2] : memref<32x64xf32, #tpu.memory_space<vmem>>, vector<32x64xf32>
    %cst = arith.constant dense<0.000000e+00> : vector<256x64xf32>
    %2 = tpu.matmul %0, %1, %cst {dimension_numbers = #tpu.dot_dimension_numbers<[1], [0], [0], [1], [0, 0, 1, 1], [], []>, precision = #tpu.contract_precision<fp32>} : vector<256x32xf32>, vector<32x64xf32>, vector<256x64xf32> -> vector<256x64xf32>
    %c0_3 = arith.constant 0 : index
    %c0_4 = arith.constant 0 : index
    %3 = vector.load %arg4[%c0_3, %c0_4] : memref<1x64xf32, #tpu.memory_space<vmem>>, vector<1x64xf32>
    %4 = vector.broadcast %3 : vector<1x64xf32> to vector<256x64xf32>
    %5 = arith.addf %2, %4 : vector<256x64xf32>
    %cst_5 = arith.constant 0.000000e+00 : f32
    %6 = vector.broadcast %cst_5 : f32 to vector<256x64xf32>
    %7 = arith.maximumf %5, %6 : vector<256x64xf32>
    %c0_6 = arith.constant 0 : index
    %c0_7 = arith.constant 0 : index
    %8 = vector.load %arg5[%c0_6, %c0_7] : memref<64x32xf32, #tpu.memory_space<vmem>>, vector<64x32xf32>
    %cst_8 = arith.constant dense<0.000000e+00> : vector<256x32xf32>
    %9 = tpu.matmul %7, %8, %cst_8 {dimension_numbers = #tpu.dot_dimension_numbers<[1], [0], [0], [1], [0, 0, 1, 1], [], []>, precision = #tpu.contract_precision<fp32>} : vector<256x64xf32>, vector<64x32xf32>, vector<256x32xf32> -> vector<256x32xf32>
    %c0_9 = arith.constant 0 : index
    %c0_10 = arith.constant 0 : index
    %10 = vector.load %arg6[%c0_9, %c0_10] : memref<1x32xf32, #tpu.memory_space<vmem>>, vector<1x32xf32>
    %11 = vector.broadcast %10 : vector<1x32xf32> to vector<256x32xf32>
    %12 = arith.addf %9, %11 : vector<256x32xf32>
    %cst_11 = arith.constant 0.000000e+00 : f32
    %13 = vector.broadcast %cst_11 : f32 to vector<256x32xf32>
    %14 = arith.maximumf %12, %13 : vector<256x32xf32>
    %c0_12 = arith.constant 0 : index
    %c0_13 = arith.constant 0 : index
    %15 = vector.load %arg7[%c0_12, %c0_13] : memref<32x128xf32, #tpu.memory_space<vmem>>, vector<32x128xf32>
    %cst_14 = arith.constant dense<0.000000e+00> : vector<256x128xf32>
    %16 = tpu.matmul %14, %15, %cst_14 {dimension_numbers = #tpu.dot_dimension_numbers<[1], [0], [0], [1], [0, 0, 1, 1], [], []>, precision = #tpu.contract_precision<fp32>} : vector<256x32xf32>, vector<32x128xf32>, vector<256x128xf32> -> vector<256x128xf32>
    %c0_15 = arith.constant 0 : index
    %c0_16 = arith.constant 0 : index
    %17 = vector.load %arg8[%c0_15, %c0_16] : memref<1x128xf32, #tpu.memory_space<vmem>>, vector<1x128xf32>
    %18 = vector.broadcast %17 : vector<1x128xf32> to vector<256x128xf32>
    %19 = arith.addf %16, %18 : vector<256x128xf32>
    %20 = math.absf %19 : vector<256x128xf32>
    %c0_17 = arith.constant 0 : index
    %c0_18 = arith.constant 0 : index
    %21 = vector.load %arg10[%c0_17, %c0_18] : memref<256x128xf32, #tpu.memory_space<vmem>>, vector<256x128xf32>
    tpu.vector_store %arg10[%c0_17, %c0_18], %20 {strides = array<i32>} : memref<256x128xf32, #tpu.memory_space<vmem>>, vector<256x128xf32>,
    %c0_19 = arith.constant 0 : index
    %c0_20 = arith.constant 0 : index
    %22 = vector.load %arg2[%c0_19, %c0_20] : memref<256x128xf32, #tpu.memory_space<vmem>>, vector<256x128xf32>
    %cst_21 = arith.constant dense<0.000000e+00> : vector<256xf32>
    %23 = vector.multi_reduction <add>, %20, %cst_21 [1] : vector<256x128xf32> to vector<256xf32>
    %24 = vector.shape_cast %23 : vector<256xf32> to vector<256x1xf32>
    %25 = tpu.reciprocal %24 {approx = true} : vector<256x1xf32> -> vector<256x1xf32>
    %cst_22 = arith.constant dense<0.000000e+00> : vector<256xf32>
    %26 = vector.multi_reduction <add>, %22, %cst_22 [1] : vector<256x128xf32> to vector<256xf32>
    %27 = vector.shape_cast %26 : vector<256xf32> to vector<256x1xf32>
    %28 = tpu.reciprocal %27 {approx = true} : vector<256x1xf32> -> vector<256x1xf32>
    %29 = vector.broadcast %25 : vector<256x1xf32> to vector<256x128xf32>
    %30 = arith.mulf %20, %29 : vector<256x128xf32>
    %31 = vector.broadcast %28 : vector<256x1xf32> to vector<256x128xf32>
    %32 = arith.mulf %22, %31 : vector<256x128xf32>
    %33 = arith.subf %30, %32 : vector<256x128xf32>
    %c0_23 = arith.constant 0 : index
    %c0_24 = arith.constant 0 : index
    %34 = vector.load %arg9[%c0_23, %c0_24] : memref<128x128xf32, #tpu.memory_space<vmem>>, vector<128x128xf32>
    %cst_25 = arith.constant dense<0.000000e+00> : vector<256x128xf32>
    %35 = tpu.matmul %33, %34, %cst_25 {dimension_numbers = #tpu.dot_dimension_numbers<[1], [0], [0], [1], [0, 0, 1, 1], [], []>, precision = #tpu.contract_precision<fp32>} : vector<256x128xf32>, vector<128x128xf32>, vector<256x128xf32> -> vector<256x128xf32>
    %36 = math.absf %35 : vector<256x128xf32>
    %37 = vector.shape_cast %36 : vector<256x128xf32> to vector<1x256x128xf32>
    %cst_26 = arith.constant dense<0.000000e+00> : vector<1xf32>
    %38 = vector.multi_reduction <add>, %37, %cst_26 [1, 2] : vector<1x256x128xf32> to vector<1xf32>
    %39 = vector.shape_cast %38 : vector<1xf32> to vector<1x1x1xf32>
    %40 = vector.extract %39[0, 0, 0] : f32 from vector<1x1x1xf32>
    %41 = arith.mulf %33, %33 : vector<256x128xf32>
    %42 = vector.shape_cast %41 : vector<256x128xf32> to vector<1x256x128xf32>
    %cst_27 = arith.constant dense<0.000000e+00> : vector<1xf32>
    %43 = vector.multi_reduction <add>, %42, %cst_27 [1, 2] : vector<1x256x128xf32> to vector<1xf32>
    %44 = vector.shape_cast %43 : vector<1xf32> to vector<1x1x1xf32>
    %45 = vector.extract %44[0, 0, 0] : f32 from vector<1x1x1xf32>
    %46 = tpu.iota {dimensions = array<i32: 2>} : vector<1x8x128xi32>
    %47 = vector.broadcast %40 : f32 to vector<1x8x128xf32>
    %48 = vector.broadcast %45 : f32 to vector<1x8x128xf32>
    %c0_i32 = arith.constant 0 : i32
    %49 = vector.broadcast %c0_i32 : i32 to vector<1x8x128xi32>
    %50 = arith.cmpi eq, %46, %49 : vector<1x8x128xi32>
    %c1_i32 = arith.constant 1 : i32
    %51 = vector.broadcast %c1_i32 : i32 to vector<1x8x128xi32>
    %52 = arith.cmpi eq, %46, %51 : vector<1x8x128xi32>
    %cst_28 = arith.constant 0.000000e+00 : f32
    %53 = vector.broadcast %cst_28 : f32 to vector<1x8x128xf32>
    %54 = arith.select %52, %48, %53 : vector<1x8x128xi1>, vector<1x8x128xf32>
    %55 = arith.select %50, %47, %54 : vector<1x8x128xi1>, vector<1x8x128xf32>
    %c0_29 = arith.constant 0 : index
    %c0_30 = arith.constant 0 : index
    %c0_31 = arith.constant 0 : index
    %56 = vector.load %arg11[%c0_29, %c0_30, %c0_31] : memref<1x8x128xf32, #tpu.memory_space<vmem>>, vector<1x8x128xf32>
    tpu.vector_store %arg11[%c0_29, %c0_30, %c0_31], %55 {strides = array<i32>} : memref<1x8x128xf32, #tpu.memory_space<vmem>>, vector<1x8x128xf32>,
    return
  }
  func.func @transform_0(%arg0: i32) -> (i32, i32) {
    %c0_i32 = arith.constant 0 : i32
    %c0_i32_0 = arith.constant 0 : i32
    return %arg0, %c0_i32 : i32, i32
  }
  func.func @transform_1(%arg0: i32) -> (i32, i32) {
    %c0_i32 = arith.constant 0 : i32
    %c0_i32_0 = arith.constant 0 : i32
    return %arg0, %c0_i32 : i32, i32
  }
  func.func @transform_2(%arg0: i32) -> (i32, i32) {
    %c0_i32 = arith.constant 0 : i32
    %c0_i32_0 = arith.constant 0 : i32
    %c0_i32_1 = arith.constant 0 : i32
    return %c0_i32, %c0_i32_0 : i32, i32
  }
  func.func @transform_3(%arg0: i32) -> (i32, i32) {
    %c0_i32 = arith.constant 0 : i32
    %c0_i32_0 = arith.constant 0 : i32
    %c0_i32_1 = arith.constant 0 : i32
    return %c0_i32, %c0_i32_0 : i32, i32
  }
  func.func @transform_4(%arg0: i32) -> (i32, i32) {
    %c0_i32 = arith.constant 0 : i32
    %c0_i32_0 = arith.constant 0 : i32
    %c0_i32_1 = arith.constant 0 : i32
    return %c0_i32, %c0_i32_0 : i32, i32
  }
  func.func @transform_5(%arg0: i32) -> (i32, i32) {
    %c0_i32 = arith.constant 0 : i32
    %c0_i32_0 = arith.constant 0 : i32
    %c0_i32_1 = arith.constant 0 : i32
    return %c0_i32, %c0_i32_0 : i32, i32
  }
  func.func @transform_6(%arg0: i32) -> (i32, i32) {
    %c0_i32 = arith.constant 0 : i32
    %c0_i32_0 = arith.constant 0 : i32
    %c0_i32_1 = arith.constant 0 : i32
    return %c0_i32, %c0_i32_0 : i32, i32
  }
  func.func @transform_7(%arg0: i32) -> (i32, i32) {
    %c0_i32 = arith.constant 0 : i32
    %c0_i32_0 = arith.constant 0 : i32
    %c0_i32_1 = arith.constant 0 : i32
    return %c0_i32, %c0_i32_0 : i32, i32
  }
  func.func @transform_8(%arg0: i32) -> (i32, i32) {
    %c0_i32 = arith.constant 0 : i32
    %c0_i32_0 = arith.constant 0 : i32
    %c0_i32_1 = arith.constant 0 : i32
    return %c0_i32, %c0_i32_0 : i32, i32
  }
  func.func @transform_9(%arg0: i32) -> (i32, i32) {
    %c0_i32 = arith.constant 0 : i32
    %c0_i32_0 = arith.constant 0 : i32
    return %arg0, %c0_i32 : i32, i32
  }
  func.func @transform_10(%arg0: i32) -> (i32, i32, i32) {
    %c0_i32 = arith.constant 0 : i32
    %c0_i32_0 = arith.constant 0 : i32
    %c0_i32_1 = arith.constant 0 : i32
    return %arg0, %c0_i32, %c0_i32_0 : i32, i32, i32
  }
}

</mosaic_0001>

<bundles_post_ra>
// kernel: tpu_custom_call.1
= control target key start
LH: loop header
LB: loop body
LE: loop exit
PB: predicated region body
PF: predicated region fallthrough
CT: control target
= control target key end

     0   :  { %16 = vsyncpa [#allocation3], 0  ;;  %s16354_s0 = inlined_call_operand.vmem [shape: f32[256,32], index: 0, kind: input, shape index: {}]   ;;  %s16355_s1 = inlined_call_operand.vmem [shape: f32[256,128], index: 1, kind: input, shape index: {}]   ;;  %s16356_s2 = inlined_call_operand.vmem [shape: f32[32,64], index: 2, kind: input, shape index: {}]   ;;  %s16357_s3 = inlined_call_operand.vmem [shape: f32[1,64], index: 3, kind: input, shape index: {}]   ;;  %s16358_s4 = inlined_call_operand.vmem [shape: f32[64,32], index: 4, kind: input, shape index: {}]   ;;  %s16359_s5 = inlined_call_operand.vmem [shape: f32[1,32], index: 5, kind: input, shape index: {}]   ;;  %s16360_s6 = inlined_call_operand.hbm [shape: f32[32,128], index: 6, kind: input, shape index: {}]   ;;  %s16361_s7 = inlined_call_operand.vmem [shape: f32[1,128], index: 7, kind: input, shape index: {}]   ;;  %s16362_s8 = inlined_call_operand.vmem [shape: f32[128,128], index: 8, kind: input, shape index: {}]   ;;  %s16363_s9 = inlined_call_operand.hbm [shape: f32[256,128], index: 9, kind: output, shape index: {0}]   ;;  %s16364_s10 = inlined_call_operand.hbm [shape: f32[1,8,128], index: 10, kind: output, shape index: {1}]  }
   0x1   :  { %17 = vsyncpa [#allocation4], 0 }
   0x2   :  { %18 = vsyncpa [#allocation7], 0  ;;  %s11289_s13 = smov [#allocation2]  }
   0x3   :  { %s36_s14 = sshll.u32 %s11289_s13, 4  ;;  %s37_s14 = int_to_ptr.vmem [resolvable:$true] %s36_s14 }
   0x4   :  { %s11231_s15 = scalar_lea.vmem %s37_s14, 512  ;;  %p11236_p1 = scmp.lt.s32.totalorder %s37_s14, %s37_s14 }
   0x5   :  { %p11232_p0 = scmp.ne.s32.totalorder %s37_s14, %s11231_s15  ;;  %p11237_p2 = scmp.lt.s32.totalorder %s11231_s15, %s11231_s15 }
   0x7   :  { %p11238_p3 = por %p11237_p2, %p11236_p1 }
   0x9   :  { %p11239_p4 = pnand %p11238_p3, %p11232_p0 }
   0xb   :  { %11242 = shalt.err (!%p11239_p4)
}
   0xc   :  { %s11290_s16 = smov 128   ;;  %s11291_s17 = smov 8  }
   0xd   :  { %42 = dma.hbm_to_vmem [thread:$0]  %s16360_s6, 512, %s37_s14, [#allocation3], %s11290_s16, %s11290_s16, %s11291_s17  }
   0xe   :  { %11283 = dma.done.wait [#allocation3], 512  }
   0xf   :  { %11284 = vsyncadd [#allocation3], 4294966784  ;;  %vm93_vm0 = vcmask 261120   ;;  %v85_v0 = vld [vmem:[%s16356_s2 + $0x18] sm:$0xff]  ;;  %v84_v1 = vld [vmem:[%s16356_s2 + $0x10] sm:$0xff]  ;;  %vm2055_vm1 = vcmask 523264  }
  0x10   :  { %v83_v2 = vld [vmem:[%s16356_s2 + $0x8] sm:$0xff]  ;;  %v11364_v3 = vand.u32 4294901760, %v85_v0  ;;  %v11366_v4 = vand.u32 4294901760, %v84_v1  ;;  %v82_v6 = vld [vmem:[%s16356_s2] sm:$0xff]  ;;  %v52_v12 = vld [vmem:[%s16354_s0 + $0x10] sm:$0xff] }
  0x11   :  { %v11368_v5 = vand.u32 4294901760, %v83_v2  ;;  %v50_v7 = vld [vmem:[%s16354_s0] sm:$0xff]  ;;  %v51_v8 = vld [vmem:[%s16354_s0 + $0x8] sm:$0xff]  ;;  %v11379_v9 = vand.u32 4294901760, %v82_v6  ;;  %v53_v13 = vld [vmem:[%s16354_s0 + $0x18] sm:$0xff]  ;;  %v101_v19 = vsel %vm93_vm0, %v52_v12, 0 }
  0x12   :  { %v95_v10 = vsel %vm93_vm0, %v50_v7, 0  ;;  %v98_v11 = vsel %vm93_vm0, %v51_v8, 0  ;;  %9500 = vmatprep.subr.mxu0 %v11364_v3  ;;  %v11391_v14 = vsub.f32 %v85_v0, %v11364_v3  ;;  %v11398_v17 = vsub.f32 %v84_v1, %v11366_v4  ;;  %v54_v38 = vld [vmem:[%s16354_s0 + $0x20] sm:$0xff]  ;;  %v55_v39 = vld [vmem:[%s16354_s0 + $0x28] sm:$0xff]  ;;  %v56_v44 = vld [vmem:[%s16354_s0 + $0x30] sm:$0xff] }
  0x13   :  { %v11393_v15 = vand.u32 4294901760, %v95_v10  ;;  %v11395_v16 = vand.u32 4294901760, %v98_v11  ;;  %9501 = vmatpush3.msra.mxu0 %v11364_v3  ;;  %v11402_v18 = vsub.f32 %v83_v2, %v11368_v5  ;;  %v104_v20 = vsel %vm93_vm0, %v53_v13, 0  ;;  %v57_v45 = vld [vmem:[%s16354_s0 + $0x38] sm:$0xff]  ;;  %v58_v50 = vld [vmem:[%s16354_s0 + $0x40] sm:$0xff]  ;;  %v59_v51 = vld [vmem:[%s16354_s0 + $0x48] sm:$0xff] }
  0x14   :  { %v11407_v21 = vsub.f32 %v82_v6, %v11379_v9  ;;  %9502 = vmatprep.subr.mxu0 %v11366_v4  ;;  %v11411_v22 = vand.u32 4294901760, %v11391_v14  ;;  %v11420_v25 = vand.u32 4294901760, %v11398_v17  ;;  %v11427_v27 = vand.u32 4294901760, %v101_v19  ;;  %v60_v0 = vld [vmem:[%s16354_s0 + $0x50] sm:$0xff]  ;;  %v61_v1 = vld [vmem:[%s16354_s0 + $0x58] sm:$0xff] }
  0x15   :  { %16800 = vst [vmem:[#allocation11_spill] sm:$0xff] %v11393_v15  ;;  %16801 = vst [vmem:[#allocation12_spill] sm:$0xff] %v11395_v16  ;;  %v11414_v23 = vsub.f32 %v95_v10, %v11393_v15  ;;  %v11417_v24 = vsub.f32 %v98_v11, %v11395_v16  ;;  %9564 = vmatprep.mubr.f32.mxu1 %v11393_v15  ;;  %9503 = vmatpush3.msra.mxu0 %v11366_v4  ;;  %v11425_v26 = vand.u32 4294901760, %v11402_v18 }
  0x16   :  { %16802 = vst [vmem:[#allocation13_spill] sm:$0xff] %v11427_v27  ;;  %v11429_v28 = vand.u32 4294901760, %v104_v20  ;;  %v11432_v29 = vand.u32 4294901760, %v11407_v21  ;;  %9504 = vmatprep.subr.mxu0 %v11368_v5  ;;  %v607_v30 = vsub.f32 %v11391_v14, %v11411_v22  ;;  %v614_v33 = vsub.f32 %v11398_v17, %v11420_v25 }
  0x17   :  { %v16378_v31 = vand.u32 4294901760, %v11414_v23  ;;  %v16377_v32 = vand.u32 4294901760, %v11417_v24  ;;  %9505 = vmatpush3.msra.mxu0 %v11368_v5  ;;  %v621_v34 = vsub.f32 %v11402_v18, %v11425_v26  ;;  %v11445_v35 = vsub.f32 %v101_v19, %v11427_v27 }
  0x18   :  { %16803 = vst [vmem:[#allocation14_spill] sm:$0xff] %v11429_v28  ;;  %v11448_v36 = vsub.f32 %v104_v20, %v11429_v28  ;;  %v628_v37 = vsub.f32 %v11407_v21, %v11432_v29  ;;  %9506 = vmatprep.subr.mxu0 %v11379_v9  ;;  %v608_v40 = vand.u32 4294901760, %v607_v30  ;;  %v615_v43 = vand.u32 4294901760, %v614_v33 }
  0x19   :  { %v262_v41 = vsub.f32 %v11414_v23, %v16378_v31  ;;  %v272_v42 = vsub.f32 %v11417_v24, %v16377_v32  ;;  %9507 = vmatpush3.msra.mxu0 %v11379_v9  ;;  %v622_v46 = vand.u32 4294901760, %v621_v34  ;;  %v16376_v47 = vand.u32 4294901760, %v11445_v35  ;;  %v72_v31 = vld [vmem:[%s16354_s0 + $0xb0] sm:$0xff] }
  0x1a   :  { %v16375_v48 = vand.u32 4294901760, %v11448_v36  ;;  %v629_v49 = vand.u32 4294901760, %v628_v37  ;;  %9556 = vmatprep.subr.mxu1 %v608_v40  ;;  %9612 = vmatprep.subr.mxu0 %v11391_v14  ;;  %v107_v54 = vsel %vm93_vm0, %v54_v38, 0  ;;  %v110_v55 = vsel %vm93_vm0, %v55_v39, 0 }
  0x1b   :  { %v263_v52 = vand.u32 4294901760, %v262_v41  ;;  %v273_v53 = vand.u32 4294901760, %v272_v42  ;;  %9557 = vmatpush3.msra.mxu1 %v608_v40  ;;  %v282_v56 = vsub.f32 %v11445_v35, %v16376_v47  ;;  %v11489_v58 = vand.u32 4294901760, %v107_v54 }
  0x1c   :  { %v292_v57 = vsub.f32 %v11448_v36, %v16375_v48  ;;  %v11491_v59 = vand.u32 4294901760, %v110_v55  ;;  %9558 = vmatprep.subr.mxu1 %v615_v43  ;;  %v113_v60 = vsel %vm93_vm0, %v56_v44, 0  ;;  %v116_v61 = vsel %vm93_vm0, %v57_v45, 0 }
  0x1d   :  { %16804 = vst [vmem:[#allocation15_spill] sm:$0xff] %v11489_v58  ;;  %9508 = vmatprep.mubr.f32.mxu0 %v263_v52  ;;  %v119_v62 = vsel %vm93_vm0, %v58_v50, 0  ;;  %v122_v63 = vsel %vm93_vm0, %v59_v51, 0  ;;  %9559 = vmatpush3.msra.mxu1 %v615_v43  ;;  %v283_v2 = vand.u32 4294901760, %v282_v56  ;;  %v11504_v7 = vsub.f32 %v107_v54, %v11489_v58  ;;  %v63_v50 = vld [vmem:[%s16354_s0 + $0x68] sm:$0xff] }
  0x1e   :  { %16805 = vst [vmem:[#allocation16_spill] sm:$0xff] %v11491_v59  ;;  %9509 = vmatmul.mubr.f32.vlgmr.msra.gmra.mxu0 %v273_v53  ;;  %v293_v6 = vand.u32 4294901760, %v292_v57  ;;  %v11507_v8 = vsub.f32 %v110_v55, %v11491_v59  ;;  %9560 = vmatprep.subr.mxu1 %v622_v46  ;;  %v11510_v10 = vand.u32 4294901760, %v113_v60  ;;  %v11512_v11 = vand.u32 4294901760, %v116_v61 }
  0x1f   :  { %9613 = vmatpush3.msra.mxu0 %v11391_v14  ;;  %v11514_v12 = vand.u32 4294901760, %v119_v62  ;;  %v11516_v13 = vand.u32 4294901760, %v122_v63  ;;  %9511 = vmatprep.mubr.f32.mxu0 %v283_v2  ;;  %v16372_v19 = vand.u32 4294901760, %v11504_v7  ;;  %v125_v30 = vsel %vm93_vm0, %v60_v0, 0 }
  0x20   :  { %16806 = vst [vmem:[#allocation17_spill] sm:$0xff] %v11510_v10  ;;  %16807 = vst [vmem:[#allocation18_spill] sm:$0xff] %v11512_v11  ;;  %9561 = vmatpush3.msra.mxu1 %v622_v46  ;;  %v16371_v20 = vand.u32 4294901760, %v11507_v8  ;;  %v128_v33 = vsel %vm93_vm0, %v61_v1, 0  ;;  %v11523_v14 = vsub.f32 %v113_v60, %v11510_v10  ;;  %v11526_v34 = vsub.f32 %v116_v61, %v11512_v11  ;;  %v64_v61 = vld [vmem:[%s16354_s0 + $0x70] sm:$0xff] }
  0x21   :  { %16808 = vst [vmem:[#allocation19_spill] sm:$0xff] %v11514_v12  ;;  %16809 = vst [vmem:[#allocation20_spill] sm:$0xff] %v11516_v13  ;;  %9562 = vmatprep.subr.mxu1 %v629_v49  ;;  %v11529_v37 = vsub.f32 %v119_v62, %v11514_v12  ;;  %v11532_v38 = vsub.f32 %v122_v63, %v11516_v13  ;;  %v302_v39 = vsub.f32 %v11504_v7, %v16372_v19  ;;  %v65_v62 = vld [vmem:[%s16354_s0 + $0x78] sm:$0xff] }
  0x22   :  { %9512 = vmatmul.mubr.f32.gmra.mxu0 %v293_v6  ;;  %9563 = vmatpush3.msra.mxu1 %v629_v49  ;;  %v312_v40 = vsub.f32 %v11507_v8, %v16371_v20  ;;  %v11540_v41 = vand.u32 4294901760, %v125_v30  ;;  %v11542_v42 = vand.u32 4294901760, %v128_v33  ;;  %v16370_v43 = vand.u32 4294901760, %v11523_v14  ;;  %v62_v49 = vld [vmem:[%s16354_s0 + $0x60] sm:$0xff] }
  0x23   :  { %9565 = vmatmul.mubr.f32.vlgmr.msra.gmra.mxu1 %v11395_v16  ;;  %9668 = vmatprep.subr.mxu1 %v11364_v3  ;;  %v16369_v44 = vand.u32 4294901760, %v11526_v34  ;;  %v16368_v45 = vand.u32 4294901760, %v11529_v37  ;;  %v16366_v46 = vand.u32 4294901760, %v11532_v38  ;;  %v303_v51 = vand.u32 4294901760, %v302_v39  ;;  %v66_v6 = vld [vmem:[%s16354_s0 + $0x80] sm:$0xff]  ;;  %v81_v16 = vld [vmem:[%s16354_s0 + $0xf8] sm:$0xff] }
  0x24   :  { %16810 = vst [vmem:[#allocation21_spill] sm:$0xff] %v11540_v41  ;;  %16811 = vst [vmem:[#allocation22_spill] sm:$0xff] %v11542_v42  ;;  %9669 = vmatpush3.msra.mxu1 %v11364_v3  ;;  %v313_v52 = vand.u32 4294901760, %v312_v40  ;;  %9567 = vmatprep.mubr.f32.mxu1 %v11427_v27  ;;  %v11559_v53 = vsub.f32 %v125_v30, %v11540_v41  ;;  %v11562_v54 = vsub.f32 %v128_v33, %v11542_v42  ;;  %v67_v30 = vld [vmem:[%s16354_s0 + $0x88] sm:$0xff] }
  0x25   :  { %v322_v55 = vsub.f32 %v11523_v14, %v16370_v43  ;;  %v332_v56 = vsub.f32 %v11526_v34, %v16369_v44  ;;  %v342_v57 = vsub.f32 %v11529_v37, %v16368_v45  ;;  %v352_v60 = vsub.f32 %v11532_v38, %v16366_v46  ;;  %9614 = vmatprep.subr.mxu0 %v11398_v17 }
  0x26   :  { %9514 = vmatprep.mubr.f32.mxu0 %v303_v51  ;;  %v16365_v63 = vand.u32 4294901760, %v11559_v53  ;;  %v16367_v0 = vand.u32 4294901760, %v11562_v54  ;;  %9615 = vmatpush3.msra.mxu0 %v11398_v17  ;;  %v131_v1 = vsel %vm93_vm0, %v62_v49, 0  ;;  %v134_v2 = vsel %vm93_vm0, %v63_v50, 0 }
  0x27   :  { %9515 = vmatmul.mubr.f32.gmra.mxu0 %v313_v52  ;;  %9568 = vmatmul.mubr.f32.gmra.mxu1 %v11429_v28  ;;  %v323_v33 = vand.u32 4294901760, %v322_v55  ;;  %v333_v39 = vand.u32 4294901760, %v332_v56  ;;  %v343_v40 = vand.u32 4294901760, %v342_v57  ;;  %v353_v17 = vand.u32 4294901760, %v352_v60  ;;  %v68_v60 = vld [vmem:[%s16354_s0 + $0x90] sm:$0xff] }
  0x28   :  { %9570 = vmatprep.mubr.f32.mxu1 %v11489_v58  ;;  %v362_v49 = vsub.f32 %v11559_v53, %v16365_v63  ;;  %9670 = vmatprep.subr.mxu1 %v11366_v4  ;;  %v11600_v50 = vand.u32 4294901760, %v131_v1  ;;  %v11602_v51 = vand.u32 4294901760, %v134_v2  ;;  %v137_v52 = vsel %vm93_vm0, %v64_v61, 0  ;;  %v69_v63 = vld [vmem:[%s16354_s0 + $0x98] sm:$0xff] }
  0x29   :  { %9517 = vmatprep.mubr.f32.mxu0 %v323_v33  ;;  %9671 = vmatpush3.msra.mxu1 %v11366_v4  ;;  %v140_v55 = vsel %vm93_vm0, %v65_v62, 0  ;;  %v143_v56 = vsel %vm93_vm0, %v66_v6, 0  ;;  %v146_v57 = vsel %vm93_vm0, %v67_v30, 0  ;;  %v372_v33 = vsub.f32 %v11562_v54, %v16367_v0 }
  0x2a   :  { %16812 = vst [vmem:[#allocation23_spill] sm:$0xff] %v11600_v50  ;;  %16813 = vst [vmem:[#allocation24_spill] sm:$0xff] %v11602_v51  ;;  %v363_v46 = vand.u32 4294901760, %v362_v49  ;;  %v11619_v61 = vsub.f32 %v131_v1, %v11600_v50  ;;  %v11622_v62 = vsub.f32 %v134_v2, %v11602_v51  ;;  %9616 = vmatprep.subr.mxu0 %v11402_v18  ;;  %9672 = vmatprep.subr.mxu1 %v11368_v5 }
  0x2b   :  { %9518 = vmatmul.mubr.f32.gmra.mxu0 %v333_v39  ;;  %9571 = vmatmul.mubr.f32.gmra.mxu1 %v11491_v59  ;;  %v11627_v6 = vand.u32 4294901760, %v137_v52  ;;  %v11629_v30 = vand.u32 4294901760, %v140_v55  ;;  %v11631_v49 = vand.u32 4294901760, %v143_v56  ;;  %v11633_v0 = vand.u32 4294901760, %v146_v57  ;;  %v77_v59 = vld [vmem:[%s16354_s0 + $0xd8] sm:$0xff] }
  0x2c   :  { %9520 = vmatprep.mubr.f32.mxu0 %v343_v40  ;;  %9573 = vmatprep.mubr.f32.mxu1 %v11510_v10  ;;  %v16373_v1 = vand.u32 4294901760, %v11619_v61  ;;  %v16374_v2 = vand.u32 4294901760, %v11622_v62  ;;  %v149_v45 = vsel %vm93_vm0, %v68_v60, 0  ;;  %v152_v39 = vsel %vm93_vm0, %v69_v63, 0 }
  0x2d   :  { %16814 = vst [vmem:[#allocation25_spill] sm:$0xff] %v11627_v6  ;;  %16815 = vst [vmem:[#allocation26_spill] sm:$0xff] %v11629_v30  ;;  %v11641_v44 = vsub.f32 %v137_v52, %v11627_v6  ;;  %v11644_v43 = vsub.f32 %v140_v55, %v11629_v30  ;;  %v11647_v20 = vsub.f32 %v143_v56, %v11631_v49  ;;  %9617 = vmatpush3.msra.mxu0 %v11402_v18 }
  0x2e   :  { %16816 = vst [vmem:[#allocation27_spill] sm:$0xff] %v11631_v49  ;;  %16817 = vst [vmem:[#allocation28_spill] sm:$0xff] %v11633_v0  ;;  %v11650_v40 = vsub.f32 %v146_v57, %v11633_v0  ;;  %v373_v19 = vand.u32 4294901760, %v372_v33  ;;  %v382_v60 = vsub.f32 %v11619_v61, %v16373_v1  ;;  %v11656_v63 = vand.u32 4294901760, %v149_v45  ;;  %9673 = vmatpush3.msra.mxu1 %v11368_v5  ;;  %v70_v33 = vld [vmem:[%s16354_s0 + $0xa0] sm:$0xff] }
  0x2f   :  { %v11658_v52 = vand.u32 4294901760, %v152_v39  ;;  %9618 = vmatprep.subr.mxu0 %v11407_v21  ;;  %9521 = vmatmul.mubr.f32.gmra.mxu0 %v353_v17  ;;  %v392_v18 = vsub.f32 %v11622_v62, %v16374_v2  ;;  %v16379_v55 = vand.u32 4294901760, %v11641_v44  ;;  %v16380_v56 = vand.u32 4294901760, %v11644_v43  ;;  %v71_v17 = vld [vmem:[%s16354_s0 + $0xa8] sm:$0xff] }
  0x30   :  { %16818 = vst [vmem:[#allocation29_spill] sm:$0xff] %v11656_v63  ;;  %9574 = vmatmul.mubr.f32.gmra.mxu1 %v11512_v11  ;;  %v16385_v57 = vand.u32 4294901760, %v11647_v20  ;;  %9523 = vmatprep.mubr.f32.mxu0 %v363_v46  ;;  %v383_v1 = vand.u32 4294901760, %v382_v60  ;;  %v11677_v2 = vsub.f32 %v149_v45, %v11656_v63  ;;  %v155_v60 = vsel %vm93_vm0, %v70_v33, 0 }
  0x31   :  { %9576 = vmatprep.mubr.f32.mxu1 %v11514_v12  ;;  %v402_v48 = vsub.f32 %v11641_v44, %v16379_v55  ;;  %9619 = vmatpush3.msra.mxu0 %v11407_v21  ;;  %v412_v32 = vsub.f32 %v11644_v43, %v16380_v56  ;;  %v11688_v46 = vsub.f32 %v152_v39, %v11658_v52  ;;  %v158_v45 = vsel %vm93_vm0, %v71_v17, 0  ;;  %v73_v55 = vld [vmem:[%s16354_s0 + $0xb8] sm:$0xff]  ;;  %v74_v21 = vld [vmem:[%s16354_s0 + $0xc0] sm:$0xff]  ;;  %v76_v56 = vld [vmem:[%s16354_s0 + $0xd0] sm:$0xff] }
  0x32   :  { %9674 = vmatprep.subr.mxu1 %v11379_v9  ;;  %9724 = vmatprep.subr.mxu0 %v11411_v22  ;;  %v393_v39 = vand.u32 4294901760, %v392_v18  ;;  %v422_v33 = vsub.f32 %v11647_v20, %v16385_v57  ;;  %v11709_v47 = vand.u32 4294901760, %v155_v60  ;;  %v11711_v12 = vand.u32 4294901760, %v158_v45 }
  0x33   :  { %9524 = vmatmul.mubr.f32.gmra.mxu0 %v373_v19  ;;  %v403_v17 = vand.u32 4294901760, %v402_v48  ;;  %v75_v19 = vld [vmem:[%s16354_s0 + $0xc8] sm:$0xff]  ;;  %v16819_v18 = vand.u32 4294901760, %v11650_v40  ;;  %v161_v57 = vsel %vm93_vm0, %v72_v31, 0  ;;  %v167_v48 = vsel %vm93_vm0, %v74_v21, 0  ;;  %9675 = vmatpush3.msra.mxu1 %v11379_v9 }
  0x34   :  { %9577 = vmatmul.mubr.f32.gmra.mxu1 %v11516_v13  ;;  %9526 = vmatprep.mubr.f32.mxu0 %v383_v1  ;;  %v164_v1 = vsel %vm93_vm0, %v73_v55, 0  ;;  %v11728_v10 = vsub.f32 %v155_v60, %v11709_v47  ;;  %v11735_v31 = vand.u32 4294901760, %v161_v57  ;;  %v11739_v21 = vand.u32 4294901760, %v167_v48 }
  0x35   :  { %9579 = vmatprep.mubr.f32.mxu1 %v11540_v41  ;;  %v432_v13 = vsub.f32 %v11650_v40, %v16819_v18  ;;  %v413_v41 = vand.u32 4294901760, %v412_v32  ;;  %v11731_v18 = vsub.f32 %v158_v45, %v11711_v12  ;;  %9780 = vmatprep.subr.mxu1 %v11364_v3  ;;  %v11737_v55 = vand.u32 4294901760, %v164_v1 }
  0x36   :  { %v170_v32 = vsel %vm93_vm0, %v75_v19, 0  ;;  %v423_v60 = vand.u32 4294901760, %v422_v33  ;;  %v16821_v45 = vand.u32 4294901760, %v11677_v2  ;;  %v11752_v58 = vsub.f32 %v161_v57, %v11735_v31 }
  0x37   :  { %16820 = vst [vmem:[#allocation30_spill] sm:$0xff] %v11731_v18  ;;  %9527 = vmatmul.mubr.f32.gmra.mxu0 %v393_v39  ;;  %v16406_v39 = vand.u32 4294901760, %v11728_v10  ;;  %v433_v19 = vand.u32 4294901760, %v432_v13  ;;  %v11758_v28 = vand.u32 4294901760, %v170_v32  ;;  %v176_v13 = vsel %vm93_vm0, %v77_v59, 0 }
  0x38   :  { %9580 = vmatmul.mubr.f32.gmra.mxu1 %v11542_v42  ;;  %9529 = vmatprep.mubr.f32.mxu0 %v403_v17  ;;  %v442_v11 = vsub.f32 %v11677_v2, %v16821_v45  ;;  %v173_v42 = vsel %vm93_vm0, %v76_v56, 0  ;;  %v16822_v17 = vand.u32 4294901760, %v11688_v46  ;;  %v11762_v56 = vsub.f32 %v164_v1, %v11737_v55 }
  0x39   :  { %9582 = vmatprep.mubr.f32.mxu1 %v11600_v50  ;;  %v11765_v45 = vsub.f32 %v167_v48, %v11739_v21  ;;  %v11767_v57 = vand.u32 4294901760, %v173_v42  ;;  %v462_v1 = vsub.f32 %v11728_v10, %v16406_v39  ;;  %v79_v48 = vld [vmem:[%s16354_s0 + $0xe8] sm:$0xff]  ;;  %v16823_v59 = vand.u32 4294901760, %v11731_v18  ;;  %v80_v39 = vld [vmem:[%s16354_s0 + $0xf0] sm:$0xff] }
  0x3a   :  { %v452_v33 = vsub.f32 %v11688_v46, %v16822_v17  ;;  %v78_v17 = vld [vmem:[%s16354_s0 + $0xe0] sm:$0xff]  ;;  %v11785_v27 = vsub.f32 %v170_v32, %v11758_v28 }
  0x3b   :  { %9530 = vmatmul.mubr.f32.gmra.mxu0 %v413_v41  ;;  %v443_v41 = vand.u32 4294901760, %v442_v11  ;;  %v179_v11 = vsel %vm93_vm0, %v78_v17, 0  ;;  %v463_v32 = vand.u32 4294901760, %v462_v1  ;;  %v16824_v17 = vand.u32 4294901760, %v11752_v58 }
  0x3c   :  { %9583 = vmatmul.mubr.f32.gmra.mxu1 %v11602_v51  ;;  %9532 = vmatprep.mubr.f32.mxu0 %v423_v60  ;;  %v472_v51 = vsub.f32 %v11731_v18, %v16823_v59  ;;  %v11787_v60 = vand.u32 4294901760, %v176_v13  ;;  %v453_v50 = vand.u32 4294901760, %v452_v33  ;;  %v11797_v59 = vsub.f32 %v173_v42, %v11767_v57 }
  0x3d   :  { %9585 = vmatprep.mubr.f32.mxu1 %v11627_v6  ;;  %v482_v15 = vsub.f32 %v11752_v58, %v16824_v17  ;;  %v11803_v18 = vand.u32 4294901760, %v179_v11  ;;  %v185_v33 = vsel %vm93_vm0, %v80_v39, 0  ;;  %v16825_v1 = vand.u32 4294901760, %v11762_v56 }
  0x3e   :  { %v473_v42 = vand.u32 4294901760, %v472_v51  ;;  %v11812_v6 = vsub.f32 %v176_v13, %v11787_v60  ;;  %v11828_v13 = vand.u32 4294901760, %v185_v33 }
  0x3f   :  { %9533 = vmatmul.mubr.f32.gmra.mxu0 %v433_v19  ;;  %v182_v19 = vsel %vm93_vm0, %v79_v48, 0  ;;  %v492_v17 = vsub.f32 %v11762_v56, %v16825_v1  ;;  %v16826_v48 = vand.u32 4294901760, %v11765_v45  ;;  %v483_v51 = vand.u32 4294901760, %v482_v15 }
  0x40   :  { %9586 = vmatmul.mubr.f32.gmra.mxu1 %v11629_v30  ;;  %9535 = vmatprep.mubr.f32.mxu0 %v443_v41  ;;  %v11822_v30 = vand.u32 4294901760, %v182_v19  ;;  %v188_v41 = vsel %vm93_vm0, %v81_v16, 0  ;;  %v16827_v1 = vand.u32 4294901760, %v11785_v27  ;;  %v16828_v16 = vand.u32 4294901760, %v11797_v59 }
  0x41   :  { %9588 = vmatprep.mubr.f32.mxu1 %v11631_v49  ;;  %v502_v39 = vsub.f32 %v11765_v45, %v16826_v48  ;;  %v493_v48 = vand.u32 4294901760, %v492_v17  ;;  %v11839_v15 = vand.u32 4294901760, %v188_v41 }
  0x42   :  { %v11837_v49 = vsub.f32 %v182_v19, %v11822_v30 }
  0x43   :  { %9536 = vmatmul.mubr.f32.gmra.mxu0 %v453_v50  ;;  %v11826_v50 = vsub.f32 %v179_v11, %v11803_v18  ;;  %v503_v11 = vand.u32 4294901760, %v502_v39  ;;  %v11855_v39 = vsub.f32 %v188_v41, %v11839_v15 }
  0x44   :  { %9589 = vmatmul.mubr.f32.gmra.mxu1 %v11633_v0  ;;  %9538 = vmatprep.mubr.f32.mxu0 %v463_v32  ;;  %v512_v0 = vsub.f32 %v11785_v27, %v16827_v1  ;;  %v16423_v32 = vand.u32 4294901760, %v11812_v6  ;;  %v11847_v1 = vsub.f32 %v185_v33, %v11828_v13 }
  0x45   :  { %9591 = vmatprep.mubr.f32.mxu1 %v11656_v63  ;;  %v522_v63 = vsub.f32 %v11797_v59, %v16828_v16  ;;  %v571_v41 = vand.u32 4294901760, %v11855_v39 }
  0x46   :  { %v513_v19 = vand.u32 4294901760, %v512_v0  ;;  %v532_v17 = vsub.f32 %v11812_v6, %v16423_v32 }
  0x47   :  { %9539 = vmatmul.mubr.f32.gmra.mxu0 %v473_v42  ;;  %v541_v42 = vand.u32 4294901760, %v11826_v50  ;;  %v523_v16 = vand.u32 4294901760, %v522_v63 }
  0x48   :  { %9592 = vmatmul.mubr.f32.gmra.mxu1 %v11658_v52  ;;  %9541 = vmatprep.mubr.f32.mxu0 %v483_v51  ;;  %v16424_v51 = vand.u32 4294901760, %v11837_v49  ;;  %v533_v0 = vand.u32 4294901760, %v532_v17  ;;  %v572_v17 = vsub.f32 %v11855_v39, %v571_v41 }
  0x49   :  { %9594 = vmatprep.mubr.f32.mxu1 %v11709_v47  ;;  %v542_v33 = vsub.f32 %v11826_v50, %v541_v42 }
  0x4a   :  { %v552_v32 = vsub.f32 %v11837_v49, %v16424_v51 }
  0x4b   :  { %9542 = vmatmul.mubr.f32.gmra.mxu0 %v493_v48  ;;  %v561_v48 = vand.u32 4294901760, %v11847_v1  ;;  %v543_v63 = vand.u32 4294901760, %v542_v33  ;;  %v16831_v33 = vand.u32 4294901760, %v11445_v35 }
  0x4c   :  { %9595 = vmatmul.mubr.f32.gmra.mxu1 %v11711_v12  ;;  %9544 = vmatprep.mubr.f32.mxu0 %v503_v11 }
  0x4d   :  { %9597 = vmatprep.mubr.f32.mxu1 %v11735_v31  ;;  %v562_v11 = vsub.f32 %v11847_v1, %v561_v48 }
  0x4f   :  { %9545 = vmatmul.mubr.f32.gmra.mxu0 %v513_v19  ;;  %v553_v19 = vand.u32 4294901760, %v552_v32  ;;  %v563_v51 = vand.u32 4294901760, %v562_v11  ;;  %v16829_v32 = vand.u32 4294901760, %v11414_v23  ;;  %v16875_v11 = vld [vmem:[#allocation26_spill] sm:$0xff] }
  0x50   :  { %9598 = vmatmul.mubr.f32.gmra.mxu1 %v11737_v55  ;;  %9547 = vmatprep.mubr.f32.mxu0 %v523_v16  ;;  %v573_v16 = vand.u32 4294901760, %v572_v17  ;;  %v16877_v17 = vld [vmem:[#allocation27_spill] sm:$0xff] }
  0x51   :  { %9600 = vmatprep.mubr.f32.mxu1 %v11739_v21 }
  0x53   :  { %9548 = vmatmul.mubr.f32.gmra.mxu0 %v533_v0  ;;  %v16873_v0 = vld [vmem:[#allocation25_spill] sm:$0xff] }
  0x54   :  { %9601 = vmatmul.mubr.f32.gmra.mxu1 %v11758_v28  ;;  %9550 = vmatprep.mubr.f32.mxu0 %v543_v63 }
  0x55   :  { %9603 = vmatprep.mubr.f32.mxu1 %v11767_v57 }
  0x57   :  { %9551 = vmatmul.mubr.f32.gmra.mxu0 %v553_v19 }
  0x58   :  { %9604 = vmatmul.mubr.f32.gmra.mxu1 %v11787_v60  ;;  %9553 = vmatprep.mubr.f32.mxu0 %v563_v51  ;;  %v16830_v51 = vand.u32 4294901760, %v11417_v24 }
  0x59   :  { %9606 = vmatprep.mubr.f32.mxu1 %v11803_v18 }
  0x5b   :  { %9554 = vmatmul.mubr.f32.gmra.mxu0 %v573_v16 }
  0x5c   :  { %9607 = vmatmul.mubr.f32.gmra.mxu1 %v11822_v30  ;;  %9620 = vmatprep.mubr.f32.mxu0 %v11414_v23  ;;  %v16833_v23 = vand.u32 4294901760, %v11504_v7 }
  0x5d   :  { %9609 = vmatprep.mubr.f32.mxu1 %v11828_v13 }
  0x5f   :  { %9621 = vmatmul.mubr.f32.vlgmr.msra.gmra.mxu0 %v11417_v24  ;;  %v16835_v24 = vand.u32 4294901760, %v11523_v14 }
  0x60   :  { %9610 = vmatmul.mubr.f32.gmra.mxu1 %v11839_v15  ;;  %9623 = vmatprep.mubr.f32.mxu0 %v11445_v35  ;;  %v16841_v35 = vand.u32 4294901760, %v11619_v61 }
  0x61   :  { %9676 = vmatprep.mubr.f32.mxu1 %v16829_v32  ;;  %9725 = vmatpush3.msra.mxu0 %v11411_v22  ;;  %v16832_v22 = vand.u32 4294901760, %v11448_v36  ;;  %v16879_v32 = vld [vmem:[#allocation28_spill] sm:$0xff] }
  0x62   :  { %9726 = vmatprep.subr.mxu0 %v11420_v25 }
  0x63   :  { %9624 = vmatmul.mubr.f32.gmra.mxu0 %v11448_v36  ;;  %v16843_v36 = vand.u32 4294901760, %v11641_v44 }
  0x64   :  { %9677 = vmatmul.mubr.f32.vlgmr.msra.gmra.mxu1 %v16830_v51  ;;  %9626 = vmatprep.mubr.f32.mxu0 %v11504_v7  ;;  %v16844_v7 = vand.u32 4294901760, %v11644_v43 }
  0x65   :  { %9781 = vmatpush3.msra.mxu1 %v11364_v3  ;;  %9679 = vmatprep.mubr.f32.mxu1 %v16831_v33  ;;  %v16834_v3 = vand.u32 4294901760, %v11507_v8  ;;  %v16880_v33 = vld [vmem:[#allocation29_spill] sm:$0xff] }
  0x66   :  { %9727 = vmatpush3.msra.mxu0 %v11420_v25  ;;  %9782 = vmatprep.subr.mxu1 %v11366_v4  ;;  %v16837_v25 = vand.u32 4294901760, %v11529_v37 }
  0x67   :  { %9728 = vmatprep.subr.mxu0 %v11425_v26  ;;  %9627 = vmatmul.mubr.f32.gmra.mxu0 %v11507_v8  ;;  %v16845_v8 = vand.u32 4294901760, %v11647_v20 }
  0x68   :  { %9680 = vmatmul.mubr.f32.gmra.mxu1 %v16832_v22  ;;  %9629 = vmatprep.mubr.f32.mxu0 %v11523_v14  ;;  %v16846_v14 = vand.u32 4294901760, %v11650_v40  ;;  %v2046_v22 = vld [vmem:[%s16358_s4 + $0x30] sm:$0xff] }
  0x69   :  { %9682 = vmatprep.mubr.f32.mxu1 %v16833_v23  ;;  %9783 = vmatpush3.msra.mxu1 %v11366_v4  ;;  %v16836_v4 = vand.u32 4294901760, %v11526_v34 }
  0x6a   :  { %9729 = vmatpush3.msra.mxu0 %v11425_v26  ;;  %9784 = vmatprep.subr.mxu1 %v11368_v5  ;;  %v16839_v26 = vand.u32 4294901760, %v11559_v53 }
  0x6b   :  { %9730 = vmatprep.subr.mxu0 %v11432_v29  ;;  %9630 = vmatmul.mubr.f32.gmra.mxu0 %v11526_v34  ;;  %v16847_v34 = vand.u32 4294901760, %v11677_v2 }
  0x6c   :  { %9683 = vmatmul.mubr.f32.gmra.mxu1 %v16834_v3  ;;  %9632 = vmatprep.mubr.f32.mxu0 %v11529_v37  ;;  %v16848_v37 = vld [vmem:[#allocation30_spill] sm:$0xff]  ;;  %v12045_v3 = vand.u32 4294901760, %v2046_v22 }
  0x6d   :  { %9685 = vmatprep.mubr.f32.mxu1 %v16835_v24  ;;  %9785 = vmatpush3.msra.mxu1 %v11368_v5  ;;  %v16838_v5 = vand.u32 4294901760, %v11532_v38 }
  0x6e   :  { %9731 = vmatpush3.msra.mxu0 %v11432_v29  ;;  %9786 = vmatprep.subr.mxu1 %v11379_v9  ;;  %v16840_v29 = vand.u32 4294901760, %v11562_v54  ;;  %v12050_v24 = vsub.f32 %v2046_v22, %v12045_v3 }
  0x6f   :  { %9633 = vmatmul.mubr.f32.gmra.mxu0 %v11532_v38  ;;  %9787 = vmatpush3.msra.mxu1 %v11379_v9  ;;  %v16842_v9 = vand.u32 4294901760, %v11622_v62  ;;  %v16849_v38 = vand.u32 4294901760, %v11688_v46 }
  0x70   :  { %9686 = vmatmul.mubr.f32.gmra.mxu1 %v16836_v4  ;;  %9635 = vmatprep.mubr.f32.mxu0 %v11559_v53  ;;  %v16853_v53 = vand.u32 4294901760, %v11762_v56  ;;  %v12056_v4 = vand.u32 4294901760, %v12050_v24 }
  0x71   :  { %9688 = vmatprep.mubr.f32.mxu1 %v16837_v25 }
  0x72   :  { %v2572_v25 = vsub.f32 %v12050_v24, %v12056_v4 }
  0x73   :  { %9636 = vmatmul.mubr.f32.gmra.mxu0 %v11562_v54  ;;  %v16855_v54 = vand.u32 4294901760, %v11785_v27 }
  0x74   :  { %9689 = vmatmul.mubr.f32.gmra.mxu1 %v16838_v5  ;;  %9638 = vmatprep.mubr.f32.mxu0 %v11619_v61  ;;  %v16857_v61 = vand.u32 4294901760, %v11812_v6  ;;  %v2045_v5 = vld [vmem:[%s16358_s4 + $0x28] sm:$0xff] }
  0x75   :  { %9691 = vmatprep.mubr.f32.mxu1 %v16839_v26  ;;  %v2573_v26 = vand.u32 4294901760, %v2572_v25 }
  0x77   :  { %9639 = vmatmul.mubr.f32.gmra.mxu0 %v11622_v62  ;;  %v16859_v62 = vld [vmem:[#allocation11_spill] sm:$0xff] }
  0x78   :  { %9692 = vmatmul.mubr.f32.gmra.mxu1 %v16840_v29  ;;  %9641 = vmatprep.mubr.f32.mxu0 %v11641_v44  ;;  %v16852_v44 = vand.u32 4294901760, %v11752_v58  ;;  %v12068_v29 = vand.u32 4294901760, %v2045_v5 }
  0x79   :  { %9694 = vmatprep.mubr.f32.mxu1 %v16841_v35 }
  0x7b   :  { %9642 = vmatmul.mubr.f32.gmra.mxu0 %v11644_v43  ;;  %v16851_v43 = vand.u32 4294901760, %v16848_v37 }
  0x7c   :  { %9695 = vmatmul.mubr.f32.gmra.mxu1 %v16842_v9  ;;  %9644 = vmatprep.mubr.f32.mxu0 %v11647_v20  ;;  %v16850_v20 = vand.u32 4294901760, %v11728_v10 }
  0x7d   :  { %9697 = vmatprep.mubr.f32.mxu1 %v16843_v36 }
  0x7f   :  { %9645 = vmatmul.mubr.f32.gmra.mxu0 %v11650_v40  ;;  %v16862_v40 = vld [vmem:[#allocation14_spill] sm:$0xff] }
  0x80   :  { %9698 = vmatmul.mubr.f32.gmra.mxu1 %v16844_v7  ;;  %9647 = vmatprep.mubr.f32.mxu0 %v11677_v2  ;;  %v16860_v2 = vld [vmem:[#allocation12_spill] sm:$0xff]  ;;  %16882 = vst [vmem:[#allocation14_spill] sm:$0xff] %v12050_v24 }
  0x81   :  { %9700 = vmatprep.mubr.f32.mxu1 %v16845_v8 }
  0x83   :  { %9648 = vmatmul.mubr.f32.gmra.mxu0 %v11688_v46  ;;  %v16864_v46 = vld [vmem:[#allocation16_spill] sm:$0xff] }
  0x84   :  { %9701 = vmatmul.mubr.f32.gmra.mxu1 %v16846_v14  ;;  %9650 = vmatprep.mubr.f32.mxu0 %v11728_v10  ;;  %v16854_v10 = vand.u32 4294901760, %v11765_v45  ;;  %16884 = vst [vmem:[#allocation16_spill] sm:$0xff] %v12068_v29 }
  0x85   :  { %9703 = vmatprep.mubr.f32.mxu1 %v16847_v34 }
  0x87   :  { %9651 = vmatmul.mubr.f32.gmra.mxu0 %v16848_v37 }
  0x88   :  { %9704 = vmatmul.mubr.f32.gmra.mxu1 %v16849_v38  ;;  %9653 = vmatprep.mubr.f32.mxu0 %v11752_v58  ;;  %v16856_v58 = vand.u32 4294901760, %v11797_v59 }
  0x89   :  { %9706 = vmatprep.mubr.f32.mxu1 %v16850_v20 }
  0x8b   :  { %9654 = vmatmul.mubr.f32.gmra.mxu0 %v11762_v56  ;;  %v16865_v56 = vld [vmem:[#allocation17_spill] sm:$0xff] }
  0x8c   :  { %9707 = vmatmul.mubr.f32.gmra.mxu1 %v16851_v43  ;;  %9656 = vmatprep.mubr.f32.mxu0 %v11765_v45  ;;  %v16866_v45 = vld [vmem:[#allocation18_spill] sm:$0xff]  ;;  %v2041_v43 = vld [vmem:[%s16358_s4 + $0x8] sm:$0xff] }
  0x8d   :  { %9709 = vmatprep.mubr.f32.mxu1 %v16852_v44 }
  0x8f   :  { %9657 = vmatmul.mubr.f32.gmra.mxu0 %v11785_v27  ;;  %v16858_v27 = vand.u32 4294901760, %v11837_v49 }
  0x90   :  { %9710 = vmatmul.mubr.f32.gmra.mxu1 %v16853_v53  ;;  %9659 = vmatprep.mubr.f32.mxu0 %v11797_v59  ;;  %v16867_v59 = vld [vmem:[#allocation19_spill] sm:$0xff]  ;;  %v12150_v53 = vand.u32 4294901760, %v2041_v43 }
  0x91   :  { %9712 = vmatprep.mubr.f32.mxu1 %v16854_v10 }
  0x92   :  { %16895 = vst [vmem:[#allocation27_spill] sm:$0xff] %v12150_v53 }
  0x93   :  { %9660 = vmatmul.mubr.f32.gmra.mxu0 %v11812_v6  ;;  %v16861_v6 = vld [vmem:[#allocation13_spill] sm:$0xff] }
  0x94   :  { %9713 = vmatmul.mubr.f32.gmra.mxu1 %v16855_v54  ;;  %9662 = vmatprep.mubr.f32.mxu0 %v11826_v50  ;;  %v16868_v50 = vld [vmem:[#allocation20_spill] sm:$0xff]  ;;  %16881 = vst [vmem:[#allocation13_spill] sm:$0xff] %v12045_v3 }
  0x95   :  { %9715 = vmatprep.mubr.f32.mxu1 %v16856_v58  ;;  %v2040_v58 = vld [vmem:[%s16358_s4] sm:$0xff] }
  0x97   :  { %9663 = vmatmul.mubr.f32.gmra.mxu0 %v11837_v49  ;;  %v16863_v49 = vld [vmem:[#allocation15_spill] sm:$0xff] }
  0x98   :  { %9716 = vmatmul.mubr.f32.gmra.mxu1 %v16857_v61  ;;  %9665 = vmatprep.mubr.f32.mxu0 %v11847_v1  ;;  %v16870_v1 = vld [vmem:[#allocation22_spill] sm:$0xff]  ;;  %16883 = vst [vmem:[#allocation15_spill] sm:$0xff] %v12056_v4 }
  0x99   :  { %9718 = vmatprep.mubr.f32.mxu1 %v541_v42  ;;  %v16869_v42 = vld [vmem:[#allocation21_spill] sm:$0xff] }
  0x9b   :  { %9666 = vmatmul.mubr.f32.gmra.mxu0 %v11855_v39  ;;  %v16871_v39 = vld [vmem:[#allocation23_spill] sm:$0xff] }
  0x9c   :  { %9719 = vmatmul.mubr.f32.gmra.mxu1 %v16858_v27  ;;  %9732 = vmatprep.mubr.f32.mxu0 %v16859_v62 }
  0x9d   :  { %9721 = vmatprep.mubr.f32.mxu1 %v561_v48  ;;  %v16872_v48 = vld [vmem:[#allocation24_spill] sm:$0xff] }
  0x9f   :  { %9733 = vmatmul.mubr.f32.vlgmr.msra.gmra.mxu0 %v16860_v2 }
  0xa0   :  { %9722 = vmatmul.mubr.f32.gmra.mxu1 %v571_v41  ;;  %9735 = vmatprep.mubr.f32.mxu0 %v16861_v6  ;;  %v2047_v41 = vld [vmem:[%s16358_s4 + $0x38] sm:$0xff] }
  0xa1   :  { %9788 = vmatprep.mubr.f32.mxu1 %v16859_v62  ;;  %v12022_v63 = vand.u32 4294901760, %v2047_v41 }
  0xa3   :  { %9736 = vmatmul.mubr.f32.gmra.mxu0 %v16862_v40  ;;  %16874 = vst [vmem:[#allocation30_spill] sm:$0xff] %v12022_v63  ;;  %v12027_v19 = vsub.f32 %v2047_v41, %v12022_v63  ;;  %9836 = vmatprep.subr.mxu0 %v12022_v63 }
  0xa4   :  { %9789 = vmatmul.mubr.f32.vlgmr.msra.gmra.mxu1 %v16860_v2  ;;  %9738 = vmatprep.mubr.f32.mxu0 %v16863_v49  ;;  %v12166_v2 = vsub.f32 %v2041_v43, %v12150_v53 }
  0xa5   :  { %9791 = vmatprep.mubr.f32.mxu1 %v16861_v6  ;;  %16876 = vst [vmem:[#allocation11_spill] sm:$0xff] %v12027_v19  ;;  %v12033_v16 = vand.u32 4294901760, %v12027_v19  ;;  %9837 = vmatpush3.msra.mxu0 %v12022_v63  ;;  %v12168_v6 = vand.u32 4294901760, %v2040_v58 }
  0xa6   :  { %9838 = vmatprep.subr.mxu0 %v12045_v3  ;;  %16897 = vst [vmem:[#allocation29_spill] sm:$0xff] %v12166_v2 }
  0xa7   :  { %9739 = vmatmul.mubr.f32.gmra.mxu0 %v16864_v46  ;;  %16878 = vst [vmem:[#allocation12_spill] sm:$0xff] %v12033_v16  ;;  %v2565_v51 = vsub.f32 %v12027_v19, %v12033_v16  ;;  %16898 = vst [vmem:[#allocation31_spill] sm:$0xff] %v12168_v6 }
  0xa8   :  { %9792 = vmatmul.mubr.f32.gmra.mxu1 %v16862_v40  ;;  %9741 = vmatprep.mubr.f32.mxu0 %v16865_v56 }
  0xa9   :  { %9794 = vmatprep.mubr.f32.mxu1 %v16863_v49  ;;  %v2566_v23 = vand.u32 4294901760, %v2565_v51  ;;  %9839 = vmatpush3.msra.mxu0 %v12045_v3 }
  0xaa   :  { %9840 = vmatprep.subr.mxu0 %v12068_v29 }
  0xab   :  { %9742 = vmatmul.mubr.f32.gmra.mxu0 %v16866_v45  ;;  %9900 = vmatprep.subr.mxu1 %v2566_v23 }
  0xac   :  { %9795 = vmatmul.mubr.f32.gmra.mxu1 %v16864_v46  ;;  %9744 = vmatprep.mubr.f32.mxu0 %v16867_v59  ;;  %v12176_v46 = vand.u32 4294901760, %v12166_v2 }
  0xad   :  { %9797 = vmatprep.mubr.f32.mxu1 %v16865_v56  ;;  %9901 = vmatpush3.msra.mxu1 %v2566_v23 }
  0xae   :  { %9902 = vmatprep.subr.mxu1 %v2573_v26  ;;  %9841 = vmatpush3.msra.mxu0 %v12068_v29  ;;  %16899 = vst [vmem:[#allocation32_spill] sm:$0xff] %v12176_v46 }
  0xaf   :  { %9745 = vmatmul.mubr.f32.gmra.mxu0 %v16868_v50  ;;  %9903 = vmatpush3.msra.mxu1 %v2573_v26 }
  0xb0   :  { %9798 = vmatmul.mubr.f32.gmra.mxu1 %v16866_v45  ;;  %9747 = vmatprep.mubr.f32.mxu0 %v16869_v42 }
  0xb1   :  { %9800 = vmatprep.mubr.f32.mxu1 %v16867_v59  ;;  %v12180_v59 = vsub.f32 %v2040_v58, %v12168_v6 }
  0xb3   :  { %9748 = vmatmul.mubr.f32.gmra.mxu0 %v16870_v1  ;;  %16900 = vst [vmem:[#allocation33_spill] sm:$0xff] %v12180_v59  ;;  %v12194_v41 = vand.u32 4294901760, %v12180_v59 }
  0xb4   :  { %9801 = vmatmul.mubr.f32.gmra.mxu1 %v16868_v50  ;;  %9750 = vmatprep.mubr.f32.mxu0 %v16871_v39 }
  0xb5   :  { %9803 = vmatprep.mubr.f32.mxu1 %v16869_v42  ;;  %16901 = vst [vmem:[#allocation34_spill] sm:$0xff] %v12194_v41  ;;  %v2614_v51 = vsub.f32 %v12180_v59, %v12194_v41 }
  0xb7   :  { %9751 = vmatmul.mubr.f32.gmra.mxu0 %v16872_v48 }
  0xb8   :  { %9804 = vmatmul.mubr.f32.gmra.mxu1 %v16870_v1  ;;  %9753 = vmatprep.mubr.f32.mxu0 %v16873_v0 }
  0xb9   :  { %9806 = vmatprep.mubr.f32.mxu1 %v16871_v39  ;;  %v2607_v39 = vsub.f32 %v12166_v2, %v12176_v46 }
  0xbb   :  { %9754 = vmatmul.mubr.f32.gmra.mxu0 %v16875_v11 }
  0xbc   :  { %9807 = vmatmul.mubr.f32.gmra.mxu1 %v16872_v48  ;;  %9756 = vmatprep.mubr.f32.mxu0 %v16877_v17 }
  0xbd   :  { %9809 = vmatprep.mubr.f32.mxu1 %v16873_v0 }
  0xbf   :  { %9757 = vmatmul.mubr.f32.gmra.mxu0 %v16879_v32 }
  0xc0   :  { %9810 = vmatmul.mubr.f32.gmra.mxu1 %v16875_v11  ;;  %9759 = vmatprep.mubr.f32.mxu0 %v16880_v33  ;;  %v2608_v11 = vand.u32 4294901760, %v2607_v39 }
  0xc1   :  { %9812 = vmatprep.mubr.f32.mxu1 %v16877_v17 }
  0xc3   :  { %9760 = vmatmul.mubr.f32.gmra.mxu0 %v11658_v52 }
  0xc4   :  { %9813 = vmatmul.mubr.f32.gmra.mxu1 %v16879_v32  ;;  %9762 = vmatprep.mubr.f32.mxu0 %v11709_v47 }
  0xc5   :  { %9815 = vmatprep.mubr.f32.mxu1 %v16880_v33 }
  0xc7   :  { %9763 = vmatmul.mubr.f32.gmra.mxu0 %v11711_v12 }
  0xc8   :  { %9816 = vmatmul.mubr.f32.gmra.mxu1 %v11658_v52  ;;  %9765 = vmatprep.mubr.f32.mxu0 %v11735_v31  ;;  %v12073_v52 = vsub.f32 %v2045_v5, %v12068_v29  ;;  %v2615_v5 = vand.u32 4294901760, %v2614_v51 }
  0xc9   :  { %9818 = vmatprep.mubr.f32.mxu1 %v11709_v47 }
  0xca   :  { %16885 = vst [vmem:[#allocation17_spill] sm:$0xff] %v12073_v52  ;;  %v12079_v47 = vand.u32 4294901760, %v12073_v52 }
  0xcb   :  { %9766 = vmatmul.mubr.f32.gmra.mxu0 %v11737_v55 }
  0xcc   :  { %9819 = vmatmul.mubr.f32.gmra.mxu1 %v11711_v12  ;;  %9768 = vmatprep.mubr.f32.mxu0 %v11739_v21  ;;  %16886 = vst [vmem:[#allocation18_spill] sm:$0xff] %v12079_v47  ;;  %v2579_v12 = vsub.f32 %v12073_v52, %v12079_v47 }
  0xcd   :  { %9821 = vmatprep.mubr.f32.mxu1 %v11735_v31  ;;  %v2044_v31 = vld [vmem:[%s16358_s4 + $0x20] sm:$0xff] }
  0xce   :  { %v2580_v35 = vand.u32 4294901760, %v2579_v12  ;;  %v12091_v9 = vand.u32 4294901760, %v2044_v31 }
  0xcf   :  { %9769 = vmatmul.mubr.f32.gmra.mxu0 %v11758_v28 }
  0xd0   :  { %9822 = vmatmul.mubr.f32.gmra.mxu1 %v11737_v55  ;;  %9771 = vmatprep.mubr.f32.mxu0 %v11767_v57  ;;  %16887 = vst [vmem:[#allocation19_spill] sm:$0xff] %v12091_v9  ;;  %v12096_v55 = vsub.f32 %v2044_v31, %v12091_v9 }
  0xd1   :  { %9824 = vmatprep.mubr.f32.mxu1 %v11739_v21  ;;  %9904 = vmatprep.subr.mxu1 %v2580_v35 }
  0xd2   :  { %16888 = vst [vmem:[#allocation20_spill] sm:$0xff] %v12096_v55  ;;  %9842 = vmatprep.subr.mxu0 %v12091_v9  ;;  %v12102_v21 = vand.u32 4294901760, %v12096_v55  ;;  %9905 = vmatpush3.msra.mxu1 %v2580_v35 }
  0xd3   :  { %9772 = vmatmul.mubr.f32.gmra.mxu0 %v11787_v60 }
  0xd4   :  { %9825 = vmatmul.mubr.f32.gmra.mxu1 %v11758_v28  ;;  %9774 = vmatprep.mubr.f32.mxu0 %v11803_v18  ;;  %16889 = vst [vmem:[#allocation21_spill] sm:$0xff] %v12102_v21  ;;  %v2586_v28 = vsub.f32 %v12096_v55, %v12102_v21 }
  0xd5   :  { %9827 = vmatprep.mubr.f32.mxu1 %v11767_v57  ;;  %9843 = vmatpush3.msra.mxu0 %v12091_v9  ;;  %v2043_v57 = vld [vmem:[%s16358_s4 + $0x18] sm:$0xff] }
  0xd6   :  { %v2587_v36 = vand.u32 4294901760, %v2586_v28  ;;  %v12114_v7 = vand.u32 4294901760, %v2043_v57 }
  0xd7   :  { %9775 = vmatmul.mubr.f32.gmra.mxu0 %v11822_v30 }
  0xd8   :  { %9828 = vmatmul.mubr.f32.gmra.mxu1 %v11787_v60  ;;  %9777 = vmatprep.mubr.f32.mxu0 %v11828_v13  ;;  %16890 = vst [vmem:[#allocation22_spill] sm:$0xff] %v12114_v7  ;;  %v12119_v60 = vsub.f32 %v2043_v57, %v12114_v7 }
  0xd9   :  { %9830 = vmatprep.mubr.f32.mxu1 %v11803_v18  ;;  %9906 = vmatprep.subr.mxu1 %v2587_v36  ;;  %v12125_v18 = vld [vmem:[%s16357_s3] ss:$0 sm:$0xff] }
  0xda   :  { %16891 = vst [vmem:[#allocation23_spill] sm:$0xff] %v12119_v60  ;;  %9907 = vmatpush3.msra.mxu1 %v2587_v36  ;;  %9844 = vmatprep.subr.mxu0 %v12114_v7  ;;  %v12129_v8 = vand.u32 4294901760, %v12119_v60 }
  0xdb   :  { %9778 = vmatmul.mubr.f32.gmra.mxu0 %v11839_v15 }
  0xdc   :  { %9831 = vmatmul.mubr.f32.gmra.mxu1 %v11822_v30  ;;  %16892 = vst [vmem:[#allocation24_spill] sm:$0xff] %v12129_v8  ;;  %9845 = vmatpush3.msra.mxu0 %v12114_v7  ;;  %v2593_v30 = vsub.f32 %v12119_v60, %v12129_v8 }
  0xdd   :  { %9833 = vmatprep.mubr.f32.mxu1 %v11828_v13  ;;  %v2042_v13 = vld [vmem:[%s16358_s4 + $0x10] sm:$0xff] }
  0xde   :  { %v9510_v14 = vpop.f32.mrf.mxu0  ;;  %v12141_v38 = vand.u32 4294901760, %v2042_v13  ;;  %v2594_v20 = vand.u32 4294901760, %v2593_v30 }
  0xdf   :  { %v276_v34 = vadd.f32 %v9510_v14, %v12125_v18 }
  0xe0   :  { %9834 = vmatmul.mubr.f32.gmra.mxu1 %v11839_v15  ;;  %v12139_v37 = vpop.f32.mrf.mxu0  ;;  %16893 = vst [vmem:[#allocation25_spill] sm:$0xff] %v12141_v38  ;;  %9846 = vmatprep.subr.mxu0 %v12141_v38  ;;  %v12148_v15 = vsub.f32 %v2042_v13, %v12141_v38 }
  0xe1   :  { %9908 = vmatprep.subr.mxu1 %v2594_v20  ;;  %9847 = vmatpush3.msra.mxu0 %v12141_v38 }
  0xe2   :  { %v9513_v44 = vpop.f32.mrf.mxu0  ;;  %16894 = vst [vmem:[#allocation26_spill] sm:$0xff] %v12148_v15  ;;  %9909 = vmatpush3.msra.mxu1 %v2594_v20  ;;  %v12162_v62 = vand.u32 4294901760, %v12148_v15  ;;  %9848 = vmatprep.subr.mxu0 %v12150_v53 }
  0xe3   :  { %v296_v10 = vadd.f32 %v9513_v44, %v12125_v18  ;;  %v9566_v54 = vpop.f32.mrf.mxu1  ;;  %9849 = vmatpush3.msra.mxu0 %v12150_v53 }
  0xe4   :  { %v12157_v61 = vpop.f32.mrf.mxu0  ;;  %v12159_v27 = vadd.f32 %v9566_v54, %v276_v34  ;;  %16896 = vst [vmem:[#allocation28_spill] sm:$0xff] %v12162_v62  ;;  %v2600_v49 = vsub.f32 %v12148_v15, %v12162_v62  ;;  %9850 = vmatprep.subr.mxu0 %v12168_v6 }
  0xe5   :  { %v12170_v40 = vpop.f32.mrf.mxu1  ;;  %9851 = vmatpush3.msra.mxu0 %v12168_v6 }
  0xe6   :  { %v2601_v1 = vand.u32 4294901760, %v2600_v49  ;;  %9964 = vmatprep.subr.mxu0 %v12027_v19 }
  0xe7   :  { %v9516_v56 = vpop.f32.mrf.mxu0  ;;  %v9569_v45 = vpop.f32.mrf.mxu1 }
  0xe8   :  { %v316_v50 = vadd.f32 %v9516_v56, %v12125_v18  ;;  %v12184_v42 = vadd.f32 %v9569_v45, %v296_v10  ;;  %9910 = vmatprep.subr.mxu1 %v2601_v1 }
  0xe9   :  { %v12189_v48 = vpop.f32.mrf.mxu0  ;;  %v12191_v0 = vpop.f32.mrf.mxu1  ;;  %9911 = vmatpush3.msra.mxu1 %v2601_v1 }
  0xea   :  { %9912 = vmatprep.subr.mxu1 %v2608_v11 }
  0xeb   :  { %v9519_v17 = vpop.f32.mrf.mxu0  ;;  %v9572_v32 = vpop.f32.mrf.mxu1  ;;  %9913 = vmatpush3.msra.mxu1 %v2608_v11 }
  0xec   :  { %v336_v33 = vadd.f32 %v9519_v17, %v12125_v18  ;;  %v12199_v22 = vadd.f32 %v9572_v32, %v316_v50  ;;  %9914 = vmatprep.subr.mxu1 %v2615_v5 }
  0xed   :  { %v12201_v23 = vpop.f32.mrf.mxu0  ;;  %v12203_v25 = vpop.f32.mrf.mxu1  ;;  %9915 = vmatpush3.msra.mxu1 %v2615_v5 }
  0xee   :  { %10028 = vmatprep.subr.mxu1 %v12022_v63 }
  0xef   :  { %v9522_v26 = vpop.f32.mrf.mxu0 }
  0xf0   :  { %v9575_v12 = vpop.f32.mrf.mxu1  ;;  %v356_v31 = vadd.f32 %v9522_v26, %v12125_v18 }
  0xf1   :  { %v12206_v35 = vadd.f32 %v9575_v12, %v336_v33  ;;  %v12208_v28 = vpop.f32.mrf.mxu0 }
  0xf2   :  { %v12210_v57 = vpop.f32.mrf.mxu1 }
  0xf3   :  { %v9525_v36 = vpop.f32.mrf.mxu0 }
  0xf4   :  { %v9578_v14 = vpop.f32.mrf.mxu1  ;;  %v376_v30 = vadd.f32 %v9525_v36, %v12125_v18 }
  0xf5   :  { %v12214_v13 = vadd.f32 %v9578_v14, %v356_v31  ;;  %v12216_v34 = vpop.f32.mrf.mxu0 }
  0xf6   :  { %v12218_v20 = vpop.f32.mrf.mxu1 }
  0xf7   :  { %16902 = vst [vmem:[#allocation35_spill] sm:$0xff] %v12214_v13  ;;  %v9528_v43 = vpop.f32.mrf.mxu0 }
  0xf8   :  { %v9581_v44 = vpop.f32.mrf.mxu1  ;;  %v396_v10 = vadd.f32 %v9528_v43, %v12125_v18 }
  0xf9   :  { %v12221_v54 = vadd.f32 %v9581_v44, %v376_v30  ;;  %v12223_v58 = vpop.f32.mrf.mxu0 }
  0xfa   :  { %v12225_v49 = vpop.f32.mrf.mxu1 }
  0xfb   :  { %16903 = vst [vmem:[#allocation36_spill] sm:$0xff] %v12221_v54  ;;  %v9531_v56 = vpop.f32.mrf.mxu0 }
  0xfc   :  { %v9584_v45 = vpop.f32.mrf.mxu1  ;;  %v416_v50 = vadd.f32 %v9531_v56, %v12125_v18 }
  0xfd   :  { %v12228_v1 = vadd.f32 %v9584_v45, %v396_v10  ;;  %v12230_v39 = vpop.f32.mrf.mxu0 }
  0xfe   :  { %v12232_v11 = vpop.f32.mrf.mxu1 }
  0xff   :  { %16904 = vst [vmem:[#allocation37_spill] sm:$0xff] %v12228_v1  ;;  %v9534_v17 = vpop.f32.mrf.mxu0 }
 0x100   :  { %v9587_v32 = vpop.f32.mrf.mxu1  ;;  %v436_v51 = vadd.f32 %v9534_v17, %v12125_v18 }
 0x101   :  { %v12235_v33 = vadd.f32 %v9587_v32, %v416_v50  ;;  %v12237_v5 = vpop.f32.mrf.mxu0 }
 0x102   :  { %v12239_v26 = vpop.f32.mrf.mxu1 }
 0x103   :  { %16905 = vst [vmem:[#allocation38_spill] sm:$0xff] %v12235_v33  ;;  %v9537_v12 = vpop.f32.mrf.mxu0 }
 0x104   :  { %v9590_v31 = vpop.f32.mrf.mxu1  ;;  %v456_v36 = vadd.f32 %v9537_v12, %v12125_v18 }
 0x105   :  { %v12242_v14 = vadd.f32 %v9590_v31, %v436_v51  ;;  %v12244_v30 = vpop.f32.mrf.mxu0 }
 0x106   :  { %v12246_v43 = vpop.f32.mrf.mxu1 }
 0x107   :  { %16906 = vst [vmem:[#allocation39_spill] sm:$0xff] %v12242_v14  ;;  %v9540_v44 = vpop.f32.mrf.mxu0 }
 0x108   :  { %v9593_v10 = vpop.f32.mrf.mxu1  ;;  %v476_v56 = vadd.f32 %v9540_v44, %v12125_v18 }
 0x109   :  { %v12249_v45 = vadd.f32 %v9593_v10, %v456_v36  ;;  %v12251_v50 = vpop.f32.mrf.mxu0 }
 0x10a   :  { %v12253_v17 = vpop.f32.mrf.mxu1 }
 0x10b   :  { %16907 = vst [vmem:[#allocation40_spill] sm:$0xff] %v12249_v45  ;;  %v9543_v32 = vpop.f32.mrf.mxu0 }
 0x10c   :  { %v9596_v41 = vpop.f32.mrf.mxu1  ;;  %v496_v12 = vadd.f32 %v9543_v32, %v12125_v18 }
 0x10d   :  { %v12256_v51 = vadd.f32 %v9596_v41, %v476_v56  ;;  %v12258_v31 = vpop.f32.mrf.mxu0 }
 0x10e   :  { %v12260_v46 = vpop.f32.mrf.mxu1 }
 0x10f   :  { %v9546_v62 = vpop.f32.mrf.mxu0 }
 0x110   :  { %v9599_v8 = vpop.f32.mrf.mxu1  ;;  %v516_v44 = vadd.f32 %v9546_v62, %v12125_v18 }
 0x111   :  { %v12263_v36 = vadd.f32 %v9599_v8, %v496_v12  ;;  %v12265_v10 = vpop.f32.mrf.mxu0 }
 0x112   :  { %v12267_v21 = vpop.f32.mrf.mxu1 }
 0x113   :  { %v9549_v47 = vpop.f32.mrf.mxu0 }
 0x114   :  { %v9602_v4 = vpop.f32.mrf.mxu1  ;;  %v536_v32 = vadd.f32 %v9549_v47, %v12125_v18 }
 0x115   :  { %v12270_v41 = vadd.f32 %v9602_v4, %v516_v44  ;;  %v12272_v56 = vpop.f32.mrf.mxu0 }
 0x116   :  { %v12274_v16 = vpop.f32.mrf.mxu1 }
 0x117   :  { %v9552_v59 = vpop.f32.mrf.mxu0 }
 0x118   :  { %v9605_v6 = vpop.f32.mrf.mxu1  ;;  %v556_v62 = vadd.f32 %v9552_v59, %v12125_v18 }
 0x119   :  { %v12277_v8 = vadd.f32 %v9605_v6, %v536_v32  ;;  %v12279_v12 = vpop.f32.mrf.mxu0 }
 0x11a   :  { %v12281_v53 = vpop.f32.mrf.mxu1 }
 0x11b   :  { %v9555_v2 = vpop.f32.mrf.mxu0 }
 0x11c   :  { %v9608_v15 = vpop.f32.mrf.mxu1  ;;  %v576_v47 = vadd.f32 %v9555_v2, %v12125_v18 }
 0x11d   :  { %v12284_v4 = vadd.f32 %v9608_v15, %v556_v62  ;;  %v12286_v44 = vpop.f32.mrf.mxu0 }
 0x11e   :  { %v12288_v38 = vpop.f32.mrf.mxu1 }
 0x11f   :  { %v12290_v60 = vpop.f32.mrf.mxu0 }
 0x120   :  { %v9611_v55 = vpop.f32.mrf.mxu1 }
 0x121   :  { %v12292_v59 = vadd.f32 %v9611_v55, %v576_v47  ;;  %v12294_v6 = vpop.f32.mrf.mxu0 }
 0x122   :  { %v12296_v32 = vpop.f32.mrf.mxu1 }
 0x123   :  { %16908 = vst [vmem:[#allocation41_spill] sm:$0xff] %v12292_v59  ;;  %v12298_v52 = vpop.f32.mrf.mxu0 }
 0x124   :  { %v12300_v7 = vpop.f32.mrf.mxu1 }
 0x125   :  { %v12302_v2 = vpop.f32.mrf.mxu0 }
 0x126   :  { %v12304_v15 = vpop.f32.mrf.mxu1 }
 0x127   :  { %v12306_v62 = vpop.f32.mrf.mxu0 }
 0x128   :  { %v12308_v24 = vpop.f32.mrf.mxu1 }
 0x129   :  { %16909 = vst [vmem:[#allocation42_spill] sm:$0xff] %v12308_v24  ;;  %v12310_v19 = vpop.f32.mrf.mxu0 }
 0x12a   :  { %v12312_v55 = vpop.f32.mrf.mxu1 }
 0x12b   :  { %16910 = vst [vmem:[#allocation43_spill] sm:$0xff] %v12312_v55  ;;  %v12314_v47 = vpop.f32.mrf.mxu0 }
 0x12c   :  { %v12316_v9 = vpop.f32.mrf.mxu1 }
 0x12d   :  { %16911 = vst [vmem:[#allocation44_spill] sm:$0xff] %v12316_v9  ;;  %v12318_v29 = vpop.f32.mrf.mxu0 }
 0x12e   :  { %16912 = vst [vmem:[#allocation45_spill] sm:$0xff] %v12318_v29  ;;  %v12320_v3 = vpop.f32.mrf.mxu1 }
 0x12f   :  { %16913 = vst [vmem:[#allocation46_spill] sm:$0xff] %v12320_v3  ;;  %v12322_v63 = vpop.f32.mrf.mxu0 }
 0x130   :  { %16914 = vst [vmem:[#allocation47_spill] sm:$0xff] %v12322_v63  ;;  %v12324_v45 = vpop.f32.mrf.mxu1 }
 0x131   :  { %16915 = vst [vmem:[#allocation48_spill] sm:$0xff] %v12324_v45  ;;  %v12326_v14 = vpop.f32.mrf.mxu0 }
 0x132   :  { %16916 = vst [vmem:[#allocation49_spill] sm:$0xff] %v12326_v14  ;;  %v12328_v33 = vpop.f32.mrf.mxu1 }
 0x133   :  { %16917 = vst [vmem:[#allocation50_spill] sm:$0xff] %v12328_v33  ;;  %v12330_v1 = vpop.f32.mrf.mxu0 }
 0x134   :  { %16918 = vst [vmem:[#allocation51_spill] sm:$0xff] %v12330_v1  ;;  %v12332_v54 = vpop.f32.mrf.mxu1 }
 0x135   :  { %16919 = vst [vmem:[#allocation52_spill] sm:$0xff] %v12332_v54  ;;  %v12334_v13 = vpop.f32.mrf.mxu0 }
 0x136   :  { %16920 = vst [vmem:[#allocation53_spill] sm:$0xff] %v12334_v13  ;;  %v12336_v55 = vpop.f32.mrf.mxu1 }
 0x137   :  { %16921 = vst [vmem:[#allocation54_spill] sm:$0xff] %v12336_v55  ;;  %v12338_v9 = vpop.f32.mrf.mxu0 }
 0x138   :  { %16922 = vst [vmem:[#allocation55_spill] sm:$0xff] %v12338_v9  ;;  %v12340_v29 = vpop.f32.mrf.mxu1 }
 0x139   :  { %16923 = vst [vmem:[#allocation56_spill] sm:$0xff] %v12340_v29  ;;  %v12342_v3 = vpop.f32.mrf.mxu0 }
 0x13a   :  { %16924 = vst [vmem:[#allocation57_spill] sm:$0xff] %v12342_v3  ;;  %v12344_v63 = vpop.f32.mrf.mxu1 }
 0x13b   :  { %16925 = vst [vmem:[#allocation58_spill] sm:$0xff] %v12344_v63  ;;  %v12346_v45 = vpop.f32.mrf.mxu0 }
 0x13c   :  { %16926 = vst [vmem:[#allocation59_spill] sm:$0xff] %v12346_v45  ;;  %v12348_v14 = vpop.f32.mrf.mxu1 }
 0x13d   :  { %16927 = vst [vmem:[#allocation60_spill] sm:$0xff] %v12348_v14  ;;  %v12350_v33 = vpop.f32.mrf.mxu0 }
 0x13e   :  { %16928 = vst [vmem:[#allocation61_spill] sm:$0xff] %v12350_v33  ;;  %v12352_v1 = vpop.f32.mrf.mxu1 }
 0x13f   :  { %16929 = vst [vmem:[#allocation62_spill] sm:$0xff] %v12352_v1  ;;  %v12354_v54 = vpop.f32.mrf.mxu0 }
 0x140   :  { %16930 = vst [vmem:[#allocation63_spill] sm:$0xff] %v12354_v54  ;;  %v12356_v13 = vpop.f32.mrf.mxu1 }
 0x141   :  { %16931 = vst [vmem:[#allocation64_spill] sm:$0xff] %v12356_v13  ;;  %v12358_v55 = vpop.f32.mrf.mxu0 }
 0x142   :  { %16932 = vst [vmem:[#allocation65_spill] sm:$0xff] %v12358_v55  ;;  %v12360_v9 = vpop.f32.mrf.mxu1 }
 0x143   :  { %16933 = vst [vmem:[#allocation66_spill] sm:$0xff] %v12360_v9  ;;  %v12362_v29 = vpop.f32.mrf.mxu0 }
 0x144   :  { %16934 = vst [vmem:[#allocation67_spill] sm:$0xff] %v12362_v29  ;;  %v12364_v3 = vpop.f32.mrf.mxu1 }
 0x145   :  { %16935 = vst [vmem:[#allocation68_spill] sm:$0xff] %v12364_v3  ;;  %v12366_v63 = vpop.f32.mrf.mxu0 }
 0x146   :  { %16936 = vst [vmem:[#allocation69_spill] sm:$0xff] %v12366_v63  ;;  %v12368_v45 = vpop.f32.mrf.mxu1 }
 0x147   :  { %16937 = vst [vmem:[#allocation70_spill] sm:$0xff] %v12368_v45  ;;  %v9652_v14 = vpop.f32.mrf.mxu0  ;;  %v266_v45 = vadd.f32 %v12125_v18, %v12139_v37 }
 0x148   :  { %v12370_v33 = vpop.f32.mrf.mxu1  ;;  %v1080_v1 = vadd.f32 %v9652_v14, %v12256_v51  ;;  %v286_v14 = vadd.f32 %v12125_v18, %v12157_v61  ;;  %v306_v51 = vadd.f32 %v12125_v18, %v12189_v48  ;;  %v346_v48 = vadd.f32 %v12125_v18, %v12208_v28 }
 0x149   :  { %16938 = vst [vmem:[#allocation71_spill] sm:$0xff] %v12370_v33  ;;  %v12373_v54 = vpop.f32.mrf.mxu0 }
 0x14a   :  { %v12375_v13 = vpop.f32.mrf.mxu1  ;;  %v679_v37 = vadd.f32 %v12191_v0, %v286_v14  ;;  %v691_v61 = vadd.f32 %v12203_v25, %v306_v51  ;;  %v426_v0 = vadd.f32 %v12125_v18, %v12237_v5 }
 0x14b   :  { %16939 = vst [vmem:[#allocation72_spill] sm:$0xff] %v12375_v13  ;;  %v9655_v55 = vpop.f32.mrf.mxu0 }
 0x14c   :  { %v9708_v24 = vpop.f32.mrf.mxu1  ;;  %v1094_v9 = vadd.f32 %v9655_v55, %v12263_v36  ;;  %v667_v55 = vadd.f32 %v12170_v40, %v266_v45 }
 0x14d   :  { %v12378_v29 = vadd.f32 %v9708_v24, %v1080_v1  ;;  %v12380_v3 = vpop.f32.mrf.mxu0 }
 0x14e   :  { %v12382_v63 = vpop.f32.mrf.mxu1 }
 0x14f   :  { %16940 = vst [vmem:[#allocation73_spill] sm:$0xff] %v12378_v29  ;;  %v9658_v33 = vpop.f32.mrf.mxu0  ;;  %v326_v29 = vadd.f32 %v12125_v18, %v12201_v23  ;;  %v446_v23 = vadd.f32 %v12125_v18, %v12244_v30 }
 0x150   :  { %v9711_v59 = vpop.f32.mrf.mxu1  ;;  %v1108_v13 = vadd.f32 %v9658_v33, %v12270_v41  ;;  %v386_v33 = vadd.f32 %v12125_v18, %v12223_v58  ;;  %v406_v41 = vadd.f32 %v12125_v18, %v12230_v39  ;;  %v466_v39 = vadd.f32 %v12125_v18, %v12251_v50 }
 0x151   :  { %v12391_v36 = vadd.f32 %v9711_v59, %v1094_v9  ;;  %v12393_v24 = vpop.f32.mrf.mxu0  ;;  %v366_v9 = vadd.f32 %v12125_v18, %v12216_v34  ;;  %v703_v34 = vadd.f32 %v12210_v57, %v326_v29  ;;  %v715_v59 = vadd.f32 %v12218_v20, %v346_v48 }
 0x152   :  { %v12395_v1 = vpop.f32.mrf.mxu1  ;;  %v739_v5 = vadd.f32 %v12232_v11, %v386_v33  ;;  %v751_v30 = vadd.f32 %v12239_v26, %v406_v41  ;;  %v12432_v29 = vadd.f32 %v12253_v17, %v446_v23  ;;  %v486_v57 = vadd.f32 %v12125_v18, %v12258_v31  ;;  %v16941_v33 = vld [vmem:[#allocation41_spill] sm:$0xff] }
 0x153   :  { %v9661_v40 = vpop.f32.mrf.mxu0  ;;  %v727_v58 = vadd.f32 %v12225_v49, %v366_v9  ;;  %v12437_v20 = vadd.f32 %v12260_v46, %v466_v39  ;;  %v506_v49 = vadd.f32 %v12125_v18, %v12265_v10  ;;  %v526_v11 = vadd.f32 %v12125_v18, %v12272_v56 }
 0x154   :  { %v9714_v45 = vpop.f32.mrf.mxu1  ;;  %v1122_v25 = vadd.f32 %v9661_v40, %v12277_v8  ;;  %v566_v17 = vadd.f32 %v12125_v18, %v12286_v44  ;;  %v12451_v46 = vadd.f32 %v12267_v21, %v486_v57  ;;  %v940_v56 = vadd.f32 %v12290_v60, %v12159_v27  ;;  %v16950_v57 = vld [vmem:[#allocation48_spill] sm:$0xff] }
 0x155   :  { %v12415_v28 = vadd.f32 %v9714_v45, %v1108_v13  ;;  %v12422_v14 = vpop.f32.mrf.mxu0  ;;  %v12429_v13 = vadd.f32 %v12246_v43, %v426_v0  ;;  %v546_v43 = vadd.f32 %v12125_v18, %v12279_v12  ;;  %v12454_v10 = vadd.f32 %v12274_v16, %v506_v49 }
 0x156   :  { %v12424_v51 = vpop.f32.mrf.mxu1  ;;  %v933_v48 = vadd.f32 %v12294_v6, %v667_v55  ;;  %v12464_v18 = vadd.f32 %v12281_v53, %v526_v11  ;;  %v12470_v21 = vadd.f32 %v12296_v32, %v566_v17  ;;  %v954_v16 = vadd.f32 %v12298_v52, %v12184_v42  ;;  %v16942_v52 = vld [vmem:[#allocation42_spill] sm:$0xff]  ;;  %v16951_v11 = vld [vmem:[#allocation36_spill] sm:$0xff]  ;;  %v16954_v17 = vld [vmem:[#allocation53_spill] sm:$0xff] }
 0x157   :  { %v9664_v50 = vpop.f32.mrf.mxu0  ;;  %v947_v60 = vadd.f32 %v12302_v2, %v679_v37  ;;  %v1235_v27 = vadd.f32 %v12300_v7, %v940_v56  ;;  %v968_v44 = vadd.f32 %v12306_v62, %v12199_v22  ;;  %v982_v32 = vadd.f32 %v12314_v47, %v12206_v35  ;;  %v16943_v2 = vld [vmem:[#allocation43_spill] sm:$0xff]  ;;  %v16944_v37 = vld [vmem:[#allocation45_spill] sm:$0xff]  ;;  %v16948_v47 = vld [vmem:[#allocation46_spill] sm:$0xff] }
 0x158   :  { %v9717_v26 = vpop.f32.mrf.mxu1  ;;  %v1136_v8 = vadd.f32 %v9664_v50, %v12284_v4  ;;  %v12467_v4 = vadd.f32 %v12288_v38, %v546_v43  ;;  %v1227_v6 = vadd.f32 %v12304_v15, %v933_v48  ;;  %v961_v38 = vadd.f32 %v12310_v19, %v691_v61  ;;  %v16945_v22 = vld [vmem:[#allocation35_spill] sm:$0xff]  ;;  %v16947_v19 = vld [vmem:[#allocation44_spill] sm:$0xff] }
 0x159   :  { %v12448_v31 = vadd.f32 %v9717_v26, %v1122_v25  ;;  %v12459_v9 = vpop.f32.mrf.mxu0  ;;  %v1251_v42 = vadd.f32 %v16942_v52, %v954_v16  ;;  %v1243_v7 = vadd.f32 %v16943_v2, %v947_v60  ;;  %v975_v45 = vadd.f32 %v16944_v37, %v703_v34  ;;  %v16946_v62 = vld [vmem:[#allocation47_spill] sm:$0xff]  ;;  %v16949_v25 = vld [vmem:[#allocation49_spill] sm:$0xff]  ;;  %v16953_v26 = vld [vmem:[#allocation50_spill] sm:$0xff] }
 0x15a   :  { %v12461_v12 = vpop.f32.mrf.mxu1  ;;  %v996_v15 = vadd.f32 %v16946_v62, %v16945_v22  ;;  %v1267_v35 = vadd.f32 %v16947_v19, %v968_v44  ;;  %v12496_v61 = vadd.f32 %v16948_v47, %v961_v38  ;;  %v989_v39 = vadd.f32 %v16949_v25, %v715_v59  ;;  %v16952_v34 = vld [vmem:[#allocation51_spill] sm:$0xff]  ;;  %v16955_v56 = vld [vmem:[#allocation52_spill] sm:$0xff]  ;;  %v16956_v44 = vld [vmem:[#allocation37_spill] sm:$0xff] }
 0x15b   :  { %v9667_v53 = vpop.f32.mrf.mxu0  ;;  %v12500_v49 = vadd.f32 %v16950_v57, %v982_v32  ;;  %v1010_v50 = vadd.f32 %v16952_v34, %v16951_v11  ;;  %v12505_v43 = vadd.f32 %v16953_v26, %v975_v45  ;;  %v16958_v59 = vld [vmem:[#allocation54_spill] sm:$0xff]  ;;  %v16959_v32 = vld [vmem:[#allocation57_spill] sm:$0xff]  ;;  %v16960_v2 = vld [vmem:[#allocation56_spill] sm:$0xff] }
 0x15c   :  { %v9720_v55 = vpop.f32.mrf.mxu1  ;;  %v1150_v41 = vadd.f32 %v9667_v53, %v16941_v33  ;;  %v12509_v48 = vadd.f32 %v16955_v56, %v996_v15  ;;  %v16957_v53 = vld [vmem:[#allocation55_spill] sm:$0xff]  ;;  %v12514_v38 = vadd.f32 %v16958_v59, %v989_v39  ;;  %v1017_v33 = vadd.f32 %v16959_v32, %v739_v5  ;;  %v16961_v45 = vld [vmem:[#allocation38_spill] sm:$0xff]  ;;  %v16964_v19 = vld [vmem:[#allocation61_spill] sm:$0xff] }
 0x15d   :  { %v12483_v40 = vadd.f32 %v9720_v55, %v1136_v8  ;;  %v12490_v0 = vpop.f32.mrf.mxu0  ;;  %v1003_v8 = vadd.f32 %v16954_v17, %v727_v58  ;;  %v1024_v55 = vadd.f32 %v16957_v53, %v16956_v44  ;;  %v12520_v37 = vadd.f32 %v16960_v2, %v1010_v50  ;;  %v16962_v58 = vld [vmem:[#allocation59_spill] sm:$0xff]  ;;  %v16963_v62 = vld [vmem:[#allocation58_spill] sm:$0xff]  ;;  %v16965_v11 = vld [vmem:[#allocation60_spill] sm:$0xff] }
 0x15e   :  { %v12492_v23 = vpop.f32.mrf.mxu1  ;;  %v1038_v22 = vadd.f32 %v16962_v58, %v16961_v45  ;;  %v1031_v47 = vadd.f32 %v16964_v19, %v751_v30  ;;  %v16966_v34 = vld [vmem:[#allocation39_spill] sm:$0xff]  ;;  %v16968_v26 = vld [vmem:[#allocation62_spill] sm:$0xff]  ;;  %v16969_v56 = vld [vmem:[#allocation65_spill] sm:$0xff] }
 0x15f   :  { %v9734_v16 = vpop.f32.mrf.mxu0  ;;  %v12525_v15 = vadd.f32 %v16963_v62, %v1003_v8  ;;  %v12529_v39 = vadd.f32 %v16965_v11, %v1024_v55  ;;  %v16967_v5 = vld [vmem:[#allocation63_spill] sm:$0xff]  ;;  %v12534_v17 = vadd.f32 %v16968_v26, %v1017_v33  ;;  %v16970_v44 = vld [vmem:[#allocation64_spill] sm:$0xff]  ;;  %v16973_v32 = vld [vmem:[#allocation66_spill] sm:$0xff] }
 0x160   :  { %v9723_v60 = vpop.f32.mrf.mxu1  ;;  %v1564_v50 = vadd.f32 %v9734_v16, %v1235_v27  ;;  %v12539_v8 = vadd.f32 %v16970_v44, %v1038_v22  ;;  %v16971_v53 = vld [vmem:[#allocation40_spill] sm:$0xff]  ;;  %v16972_v30 = vld [vmem:[#allocation67_spill] sm:$0xff]  ;;  %v12544_v2 = vadd.f32 %v16973_v32, %v1031_v47  ;;  %v16974_v58 = vld [vmem:[#allocation69_spill] sm:$0xff]  ;;  %v1073_v22 = vadd.f32 %v12373_v54, %v12437_v20 }
 0x161   :  { %v12517_v52 = vadd.f32 %v9723_v60, %v1150_v41  ;;  %v1557_v25 = vpop.f32.mrf.mxu0  ;;  %v1052_v41 = vadd.f32 %v16967_v5, %v16966_v34  ;;  %v1045_v60 = vadd.f32 %v16969_v56, %v12429_v13  ;;  %v1066_v59 = vadd.f32 %v16972_v30, %v16971_v53  ;;  %v16975_v33 = vld [vmem:[#allocation68_spill] sm:$0xff]  ;;  %v16976_v13 = vld [vmem:[#allocation70_spill] sm:$0xff]  ;;  %v16977_v34 = vld [vmem:[#allocation71_spill] sm:$0xff] }
 0x162   :  { %v1466_v57 = vpop.f32.mrf.mxu1  ;;  %v1059_v62 = vadd.f32 %v16974_v58, %v12432_v29  ;;  %v1558_v27 = vadd.f32 %v1557_v25, %v1227_v6  ;;  %v1087_v47 = vadd.f32 %v12380_v3, %v12451_v46  ;;  %v16978_v29 = vld [vmem:[#allocation72_spill] sm:$0xff]  ;;  %v1101_v54 = vadd.f32 %v12393_v24, %v12454_v10 }
 0x163   :  { %v9737_v55 = vpop.f32.mrf.mxu0  ;;  %v12549_v19 = vadd.f32 %v16975_v33, %v1052_v41  ;;  %v12552_v11 = vadd.f32 %v16976_v13, %v1045_v60  ;;  %v12557_v5 = vadd.f32 %v16977_v34, %v1066_v59  ;;  %v1115_v3 = vadd.f32 %v12422_v14, %v12464_v18 }
 0x164   :  { %v9790_v45 = vpop.f32.mrf.mxu1  ;;  %v12562_v44 = vadd.f32 %v16978_v29, %v1059_v62  ;;  %v1576_v41 = vadd.f32 %v9737_v55, %v1251_v42  ;;  %v12570_v20 = vadd.f32 %v12395_v1, %v1087_v47  ;;  %v12576_v32 = vadd.f32 %v12424_v51, %v1101_v54 }
 0x165   :  { %v1825_v16 = vadd.f32 %v9790_v45, %v1564_v50  ;;  %v1569_v26 = vpop.f32.mrf.mxu0  ;;  %v12565_v50 = vadd.f32 %v12382_v63, %v1073_v22  ;;  %v1129_v63 = vadd.f32 %v12459_v9, %v12467_v4  ;;  %v12581_v24 = vadd.f32 %v12461_v12, %v1115_v3  ;;  %v16982_v3 = vld [vmem:[#allocation30_spill] sm:$0xff] }
 0x166   :  { %v1818_v56 = vpop.f32.mrf.mxu1  ;;  %v1570_v53 = vadd.f32 %v1569_v26, %v1243_v7  ;;  %v1143_v58 = vadd.f32 %v12490_v0, %v12470_v21 }
 0x167   :  { %v2009_v6 = vmax.f32 %v1825_v16, 0.0  ;;  %v1819_v25 = vadd.f32 %v1818_v56, %v1558_v27  ;;  %v9740_v46 = vpop.f32.mrf.mxu0  ;;  %v12589_v51 = vadd.f32 %v12492_v23, %v1129_v63 }
 0x168   :  { %v9793_v60 = vpop.f32.mrf.mxu1  ;;  %v1588_v18 = vadd.f32 %v9740_v46, %v1267_v35  ;;  %v12598_v13 = vadd.f32 %v1466_v57, %v1143_v58 }
 0x169   :  { %v2060_v30 = vsel %vm2055_vm1, %v2009_v6, 0  ;;  %v2008_v42 = vmax.f32 %v1819_v25, 0.0  ;;  %v1837_v59 = vadd.f32 %v9793_v60, %v1576_v41  ;;  %v1581_v10 = vpop.f32.mrf.mxu0 }
 0x16a   :  { %v12583_v1 = vand.u32 4294901760, %v2060_v30  ;;  %v1830_v14 = vpop.f32.mrf.mxu1  ;;  %v1582_v33 = vadd.f32 %v1581_v10, %v12496_v61 }
 0x16b   :  { %v2057_v7 = vsel %vm2055_vm1, %v2008_v42, 0  ;;  %v2011_v55 = vmax.f32 %v1837_v59, 0.0  ;;  %v1831_v45 = vadd.f32 %v1830_v14, %v1570_v53  ;;  %v9743_v4 = vpop.f32.mrf.mxu0 }
 0x16c   :  { %16979 = vst [vmem:[#allocation41_spill] sm:$0xff] %v12583_v1  ;;  %v12592_v9 = vsub.f32 %v2060_v30, %v12583_v1  ;;  %v12594_v12 = vand.u32 4294901760, %v2057_v7  ;;  %v9796_v62 = vpop.f32.mrf.mxu1  ;;  %v1600_v47 = vadd.f32 %v9743_v4, %v12500_v49  ;;  %v16983_v30 = vld [vmem:[#allocation13_spill] sm:$0xff] }
 0x16d   :  { %v2066_v35 = vsel %vm2055_vm1, %v2011_v55, 0  ;;  %v2010_v27 = vmax.f32 %v1831_v45, 0.0  ;;  %v1849_v16 = vadd.f32 %v9796_v62, %v1588_v18  ;;  %v1593_v22 = vpop.f32.mrf.mxu0  ;;  %v16984_v45 = vld [vmem:[#allocation16_spill] sm:$0xff] }
 0x16e   :  { %v16476_v21 = vand.u32 4294901760, %v12592_v9  ;;  %v12602_v0 = vsub.f32 %v2057_v7, %v12594_v12  ;;  %v12604_v23 = vand.u32 4294901760, %v2066_v35  ;;  %v1842_v34 = vpop.f32.mrf.mxu1  ;;  %9916 = vmatprep.mubr.f32.mxu1 %v12594_v12  ;;  %v1594_v41 = vadd.f32 %v1593_v22, %v12505_v43 }
 0x16f   :  { %v2063_v61 = vsel %vm2055_vm1, %v2010_v27, 0  ;;  %v2013_v26 = vmax.f32 %v1849_v16, 0.0  ;;  %v1843_v56 = vadd.f32 %v1842_v34, %v1582_v33  ;;  %9917 = vmatmul.mubr.f32.vlgmr.msra.gmra.mxu1 %v12583_v1  ;;  %v9746_v6 = vpop.f32.mrf.mxu0 }
 0x170   :  { %16980 = vst [vmem:[#allocation42_spill] sm:$0xff] %v12604_v23  ;;  %v2238_v57 = vsub.f32 %v12592_v9, %v16476_v21  ;;  %v12613_v29 = vand.u32 4294901760, %v2063_v61  ;;  %v9799_v25 = vpop.f32.mrf.mxu1  ;;  %v16478_v54 = vand.u32 4294901760, %v12602_v0  ;;  %10029 = vmatpush3.msra.mxu1 %v16982_v3  ;;  %v12619_v49 = vsub.f32 %v2066_v35, %v12604_v23 }
 0x171   :  { %v2072_v46 = vsel %vm2055_vm1, %v2013_v26, 0  ;;  %v2012_v60 = vmax.f32 %v1843_v56, 0.0  ;;  %v1861_v53 = vadd.f32 %v9799_v25, %v1600_v47  ;;  %10030 = vmatprep.subr.mxu1 %v16983_v30  ;;  %v1612_v43 = vadd.f32 %v9746_v6, %v12509_v48  ;;  %v1605_v59 = vpop.f32.mrf.mxu0  ;;  %v16987_v47 = vld [vmem:[#allocation19_spill] sm:$0xff] }
 0x172   :  { %16981 = vst [vmem:[#allocation43_spill] sm:$0xff] %v12613_v29  ;;  %v12624_v42 = vsub.f32 %v2063_v61, %v12613_v29  ;;  %v1854_v63 = vpop.f32.mrf.mxu1  ;;  %9919 = vmatprep.mubr.f32.mxu1 %v12613_v29  ;;  %v2228_v10 = vsub.f32 %v12602_v0, %v16478_v54  ;;  %10031 = vmatpush3.msra.mxu1 %v16983_v30  ;;  %v2239_v14 = vand.u32 4294901760, %v2238_v57  ;;  %v12635_v48 = vand.u32 4294901760, %v2072_v46 }
 0x173   :  { %v2069_v18 = vsel %vm2055_vm1, %v2012_v60, 0  ;;  %v2015_v7 = vmax.f32 %v1861_v53, 0.0  ;;  %v1855_v55 = vadd.f32 %v1854_v63, %v1594_v41  ;;  %9920 = vmatmul.mubr.f32.gmra.mxu1 %v12604_v23  ;;  %10032 = vmatprep.subr.mxu1 %v16984_v45  ;;  %v9749_v4 = vpop.f32.mrf.mxu0  ;;  %v1606_v27 = vadd.f32 %v1605_v59, %v12514_v38 }
 0x174   :  { %16985 = vst [vmem:[#allocation45_spill] sm:$0xff] %v12635_v48  ;;  %v12637_v58 = vand.u32 4294901760, %v2069_v18  ;;  %v9802_v62 = vpop.f32.mrf.mxu1  ;;  %v2229_v33 = vand.u32 4294901760, %v2228_v10  ;;  %v16475_v35 = vand.u32 4294901760, %v12624_v42  ;;  %10033 = vmatpush3.msra.mxu1 %v16984_v45  ;;  %v16473_v41 = vand.u32 4294901760, %v12619_v49 }
 0x175   :  { %v2078_v16 = vsel %vm2055_vm1, %v2015_v7, 0  ;;  %v2014_v22 = vmax.f32 %v1855_v55, 0.0  ;;  %v1873_v34 = vadd.f32 %v9802_v62, %v1612_v43  ;;  %10034 = vmatprep.subr.mxu1 %v16987_v47  ;;  %v1617_v56 = vpop.f32.mrf.mxu0  ;;  %v1624_v6 = vadd.f32 %v9749_v4, %v12520_v37  ;;  %v16991_v62 = vld [vmem:[#allocation14_spill] sm:$0xff] }
 0x176   :  { %16986 = vst [vmem:[#allocation35_spill] sm:$0xff] %v12637_v58  ;;  %v12645_v61 = vsub.f32 %v2069_v18, %v12637_v58  ;;  %v12647_v26 = vand.u32 4294901760, %v2078_v16  ;;  %v1866_v57 = vpop.f32.mrf.mxu1  ;;  %9852 = vmatprep.mubr.f32.mxu0 %v2229_v33  ;;  %9922 = vmatprep.mubr.f32.mxu1 %v12637_v58  ;;  %v2248_v38 = vsub.f32 %v12624_v42, %v16475_v35  ;;  %v16990_v18 = vld [vmem:[#allocation11_spill] sm:$0xff]  ;;  %v16992_v33 = vld [vmem:[#allocation22_spill] sm:$0xff] }
 0x177   :  { %v2075_v25 = vsel %vm2055_vm1, %v2014_v22, 0  ;;  %v2017_v60 = vmax.f32 %v1873_v34, 0.0  ;;  %v1867_v53 = vadd.f32 %v1866_v57, %v1606_v27  ;;  %9853 = vmatmul.mubr.f32.vlgmr.msra.gmra.mxu0 %v2239_v14  ;;  %9923 = vmatmul.mubr.f32.gmra.mxu1 %v12635_v48  ;;  %v12658_v43 = vsub.f32 %v2072_v46, %v12635_v48  ;;  %v9752_v63 = vpop.f32.mrf.mxu0 }
 0x178   :  { %16988 = vst [vmem:[#allocation47_spill] sm:$0xff] %v12647_v26  ;;  %v12660_v59 = vand.u32 4294901760, %v2075_v25  ;;  %v9805_v10 = vpop.f32.mrf.mxu1  ;;  %9965 = vmatpush3.msra.mxu0 %v16990_v18  ;;  %v2249_v7 = vand.u32 4294901760, %v2248_v38  ;;  %v2258_v37 = vsub.f32 %v12619_v49, %v16473_v41  ;;  %10035 = vmatpush3.msra.mxu1 %v16987_v47  ;;  %v1618_v14 = vadd.f32 %v1617_v56, %v12525_v15 }
 0x179   :  { %v2084_v55 = vsel %vm2055_vm1, %v2017_v60, 0  ;;  %v2016_v4 = vmax.f32 %v1867_v53, 0.0  ;;  %v1885_v46 = vadd.f32 %v9805_v10, %v1624_v6  ;;  %9966 = vmatprep.subr.mxu0 %v16991_v62  ;;  %10036 = vmatprep.subr.mxu1 %v16992_v33  ;;  %v12672_v27 = vsub.f32 %v2078_v16, %v12647_v26  ;;  %v1629_v34 = vpop.f32.mrf.mxu0 }
 0x17a   :  { %16989 = vst [vmem:[#allocation44_spill] sm:$0xff] %v12660_v59  ;;  %v12674_v22 = vand.u32 4294901760, %v2084_v55  ;;  %v1878_v57 = vpop.f32.mrf.mxu1  ;;  %9855 = vmatprep.mubr.f32.mxu0 %v2249_v7  ;;  %9925 = vmatprep.mubr.f32.mxu1 %v12660_v59  ;;  %v2259_v38 = vand.u32 4294901760, %v2258_v37  ;;  %v16472_v15 = vand.u32 4294901760, %v12645_v61  ;;  %v1636_v56 = vadd.f32 %v9752_v63, %v12529_v39  ;;  %v16995_v37 = vld [vmem:[#allocation17_spill] sm:$0xff] }
 0x17b   :  { %v2081_v6 = vsel %vm2055_vm1, %v2016_v4, 0  ;;  %v2019_v60 = vmax.f32 %v1885_v46, 0.0  ;;  %v1879_v53 = vadd.f32 %v1878_v57, %v1618_v14  ;;  %9926 = vmatmul.mubr.f32.gmra.mxu1 %v12647_v26  ;;  %9967 = vmatpush3.msra.mxu0 %v16991_v62  ;;  %v12683_v16 = vsub.f32 %v2075_v25, %v12660_v59  ;;  %v9755_v18 = vpop.f32.mrf.mxu0 }
 0x17c   :  { %16993 = vst [vmem:[#allocation46_spill] sm:$0xff] %v12674_v22  ;;  %v12685_v10 = vand.u32 4294901760, %v2081_v6  ;;  %9856 = vmatmul.mubr.f32.gmra.mxu0 %v2259_v38  ;;  %v9808_v7 = vpop.f32.mrf.mxu1  ;;  %v2268_v39 = vsub.f32 %v12645_v61, %v16472_v15  ;;  %v16474_v63 = vand.u32 4294901760, %v12658_v43  ;;  %9968 = vmatprep.subr.mxu0 %v16995_v37  ;;  %v1630_v14 = vadd.f32 %v1629_v34, %v12534_v17  ;;  %v16997_v34 = vld [vmem:[#allocation20_spill] sm:$0xff] }
 0x17d   :  { %v2090_v4 = vsel %vm2055_vm1, %v2019_v60, 0  ;;  %v2018_v46 = vmax.f32 %v1879_v53, 0.0  ;;  %v1897_v25 = vadd.f32 %v9808_v7, %v1636_v56  ;;  %9969 = vmatpush3.msra.mxu0 %v16995_v37  ;;  %10037 = vmatpush3.msra.mxu1 %v16992_v33  ;;  %v12697_v62 = vsub.f32 %v2084_v55, %v12674_v22  ;;  %v1641_v38 = vpop.f32.mrf.mxu0 }
 0x17e   :  { %16994 = vst [vmem:[#allocation49_spill] sm:$0xff] %v12685_v10  ;;  %v12699_v57 = vand.u32 4294901760, %v2090_v4  ;;  %v1890_v15 = vpop.f32.mrf.mxu1  ;;  %v2269_v41 = vand.u32 4294901760, %v2268_v39  ;;  %9928 = vmatprep.mubr.f32.mxu1 %v12685_v10  ;;  %v2278_v17 = vsub.f32 %v12658_v43, %v16474_v63  ;;  %9970 = vmatprep.subr.mxu0 %v16997_v34  ;;  %v1648_v56 = vadd.f32 %v9755_v18, %v12539_v8  ;;  %v16999_v8 = vld [vmem:[#allocation23_spill] sm:$0xff] }
 0x17f   :  { %v2087_v60 = vsel %vm2055_vm1, %v2018_v46, 0  ;;  %v2021_v53 = vmax.f32 %v1897_v25, 0.0  ;;  %v1891_v55 = vadd.f32 %v1890_v15, %v1630_v14  ;;  %9929 = vmatmul.mubr.f32.gmra.mxu1 %v12674_v22  ;;  %9971 = vmatpush3.msra.mxu0 %v16997_v34  ;;  %v12711_v7 = vsub.f32 %v2081_v6, %v12685_v10  ;;  %v9758_v37 = vpop.f32.mrf.mxu0  ;;  %v17000_v6 = vld [vmem:[#allocation25_spill] sm:$0xff] }
 0x180   :  { %16996 = vst [vmem:[#allocation48_spill] sm:$0xff] %v12699_v57  ;;  %v12713_v39 = vand.u32 4294901760, %v2087_v60  ;;  %9858 = vmatprep.mubr.f32.mxu0 %v2269_v41  ;;  %v2279_v63 = vand.u32 4294901760, %v2278_v17  ;;  %v9811_v35 = vpop.f32.mrf.mxu1  ;;  %v16477_v21 = vand.u32 4294901760, %v12683_v16  ;;  %9972 = vmatprep.subr.mxu0 %v16999_v8  ;;  %v1642_v18 = vadd.f32 %v1641_v38, %v12544_v2 }
 0x181   :  { %v2096_v15 = vsel %vm2055_vm1, %v2021_v53, 0  ;;  %v2020_v14 = vmax.f32 %v1891_v55, 0.0  ;;  %v1909_v46 = vadd.f32 %v9811_v35, %v1648_v56  ;;  %9973 = vmatpush3.msra.mxu0 %v16999_v8  ;;  %10038 = vmatprep.subr.mxu1 %v17000_v6  ;;  %v12722_v25 = vsub.f32 %v2090_v4, %v12699_v57  ;;  %v1653_v17 = vpop.f32.mrf.mxu0  ;;  %v17002_v55 = vld [vmem:[#allocation26_spill] sm:$0xff] }
 0x182   :  { %16998 = vst [vmem:[#allocation36_spill] sm:$0xff] %v12713_v39  ;;  %v12724_v41 = vand.u32 4294901760, %v2096_v15  ;;  %9859 = vmatmul.mubr.f32.gmra.mxu0 %v2279_v63  ;;  %v1902_v34 = vpop.f32.mrf.mxu1  ;;  %v2288_v2 = vsub.f32 %v12683_v16, %v16477_v21  ;;  %9931 = vmatprep.mubr.f32.mxu1 %v12713_v39  ;;  %v16483_v35 = vand.u32 4294901760, %v12672_v27  ;;  %v1660_v38 = vadd.f32 %v9758_v37, %v12549_v19 }
 0x183   :  { %v2093_v56 = vsel %vm2055_vm1, %v2020_v14, 0  ;;  %v2023_v53 = vmax.f32 %v1909_v46, 0.0  ;;  %v1903_v4 = vadd.f32 %v1902_v34, %v1642_v18  ;;  %9932 = vmatmul.mubr.f32.gmra.mxu1 %v12699_v57  ;;  %9974 = vmatprep.subr.mxu0 %v17002_v55  ;;  %v12736_v63 = vsub.f32 %v2087_v60, %v12713_v39  ;;  %v9761_v21 = vpop.f32.mrf.mxu0  ;;  %v17004_v46 = vld [vmem:[#allocation29_spill] sm:$0xff]  ;;  %v17005_v34 = vld [vmem:[#allocation27_spill] sm:$0xff] }
 0x184   :  { %17001 = vst [vmem:[#allocation51_spill] sm:$0xff] %v12724_v41  ;;  %v12738_v8 = vand.u32 4294901760, %v2093_v56  ;;  %v2289_v54 = vand.u32 4294901760, %v2288_v2  ;;  %v2298_v22 = vsub.f32 %v12672_v27, %v16483_v35  ;;  %v9814_v19 = vpop.f32.mrf.mxu1  ;;  %9975 = vmatpush3.msra.mxu0 %v17002_v55  ;;  %10039 = vmatpush3.msra.mxu1 %v17000_v6  ;;  %v1654_v37 = vadd.f32 %v1653_v17, %v12552_v11 }
 0x185   :  { %v2102_v18 = vsel %vm2055_vm1, %v2023_v53, 0  ;;  %v2022_v14 = vmax.f32 %v1903_v4, 0.0  ;;  %v1921_v60 = vadd.f32 %v9814_v19, %v1660_v38  ;;  %9976 = vmatprep.subr.mxu0 %v17004_v46  ;;  %10040 = vmatprep.subr.mxu1 %v17005_v34  ;;  %v12750_v2 = vsub.f32 %v2096_v15, %v12724_v41  ;;  %v1665_v55 = vpop.f32.mrf.mxu0 }
 0x186   :  { %17003 = vst [vmem:[#allocation50_spill] sm:$0xff] %v12738_v8  ;;  %v12752_v57 = vand.u32 4294901760, %v2102_v18  ;;  %9861 = vmatprep.mubr.f32.mxu0 %v2289_v54  ;;  %v2299_v35 = vand.u32 4294901760, %v2298_v22  ;;  %v1914_v39 = vpop.f32.mrf.mxu1  ;;  %v16488_v10 = vand.u32 4294901760, %v12711_v7  ;;  %9934 = vmatprep.mubr.f32.mxu1 %v12738_v8  ;;  %v1672_v11 = vadd.f32 %v9761_v21, %v12557_v5 }
 0x187   :  { %v2099_v17 = vsel %vm2055_vm1, %v2022_v14, 0  ;;  %v2025_v38 = vmax.f32 %v1921_v60, 0.0  ;;  %v1915_v53 = vadd.f32 %v1914_v39, %v1654_v37  ;;  %9935 = vmatmul.mubr.f32.gmra.mxu1 %v12724_v41  ;;  %9977 = vmatpush3.msra.mxu0 %v17004_v46  ;;  %v12761_v15 = vsub.f32 %v2093_v56, %v12738_v8  ;;  %v9764_v22 = vpop.f32.mrf.mxu0  ;;  %v17008_v14 = vld [vmem:[#allocation31_spill] sm:$0xff]  ;;  %v17009_v60 = vld [vmem:[#allocation33_spill] sm:$0xff] }
 0x188   :  { %17006 = vst [vmem:[#allocation53_spill] sm:$0xff] %v12752_v57  ;;  %v12763_v54 = vand.u32 4294901760, %v2099_v17  ;;  %9862 = vmatmul.mubr.f32.gmra.mxu0 %v2299_v35  ;;  %v2308_v4 = vsub.f32 %v12711_v7, %v16488_v10  ;;  %v16493_v5 = vand.u32 4294901760, %v12697_v62  ;;  %v9817_v21 = vpop.f32.mrf.mxu1  ;;  %10041 = vmatpush3.msra.mxu1 %v17005_v34  ;;  %v1666_v39 = vadd.f32 %v1665_v55, %v12562_v44  ;;  %v17011_v55 = vld [vmem:[#allocation73_spill] sm:$0xff] }
 0x189   :  { %v2108_v19 = vsel %vm2055_vm1, %v2025_v38, 0  ;;  %v2024_v37 = vmax.f32 %v1915_v53, 0.0  ;;  %v1933_v56 = vadd.f32 %v9817_v21, %v1672_v11  ;;  %10042 = vmatprep.subr.mxu1 %v17008_v14  ;;  %9978 = vmatprep.subr.mxu0 %v17009_v60  ;;  %v12775_v35 = vsub.f32 %v2102_v18, %v12752_v57  ;;  %v1677_v8 = vpop.f32.mrf.mxu0 }
 0x18a   :  { %17007 = vst [vmem:[#allocation52_spill] sm:$0xff] %v12763_v54  ;;  %v12777_v46 = vand.u32 4294901760, %v2108_v19  ;;  %v2309_v10 = vand.u32 4294901760, %v2308_v4  ;;  %v2318_v41 = vsub.f32 %v12697_v62, %v16493_v5  ;;  %v1926_v44 = vpop.f32.mrf.mxu1  ;;  %9937 = vmatprep.mubr.f32.mxu1 %v12763_v54  ;;  %10043 = vmatpush3.msra.mxu1 %v17008_v14  ;;  %v1684_v11 = vadd.f32 %v9764_v22, %v17011_v55  ;;  %v17013_v22 = vld [vmem:[#allocation12_spill] sm:$0xff] }
 0x18b   :  { %v2105_v38 = vsel %vm2055_vm1, %v2024_v37, 0  ;;  %v2027_v53 = vmax.f32 %v1933_v56, 0.0  ;;  %v1927_v18 = vadd.f32 %v1926_v44, %v1666_v39  ;;  %9938 = vmatmul.mubr.f32.gmra.mxu1 %v12752_v57  ;;  %9979 = vmatpush3.msra.mxu0 %v17009_v60  ;;  %v9767_v26 = vpop.f32.mrf.mxu0  ;;  %v16500_v59 = vand.u32 4294901760, %v12736_v63 }
 0x18c   :  { %17010 = vst [vmem:[#allocation37_spill] sm:$0xff] %v12777_v46  ;;  %v12789_v4 = vsub.f32 %v2108_v19, %v12777_v46  ;;  %v12791_v21 = vand.u32 4294901760, %v2105_v38  ;;  %9864 = vmatprep.mubr.f32.mxu0 %v2309_v10  ;;  %v2319_v5 = vand.u32 4294901760, %v2318_v41  ;;  %v9820_v48 = vpop.f32.mrf.mxu1  ;;  %10092 = vmatprep.subr.mxu0 %v17013_v22  ;;  %v12796_v37 = vsub.f32 %v2099_v17, %v12763_v54 }
 0x18d   :  { %v2114_v39 = vsel %vm2055_vm1, %v2027_v53, 0  ;;  %v2026_v56 = vmax.f32 %v1927_v18, 0.0  ;;  %v16509_v60 = vand.u32 4294901760, %v12722_v25  ;;  %10156 = vmatprep.subr.mxu1 %v16982_v3  ;;  %v1678_v10 = vadd.f32 %v1677_v8, %v12565_v50  ;;  %v1689_v17 = vpop.f32.mrf.mxu0 }
 0x18e   :  { %17012 = vst [vmem:[#allocation55_spill] sm:$0xff] %v12791_v21  ;;  %9865 = vmatmul.mubr.f32.gmra.mxu0 %v2319_v5  ;;  %v12802_v41 = vand.u32 4294901760, %v2114_v39  ;;  %v1696_v19 = vadd.f32 %v9767_v26, %v12391_v36  ;;  %v2328_v44 = vsub.f32 %v12736_v63, %v16500_v59  ;;  %v1938_v55 = vpop.f32.mrf.mxu1  ;;  %9940 = vmatprep.mubr.f32.mxu1 %v12791_v21  ;;  %v16512_v23 = vand.u32 4294901760, %v12761_v15 }
 0x18f   :  { %v2111_v18 = vsel %vm2055_vm1, %v2026_v56, 0  ;;  %v2338_v50 = vsub.f32 %v12722_v25, %v16509_v60  ;;  %v1945_v8 = vadd.f32 %v9820_v48, %v1684_v11  ;;  %9941 = vmatmul.mubr.f32.gmra.mxu1 %v12777_v46  ;;  %v9770_v59 = vpop.f32.mrf.mxu0  ;;  %v1939_v57 = vadd.f32 %v1938_v55, %v1678_v10 }
 0x190   :  { %17014 = vst [vmem:[#allocation54_spill] sm:$0xff] %v12802_v41  ;;  %v12816_v36 = vsub.f32 %v2114_v39, %v12802_v41  ;;  %v12818_v26 = vand.u32 4294901760, %v2111_v18  ;;  %v2329_v5 = vand.u32 4294901760, %v2328_v44  ;;  %v9823_v54 = vpop.f32.mrf.mxu1  ;;  %v12821_v53 = vsub.f32 %v2105_v38, %v12791_v21 }
 0x191   :  { %v2339_v56 = vand.u32 4294901760, %v2338_v50  ;;  %v2029_v58 = vmax.f32 %v1945_v8, 0.0  ;;  %v1690_v48 = vadd.f32 %v1689_v17, %v12570_v20  ;;  %v1708_v11 = vadd.f32 %v9770_v59, %v12415_v28  ;;  %v1701_v46 = vpop.f32.mrf.mxu0 }
 0x192   :  { %17015 = vst [vmem:[#allocation57_spill] sm:$0xff] %v12818_v26  ;;  %9867 = vmatprep.mubr.f32.mxu0 %v2329_v5  ;;  %v2028_v39 = vmax.f32 %v1939_v57, 0.0  ;;  %v16517_v60 = vand.u32 4294901760, %v12750_v2  ;;  %v1950_v44 = vpop.f32.mrf.mxu1  ;;  %9943 = vmatprep.mubr.f32.mxu1 %v12818_v26  ;;  %v2348_v55 = vsub.f32 %v12761_v15, %v16512_v23  ;;  %v1957_v50 = vadd.f32 %v9823_v54, %v1696_v19 }
 0x193   :  { %9868 = vmatmul.mubr.f32.gmra.mxu0 %v2339_v56  ;;  %v2120_v38 = vsel %vm2055_vm1, %v2029_v58, 0  ;;  %9944 = vmatmul.mubr.f32.gmra.mxu1 %v12802_v41  ;;  %v9773_v57 = vpop.f32.mrf.mxu0  ;;  %v1951_v17 = vadd.f32 %v1950_v44, %v1690_v48  ;;  %v12841_v58 = vsub.f32 %v2111_v18, %v12818_v26  ;;  %v1702_v23 = vadd.f32 %v1701_v46, %v12576_v32 }
 0x194   :  { %v12834_v28 = vand.u32 4294901760, %v2120_v38  ;;  %v2117_v20 = vsel %vm2055_vm1, %v2028_v39, 0  ;;  %v2358_v59 = vsub.f32 %v12750_v2, %v16517_v60  ;;  %v9826_v8 = vpop.f32.mrf.mxu1  ;;  %v2349_v56 = vand.u32 4294901760, %v2348_v55 }
 0x195   :  { %v12843_v5 = vand.u32 4294901760, %v2117_v20  ;;  %v2031_v54 = vmax.f32 %v1957_v50, 0.0  ;;  %v2030_v10 = vmax.f32 %v1951_v17, 0.0  ;;  %v16518_v39 = vand.u32 4294901760, %v12796_v37  ;;  %v1713_v41 = vpop.f32.mrf.mxu0 }
 0x196   :  { %17016 = vst [vmem:[#allocation56_spill] sm:$0xff] %v12834_v28  ;;  %v2359_v19 = vand.u32 4294901760, %v2358_v59  ;;  %v1962_v21 = vpop.f32.mrf.mxu1  ;;  %v12848_v60 = vsub.f32 %v2120_v38, %v12834_v28  ;;  %9870 = vmatprep.mubr.f32.mxu0 %v2349_v56  ;;  %v1720_v18 = vadd.f32 %v9773_v57, %v12448_v31  ;;  %v16529_v44 = vand.u32 4294901760, %v12775_v35 }
 0x197   :  { %17017 = vst [vmem:[#allocation38_spill] sm:$0xff] %v12843_v5  ;;  %v2126_v48 = vsel %vm2055_vm1, %v2031_v54, 0  ;;  %9946 = vmatprep.mubr.f32.mxu1 %v12843_v5  ;;  %v12855_v55 = vsub.f32 %v2117_v20, %v12843_v5  ;;  %v2123_v46 = vsel %vm2055_vm1, %v2030_v10, 0  ;;  %v2368_v38 = vsub.f32 %v12796_v37, %v16518_v39  ;;  %v9776_v50 = vpop.f32.mrf.mxu0 }
 0x198   :  { %9871 = vmatmul.mubr.f32.gmra.mxu0 %v2359_v19  ;;  %v12857_v32 = vand.u32 4294901760, %v2126_v48  ;;  %9947 = vmatmul.mubr.f32.gmra.mxu1 %v12834_v28  ;;  %v9829_v31 = vpop.f32.mrf.mxu1  ;;  %v12864_v59 = vand.u32 4294901760, %v2123_v46  ;;  %v2378_v20 = vsub.f32 %v12775_v35, %v16529_v44  ;;  %v1714_v57 = vadd.f32 %v1713_v41, %v12581_v24 }
 0x199   :  { %v1969_v17 = vadd.f32 %v9826_v8, %v1708_v11  ;;  %v2369_v10 = vand.u32 4294901760, %v2368_v38  ;;  %v1963_v54 = vadd.f32 %v1962_v21, %v1702_v23  ;;  %v16530_v19 = vand.u32 4294901760, %v12821_v53  ;;  %v1725_v39 = vpop.f32.mrf.mxu0 }
 0x19a   :  { %17018 = vst [vmem:[#allocation59_spill] sm:$0xff] %v12857_v32  ;;  %v12871_v56 = vsub.f32 %v2126_v48, %v12857_v32  ;;  %v1974_v5 = vpop.f32.mrf.mxu1  ;;  %v2379_v26 = vand.u32 4294901760, %v2378_v20  ;;  %v17019_v1 = vand.u32 4294901760, %v12789_v4  ;;  %9949 = vmatprep.mubr.f32.mxu1 %v12864_v59  ;;  %v12880_v24 = vsub.f32 %v2123_v46, %v12864_v59 }
 0x19b   :  { %v2033_v29 = vmax.f32 %v1969_v17, 0.0  ;;  %9873 = vmatprep.mubr.f32.mxu0 %v2369_v10  ;;  %v1732_v23 = vadd.f32 %v9776_v50, %v12483_v40  ;;  %v2032_v21 = vmax.f32 %v1963_v54, 0.0  ;;  %v2388_v41 = vsub.f32 %v12821_v53, %v16530_v19  ;;  %v9779_v11 = vpop.f32.mrf.mxu0 }
 0x19c   :  { %v2398_v44 = vsub.f32 %v12789_v4, %v17019_v1  ;;  %9950 = vmatmul.mubr.f32.gmra.mxu1 %v12857_v32  ;;  %v9832_v8 = vpop.f32.mrf.mxu1  ;;  %9874 = vmatmul.mubr.f32.gmra.mxu0 %v2379_v26  ;;  %v1726_v46 = vadd.f32 %v1725_v39, %v12589_v51  ;;  %v1981_v38 = vadd.f32 %v9829_v31, %v1720_v18  ;;  %v16538_v48 = vand.u32 4294901760, %v12841_v58 }
 0x19d   :  { %v2132_v1 = vsel %vm2055_vm1, %v2033_v29, 0  ;;  %v2129_v40 = vsel %vm2055_vm1, %v2032_v21, 0  ;;  %v2389_v50 = vand.u32 4294901760, %v2388_v41  ;;  %v1975_v17 = vadd.f32 %v1974_v5, %v1714_v57  ;;  %v1737_v10 = vpop.f32.mrf.mxu0 }
 0x19e   :  { %v12890_v20 = vand.u32 4294901760, %v2132_v1  ;;  %v1986_v54 = vpop.f32.mrf.mxu1  ;;  %v12893_v19 = vand.u32 4294901760, %v2129_v40  ;;  %v2399_v28 = vand.u32 4294901760, %v2398_v44  ;;  %v2035_v32 = vmax.f32 %v1981_v38, 0.0 }
 0x19f   :  { %9876 = vmatprep.mubr.f32.mxu0 %v2389_v50  ;;  %v1744_v29 = vadd.f32 %v9779_v11, %v12517_v52  ;;  %v2034_v26 = vmax.f32 %v1975_v17, 0.0  ;;  %v17020_v51 = vand.u32 4294901760, %v12816_v36  ;;  %v1993_v18 = vadd.f32 %v9832_v8, %v1732_v23 }
 0x1a0   :  { %v9835_v31 = vpop.f32.mrf.mxu1  ;;  %v12901_v5 = vsub.f32 %v2132_v1, %v12890_v20  ;;  %9877 = vmatmul.mubr.f32.gmra.mxu0 %v2399_v28  ;;  %v2138_v57 = vsel %vm2055_vm1, %v2035_v32, 0  ;;  %v2408_v44 = vsub.f32 %v12841_v58, %v16538_v48  ;;  %v1738_v21 = vadd.f32 %v1737_v10, %v12598_v13  ;;  %9952 = vmatprep.mubr.f32.mxu1 %v12893_v19 }
 0x1a1   :  { %v2418_v39 = vsub.f32 %v12816_v36, %v17020_v51  ;;  %v12910_v52 = vsub.f32 %v2129_v40, %v12893_v19  ;;  %v12912_v41 = vand.u32 4294901760, %v2138_v57  ;;  %v2135_v23 = vsel %vm2055_vm1, %v2034_v26, 0  ;;  %9953 = vmatmul.mubr.f32.gmra.mxu1 %v12890_v20 }
 0x1a2   :  { %v2037_v11 = vmax.f32 %v1993_v18, 0.0  ;;  %v12916_v28 = vand.u32 4294901760, %v2135_v23  ;;  %v2409_v32 = vand.u32 4294901760, %v2408_v44  ;;  %v1987_v8 = vadd.f32 %v1986_v54, %v1726_v46  ;;  %v1998_v38 = vpop.f32.mrf.mxu1 }
 0x1a3   :  { %v16533_v1 = vand.u32 4294901760, %v12855_v55  ;;  %v2419_v13 = vand.u32 4294901760, %v2418_v39  ;;  %v17021_v40 = vand.u32 4294901760, %v12848_v60  ;;  %v2005_v10 = vadd.f32 %v9835_v31, %v1744_v29 }
 0x1a4   :  { %v2144_v50 = vsel %vm2055_vm1, %v2037_v11, 0  ;;  %v16536_v26 = vand.u32 4294901760, %v12901_v5  ;;  %v12925_v51 = vsub.f32 %v2138_v57, %v12912_v41  ;;  %9879 = vmatprep.mubr.f32.mxu0 %v2409_v32  ;;  %v2036_v18 = vmax.f32 %v1987_v8, 0.0  ;;  %9955 = vmatprep.mubr.f32.mxu1 %v12916_v28 }
 0x1a5   :  { %v2438_v17 = vsub.f32 %v12848_v60, %v17021_v40  ;;  %v2428_v46 = vsub.f32 %v12855_v55, %v16533_v1  ;;  %v12932_v54 = vsub.f32 %v2135_v23, %v12916_v28  ;;  %9880 = vmatmul.mubr.f32.gmra.mxu0 %v2419_v13  ;;  %v12934_v39 = vand.u32 4294901760, %v2144_v50  ;;  %9956 = vmatmul.mubr.f32.gmra.mxu1 %v12912_v41 }
 0x1a6   :  { %v2039_v29 = vmax.f32 %v2005_v10, 0.0  ;;  %v1999_v31 = vadd.f32 %v1998_v38, %v1738_v21  ;;  %v2141_v57 = vsel %vm2055_vm1, %v2036_v18, 0  ;;  %v16534_v32 = vand.u32 4294901760, %v12880_v24 }
 0x1a7   :  { %v2429_v44 = vand.u32 4294901760, %v2428_v46  ;;  %v2439_v11 = vand.u32 4294901760, %v2438_v17  ;;  %v12939_v8 = vand.u32 4294901760, %v2141_v57  ;;  %v17022_v23 = vand.u32 4294901760, %v12871_v56 }
 0x1a8   :  { %v2150_v40 = vsel %vm2055_vm1, %v2039_v29, 0  ;;  %v2038_v1 = vmax.f32 %v1999_v31, 0.0  ;;  %v2448_v21 = vsub.f32 %v12880_v24, %v16534_v32  ;;  %v16535_v38 = vand.u32 4294901760, %v12910_v52 }
 0x1a9   :  { %v2458_v13 = vsub.f32 %v12871_v56, %v17022_v23  ;;  %9882 = vmatprep.mubr.f32.mxu0 %v2429_v44  ;;  %v16540_v17 = vand.u32 4294901760, %v12925_v51  ;;  %v12951_v10 = vsub.f32 %v2144_v50, %v12934_v39  ;;  %v12954_v18 = vsub.f32 %v2141_v57, %v12939_v8  ;;  %9958 = vmatprep.mubr.f32.mxu1 %v12939_v8 }
 0x1aa   :  { %9883 = vmatmul.mubr.f32.gmra.mxu0 %v2439_v11  ;;  %v2147_v46 = vsel %vm2055_vm1, %v2038_v1, 0  ;;  %v12958_v29 = vand.u32 4294901760, %v2150_v40  ;;  %v2449_v44 = vand.u32 4294901760, %v2448_v21  ;;  %v2468_v23 = vsub.f32 %v12910_v52, %v16535_v38  ;;  %9959 = vmatmul.mubr.f32.gmra.mxu1 %v12934_v39 }
 0x1ab   :  { %v12960_v31 = vand.u32 4294901760, %v2147_v46  ;;  %v2459_v50 = vand.u32 4294901760, %v2458_v13  ;;  %v2478_v57 = vsub.f32 %v12901_v5, %v16536_v26  ;;  %v16537_v1 = vand.u32 4294901760, %v12932_v54 }
 0x1ac   :  { %17023 = vst [vmem:[#allocation58_spill] sm:$0xff] %v12958_v29  ;;  %v16539_v11 = vand.u32 4294901760, %v12954_v18  ;;  %9885 = vmatprep.mubr.f32.mxu0 %v2449_v44  ;;  %v2469_v21 = vand.u32 4294901760, %v2468_v23  ;;  %v12985_v44 = vsub.f32 %v2150_v40, %v12958_v29  ;;  %v17024_v48 = vand.u32 4294901760, %v12602_v0 }
 0x1ad   :  { %v12972_v32 = vsub.f32 %v2147_v46, %v12960_v31  ;;  %9961 = vmatprep.mubr.f32.mxu1 %v12960_v31  ;;  %v2488_v13 = vsub.f32 %v12932_v54, %v16537_v1  ;;  %v2479_v23 = vand.u32 4294901760, %v2478_v57  ;;  %v2498_v1 = vsub.f32 %v12925_v51, %v16540_v17 }
 0x1ae   :  { %9886 = vmatmul.mubr.f32.gmra.mxu0 %v2459_v50  ;;  %9962 = vmatmul.mubr.f32.gmra.mxu1 %v12958_v29  ;;  %v2508_v26 = vsub.f32 %v12954_v18, %v16539_v11  ;;  %v17025_v38 = vand.u32 4294901760, %v12592_v9  ;;  %v2537_v57 = vand.u32 4294901760, %v12985_v44  ;;  %v17026_v11 = vand.u32 4294901760, %v12951_v10 }
 0x1af   :  { %9888 = vmatprep.mubr.f32.mxu0 %v2469_v21  ;;  %v2527_v46 = vand.u32 4294901760, %v12972_v32  ;;  %v2489_v50 = vand.u32 4294901760, %v2488_v13  ;;  %10044 = vmatprep.mubr.f32.mxu1 %v17024_v48  ;;  %v2499_v13 = vand.u32 4294901760, %v2498_v1  ;;  %v17027_v29 = vand.u32 4294901760, %v12624_v42 }
 0x1b0   :  { %v2509_v21 = vand.u32 4294901760, %v2508_v26  ;;  %v2518_v17 = vsub.f32 %v12951_v10, %v17026_v11  ;;  %v17028_v26 = vand.u32 4294901760, %v12619_v49  ;;  %v2538_v1 = vsub.f32 %v12985_v44, %v2537_v57 }
 0x1b1   :  { %v2528_v40 = vsub.f32 %v12972_v32, %v2527_v46  ;;  %v17029_v11 = vand.u32 4294901760, %v12645_v61 }
 0x1b2   :  { %9889 = vmatmul.mubr.f32.gmra.mxu0 %v2479_v23  ;;  %10045 = vmatmul.mubr.f32.vlgmr.msra.gmra.mxu1 %v17025_v38  ;;  %v2519_v38 = vand.u32 4294901760, %v2518_v17  ;;  %v17031_v17 = vand.u32 4294901760, %v12683_v16  ;;  %v17041_v23 = vld [vmem:[#allocation24_spill] sm:$0xff] }
 0x1b3   :  { %9891 = vmatprep.mubr.f32.mxu0 %v2489_v50  ;;  %10047 = vmatprep.mubr.f32.mxu1 %v17027_v29  ;;  %v2529_v48 = vand.u32 4294901760, %v2528_v40  ;;  %v17033_v29 = vand.u32 4294901760, %v12711_v7  ;;  %v17044_v50 = vand.u32 4294901760, %v12796_v37  ;;  %v17048_v40 = vand.u32 4294901760, %v12821_v53 }
 0x1b4   :  { %10157 = vmatpush3.msra.mxu1 %v16982_v3  ;;  %v17030_v3 = vand.u32 4294901760, %v12658_v43 }
 0x1b5   :  { %10158 = vmatprep.subr.mxu1 %v16983_v30 }
 0x1b6   :  { %9892 = vmatmul.mubr.f32.gmra.mxu0 %v2499_v13  ;;  %10159 = vmatpush3.msra.mxu1 %v16983_v30  ;;  %v2539_v30 = vand.u32 4294901760, %v2538_v1  ;;  %v17079_v13 = vld [vmem:[#allocation57_spill] sm:$0xff]  ;;  %v17082_v1 = vld [vmem:[#allocation38_spill] sm:$0xff] }
 0x1b7   :  { %9894 = vmatprep.mubr.f32.mxu0 %v2509_v21  ;;  %10048 = vmatmul.mubr.f32.gmra.mxu1 %v17028_v26  ;;  %v17045_v21 = vld [vmem:[#allocation32_spill] sm:$0xff]  ;;  %v17080_v26 = vld [vmem:[#allocation54_spill] sm:$0xff] }
 0x1b8   :  { %10050 = vmatprep.mubr.f32.mxu1 %v17029_v11  ;;  %10160 = vmatprep.subr.mxu1 %v16984_v45 }
 0x1b9   :  { %10161 = vmatpush3.msra.mxu1 %v16984_v45  ;;  %v17032_v45 = vand.u32 4294901760, %v12672_v27 }
 0x1ba   :  { %9895 = vmatmul.mubr.f32.gmra.mxu0 %v2519_v38  ;;  %10162 = vmatprep.subr.mxu1 %v16987_v47 }
 0x1bb   :  { %9897 = vmatprep.mubr.f32.mxu0 %v2529_v48  ;;  %10051 = vmatmul.mubr.f32.gmra.mxu1 %v17030_v3  ;;  %v4057_v48 = vld [vmem:[#allocation2 + $0x18] sm:$0xff]  ;;  %v17084_v3 = vld [vmem:[#allocation56_spill] sm:$0xff] }
 0x1bc   :  { %10053 = vmatprep.mubr.f32.mxu1 %v17031_v17  ;;  %10163 = vmatpush3.msra.mxu1 %v16987_v47  ;;  %v17035_v47 = vld [vmem:[#allocation15_spill] sm:$0xff]  ;;  %v13159_v38 = vand.u32 4294901760, %v4057_v48 }
 0x1bd   :  { %10164 = vmatprep.subr.mxu1 %v16992_v33 }
 0x1be   :  { %9898 = vmatmul.mubr.f32.gmra.mxu0 %v2539_v30  ;;  %10165 = vmatpush3.msra.mxu1 %v16992_v33  ;;  %v17036_v33 = vand.u32 4294901760, %v12736_v63  ;;  %17081 = vst [vmem:[#allocation61_spill] sm:$0xff] %v13159_v38  ;;  %v13165_v11 = vsub.f32 %v4057_v48, %v13159_v38 }
 0x1bf   :  { %9980 = vmatprep.mubr.f32.mxu0 %v12602_v0  ;;  %10054 = vmatmul.mubr.f32.gmra.mxu1 %v17032_v45  ;;  %v17034_v0 = vand.u32 4294901760, %v12697_v62  ;;  %v17086_v45 = vld [vmem:[#allocation59_spill] sm:$0xff] }
 0x1c0   :  { %10056 = vmatprep.mubr.f32.mxu1 %v17033_v29  ;;  %10166 = vmatprep.subr.mxu1 %v17000_v6  ;;  %17083 = vst [vmem:[#allocation60_spill] sm:$0xff] %v13165_v11  ;;  %v13171_v30 = vand.u32 4294901760, %v13165_v11 }
 0x1c1   :  { %10167 = vmatpush3.msra.mxu1 %v17000_v6  ;;  %v17037_v6 = vld [vmem:[#allocation18_spill] sm:$0xff] }
 0x1c2   :  { %9981 = vmatmul.mubr.f32.vlgmr.msra.gmra.mxu0 %v12592_v9  ;;  %10168 = vmatprep.subr.mxu1 %v17005_v34  ;;  %v17038_v9 = vand.u32 4294901760, %v12722_v25  ;;  %17085 = vst [vmem:[#allocation39_spill] sm:$0xff] %v13171_v30  ;;  %v4578_v17 = vsub.f32 %v13165_v11, %v13171_v30 }
 0x1c3   :  { %9983 = vmatprep.mubr.f32.mxu0 %v12624_v42  ;;  %10093 = vmatpush3.msra.mxu0 %v17013_v22  ;;  %v17039_v42 = vld [vmem:[#allocation21_spill] sm:$0xff]  ;;  %v17040_v22 = vand.u32 4294901760, %v12761_v15 }
 0x1c4   :  { %10057 = vmatmul.mubr.f32.gmra.mxu1 %v17034_v0  ;;  %10094 = vmatprep.subr.mxu0 %v17035_v47  ;;  %v4579_v29 = vand.u32 4294901760, %v4578_v17  ;;  %v4056_v0 = vld [vmem:[#allocation2 + $0x10] sm:$0xff] }
 0x1c5   :  { %10059 = vmatprep.mubr.f32.mxu1 %v17036_v33  ;;  %10095 = vmatpush3.msra.mxu0 %v17035_v47  ;;  %v13187_v47 = vand.u32 4294901760, %v4056_v0 }
 0x1c6   :  { %9984 = vmatmul.mubr.f32.gmra.mxu0 %v12619_v49  ;;  %10096 = vmatprep.subr.mxu0 %v17037_v6  ;;  %v17042_v49 = vand.u32 4294901760, %v12750_v2 }
 0x1c7   :  { %9986 = vmatprep.mubr.f32.mxu0 %v12645_v61  ;;  %10097 = vmatpush3.msra.mxu0 %v17037_v6  ;;  %v17043_v61 = vld [vmem:[#allocation28_spill] sm:$0xff]  ;;  %17087 = vst [vmem:[#allocation63_spill] sm:$0xff] %v13187_v47  ;;  %v13193_v33 = vsub.f32 %v4056_v0, %v13187_v47 }
 0x1c8   :  { %10060 = vmatmul.mubr.f32.gmra.mxu1 %v17038_v9  ;;  %10098 = vmatprep.subr.mxu0 %v17039_v42 }
 0x1c9   :  { %10062 = vmatprep.mubr.f32.mxu1 %v17040_v22  ;;  %10099 = vmatpush3.msra.mxu0 %v17039_v42  ;;  %17088 = vst [vmem:[#allocation62_spill] sm:$0xff] %v13193_v33  ;;  %v13199_v6 = vand.u32 4294901760, %v13193_v33  ;;  %v17090_v22 = vld [vmem:[#allocation58_spill] sm:$0xff] }
 0x1ca   :  { %9987 = vmatmul.mubr.f32.gmra.mxu0 %v12658_v43  ;;  %10100 = vmatprep.subr.mxu0 %v17041_v23  ;;  %v17046_v43 = vand.u32 4294901760, %v12775_v35 }
 0x1cb   :  { %9989 = vmatprep.mubr.f32.mxu0 %v12683_v16  ;;  %10101 = vmatpush3.msra.mxu0 %v17041_v23  ;;  %v17047_v16 = vld [vmem:[#allocation34_spill] sm:$0xff]  ;;  %17089 = vst [vmem:[#allocation65_spill] sm:$0xff] %v13199_v6  ;;  %v4585_v9 = vsub.f32 %v13193_v33, %v13199_v6 }
 0x1cc   :  { %10063 = vmatmul.mubr.f32.gmra.mxu1 %v17042_v49  ;;  %10102 = vmatprep.subr.mxu0 %v17043_v61 }
 0x1cd   :  { %10065 = vmatprep.mubr.f32.mxu1 %v17044_v50  ;;  %10103 = vmatpush3.msra.mxu0 %v17043_v61  ;;  %v13216_v50 = vld [vmem:[%s16359_s5] ss:$0 sm:$0xff] }
 0x1ce   :  { %9990 = vmatmul.mubr.f32.gmra.mxu0 %v12672_v27  ;;  %10104 = vmatprep.subr.mxu0 %v17045_v21  ;;  %v17049_v27 = vand.u32 4294901760, %v12789_v4 }
 0x1cf   :  { %9992 = vmatprep.mubr.f32.mxu0 %v12711_v7  ;;  %10105 = vmatpush3.msra.mxu0 %v17045_v21  ;;  %v17050_v7 = vand.u32 4294901760, %v12841_v58 }
 0x1d0   :  { %10066 = vmatmul.mubr.f32.gmra.mxu1 %v17046_v43  ;;  %10106 = vmatprep.subr.mxu0 %v17047_v16  ;;  %v4055_v43 = vld [vmem:[#allocation2 + $0x8] sm:$0xff] }
 0x1d1   :  { %10068 = vmatprep.mubr.f32.mxu1 %v17048_v40  ;;  %10169 = vmatpush3.msra.mxu1 %v17005_v34  ;;  %v17052_v34 = vand.u32 4294901760, %v12855_v55 }
 0x1d2   :  { %9993 = vmatmul.mubr.f32.gmra.mxu0 %v12697_v62  ;;  %10170 = vmatprep.subr.mxu1 %v17008_v14  ;;  %v17051_v62 = vand.u32 4294901760, %v12816_v36 }
 0x1d3   :  { %9995 = vmatprep.mubr.f32.mxu0 %v12736_v63  ;;  %10171 = vmatpush3.msra.mxu1 %v17008_v14  ;;  %v17053_v63 = vand.u32 4294901760, %v12848_v60  ;;  %v17054_v14 = vand.u32 4294901760, %v12880_v24 }
 0x1d4   :  { %10069 = vmatmul.mubr.f32.gmra.mxu1 %v17049_v27  ;;  %10107 = vmatpush3.msra.mxu0 %v17047_v16  ;;  %v13221_v16 = vand.u32 4294901760, %v4055_v43 }
 0x1d5   :  { %10071 = vmatprep.mubr.f32.mxu1 %v17050_v7  ;;  %10220 = vmatprep.subr.mxu0 %v13159_v38 }
 0x1d6   :  { %9996 = vmatmul.mubr.f32.gmra.mxu0 %v12722_v25  ;;  %v17055_v25 = vand.u32 4294901760, %v12871_v56  ;;  %10276 = vmatprep.subr.mxu1 %v4579_v29  ;;  %17091 = vst [vmem:[#allocation64_spill] sm:$0xff] %v13221_v16 }
 0x1d7   :  { %9998 = vmatprep.mubr.f32.mxu0 %v12761_v15  ;;  %v17056_v15 = vand.u32 4294901760, %v12910_v52 }
 0x1d8   :  { %10072 = vmatmul.mubr.f32.gmra.mxu1 %v17051_v62 }
 0x1d9   :  { %10074 = vmatprep.mubr.f32.mxu1 %v17052_v34 }
 0x1da   :  { %9999 = vmatmul.mubr.f32.gmra.mxu0 %v12750_v2  ;;  %v17057_v2 = vand.u32 4294901760, %v12901_v5 }
 0x1db   :  { %10001 = vmatprep.mubr.f32.mxu0 %v12796_v37  ;;  %v17058_v37 = vand.u32 4294901760, %v12932_v54 }
 0x1dc   :  { %10075 = vmatmul.mubr.f32.gmra.mxu1 %v17053_v63 }
 0x1dd   :  { %10077 = vmatprep.mubr.f32.mxu1 %v17054_v14 }
 0x1de   :  { %10002 = vmatmul.mubr.f32.gmra.mxu0 %v12775_v35  ;;  %v17059_v35 = vand.u32 4294901760, %v12925_v51 }
 0x1df   :  { %10004 = vmatprep.mubr.f32.mxu0 %v12821_v53  ;;  %v17060_v53 = vand.u32 4294901760, %v12954_v18 }
 0x1e0   :  { %10078 = vmatmul.mubr.f32.gmra.mxu1 %v17055_v25 }
 0x1e1   :  { %10080 = vmatprep.mubr.f32.mxu1 %v17056_v15 }
 0x1e2   :  { %10005 = vmatmul.mubr.f32.gmra.mxu0 %v12789_v4  ;;  %v17061_v4 = vand.u32 4294901760, %v12951_v10 }
 0x1e3   :  { %10007 = vmatprep.mubr.f32.mxu0 %v12841_v58  ;;  %v17064_v58 = vld [vmem:[#allocation42_spill] sm:$0xff] }
 0x1e4   :  { %10081 = vmatmul.mubr.f32.gmra.mxu1 %v17057_v2 }
 0x1e5   :  { %10083 = vmatprep.mubr.f32.mxu1 %v17058_v37 }
 0x1e6   :  { %10008 = vmatmul.mubr.f32.gmra.mxu0 %v12816_v36  ;;  %v17063_v36 = vld [vmem:[#allocation43_spill] sm:$0xff] }
 0x1e7   :  { %10010 = vmatprep.mubr.f32.mxu0 %v12855_v55  ;;  %v17065_v55 = vld [vmem:[#allocation35_spill] sm:$0xff] }
 0x1e8   :  { %10084 = vmatmul.mubr.f32.gmra.mxu1 %v17059_v35 }
 0x1e9   :  { %10086 = vmatprep.mubr.f32.mxu1 %v17060_v53 }
 0x1ea   :  { %10011 = vmatmul.mubr.f32.gmra.mxu0 %v12848_v60  ;;  %v17062_v60 = vld [vmem:[#allocation41_spill] sm:$0xff] }
 0x1eb   :  { %10013 = vmatprep.mubr.f32.mxu0 %v12880_v24  ;;  %v17067_v24 = vld [vmem:[#allocation44_spill] sm:$0xff] }
 0x1ec   :  { %10087 = vmatmul.mubr.f32.gmra.mxu1 %v17061_v4 }
 0x1ed   :  { %10089 = vmatprep.mubr.f32.mxu1 %v2527_v46  ;;  %v17076_v46 = vld [vmem:[#allocation53_spill] sm:$0xff] }
 0x1ee   :  { %10014 = vmatmul.mubr.f32.gmra.mxu0 %v12871_v56  ;;  %v17066_v56 = vld [vmem:[#allocation45_spill] sm:$0xff] }
 0x1ef   :  { %10016 = vmatprep.mubr.f32.mxu0 %v12910_v52  ;;  %v17069_v52 = vld [vmem:[#allocation49_spill] sm:$0xff] }
 0x1f0   :  { %10090 = vmatmul.mubr.f32.gmra.mxu1 %v2537_v57  ;;  %v17078_v57 = vld [vmem:[#allocation37_spill] sm:$0xff] }
 0x1f1   :  { %10172 = vmatprep.mubr.f32.mxu1 %v12594_v12 }
 0x1f2   :  { %10017 = vmatmul.mubr.f32.gmra.mxu0 %v12901_v5  ;;  %v17068_v5 = vld [vmem:[#allocation47_spill] sm:$0xff] }
 0x1f3   :  { %10019 = vmatprep.mubr.f32.mxu0 %v12932_v54  ;;  %v17071_v54 = vld [vmem:[#allocation36_spill] sm:$0xff] }
 0x1f4   :  { %10173 = vmatmul.mubr.f32.vlgmr.msra.gmra.mxu1 %v17062_v60 }
 0x1f5   :  { %10175 = vmatprep.mubr.f32.mxu1 %v17063_v36  ;;  %10277 = vmatpush3.msra.mxu1 %v4579_v29 }
 0x1f6   :  { %10020 = vmatmul.mubr.f32.gmra.mxu0 %v12925_v51  ;;  %v17070_v51 = vld [vmem:[#allocation46_spill] sm:$0xff] }
 0x1f7   :  { %10022 = vmatprep.mubr.f32.mxu0 %v12954_v18  ;;  %v17075_v18 = vld [vmem:[#allocation52_spill] sm:$0xff] }
 0x1f8   :  { %10176 = vmatmul.mubr.f32.gmra.mxu1 %v17064_v58 }
 0x1f9   :  { %10178 = vmatprep.mubr.f32.mxu1 %v17065_v55 }
 0x1fa   :  { %10023 = vmatmul.mubr.f32.gmra.mxu0 %v12951_v10  ;;  %v17073_v10 = vld [vmem:[#allocation50_spill] sm:$0xff] }
 0x1fb   :  { %10025 = vmatprep.mubr.f32.mxu0 %v12972_v32  ;;  %v17072_v32 = vld [vmem:[#allocation48_spill] sm:$0xff] }
 0x1fc   :  { %10179 = vmatmul.mubr.f32.gmra.mxu1 %v17066_v56 }
 0x1fd   :  { %10181 = vmatprep.mubr.f32.mxu1 %v17067_v24 }
 0x1fe   :  { %10026 = vmatmul.mubr.f32.gmra.mxu0 %v12985_v44  ;;  %v17077_v44 = vld [vmem:[#allocation55_spill] sm:$0xff] }
 0x1ff   :  { %10108 = vmatprep.mubr.f32.mxu0 %v12594_v12  ;;  %v17074_v12 = vld [vmem:[#allocation51_spill] sm:$0xff] }
 0x200   :  { %10182 = vmatmul.mubr.f32.gmra.mxu1 %v17068_v5 }
 0x201   :  { %10184 = vmatprep.mubr.f32.mxu1 %v17069_v52 }
 0x202   :  { %10109 = vmatmul.mubr.f32.vlgmr.msra.gmra.mxu0 %v17062_v60  ;;  %v4054_v60 = vld [vmem:[#allocation2] sm:$0xff] }
 0x203   :  { %10111 = vmatprep.mubr.f32.mxu0 %v17063_v36  ;;  %10221 = vmatpush3.msra.mxu0 %v13159_v38 }
 0x204   :  { %10185 = vmatmul.mubr.f32.gmra.mxu1 %v17070_v51  ;;  %10222 = vmatprep.subr.mxu0 %v13187_v47 }
 0x205   :  { %10187 = vmatprep.mubr.f32.mxu1 %v17071_v54  ;;  %10223 = vmatpush3.msra.mxu0 %v13187_v47 }
 0x206   :  { %10112 = vmatmul.mubr.f32.gmra.mxu0 %v17064_v58  ;;  %10224 = vmatprep.subr.mxu0 %v13221_v16 }
 0x207   :  { %10114 = vmatprep.mubr.f32.mxu0 %v17065_v55  ;;  %10225 = vmatpush3.msra.mxu0 %v13221_v16  ;;  %v13258_v55 = vand.u32 4294901760, %v4054_v60 }
 0x208   :  { %10188 = vmatmul.mubr.f32.gmra.mxu1 %v17072_v32 }
 0x209   :  { %10190 = vmatprep.mubr.f32.mxu1 %v17073_v10  ;;  %17094 = vst [vmem:[#allocation66_spill] sm:$0xff] %v13258_v55  ;;  %10226 = vmatprep.subr.mxu0 %v13258_v55 }
 0x20a   :  { %10115 = vmatmul.mubr.f32.gmra.mxu0 %v17066_v56 }
 0x20b   :  { %10117 = vmatprep.mubr.f32.mxu0 %v17067_v24  ;;  %v13262_v24 = vsub.f32 %v4054_v60, %v13258_v55  ;;  %10227 = vmatpush3.msra.mxu0 %v13258_v55 }
 0x20c   :  { %10191 = vmatmul.mubr.f32.gmra.mxu1 %v17074_v12  ;;  %10332 = vmatprep.subr.mxu0 %v13165_v11 }
 0x20d   :  { %10193 = vmatprep.mubr.f32.mxu1 %v17075_v18  ;;  %17095 = vst [vmem:[#allocation69_spill] sm:$0xff] %v13262_v24 }
 0x20e   :  { %10118 = vmatmul.mubr.f32.gmra.mxu0 %v17068_v5 }
 0x20f   :  { %10120 = vmatprep.mubr.f32.mxu0 %v17069_v52 }
 0x210   :  { %10194 = vmatmul.mubr.f32.gmra.mxu1 %v17076_v46 }
 0x211   :  { %10196 = vmatprep.mubr.f32.mxu1 %v17077_v44 }
 0x212   :  { %10121 = vmatmul.mubr.f32.gmra.mxu0 %v17070_v51 }
 0x213   :  { %10123 = vmatprep.mubr.f32.mxu0 %v17071_v54  ;;  %v13269_v54 = vand.u32 4294901760, %v13262_v24 }
 0x214   :  { %10197 = vmatmul.mubr.f32.gmra.mxu1 %v17078_v57 }
 0x215   :  { %10199 = vmatprep.mubr.f32.mxu1 %v17079_v13  ;;  %17096 = vst [vmem:[#allocation68_spill] sm:$0xff] %v13269_v54 }
 0x216   :  { %10124 = vmatmul.mubr.f32.gmra.mxu0 %v17072_v32 }
 0x217   :  { %10126 = vmatprep.mubr.f32.mxu0 %v17073_v10 }
 0x218   :  { %10200 = vmatmul.mubr.f32.gmra.mxu1 %v17080_v26 }
 0x219   :  { %10202 = vmatprep.mubr.f32.mxu1 %v17082_v1 }
 0x21a   :  { %10127 = vmatmul.mubr.f32.gmra.mxu0 %v17074_v12 }
 0x21b   :  { %10129 = vmatprep.mubr.f32.mxu0 %v17075_v18  ;;  %v4599_v18 = vsub.f32 %v13262_v24, %v13269_v54 }
 0x21c   :  { %10203 = vmatmul.mubr.f32.gmra.mxu1 %v17084_v3 }
 0x21d   :  { %10205 = vmatprep.mubr.f32.mxu1 %v12864_v59 }
 0x21e   :  { %10130 = vmatmul.mubr.f32.gmra.mxu0 %v17076_v46 }
 0x21f   :  { %10132 = vmatprep.mubr.f32.mxu0 %v17077_v44  ;;  %v4600_v44 = vand.u32 4294901760, %v4599_v18 }
 0x220   :  { %10206 = vmatmul.mubr.f32.gmra.mxu1 %v17086_v45 }
 0x221   :  { %10208 = vmatprep.mubr.f32.mxu1 %v12893_v19 }
 0x222   :  { %10133 = vmatmul.mubr.f32.gmra.mxu0 %v17078_v57 }
 0x223   :  { %10135 = vmatprep.mubr.f32.mxu0 %v17079_v13 }
 0x224   :  { %10209 = vmatmul.mubr.f32.gmra.mxu1 %v12890_v20 }
 0x225   :  { %10211 = vmatprep.mubr.f32.mxu1 %v12916_v28 }
 0x226   :  { %10136 = vmatmul.mubr.f32.gmra.mxu0 %v17080_v26 }
 0x227   :  { %10138 = vmatprep.mubr.f32.mxu0 %v17082_v1 }
 0x228   :  { %10212 = vmatmul.mubr.f32.gmra.mxu1 %v12912_v41 }
 0x229   :  { %10214 = vmatprep.mubr.f32.mxu1 %v12939_v8 }
 0x22a   :  { %10139 = vmatmul.mubr.f32.gmra.mxu0 %v17084_v3 }
 0x22b   :  { %10141 = vmatprep.mubr.f32.mxu0 %v12864_v59  ;;  %v4586_v59 = vand.u32 4294901760, %v4585_v9 }
 0x22c   :  { %10215 = vmatmul.mubr.f32.gmra.mxu1 %v12934_v39 }
 0x22d   :  { %10217 = vmatprep.mubr.f32.mxu1 %v12960_v31  ;;  %10278 = vmatprep.subr.mxu1 %v4586_v59 }
 0x22e   :  { %10142 = vmatmul.mubr.f32.gmra.mxu0 %v17086_v45  ;;  %10279 = vmatpush3.msra.mxu1 %v4586_v59 }
 0x22f   :  { %10144 = vmatprep.mubr.f32.mxu0 %v12893_v19  ;;  %v9918_v42 = vpop.f32.mrf.mxu1 }
 0x230   :  { %10218 = vmatmul.mubr.f32.gmra.mxu1 %v17090_v22 }
 0x231   :  { %v13207_v23 = vpop.f32.mrf.mxu1 }
 0x232   :  { %10145 = vmatmul.mubr.f32.gmra.mxu0 %v12890_v20 }
 0x233   :  { %10147 = vmatprep.mubr.f32.mxu0 %v12916_v28  ;;  %v9921_v49 = vpop.f32.mrf.mxu1 }
 0x235   :  { %v13211_v61 = vpop.f32.mrf.mxu1 }
 0x236   :  { %10148 = vmatmul.mubr.f32.gmra.mxu0 %v12912_v41  ;;  %v13232_v41 = vsub.f32 %v4055_v43, %v13221_v16 }
 0x237   :  { %10150 = vmatprep.mubr.f32.mxu0 %v12939_v8  ;;  %v9854_v19 = vpop.f32.mrf.mxu0  ;;  %v9924_v21 = vpop.f32.mrf.mxu1 }
 0x238   :  { %v2242_v20 = vadd.f32 %v9854_v19, %v13216_v50  ;;  %17092 = vst [vmem:[#allocation40_spill] sm:$0xff] %v13232_v41  ;;  %v13237_v62 = vand.u32 4294901760, %v13232_v41 }
 0x239   :  { %v13223_v28 = vpop.f32.mrf.mxu0  ;;  %v13225_v40 = vpop.f32.mrf.mxu1 }
 0x23a   :  { %10151 = vmatmul.mubr.f32.gmra.mxu0 %v12934_v39  ;;  %v13228_v27 = vadd.f32 %v9918_v42, %v2242_v20  ;;  %17093 = vst [vmem:[#allocation67_spill] sm:$0xff] %v13237_v62  ;;  %v4592_v14 = vsub.f32 %v13232_v41, %v13237_v62 }
 0x23b   :  { %10153 = vmatprep.mubr.f32.mxu0 %v12960_v31  ;;  %v9927_v8 = vpop.f32.mrf.mxu1 }
 0x23c   :  { %v9857_v7 = vpop.f32.mrf.mxu0  ;;  %v4593_v15 = vand.u32 4294901760, %v4592_v14 }
 0x23d   :  { %v2262_v34 = vadd.f32 %v9857_v7, %v13216_v50  ;;  %v13240_v63 = vpop.f32.mrf.mxu1 }
 0x23e   :  { %10154 = vmatmul.mubr.f32.gmra.mxu0 %v17090_v22  ;;  %v13243_v39 = vpop.f32.mrf.mxu0  ;;  %10280 = vmatprep.subr.mxu1 %v4593_v15 }
 0x23f   :  { %v9930_v25 = vpop.f32.mrf.mxu1  ;;  %v13247_v31 = vadd.f32 %v9921_v49, %v2262_v34  ;;  %10281 = vmatpush3.msra.mxu1 %v4593_v15 }
 0x240   :  { %10282 = vmatprep.subr.mxu1 %v4600_v44 }
 0x241   :  { %v13249_v2 = vpop.f32.mrf.mxu1  ;;  %10283 = vmatpush3.msra.mxu1 %v4600_v44 }
 0x242   :  { %v9860_v37 = vpop.f32.mrf.mxu0  ;;  %10388 = vmatprep.subr.mxu1 %v13159_v38 }
 0x243   :  { %v2282_v35 = vadd.f32 %v9860_v37, %v13216_v50  ;;  %v9933_v53 = vpop.f32.mrf.mxu1 }
 0x244   :  { %v13252_v4 = vpop.f32.mrf.mxu0 }
 0x245   :  { %v13254_v36 = vpop.f32.mrf.mxu1  ;;  %v13256_v58 = vadd.f32 %v9924_v21, %v2282_v35 }
 0x247   :  { %v9936_v56 = vpop.f32.mrf.mxu1 }
 0x248   :  { %v9863_v5 = vpop.f32.mrf.mxu0 }
 0x249   :  { %v2302_v52 = vadd.f32 %v9863_v5, %v13216_v50  ;;  %v13266_v51 = vpop.f32.mrf.mxu1 }
 0x24a   :  { %v13272_v32 = vpop.f32.mrf.mxu0 }
 0x24b   :  { %v9939_v10 = vpop.f32.mrf.mxu1  ;;  %v13274_v12 = vadd.f32 %v9927_v8, %v2302_v52 }
 0x24d   :  { %v13278_v46 = vpop.f32.mrf.mxu1 }
 0x24e   :  { %v9866_v57 = vpop.f32.mrf.mxu0 }
 0x24f   :  { %v2322_v13 = vadd.f32 %v9866_v57, %v13216_v50  ;;  %v9942_v48 = vpop.f32.mrf.mxu1 }
 0x250   :  { %v13281_v26 = vpop.f32.mrf.mxu0 }
 0x251   :  { %v13283_v1 = vpop.f32.mrf.mxu1  ;;  %v13285_v3 = vadd.f32 %v9930_v25, %v2322_v13 }
 0x253   :  { %17097 = vst [vmem:[#allocation70_spill] sm:$0xff] %v13285_v3  ;;  %v9869_v17 = vpop.f32.mrf.mxu0  ;;  %v9945_v45 = vpop.f32.mrf.mxu1 }
 0x254   :  { %v2342_v29 = vadd.f32 %v9869_v17, %v13216_v50 }
 0x255   :  { %v13289_v0 = vpop.f32.mrf.mxu0  ;;  %v13291_v9 = vpop.f32.mrf.mxu1 }
 0x256   :  { %v13293_v42 = vadd.f32 %v9933_v53, %v2342_v29 }
 0x258   :  { %17098 = vst [vmem:[#allocation71_spill] sm:$0xff] %v13293_v42  ;;  %v9872_v22 = vpop.f32.mrf.mxu0  ;;  %v9948_v59 = vpop.f32.mrf.mxu1 }
 0x259   :  { %v2362_v49 = vadd.f32 %v9872_v22, %v13216_v50 }
 0x25a   :  { %v13296_v19 = vpop.f32.mrf.mxu0  ;;  %v13298_v21 = vpop.f32.mrf.mxu1 }
 0x25b   :  { %v13300_v43 = vadd.f32 %v9936_v56, %v2362_v49 }
 0x25c   :  { %v9951_v20 = vpop.f32.mrf.mxu1  ;;  %v9875_v8 = vpop.f32.mrf.mxu0 }
 0x25d   :  { %17099 = vst [vmem:[#allocation72_spill] sm:$0xff] %v13300_v43  ;;  %v2382_v7 = vadd.f32 %v9875_v8, %v13216_v50 }
 0x25e   :  { %v13303_v34 = vpop.f32.mrf.mxu1  ;;  %v13305_v14 = vpop.f32.mrf.mxu0 }
 0x25f   :  { %v13307_v25 = vadd.f32 %v9939_v10, %v2382_v7 }
 0x260   :  { %v9878_v15 = vpop.f32.mrf.mxu0 }
 0x261   :  { %17100 = vst [vmem:[#allocation30_spill] sm:$0xff] %v13307_v25  ;;  %v2402_v37 = vadd.f32 %v9878_v15, %v13216_v50  ;;  %v9954_v35 = vpop.f32.mrf.mxu1 }
 0x262   :  { %v13310_v53 = vpop.f32.mrf.mxu0 }
 0x263   :  { %v13312_v60 = vpop.f32.mrf.mxu1  ;;  %v13314_v56 = vadd.f32 %v9942_v48, %v2402_v37 }
 0x265   :  { %17101 = vst [vmem:[#allocation13_spill] sm:$0xff] %v13314_v56  ;;  %v9881_v5 = vpop.f32.mrf.mxu0  ;;  %v9957_v52 = vpop.f32.mrf.mxu1 }
 0x266   :  { %v2422_v18 = vadd.f32 %v9881_v5, %v13216_v50 }
 0x267   :  { %v13317_v44 = vpop.f32.mrf.mxu0  ;;  %v13319_v57 = vpop.f32.mrf.mxu1 }
 0x268   :  { %v13321_v10 = vadd.f32 %v9945_v45, %v2422_v18 }
 0x26a   :  { %17102 = vst [vmem:[#allocation16_spill] sm:$0xff] %v13321_v10  ;;  %v9884_v13 = vpop.f32.mrf.mxu0  ;;  %v9960_v29 = vpop.f32.mrf.mxu1 }
 0x26b   :  { %v2442_v17 = vadd.f32 %v9884_v13, %v13216_v50 }
 0x26c   :  { %v13324_v22 = vpop.f32.mrf.mxu0  ;;  %v13326_v49 = vpop.f32.mrf.mxu1 }
 0x26d   :  { %v13328_v48 = vadd.f32 %v9948_v59, %v2442_v17 }
 0x26e   :  { %v9887_v8 = vpop.f32.mrf.mxu0  ;;  %v9963_v15 = vpop.f32.mrf.mxu1 }
 0x26f   :  { %v2462_v7 = vadd.f32 %v9887_v8, %v13216_v50 }
 0x270   :  { %v13331_v37 = vpop.f32.mrf.mxu0  ;;  %v13333_v5 = vpop.f32.mrf.mxu1 }
 0x271   :  { %17103 = vst [vmem:[#allocation19_spill] sm:$0xff] %v13333_v5  ;;  %v13335_v45 = vadd.f32 %v9951_v20, %v2462_v7 }
 0x272   :  { %v9890_v18 = vpop.f32.mrf.mxu0  ;;  %v13338_v54 = vpop.f32.mrf.mxu1 }
 0x273   :  { %v2482_v13 = vadd.f32 %v9890_v18, %v13216_v50  ;;  %17104 = vst [vmem:[#allocation11_spill] sm:$0xff] %v13338_v54 }
 0x274   :  { %v13340_v62 = vpop.f32.mrf.mxu0  ;;  %v13342_v6 = vpop.f32.mrf.mxu1 }
 0x275   :  { %17105 = vst [vmem:[#allocation14_spill] sm:$0xff] %v13342_v6  ;;  %v13344_v59 = vadd.f32 %v9954_v35, %v2482_v13 }
 0x276   :  { %v9893_v17 = vpop.f32.mrf.mxu0 }
 0x277   :  { %v2502_v8 = vadd.f32 %v9893_v17, %v13216_v50  ;;  %v13347_v30 = vpop.f32.mrf.mxu1 }
 0x278   :  { %17106 = vst [vmem:[#allocation22_spill] sm:$0xff] %v13347_v30  ;;  %v13349_v24 = vpop.f32.mrf.mxu0 }
 0x279   :  { %v13351_v20 = vpop.f32.mrf.mxu1  ;;  %v13353_v7 = vadd.f32 %v9957_v52, %v2502_v8 }
 0x27a   :  { %17107 = vst [vmem:[#allocation17_spill] sm:$0xff] %v13351_v20  ;;  %v9896_v18 = vpop.f32.mrf.mxu0 }
 0x27b   :  { %v2522_v41 = vadd.f32 %v9896_v18, %v13216_v50  ;;  %v13356_v33 = vpop.f32.mrf.mxu1 }
 0x27c   :  { %17108 = vst [vmem:[#allocation20_spill] sm:$0xff] %v13356_v33  ;;  %v13358_v11 = vpop.f32.mrf.mxu0 }
 0x27d   :  { %v13360_v35 = vpop.f32.mrf.mxu1  ;;  %v13362_v13 = vadd.f32 %v9960_v29, %v2522_v41 }
 0x27e   :  { %17109 = vst [vmem:[#allocation23_spill] sm:$0xff] %v13360_v35  ;;  %v9899_v17 = vpop.f32.mrf.mxu0 }
 0x27f   :  { %v2542_v55 = vadd.f32 %v9899_v17, %v13216_v50  ;;  %v13365_v16 = vpop.f32.mrf.mxu1 }
 0x280   :  { %17110 = vst [vmem:[#allocation25_spill] sm:$0xff] %v13365_v16  ;;  %v13367_v47 = vpop.f32.mrf.mxu0 }
 0x281   :  { %v13369_v52 = vpop.f32.mrf.mxu1  ;;  %v13371_v8 = vadd.f32 %v9963_v15, %v2542_v55 }
 0x282   :  { %17111 = vst [vmem:[#allocation26_spill] sm:$0xff] %v13369_v52  ;;  %v13373_v18 = vpop.f32.mrf.mxu0 }
 0x283   :  { %17112 = vst [vmem:[#allocation29_spill] sm:$0xff] %v13371_v8 }
 0x284   :  { %v13375_v38 = vpop.f32.mrf.mxu0  ;;  %v13377_v10 = vpop.f32.mrf.mxu1 }
 0x285   :  { %17113 = vst [vmem:[#allocation27_spill] sm:$0xff] %v13377_v10 }
 0x286   :  { %v13379_v56 = vpop.f32.mrf.mxu0  ;;  %v13381_v41 = vpop.f32.mrf.mxu1 }
 0x287   :  { %17114 = vst [vmem:[#allocation31_spill] sm:$0xff] %v13381_v41 }
 0x288   :  { %v13383_v29 = vpop.f32.mrf.mxu0  ;;  %v13385_v17 = vpop.f32.mrf.mxu1 }
 0x289   :  { %17115 = vst [vmem:[#allocation33_spill] sm:$0xff] %v13385_v17 }
 0x28a   :  { %v13387_v16 = vpop.f32.mrf.mxu0  ;;  %v13389_v25 = vpop.f32.mrf.mxu1 }
 0x28b   :  { %17116 = vst [vmem:[#allocation73_spill] sm:$0xff] %v13389_v25 }
 0x28c   :  { %v13391_v55 = vpop.f32.mrf.mxu0  ;;  %v13393_v15 = vpop.f32.mrf.mxu1 }
 0x28d   :  { %17117 = vst [vmem:[#allocation12_spill] sm:$0xff] %v13393_v15 }
 0x28e   :  { %v13395_v52 = vpop.f32.mrf.mxu0  ;;  %v13397_v35 = vpop.f32.mrf.mxu1 }
 0x28f   :  { %17118 = vst [vmem:[#allocation15_spill] sm:$0xff] %v13397_v35 }
 0x290   :  { %v13399_v10 = vpop.f32.mrf.mxu0  ;;  %v13401_v33 = vpop.f32.mrf.mxu1 }
 0x291   :  { %17119 = vst [vmem:[#allocation18_spill] sm:$0xff] %v13399_v10  ;;  %17120 = vst [vmem:[#allocation21_spill] sm:$0xff] %v13401_v33 }
 0x292   :  { %v13403_v41 = vpop.f32.mrf.mxu0  ;;  %v13405_v43 = vpop.f32.mrf.mxu1 }
 0x293   :  { %17121 = vst [vmem:[#allocation24_spill] sm:$0xff] %v13403_v41  ;;  %17122 = vst [vmem:[#allocation28_spill] sm:$0xff] %v13405_v43 }
 0x294   :  { %v13407_v17 = vpop.f32.mrf.mxu0  ;;  %v13409_v20 = vpop.f32.mrf.mxu1 }
 0x295   :  { %17123 = vst [vmem:[#allocation32_spill] sm:$0xff] %v13407_v17  ;;  %17124 = vst [vmem:[#allocation34_spill] sm:$0xff] %v13409_v20 }
 0x296   :  { %v13411_v25 = vpop.f32.mrf.mxu0  ;;  %v13413_v8 = vpop.f32.mrf.mxu1 }
 0x297   :  { %17125 = vst [vmem:[#allocation41_spill] sm:$0xff] %v13411_v25  ;;  %17126 = vst [vmem:[#allocation43_spill] sm:$0xff] %v13413_v8 }
 0x298   :  { %v13415_v15 = vpop.f32.mrf.mxu0  ;;  %v13417_v42 = vpop.f32.mrf.mxu1 }
 0x299   :  { %17127 = vst [vmem:[#allocation42_spill] sm:$0xff] %v13415_v15  ;;  %17128 = vst [vmem:[#allocation35_spill] sm:$0xff] %v13417_v42 }
 0x29a   :  { %v13419_v35 = vpop.f32.mrf.mxu0  ;;  %v13421_v30 = vpop.f32.mrf.mxu1 }
 0x29b   :  { %17129 = vst [vmem:[#allocation45_spill] sm:$0xff] %v13419_v35  ;;  %17130 = vst [vmem:[#allocation44_spill] sm:$0xff] %v13421_v30 }
 0x29c   :  { %v13423_v33 = vpop.f32.mrf.mxu0  ;;  %v10076_v6 = vpop.f32.mrf.mxu1 }
 0x29d   :  { %17131 = vst [vmem:[#allocation47_spill] sm:$0xff] %v13423_v33 }
 0x29e   :  { %v13425_v43 = vpop.f32.mrf.mxu0  ;;  %v13427_v17 = vpop.f32.mrf.mxu1 }
 0x29f   :  { %17132 = vst [vmem:[#allocation49_spill] sm:$0xff] %v13425_v43  ;;  %17133 = vst [vmem:[#allocation46_spill] sm:$0xff] %v13427_v17 }
 0x2a0   :  { %v13429_v20 = vpop.f32.mrf.mxu0  ;;  %v10079_v25 = vpop.f32.mrf.mxu1 }
 0x2a1   :  { %17134 = vst [vmem:[#allocation36_spill] sm:$0xff] %v13429_v20 }
 0x2a2   :  { %v13431_v41 = vpop.f32.mrf.mxu0  ;;  %v13433_v8 = vpop.f32.mrf.mxu1 }
 0x2a3   :  { %17135 = vst [vmem:[#allocation48_spill] sm:$0xff] %v13431_v41  ;;  %17136 = vst [vmem:[#allocation50_spill] sm:$0xff] %v13433_v8 }
 0x2a4   :  { %v13435_v15 = vpop.f32.mrf.mxu0  ;;  %v10082_v42 = vpop.f32.mrf.mxu1 }
 0x2a5   :  { %17137 = vst [vmem:[#allocation51_spill] sm:$0xff] %v13435_v15 }
 0x2a6   :  { %v13437_v35 = vpop.f32.mrf.mxu0  ;;  %v13439_v30 = vpop.f32.mrf.mxu1 }
 0x2a7   :  { %17138 = vst [vmem:[#allocation52_spill] sm:$0xff] %v13437_v35  ;;  %17139 = vst [vmem:[#allocation53_spill] sm:$0xff] %v13439_v30  ;;  %v2232_v30 = vadd.f32 %v13216_v50, %v13223_v28 }
 0x2a8   :  { %v13441_v33 = vpop.f32.mrf.mxu0  ;;  %v10085_v3 = vpop.f32.mrf.mxu1 }
 0x2a9   :  { %17140 = vst [vmem:[#allocation55_spill] sm:$0xff] %v13441_v33 }
 0x2aa   :  { %v10012_v43 = vpop.f32.mrf.mxu0  ;;  %v13443_v10 = vpop.f32.mrf.mxu1 }
 0x2ab   :  { %v3074_v17 = vadd.f32 %v10012_v43, %v13328_v48  ;;  %v2252_v43 = vadd.f32 %v13216_v50, %v13243_v39  ;;  %v2272_v48 = vadd.f32 %v13216_v50, %v13252_v4  ;;  %v2352_v39 = vadd.f32 %v13216_v50, %v13296_v19 }
 0x2ac   :  { %v13446_v20 = vpop.f32.mrf.mxu0  ;;  %v13448_v41 = vpop.f32.mrf.mxu1  ;;  %v2372_v4 = vadd.f32 %v13216_v50, %v13305_v14  ;;  %v2412_v19 = vadd.f32 %v13216_v50, %v13317_v44  ;;  %v2432_v14 = vadd.f32 %v13216_v50, %v13324_v22 }
 0x2ad   :  { %v13450_v8 = vadd.f32 %v10076_v6, %v3074_v17  ;;  %v2292_v17 = vadd.f32 %v13216_v50, %v13272_v32 }
 0x2ae   :  { %v10015_v15 = vpop.f32.mrf.mxu0  ;;  %v13452_v54 = vpop.f32.mrf.mxu1  ;;  %v2737_v44 = vadd.f32 %v13278_v46, %v2372_v4  ;;  %v2761_v46 = vadd.f32 %v13291_v9, %v2412_v19  ;;  %v17154_v19 = vld [vmem:[#allocation41_spill] sm:$0xff] }
 0x2af   :  { %17141 = vst [vmem:[#allocation37_spill] sm:$0xff] %v13450_v8  ;;  %17142 = vst [vmem:[#allocation57_spill] sm:$0xff] %v13452_v54  ;;  %v3088_v35 = vadd.f32 %v10015_v15, %v13335_v45  ;;  %v2312_v45 = vadd.f32 %v13216_v50, %v13281_v26  ;;  %v2332_v8 = vadd.f32 %v13216_v50, %v13289_v0 }
 0x2b0   :  { %v13457_v33 = vpop.f32.mrf.mxu0  ;;  %v13459_v5 = vpop.f32.mrf.mxu1  ;;  %v2392_v26 = vadd.f32 %v13216_v50, %v13310_v53  ;;  %v2677_v0 = vadd.f32 %v13225_v40, %v2272_v48  ;;  %v2472_v40 = vadd.f32 %v13216_v50, %v13340_v62  ;;  %v2492_v53 = vadd.f32 %v13216_v50, %v13349_v24 }
 0x2b1   :  { %v13465_v6 = vadd.f32 %v10079_v25, %v3088_v35  ;;  %v2653_v25 = vadd.f32 %v13207_v23, %v2232_v30  ;;  %v2689_v30 = vadd.f32 %v13240_v63, %v2292_v17  ;;  %v2701_v23 = vadd.f32 %v13249_v2, %v2312_v45  ;;  %v17150_v45 = vld [vmem:[#allocation14_spill] sm:$0xff] }
 0x2b2   :  { %v10018_v15 = vpop.f32.mrf.mxu0  ;;  %v13471_v28 = vpop.f32.mrf.mxu1  ;;  %v2512_v63 = vadd.f32 %v13216_v50, %v13358_v11  ;;  %v2725_v2 = vadd.f32 %v13266_v51, %v2352_v39  ;;  %v2532_v62 = vadd.f32 %v13216_v50, %v13367_v47  ;;  %v2948_v51 = vadd.f32 %v13379_v56, %v13247_v31 }
 0x2b3   :  { %17143 = vst [vmem:[#allocation54_spill] sm:$0xff] %v13465_v6  ;;  %17144 = vst [vmem:[#allocation38_spill] sm:$0xff] %v13471_v28  ;;  %v3102_v54 = vadd.f32 %v10018_v15, %v13344_v59  ;;  %v2665_v6 = vadd.f32 %v13211_v61, %v2252_v43  ;;  %v2452_v61 = vadd.f32 %v13216_v50, %v13331_v37 }
 0x2b4   :  { %v13481_v32 = vpop.f32.mrf.mxu0  ;;  %v13483_v35 = vpop.f32.mrf.mxu1  ;;  %v2927_v11 = vadd.f32 %v13375_v38, %v2653_v25  ;;  %v2962_v38 = vadd.f32 %v13387_v16, %v13256_v58  ;;  %v2955_v31 = vadd.f32 %v13391_v55, %v2677_v0  ;;  %v13538_v9 = vadd.f32 %v13326_v49, %v2512_v63  ;;  %v17147_v58 = vld [vmem:[#allocation18_spill] sm:$0xff]  ;;  %v17149_v49 = vld [vmem:[#allocation24_spill] sm:$0xff]  ;;  %v17153_v0 = vld [vmem:[#allocation71_spill] sm:$0xff] }
 0x2b5   :  { %v13489_v59 = vadd.f32 %v10082_v42, %v3102_v54  ;;  %v2713_v54 = vadd.f32 %v13254_v36, %v2332_v8  ;;  %v2934_v36 = vadd.f32 %v13373_v18, %v13228_v27  ;;  %v2773_v8 = vadd.f32 %v13298_v21, %v2432_v14  ;;  %v17148_v55 = vld [vmem:[#allocation70_spill] sm:$0xff]  ;;  %v17159_v63 = vld [vmem:[#allocation45_spill] sm:$0xff] }
 0x2b6   :  { %v10021_v15 = vpop.f32.mrf.mxu0  ;;  %v13497_v28 = vpop.f32.mrf.mxu1  ;;  %v2941_v47 = vadd.f32 %v13383_v29, %v2665_v6  ;;  %v2785_v50 = vadd.f32 %v13303_v34, %v2452_v61  ;;  %v2797_v27 = vadd.f32 %v13312_v60, %v2472_v40  ;;  %v2976_v34 = vadd.f32 %v13395_v52, %v13274_v12  ;;  %v17145_v60 = vld [vmem:[#allocation19_spill] sm:$0xff]  ;;  %v17151_v25 = vld [vmem:[#allocation22_spill] sm:$0xff]  ;;  %v17152_v52 = vld [vmem:[#allocation32_spill] sm:$0xff] }
 0x2b7   :  { %v3116_v42 = vadd.f32 %v10021_v15, %v13353_v7  ;;  %v2749_v7 = vadd.f32 %v13283_v1, %v2392_v26  ;;  %v13547_v18 = vadd.f32 %v17145_v60, %v2532_v62  ;;  %v2990_v6 = vadd.f32 %v17149_v49, %v17148_v55  ;;  %v17155_v15 = vld [vmem:[#allocation29_spill] sm:$0xff]  ;;  %v17162_v60 = vld [vmem:[#allocation47_spill] sm:$0xff] }
 0x2b8   :  { %v13511_v22 = vpop.f32.mrf.mxu0  ;;  %v13513_v37 = vpop.f32.mrf.mxu1  ;;  %v3225_v39 = vadd.f32 %v17150_v45, %v2927_v11  ;;  %v3249_v12 = vadd.f32 %v17151_v25, %v2948_v51  ;;  %v2983_v26 = vadd.f32 %v17152_v52, %v2701_v23  ;;  %v3004_v14 = vadd.f32 %v17154_v19, %v17153_v0  ;;  %v17156_v61 = vld [vmem:[#allocation17_spill] sm:$0xff]  ;;  %v17166_v45 = vld [vmem:[#allocation36_spill] sm:$0xff] }
 0x2b9   :  { %v13520_v24 = vadd.f32 %v10085_v3, %v3116_v42  ;;  %v2809_v3 = vadd.f32 %v13319_v57, %v2492_v53  ;;  %v2969_v57 = vadd.f32 %v17147_v58, %v2689_v30  ;;  %v3241_v40 = vadd.f32 %v17156_v61, %v2941_v47  ;;  %v17157_v30 = vld [vmem:[#allocation42_spill] sm:$0xff]  ;;  %v17158_v53 = vld [vmem:[#allocation72_spill] sm:$0xff]  ;;  %v17164_v55 = vld [vmem:[#allocation49_spill] sm:$0xff] }
 0x2ba   :  { %v10024_v43 = vpop.f32.mrf.mxu0  ;;  %v13527_v48 = vpop.f32.mrf.mxu1  ;;  %v2997_v42 = vadd.f32 %v17157_v30, %v2713_v54  ;;  %v3018_v62 = vadd.f32 %v17159_v63, %v17158_v53  ;;  %v17163_v58 = vld [vmem:[#allocation30_spill] sm:$0xff]  ;;  %v17165_v47 = vld [vmem:[#allocation25_spill] sm:$0xff]  ;;  %v3025_v25 = vadd.f32 %v17166_v45, %v2737_v44  ;;  %v17168_v0 = vld [vmem:[#allocation48_spill] sm:$0xff] }
 0x2bb   :  { %v3130_v1 = vadd.f32 %v10024_v43, %v13362_v13  ;;  %v17146_v13 = vld [vmem:[#allocation11_spill] sm:$0xff]  ;;  %v17160_v43 = vld [vmem:[#allocation20_spill] sm:$0xff]  ;;  %v3032_v49 = vadd.f32 %v17164_v55, %v17163_v58  ;;  %v17167_v52 = vld [vmem:[#allocation13_spill] sm:$0xff] }
 0x2bc   :  { %v13540_v21 = vpop.f32.mrf.mxu0  ;;  %v13542_v56 = vpop.f32.mrf.mxu1  ;;  %v3233_v29 = vadd.f32 %v17146_v13, %v2934_v36  ;;  %v3265_v51 = vadd.f32 %v17160_v43, %v2962_v38  ;;  %v3011_v13 = vadd.f32 %v17162_v60, %v2725_v2  ;;  %v3046_v19 = vadd.f32 %v17168_v0, %v17167_v52  ;;  %v17170_v2 = vld [vmem:[#allocation27_spill] sm:$0xff]  ;;  %v17175_v60 = vld [vmem:[#allocation52_spill] sm:$0xff]  ;;  %v17177_v52 = vld [vmem:[#allocation73_spill] sm:$0xff] }
 0x2bd   :  { %v13551_v16 = vadd.f32 %v13448_v41, %v3130_v1  ;;  %v17161_v1 = vld [vmem:[#allocation23_spill] sm:$0xff]  ;;  %v13594_v30 = vadd.f32 %v17170_v2, %v2990_v6  ;;  %v13609_v6 = vadd.f32 %v17177_v52, %v2997_v42  ;;  %v17178_v0 = vld [vmem:[#allocation12_spill] sm:$0xff] }
 0x2be   :  { %v10027_v17 = vpop.f32.mrf.mxu0  ;;  %v13557_v4 = vpop.f32.mrf.mxu1  ;;  %v13574_v23 = vadd.f32 %v17161_v1, %v2955_v31  ;;  %v17169_v31 = vld [vmem:[#allocation26_spill] sm:$0xff]  ;;  %v17171_v53 = vld [vmem:[#allocation51_spill] sm:$0xff]  ;;  %v17174_v1 = vld [vmem:[#allocation16_spill] sm:$0xff] }
 0x2bf   :  { %v3144_v41 = vadd.f32 %v10027_v17, %v17155_v15  ;;  %v13580_v17 = vadd.f32 %v17165_v47, %v2976_v34  ;;  %v13591_v61 = vadd.f32 %v17169_v31, %v2969_v57  ;;  %v3039_v34 = vadd.f32 %v17171_v53, %v2749_v7  ;;  %v17172_v43 = vld [vmem:[#allocation31_spill] sm:$0xff]  ;;  %v17180_v31 = vld [vmem:[#allocation21_spill] sm:$0xff]  ;;  %v17181_v42 = vld [vmem:[#allocation28_spill] sm:$0xff] }
 0x2c0   :  { %v13568_v36 = vpop.f32.mrf.mxu0  ;;  %v13570_v11 = vpop.f32.mrf.mxu1  ;;  %v3060_v58 = vadd.f32 %v17175_v60, %v17174_v1  ;;  %v17176_v55 = vld [vmem:[#allocation55_spill] sm:$0xff]  ;;  %v13612_v7 = vadd.f32 %v17178_v0, %v3018_v62  ;;  %v13619_v2 = vadd.f32 %v17180_v31, %v3032_v49  ;;  %v3081_v53 = vadd.f32 %v13457_v33, %v2785_v50  ;;  %v17182_v62 = vld [vmem:[#allocation34_spill] sm:$0xff] }
 0x2c1   :  { %v13583_v54 = vadd.f32 %v13459_v5, %v3144_v41  ;;  %v13598_v5 = vadd.f32 %v17172_v43, %v2983_v26  ;;  %v17173_v41 = vld [vmem:[#allocation33_spill] sm:$0xff]  ;;  %v3053_v47 = vadd.f32 %v17176_v55, %v2761_v46  ;;  %v3067_v46 = vadd.f32 %v13446_v20, %v2773_v8  ;;  %v17184_v55 = vld [vmem:[#allocation35_spill] sm:$0xff]  ;;  %v17186_v0 = vld [vmem:[#allocation46_spill] sm:$0xff] }
 0x2c2   :  { %v10110_v38 = vpop.f32.mrf.mxu0  ;;  %v13588_v15 = vpop.f32.mrf.mxu1  ;;  %v13601_v44 = vadd.f32 %v17173_v41, %v3004_v14  ;;  %v13626_v1 = vadd.f32 %v17181_v42, %v3025_v25  ;;  %v13629_v60 = vadd.f32 %v17182_v62, %v3046_v19  ;;  %v3095_v20 = vadd.f32 %v13481_v32, %v2797_v27  ;;  %v17188_v42 = vld [vmem:[#allocation53_spill] sm:$0xff] }
 0x2c3   :  { %v3574_v63 = vadd.f32 %v10110_v38, %v3233_v29  ;;  %v17179_v38 = vld [vmem:[#allocation15_spill] sm:$0xff]  ;;  %v3109_v33 = vadd.f32 %v13511_v22, %v2809_v3  ;;  %v13640_v25 = vadd.f32 %v17184_v55, %v3060_v58  ;;  %v3123_v32 = vadd.f32 %v13540_v21, %v13538_v9 }
 0x2c4   :  { %v3567_v45 = vpop.f32.mrf.mxu0  ;;  %v13606_v57 = vpop.f32.mrf.mxu1  ;;  %v13616_v14 = vadd.f32 %v17179_v38, %v3011_v13  ;;  %v13654_v58 = vadd.f32 %v17186_v0, %v3067_v46  ;;  %v13669_v46 = vadd.f32 %v17188_v42, %v3095_v20 }
 0x2c5   :  { %v3839_v29 = vadd.f32 %v13483_v35, %v3574_v63  ;;  %v3568_v26 = vadd.f32 %v3567_v45, %v3225_v39  ;;  %v17183_v63 = vld [vmem:[#allocation43_spill] sm:$0xff]  ;;  %v17185_v45 = vld [vmem:[#allocation44_spill] sm:$0xff] }
 0x2c6   :  { %v10113_v43 = vpop.f32.mrf.mxu0  ;;  %v13623_v41 = vpop.f32.mrf.mxu1  ;;  %v13633_v49 = vadd.f32 %v17183_v63, %v3039_v34  ;;  %v13643_v19 = vadd.f32 %v17185_v45, %v3053_v47 }
 0x2c7   :  { %v4023_v35 = vmax.f32 %v3839_v29, 0.0  ;;  %v3833_v39 = vadd.f32 %v13497_v28, %v3568_v26  ;;  %v3586_v13 = vadd.f32 %v10113_v43, %v3249_v12  ;;  %v17187_v29 = vld [vmem:[#allocation50_spill] sm:$0xff] }
 0x2c8   :  { %v3579_v8 = vpop.f32.mrf.mxu0  ;;  %v13637_v50 = vpop.f32.mrf.mxu1  ;;  %v13657_v47 = vadd.f32 %v17187_v29, %v3081_v53  ;;  %v13672_v53 = vadd.f32 %v13443_v10, %v3109_v33  ;;  %v17189_v10 = vld [vmem:[#allocation57_spill] sm:$0xff] }
 0x2c9   :  { %v4069_v52 = vsel %vm93_vm0, %v4023_v35, 0  ;;  %v4022_v28 = vmax.f32 %v3833_v39, 0.0  ;;  %v3851_v12 = vadd.f32 %v13513_v37, %v3586_v13  ;;  %v3580_v34 = vadd.f32 %v3579_v8, %v3241_v40 }
 0x2ca   :  { %v13649_v27 = vand.u32 4294901760, %v4069_v52  ;;  %v10116_v22 = vpop.f32.mrf.mxu0  ;;  %v13651_v3 = vpop.f32.mrf.mxu1  ;;  %v13687_v33 = vadd.f32 %v17189_v10, %v3123_v32 }
 0x2cb   :  { %v4066_v26 = vsel %vm93_vm0, %v4022_v28, 0  ;;  %v4025_v38 = vmax.f32 %v3851_v12, 0.0  ;;  %v3845_v37 = vadd.f32 %v13527_v48, %v3580_v34  ;;  %v3598_v40 = vadd.f32 %v10116_v22, %v3265_v51 }
 0x2cc   :  { %v13662_v31 = vsub.f32 %v4069_v52, %v13649_v27  ;;  %v13664_v9 = vand.u32 4294901760, %v4066_v26  ;;  %v3591_v21 = vpop.f32.mrf.mxu0  ;;  %v13666_v43 = vpop.f32.mrf.mxu1  ;;  %v13695_v52 = vadd.f32 %v13568_v36, %v13547_v18  ;;  %v17191_v36 = vld [vmem:[#allocation63_spill] sm:$0xff] }
 0x2cd   :  { %v4075_v62 = vsel %vm93_vm0, %v4025_v38, 0  ;;  %v4024_v35 = vmax.f32 %v3845_v37, 0.0  ;;  %v3863_v48 = vadd.f32 %v13542_v56, %v3598_v40  ;;  %v3592_v51 = vadd.f32 %v3591_v21, %v13574_v23 }
 0x2ce   :  { %v16568_v39 = vand.u32 4294901760, %v13662_v31  ;;  %v13679_v13 = vsub.f32 %v4066_v26, %v13664_v9  ;;  %v13681_v63 = vand.u32 4294901760, %v4075_v62  ;;  %v10119_v8 = vpop.f32.mrf.mxu0  ;;  %10284 = vmatprep.mubr.f32.mxu1 %v13664_v9  ;;  %v13684_v20 = vpop.f32.mrf.mxu1 }
 0x2cf   :  { %v4072_v55 = vsel %vm93_vm0, %v4024_v35, 0  ;;  %v4027_v56 = vmax.f32 %v3863_v48, 0.0  ;;  %v3857_v23 = vadd.f32 %v13557_v4, %v3592_v51  ;;  %v3610_v45 = vadd.f32 %v10119_v8, %v13580_v17  ;;  %10285 = vmatmul.mubr.f32.vlgmr.msra.gmra.mxu1 %v13649_v27  ;;  %v17190_v4 = vld [vmem:[#allocation61_spill] sm:$0xff]  ;;  %v17193_v48 = vld [vmem:[#allocation64_spill] sm:$0xff] }
 0x2d0   :  { %v4243_v28 = vsub.f32 %v13662_v31, %v16568_v39  ;;  %v13700_v12 = vand.u32 4294901760, %v4072_v55  ;;  %v3603_v34 = vpop.f32.mrf.mxu0  ;;  %v13702_v32 = vpop.f32.mrf.mxu1  ;;  %v16569_v22 = vand.u32 4294901760, %v13679_v13  ;;  %10389 = vmatpush3.msra.mxu1 %v17190_v4  ;;  %v13711_v26 = vsub.f32 %v4075_v62, %v13681_v63 }
 0x2d1   :  { %v4081_v17 = vsel %vm93_vm0, %v4027_v56, 0  ;;  %v4026_v0 = vmax.f32 %v3857_v23, 0.0  ;;  %v3875_v29 = vadd.f32 %v13570_v11, %v3610_v45  ;;  %v3604_v18 = vadd.f32 %v3603_v34, %v13591_v61  ;;  %10390 = vmatprep.subr.mxu1 %v17191_v36 }
 0x2d2   :  { %v13714_v38 = vsub.f32 %v4072_v55, %v13700_v12  ;;  %v13716_v37 = vand.u32 4294901760, %v4081_v17  ;;  %v10122_v40 = vpop.f32.mrf.mxu0  ;;  %10287 = vmatprep.mubr.f32.mxu1 %v13700_v12  ;;  %v4233_v21 = vsub.f32 %v13679_v13, %v16569_v22  ;;  %v13722_v11 = vpop.f32.mrf.mxu1  ;;  %10391 = vmatpush3.msra.mxu1 %v17191_v36  ;;  %v4244_v51 = vand.u32 4294901760, %v4243_v28 }
 0x2d3   :  { %v4078_v61 = vsel %vm93_vm0, %v4026_v0, 0  ;;  %v4029_v42 = vmax.f32 %v3875_v29, 0.0  ;;  %v3869_v62 = vadd.f32 %v13588_v15, %v3604_v18  ;;  %v3622_v35 = vadd.f32 %v10122_v40, %v13594_v30  ;;  %10288 = vmatmul.mubr.f32.gmra.mxu1 %v13681_v63  ;;  %10392 = vmatprep.subr.mxu1 %v17193_v48  ;;  %v17194_v0 = vld [vmem:[#allocation66_spill] sm:$0xff] }
 0x2d4   :  { %17192 = vst [vmem:[#allocation56_spill] sm:$0xff] %v13716_v37  ;;  %v13730_v8 = vand.u32 4294901760, %v4078_v61  ;;  %v3615_v10 = vpop.f32.mrf.mxu0  ;;  %v4234_v55 = vand.u32 4294901760, %v4233_v21  ;;  %v13732_v56 = vpop.f32.mrf.mxu1  ;;  %v16566_v23 = vand.u32 4294901760, %v13714_v38  ;;  %10393 = vmatpush3.msra.mxu1 %v17193_v48  ;;  %v13741_v28 = vsub.f32 %v4081_v17, %v13716_v37 }
 0x2d5   :  { %v4087_v45 = vsel %vm93_vm0, %v4029_v42, 0  ;;  %v4028_v15 = vmax.f32 %v3869_v62, 0.0  ;;  %v3887_v30 = vadd.f32 %v13606_v57, %v3622_v35  ;;  %v3616_v34 = vadd.f32 %v3615_v10, %v13598_v5  ;;  %10394 = vmatprep.subr.mxu1 %v17194_v0 }
 0x2d6   :  { %v13744_v29 = vsub.f32 %v4078_v61, %v13730_v8  ;;  %v10125_v18 = vpop.f32.mrf.mxu0  ;;  %10228 = vmatprep.mubr.f32.mxu0 %v4234_v55  ;;  %10290 = vmatprep.mubr.f32.mxu1 %v13730_v8  ;;  %v4253_v40 = vsub.f32 %v13714_v38, %v16566_v23  ;;  %v16567_v57 = vand.u32 4294901760, %v13711_v26  ;;  %v13751_v21 = vpop.f32.mrf.mxu1  ;;  %v13757_v62 = vand.u32 4294901760, %v4087_v45  ;;  %v17197_v55 = vld [vmem:[#allocation60_spill] sm:$0xff] }
 0x2d7   :  { %v4084_v5 = vsel %vm93_vm0, %v4028_v15, 0  ;;  %v4031_v42 = vmax.f32 %v3887_v30, 0.0  ;;  %v3881_v17 = vadd.f32 %v13623_v41, %v3616_v34  ;;  %v3634_v61 = vadd.f32 %v10125_v18, %v13601_v44  ;;  %10229 = vmatmul.mubr.f32.vlgmr.msra.gmra.mxu0 %v4244_v51  ;;  %10291 = vmatmul.mubr.f32.gmra.mxu1 %v13716_v37  ;;  %v17198_v18 = vld [vmem:[#allocation62_spill] sm:$0xff] }
 0x2d8   :  { %17195 = vst [vmem:[#allocation59_spill] sm:$0xff] %v13757_v62  ;;  %v13759_v35 = vand.u32 4294901760, %v4084_v5  ;;  %v3627_v10 = vpop.f32.mrf.mxu0  ;;  %10333 = vmatpush3.msra.mxu0 %v17197_v55  ;;  %v4254_v23 = vand.u32 4294901760, %v4253_v40  ;;  %v4263_v15 = vsub.f32 %v13711_v26, %v16567_v57  ;;  %v13765_v30 = vpop.f32.mrf.mxu1  ;;  %10395 = vmatpush3.msra.mxu1 %v17194_v0  ;;  %v16570_v39 = vand.u32 4294901760, %v13744_v29 }
 0x2d9   :  { %v4093_v44 = vsel %vm93_vm0, %v4031_v42, 0  ;;  %v4030_v41 = vmax.f32 %v3881_v17, 0.0  ;;  %v3899_v51 = vadd.f32 %v13637_v50, %v3634_v61  ;;  %v3628_v34 = vadd.f32 %v3627_v10, %v13609_v6  ;;  %10334 = vmatprep.subr.mxu0 %v17198_v18  ;;  %10500 = vmatprep.subr.mxu1 %v17190_v4  ;;  %v17199_v50 = vld [vmem:[#allocation38_spill] sm:$0xff] }
 0x2da   :  { %17196 = vst [vmem:[#allocation58_spill] sm:$0xff] %v13759_v35  ;;  %v13774_v40 = vsub.f32 %v4084_v5, %v13759_v35  ;;  %v10128_v55 = vpop.f32.mrf.mxu0  ;;  %10231 = vmatprep.mubr.f32.mxu0 %v4254_v23  ;;  %10293 = vmatprep.mubr.f32.mxu1 %v13759_v35  ;;  %v4264_v57 = vand.u32 4294901760, %v4263_v15  ;;  %v13778_v42 = vpop.f32.mrf.mxu1  ;;  %v13782_v17 = vadd.f32 %v17199_v50, %v13695_v52  ;;  %v13789_v23 = vand.u32 4294901760, %v4093_v44 }
 0x2db   :  { %v4090_v6 = vsel %vm93_vm0, %v4030_v41, 0  ;;  %v4033_v61 = vmax.f32 %v3899_v51, 0.0  ;;  %v3893_v10 = vadd.f32 %v13651_v3, %v3628_v34  ;;  %v3646_v5 = vadd.f32 %v10128_v55, %v13612_v7  ;;  %10294 = vmatmul.mubr.f32.gmra.mxu1 %v13757_v62  ;;  %10335 = vmatpush3.msra.mxu0 %v17198_v18  ;;  %v17202_v3 = vld [vmem:[#allocation40_spill] sm:$0xff] }
 0x2dc   :  { %17200 = vst [vmem:[#allocation19_spill] sm:$0xff] %v13789_v23  ;;  %v13791_v15 = vand.u32 4294901760, %v4090_v6  ;;  %10232 = vmatmul.mubr.f32.gmra.mxu0 %v4264_v57  ;;  %v3639_v22 = vpop.f32.mrf.mxu0  ;;  %v4273_v52 = vsub.f32 %v13744_v29, %v16570_v39  ;;  %v13797_v51 = vpop.f32.mrf.mxu1  ;;  %10336 = vmatprep.subr.mxu0 %v17202_v3  ;;  %v13805_v57 = vsub.f32 %v4087_v45, %v13757_v62  ;;  %v17204_v35 = vand.u32 4294901760, %v13741_v28 }
 0x2dd   :  { %v4099_v7 = vsel %vm93_vm0, %v4033_v61, 0  ;;  %v4032_v34 = vmax.f32 %v3893_v10, 0.0  ;;  %v3911_v18 = vadd.f32 %v13666_v43, %v3646_v5  ;;  %v3640_v55 = vadd.f32 %v3639_v22, %v13616_v14  ;;  %10337 = vmatpush3.msra.mxu0 %v17202_v3  ;;  %v17205_v43 = vld [vmem:[#allocation69_spill] sm:$0xff] }
 0x2de   :  { %17201 = vst [vmem:[#allocation11_spill] sm:$0xff] %v13791_v15  ;;  %v13807_v50 = vand.u32 4294901760, %v4099_v7  ;;  %v10131_v39 = vpop.f32.mrf.mxu0  ;;  %v4274_v41 = vand.u32 4294901760, %v4273_v52  ;;  %10296 = vmatprep.mubr.f32.mxu1 %v13791_v15  ;;  %v4283_v61 = vsub.f32 %v13741_v28, %v17204_v35  ;;  %v13813_v10 = vpop.f32.mrf.mxu1  ;;  %10338 = vmatprep.subr.mxu0 %v17205_v43  ;;  %v13822_v52 = vsub.f32 %v4093_v44, %v13789_v23 }
 0x2df   :  { %v4096_v14 = vsel %vm93_vm0, %v4032_v34, 0  ;;  %v4035_v22 = vmax.f32 %v3911_v18, 0.0  ;;  %v3905_v45 = vadd.f32 %v13684_v20, %v3640_v55  ;;  %v3658_v5 = vadd.f32 %v10131_v39, %v13619_v2  ;;  %10297 = vmatmul.mubr.f32.gmra.mxu1 %v13789_v23  ;;  %10339 = vmatpush3.msra.mxu0 %v17205_v43  ;;  %v17207_v34 = vld [vmem:[#allocation39_spill] sm:$0xff] }
 0x2e0   :  { %17203 = vst [vmem:[#allocation18_spill] sm:$0xff] %v13807_v50  ;;  %v13824_v3 = vand.u32 4294901760, %v4096_v14  ;;  %10234 = vmatprep.mubr.f32.mxu0 %v4274_v41  ;;  %v4284_v35 = vand.u32 4294901760, %v4283_v61  ;;  %v3651_v62 = vpop.f32.mrf.mxu0  ;;  %v16577_v37 = vand.u32 4294901760, %v13774_v40  ;;  %10444 = vmatprep.subr.mxu0 %v17207_v34  ;;  %v13831_v55 = vpop.f32.mrf.mxu1  ;;  %v13834_v44 = vsub.f32 %v4090_v6, %v13791_v15 }
 0x2e1   :  { %v4105_v20 = vsel %vm93_vm0, %v4035_v22, 0  ;;  %v4034_v18 = vmax.f32 %v3905_v45, 0.0  ;;  %v3923_v2 = vadd.f32 %v13702_v32, %v3658_v5  ;;  %v3652_v39 = vadd.f32 %v3651_v62, %v13626_v1 }
 0x2e2   :  { %17206 = vst [vmem:[#allocation70_spill] sm:$0xff] %v13824_v3  ;;  %v13837_v41 = vsub.f32 %v4099_v7, %v13807_v50  ;;  %10235 = vmatmul.mubr.f32.gmra.mxu0 %v4284_v35  ;;  %v10134_v61 = vpop.f32.mrf.mxu0  ;;  %v4293_v43 = vsub.f32 %v13774_v40, %v16577_v37  ;;  %10299 = vmatprep.mubr.f32.mxu1 %v13824_v3  ;;  %v16582_v32 = vand.u32 4294901760, %v13805_v57  ;;  %v13848_v7 = vand.u32 4294901760, %v4105_v20 }
 0x2e3   :  { %v4102_v1 = vsel %vm93_vm0, %v4034_v18, 0  ;;  %v4037_v62 = vmax.f32 %v3923_v2, 0.0  ;;  %v3917_v22 = vadd.f32 %v13722_v11, %v3652_v39  ;;  %v3670_v6 = vadd.f32 %v10134_v61, %v13629_v60  ;;  %10300 = vmatmul.mubr.f32.gmra.mxu1 %v13807_v50  ;;  %v13858_v60 = vpop.f32.mrf.mxu1 }
 0x2e4   :  { %17208 = vst [vmem:[#allocation24_spill] sm:$0xff] %v13848_v7  ;;  %v13850_v45 = vand.u32 4294901760, %v4102_v1  ;;  %v4294_v5 = vand.u32 4294901760, %v4293_v43  ;;  %v4303_v35 = vsub.f32 %v13805_v57, %v16582_v32  ;;  %v3663_v37 = vpop.f32.mrf.mxu0  ;;  %v13861_v39 = vsub.f32 %v4096_v14, %v13824_v3 }
 0x2e5   :  { %v4111_v23 = vsel %vm93_vm0, %v4037_v62, 0  ;;  %v4036_v18 = vmax.f32 %v3917_v22, 0.0  ;;  %v3935_v2 = vadd.f32 %v13732_v56, %v3670_v6  ;;  %v3664_v11 = vadd.f32 %v3663_v37, %v13633_v49 }
 0x2e6   :  { %17209 = vst [vmem:[#allocation14_spill] sm:$0xff] %v13850_v45  ;;  %v13863_v61 = vand.u32 4294901760, %v4111_v23  ;;  %10237 = vmatprep.mubr.f32.mxu0 %v4294_v5  ;;  %v4304_v43 = vand.u32 4294901760, %v4303_v35  ;;  %v10137_v50 = vpop.f32.mrf.mxu0  ;;  %v16583_v32 = vand.u32 4294901760, %v13834_v44  ;;  %10302 = vmatprep.mubr.f32.mxu1 %v13850_v45  ;;  %v13872_v37 = vsub.f32 %v4105_v20, %v13848_v7 }
 0x2e7   :  { %v4108_v62 = vsel %vm93_vm0, %v4036_v18, 0  ;;  %v4039_v22 = vmax.f32 %v3935_v2, 0.0  ;;  %v3929_v56 = vadd.f32 %v13751_v21, %v3664_v11  ;;  %v3682_v49 = vadd.f32 %v10137_v50, %v13640_v25  ;;  %10303 = vmatmul.mubr.f32.gmra.mxu1 %v13848_v7  ;;  %v13883_v2 = vpop.f32.mrf.mxu1 }
 0x2e8   :  { %17210 = vst [vmem:[#allocation22_spill] sm:$0xff] %v13863_v61  ;;  %v13874_v14 = vand.u32 4294901760, %v4108_v62  ;;  %10238 = vmatmul.mubr.f32.gmra.mxu0 %v4304_v43  ;;  %v4313_v6 = vsub.f32 %v13834_v44, %v16583_v32  ;;  %v16586_v5 = vand.u32 4294901760, %v13822_v52  ;;  %v3675_v35 = vpop.f32.mrf.mxu0  ;;  %v13886_v20 = vsub.f32 %v4102_v1, %v13850_v45 }
 0x2e9   :  { %v4117_v18 = vsel %vm93_vm0, %v4039_v22, 0  ;;  %v4038_v21 = vmax.f32 %v3929_v56, 0.0  ;;  %v3947_v25 = vadd.f32 %v13765_v30, %v3682_v49  ;;  %v3676_v50 = vadd.f32 %v3675_v35, %v13643_v19  ;;  %v17212_v56 = vld [vmem:[#allocation37_spill] sm:$0xff] }
 0x2ea   :  { %17211 = vst [vmem:[#allocation32_spill] sm:$0xff] %v13874_v14  ;;  %v13889_v11 = vsub.f32 %v4111_v23, %v13863_v61  ;;  %v4314_v43 = vand.u32 4294901760, %v4313_v6  ;;  %v4323_v32 = vsub.f32 %v13822_v52, %v16586_v5  ;;  %v10140_v7 = vpop.f32.mrf.mxu0  ;;  %10305 = vmatprep.mubr.f32.mxu1 %v13874_v14  ;;  %v13899_v1 = vand.u32 4294901760, %v4117_v18 }
 0x2eb   :  { %v4114_v30 = vsel %vm93_vm0, %v4038_v21, 0  ;;  %v4041_v22 = vmax.f32 %v3947_v25, 0.0  ;;  %v3941_v19 = vadd.f32 %v13778_v42, %v3676_v50  ;;  %v3694_v49 = vadd.f32 %v10140_v7, %v17212_v56  ;;  %10306 = vmatmul.mubr.f32.gmra.mxu1 %v13863_v61  ;;  %v13907_v25 = vpop.f32.mrf.mxu1  ;;  %v17214_v56 = vld [vmem:[#allocation54_spill] sm:$0xff] }
 0x2ec   :  { %17213 = vst [vmem:[#allocation71_spill] sm:$0xff] %v13899_v1  ;;  %v13901_v23 = vand.u32 4294901760, %v4114_v30  ;;  %10240 = vmatprep.mubr.f32.mxu0 %v4314_v43  ;;  %v4324_v6 = vand.u32 4294901760, %v4323_v32  ;;  %v16591_v35 = vand.u32 4294901760, %v13861_v39  ;;  %v3687_v5 = vpop.f32.mrf.mxu0  ;;  %v16596_v42 = vand.u32 4294901760, %v13837_v41 }
 0x2ed   :  { %v4123_v45 = vsel %vm93_vm0, %v4041_v22, 0  ;;  %v4040_v3 = vmax.f32 %v3941_v19, 0.0  ;;  %v3959_v21 = vadd.f32 %v13797_v51, %v3694_v49  ;;  %v13910_v7 = vsub.f32 %v4108_v62, %v13874_v14  ;;  %v10213_v14 = vpop.f32.mrf.mxu1 }
 0x2ee   :  { %10241 = vmatmul.mubr.f32.gmra.mxu0 %v4324_v6  ;;  %v4333_v32 = vsub.f32 %v13861_v39, %v16591_v35  ;;  %v3688_v50 = vadd.f32 %v3687_v5, %v13654_v58  ;;  %v10143_v43 = vpop.f32.mrf.mxu0  ;;  %10308 = vmatprep.mubr.f32.mxu1 %v13901_v23  ;;  %v4343_v19 = vsub.f32 %v13837_v41, %v16596_v42  ;;  %v13923_v49 = vand.u32 4294901760, %v4123_v45 }
 0x2ef   :  { %v4120_v22 = vsel %vm93_vm0, %v4040_v3, 0  ;;  %v4043_v51 = vmax.f32 %v3959_v21, 0.0  ;;  %v3706_v62 = vadd.f32 %v10143_v43, %v17214_v56  ;;  %10309 = vmatmul.mubr.f32.gmra.mxu1 %v13899_v1  ;;  %v13929_v61 = vsub.f32 %v4117_v18, %v13899_v1 }
 0x2f0   :  { %17215 = vst [vmem:[#allocation41_spill] sm:$0xff] %v13923_v49  ;;  %v13925_v6 = vand.u32 4294901760, %v4120_v22  ;;  %v4334_v35 = vand.u32 4294901760, %v4333_v32  ;;  %v3953_v58 = vadd.f32 %v13813_v10, %v3688_v50  ;;  %v3699_v5 = vpop.f32.mrf.mxu0  ;;  %v4344_v3 = vand.u32 4294901760, %v4343_v19 }
 0x2f1   :  { %v3971_v21 = vadd.f32 %v13831_v55, %v3706_v62  ;;  %v16600_v42 = vand.u32 4294901760, %v13886_v20  ;;  %v13934_v43 = vsub.f32 %v4114_v30, %v13901_v23  ;;  %v4129_v56 = vsel %vm93_vm0, %v4043_v51, 0 }
 0x2f2   :  { %17216 = vst [vmem:[#allocation29_spill] sm:$0xff] %v13925_v6  ;;  %10243 = vmatprep.mubr.f32.mxu0 %v4334_v35  ;;  %v4042_v15 = vmax.f32 %v3953_v58, 0.0  ;;  %v16599_v32 = vand.u32 4294901760, %v13872_v37  ;;  %v10146_v10 = vpop.f32.mrf.mxu0  ;;  %10311 = vmatprep.mubr.f32.mxu1 %v13925_v6  ;;  %v3700_v50 = vadd.f32 %v3699_v5, %v13657_v47  ;;  %v13946_v35 = vsub.f32 %v4123_v45, %v13923_v49 }
 0x2f3   :  { %10244 = vmatmul.mubr.f32.gmra.mxu0 %v4344_v3  ;;  %v4045_v18 = vmax.f32 %v3971_v21, 0.0  ;;  %v4353_v55 = vsub.f32 %v13886_v20, %v16600_v42  ;;  %v3718_v30 = vadd.f32 %v10146_v10, %v13489_v59  ;;  %10312 = vmatmul.mubr.f32.gmra.mxu1 %v13923_v49  ;;  %v16605_v62 = vand.u32 4294901760, %v13910_v7  ;;  %v3988_v21 = vpop.f32.mrf.mxu1 }
 0x2f4   :  { %v4126_v51 = vsel %vm93_vm0, %v4042_v15, 0  ;;  %v4363_v19 = vsub.f32 %v13872_v37, %v16599_v32  ;;  %v3711_v58 = vpop.f32.mrf.mxu0  ;;  %v3965_v59 = vadd.f32 %v13858_v60, %v3700_v50  ;;  %v13957_v10 = vand.u32 4294901760, %v4129_v56 }
 0x2f5   :  { %v13953_v3 = vand.u32 4294901760, %v4126_v51  ;;  %v4135_v47 = vsel %vm93_vm0, %v4045_v18, 0  ;;  %v4354_v5 = vand.u32 4294901760, %v4353_v55  ;;  %v3983_v15 = vadd.f32 %v13883_v2, %v3718_v30 }
 0x2f6   :  { %17217 = vst [vmem:[#allocation17_spill] sm:$0xff] %v13957_v10  ;;  %v4364_v45 = vand.u32 4294901760, %v4363_v19  ;;  %v4373_v32 = vsub.f32 %v13910_v7, %v16605_v62  ;;  %v10149_v42 = vpop.f32.mrf.mxu0  ;;  %v13964_v49 = vsub.f32 %v4120_v22, %v13925_v6  ;;  %v4044_v1 = vmax.f32 %v3965_v59, 0.0 }
 0x2f7   :  { %10246 = vmatprep.mubr.f32.mxu0 %v4354_v5  ;;  %v16610_v18 = vand.u32 4294901760, %v13889_v11  ;;  %v3712_v60 = vadd.f32 %v3711_v58, %v13669_v46  ;;  %10314 = vmatprep.mubr.f32.mxu1 %v13953_v3  ;;  %v13969_v55 = vand.u32 4294901760, %v4135_v47  ;;  %v4047_v2 = vmax.f32 %v3983_v15, 0.0  ;;  %v10216_v5 = vpop.f32.mrf.mxu1 }
 0x2f8   :  { %10247 = vmatmul.mubr.f32.gmra.mxu0 %v4364_v45  ;;  %v4374_v50 = vand.u32 4294901760, %v4373_v32  ;;  %v3730_v30 = vadd.f32 %v10149_v42, %v13520_v24  ;;  %10315 = vmatmul.mubr.f32.gmra.mxu1 %v13957_v10  ;;  %v3723_v19 = vpop.f32.mrf.mxu0  ;;  %v4132_v22 = vsel %vm93_vm0, %v4044_v1, 0  ;;  %v16608_v58 = vand.u32 4294901760, %v13934_v43 }
 0x2f9   :  { %17218 = vst [vmem:[#allocation42_spill] sm:$0xff] %v13969_v55  ;;  %v4383_v59 = vsub.f32 %v13889_v11, %v16610_v18  ;;  %v3977_v46 = vadd.f32 %v13907_v25, %v3712_v60  ;;  %v13980_v45 = vsub.f32 %v4129_v56, %v13957_v10  ;;  %v13982_v32 = vand.u32 4294901760, %v4132_v22 }
 0x2fa   :  { %10249 = vmatprep.mubr.f32.mxu0 %v4374_v50  ;;  %v3995_v24 = vadd.f32 %v10213_v14, %v3730_v30  ;;  %v16609_v42 = vand.u32 4294901760, %v13929_v61  ;;  %v10152_v15 = vpop.f32.mrf.mxu0  ;;  %v4141_v1 = vsel %vm93_vm0, %v4047_v2, 0  ;;  %v4393_v25 = vsub.f32 %v13934_v43, %v16608_v58 }
 0x2fb   :  { %v4384_v62 = vand.u32 4294901760, %v4383_v59  ;;  %v4046_v6 = vmax.f32 %v3977_v46, 0.0  ;;  %v13990_v60 = vsub.f32 %v4126_v51, %v13953_v3  ;;  %v3724_v14 = vadd.f32 %v3723_v19, %v13672_v53  ;;  %10317 = vmatprep.mubr.f32.mxu1 %v13982_v32  ;;  %v4000_v46 = vpop.f32.mrf.mxu1 }
 0x2fc   :  { %v4049_v56 = vmax.f32 %v3995_v24, 0.0  ;;  %v4403_v50 = vsub.f32 %v13929_v61, %v16609_v42  ;;  %v3735_v30 = vpop.f32.mrf.mxu0  ;;  %v13998_v2 = vsub.f32 %v4135_v47, %v13969_v55  ;;  %v4394_v58 = vand.u32 4294901760, %v4393_v25  ;;  %10318 = vmatmul.mubr.f32.gmra.mxu1 %v13969_v55 }
 0x2fd   :  { %10250 = vmatmul.mubr.f32.gmra.mxu0 %v4384_v62  ;;  %v4138_v59 = vsel %vm93_vm0, %v4046_v6, 0  ;;  %v3742_v51 = vadd.f32 %v10152_v15, %v13551_v16  ;;  %v14003_v24 = vand.u32 4294901760, %v4141_v1  ;;  %v3989_v19 = vadd.f32 %v3988_v21, %v3724_v14  ;;  %v10219_v21 = vpop.f32.mrf.mxu1 }
 0x2fe   :  { %v14005_v42 = vand.u32 4294901760, %v4138_v59  ;;  %v4147_v53 = vsel %vm93_vm0, %v4049_v56, 0  ;;  %v10155_v18 = vpop.f32.mrf.mxu0  ;;  %10252 = vmatprep.mubr.f32.mxu0 %v4394_v58  ;;  %v4404_v47 = vand.u32 4294901760, %v4403_v50  ;;  %v16615_v62 = vand.u32 4294901760, %v13964_v49 }
 0x2ff   :  { %v4007_v10 = vadd.f32 %v10216_v5, %v3742_v51  ;;  %v16616_v6 = vand.u32 4294901760, %v13946_v35  ;;  %v14011_v25 = vsub.f32 %v4132_v22, %v13982_v32  ;;  %v4048_v16 = vmax.f32 %v3989_v19, 0.0 }
 0x300   :  { %v3736_v15 = vadd.f32 %v3735_v30, %v13687_v33  ;;  %v3754_v55 = vadd.f32 %v10155_v18, %v13583_v54  ;;  %10320 = vmatprep.mubr.f32.mxu1 %v14005_v42  ;;  %v14016_v56 = vand.u32 4294901760, %v4147_v53  ;;  %v4413_v5 = vsub.f32 %v13964_v49, %v16615_v62  ;;  %v3747_v14 = vpop.f32.mrf.mxu0 }
 0x301   :  { %10253 = vmatmul.mubr.f32.gmra.mxu0 %v4404_v47  ;;  %v4051_v58 = vmax.f32 %v4007_v10, 0.0  ;;  %v4423_v22 = vsub.f32 %v13946_v35, %v16616_v6  ;;  %10321 = vmatmul.mubr.f32.gmra.mxu1 %v14003_v24  ;;  %v4144_v33 = vsel %vm93_vm0, %v4048_v16, 0  ;;  %v16617_v50 = vand.u32 4294901760, %v13990_v60 }
 0x302   :  { %v4001_v54 = vadd.f32 %v4000_v46, %v3736_v15  ;;  %v4019_v18 = vadd.f32 %v10219_v21, %v3754_v55  ;;  %v14028_v30 = vsub.f32 %v4138_v59, %v14005_v42  ;;  %v14030_v10 = vand.u32 4294901760, %v4144_v33 }
 0x303   :  { %v4153_v51 = vsel %vm93_vm0, %v4051_v58, 0  ;;  %v4414_v19 = vand.u32 4294901760, %v4413_v5  ;;  %v4424_v47 = vand.u32 4294901760, %v4423_v22  ;;  %v4433_v16 = vsub.f32 %v13990_v60, %v16617_v50  ;;  %v4012_v58 = vpop.f32.mrf.mxu1 }
 0x304   :  { %v4050_v62 = vmax.f32 %v4001_v54, 0.0  ;;  %v4053_v6 = vmax.f32 %v4019_v18, 0.0  ;;  %v14037_v55 = vsub.f32 %v4141_v1, %v14003_v24  ;;  %v16620_v46 = vand.u32 4294901760, %v13980_v45  ;;  %10323 = vmatprep.mubr.f32.mxu1 %v14030_v10 }
 0x305   :  { %10255 = vmatprep.mubr.f32.mxu0 %v4414_v19  ;;  %v3748_v59 = vadd.f32 %v3747_v14, %v13782_v17  ;;  %v16618_v15 = vand.u32 4294901760, %v14011_v25  ;;  %v14044_v21 = vsub.f32 %v4147_v53, %v14016_v56  ;;  %v14046_v5 = vand.u32 4294901760, %v4153_v51  ;;  %10324 = vmatmul.mubr.f32.gmra.mxu1 %v14016_v56 }
 0x306   :  { %10256 = vmatmul.mubr.f32.gmra.mxu0 %v4424_v47  ;;  %v4150_v22 = vsel %vm93_vm0, %v4050_v62, 0  ;;  %v4434_v1 = vand.u32 4294901760, %v4433_v16  ;;  %v14051_v54 = vsub.f32 %v4144_v33, %v14030_v10  ;;  %v4443_v18 = vsub.f32 %v13980_v45, %v16620_v46 }
 0x307   :  { %v14053_v17 = vand.u32 4294901760, %v4150_v22  ;;  %v4013_v53 = vadd.f32 %v4012_v58, %v3748_v59  ;;  %v4159_v14 = vsel %vm93_vm0, %v4053_v6, 0  ;;  %v4453_v62 = vsub.f32 %v14011_v25, %v16618_v15 }
 0x308   :  { %10258 = vmatprep.mubr.f32.mxu0 %v4434_v1  ;;  %v16619_v19 = vand.u32 4294901760, %v13998_v2  ;;  %v16621_v47 = vand.u32 4294901760, %v14028_v30  ;;  %v4444_v16 = vand.u32 4294901760, %v4443_v18  ;;  %v14081_v15 = vand.u32 4294901760, %v4159_v14 }
 0x309   :  { %17219 = vst [vmem:[#allocation72_spill] sm:$0xff] %v14053_v17  ;;  %v14065_v33 = vsub.f32 %v4150_v22, %v14053_v17  ;;  %v4052_v50 = vmax.f32 %v4013_v53, 0.0  ;;  %10326 = vmatprep.mubr.f32.mxu1 %v14053_v17  ;;  %v4454_v58 = vand.u32 4294901760, %v4453_v62  ;;  %v14077_v22 = vsub.f32 %v4153_v51, %v14046_v5 }
 0x30a   :  { %v4463_v6 = vsub.f32 %v13998_v2, %v16619_v19  ;;  %v4473_v1 = vsub.f32 %v14028_v30, %v16621_v47  ;;  %10327 = vmatmul.mubr.f32.gmra.mxu1 %v14046_v5  ;;  %10259 = vmatmul.mubr.f32.gmra.mxu0 %v4444_v16  ;;  %v16624_v53 = vand.u32 4294901760, %v14051_v54  ;;  %17220 = vst [vmem:[#allocation45_spill] sm:$0xff] %v14081_v15  ;;  %v17221_v47 = vand.u32 4294901760, %v14037_v55 }
 0x30b   :  { %v4156_v18 = vsel %vm93_vm0, %v4052_v50, 0  ;;  %10261 = vmatprep.mubr.f32.mxu0 %v4454_v58  ;;  %v16625_v46 = vand.u32 4294901760, %v14065_v33  ;;  %v16626_v50 = vand.u32 4294901760, %v14044_v21 }
 0x30c   :  { %v14083_v62 = vand.u32 4294901760, %v4156_v18  ;;  %v4474_v19 = vand.u32 4294901760, %v4473_v1  ;;  %v4464_v59 = vand.u32 4294901760, %v4463_v6  ;;  %v4483_v17 = vsub.f32 %v14037_v55, %v17221_v47 }
 0x30d   :  { %v4493_v51 = vsub.f32 %v14051_v54, %v16624_v53  ;;  %v17222_v6 = vand.u32 4294901760, %v13679_v13  ;;  %v4513_v47 = vsub.f32 %v14065_v33, %v16625_v46  ;;  %v14105_v53 = vsub.f32 %v4159_v14, %v14081_v15 }
 0x30e   :  { %v14094_v16 = vsub.f32 %v4156_v18, %v14083_v62  ;;  %10329 = vmatprep.mubr.f32.mxu1 %v14083_v62  ;;  %10262 = vmatmul.mubr.f32.gmra.mxu0 %v4464_v59  ;;  %v4484_v18 = vand.u32 4294901760, %v4483_v17  ;;  %v4503_v59 = vsub.f32 %v14044_v21, %v16626_v50  ;;  %v17224_v46 = vand.u32 4294901760, %v13714_v38 }
 0x30f   :  { %10330 = vmatmul.mubr.f32.gmra.mxu1 %v14081_v15  ;;  %10264 = vmatprep.mubr.f32.mxu0 %v4474_v19  ;;  %v4494_v58 = vand.u32 4294901760, %v4493_v51  ;;  %v4522_v19 = vand.u32 4294901760, %v14077_v22  ;;  %v17223_v51 = vand.u32 4294901760, %v13662_v31  ;;  %v4542_v15 = vand.u32 4294901760, %v14105_v53 }
 0x310   :  { %10396 = vmatprep.mubr.f32.mxu1 %v17222_v6  ;;  %v4532_v1 = vand.u32 4294901760, %v14094_v16  ;;  %v4514_v6 = vand.u32 4294901760, %v4513_v47  ;;  %v4504_v17 = vand.u32 4294901760, %v4503_v59  ;;  %v17226_v47 = vand.u32 4294901760, %v13744_v29 }
 0x311   :  { %v4523_v50 = vsub.f32 %v14077_v22, %v4522_v19  ;;  %v4543_v59 = vsub.f32 %v14105_v53, %v4542_v15 }
 0x312   :  { %10265 = vmatmul.mubr.f32.gmra.mxu0 %v4484_v18  ;;  %v4533_v14 = vsub.f32 %v14094_v16, %v4532_v1 }
 0x313   :  { %10397 = vmatmul.mubr.f32.vlgmr.msra.gmra.mxu1 %v17223_v51  ;;  %10267 = vmatprep.mubr.f32.mxu0 %v4494_v58  ;;  %v17225_v58 = vand.u32 4294901760, %v13711_v26  ;;  %v4524_v18 = vand.u32 4294901760, %v4523_v50  ;;  %v17228_v51 = vand.u32 4294901760, %v13774_v40  ;;  %v17229_v50 = vand.u32 4294901760, %v13805_v57 }
 0x314   :  { %10399 = vmatprep.mubr.f32.mxu1 %v17224_v46  ;;  %10501 = vmatpush3.msra.mxu1 %v17190_v4  ;;  %v4534_v46 = vand.u32 4294901760, %v4533_v14  ;;  %v17227_v4 = vand.u32 4294901760, %v13741_v28  ;;  %v17231_v14 = vand.u32 4294901760, %v13822_v52 }
 0x315   :  { %10502 = vmatprep.subr.mxu1 %v17191_v36 }
 0x316   :  { %10268 = vmatmul.mubr.f32.gmra.mxu0 %v4504_v17  ;;  %10503 = vmatpush3.msra.mxu1 %v17191_v36  ;;  %v17230_v36 = vand.u32 4294901760, %v13834_v44  ;;  %v17233_v17 = vld [vmem:[#allocation65_spill] sm:$0xff] }
 0x317   :  { %10400 = vmatmul.mubr.f32.gmra.mxu1 %v17225_v58  ;;  %10270 = vmatprep.mubr.f32.mxu0 %v4514_v6  ;;  %v4544_v6 = vand.u32 4294901760, %v4543_v59  ;;  %v17243_v58 = vand.u32 4294901760, %v13964_v49 }
 0x318   :  { %10402 = vmatprep.mubr.f32.mxu1 %v17226_v47  ;;  %10504 = vmatprep.subr.mxu1 %v17193_v48  ;;  %v6052_v47 = vld [vmem:[%s16355_s1 + $0x48] sm:$0xff] }
 0x319   :  { %10505 = vmatpush3.msra.mxu1 %v17193_v48  ;;  %v17232_v48 = vand.u32 4294901760, %v13861_v39 }
 0x31a   :  { %10271 = vmatmul.mubr.f32.gmra.mxu0 %v4524_v18  ;;  %10506 = vmatprep.subr.mxu1 %v17194_v0  ;;  %v17271_v18 = vld [vmem:[#allocation45_spill] sm:$0xff] }
 0x31b   :  { %10403 = vmatmul.mubr.f32.gmra.mxu1 %v17227_v4  ;;  %10273 = vmatprep.mubr.f32.mxu0 %v4534_v46  ;;  %v17270_v46 = vld [vmem:[#allocation72_spill] sm:$0xff] }
 0x31c   :  { %10405 = vmatprep.mubr.f32.mxu1 %v17228_v51  ;;  %10507 = vmatpush3.msra.mxu1 %v17194_v0  ;;  %v17237_v0 = vand.u32 4294901760, %v13872_v37 }
 0x31e   :  { %10274 = vmatmul.mubr.f32.gmra.mxu0 %v4544_v6 }
 0x31f   :  { %10406 = vmatmul.mubr.f32.gmra.mxu1 %v17229_v50  ;;  %10340 = vmatprep.mubr.f32.mxu0 %v13679_v13  ;;  %v17234_v13 = vand.u32 4294901760, %v13837_v41  ;;  %v14328_v50 = vld [vmem:[%s16361_s7] ss:$0 sm:$0xff] }
 0x320   :  { %10408 = vmatprep.mubr.f32.mxu1 %v17230_v36 }
 0x322   :  { %10341 = vmatmul.mubr.f32.vlgmr.msra.gmra.mxu0 %v13662_v31  ;;  %v17235_v31 = vand.u32 4294901760, %v13886_v20 }
 0x323   :  { %10409 = vmatmul.mubr.f32.gmra.mxu1 %v17231_v14  ;;  %10343 = vmatprep.mubr.f32.mxu0 %v13714_v38  ;;  %v17236_v38 = vld [vmem:[#allocation67_spill] sm:$0xff] }
 0x324   :  { %10445 = vmatpush3.msra.mxu0 %v17207_v34  ;;  %10411 = vmatprep.mubr.f32.mxu1 %v17232_v48  ;;  %v17239_v34 = vld [vmem:[#allocation68_spill] sm:$0xff] }
 0x325   :  { %10446 = vmatprep.subr.mxu0 %v17233_v17 }
 0x326   :  { %10447 = vmatpush3.msra.mxu0 %v17233_v17 }
 0x327   :  { %10344 = vmatmul.mubr.f32.gmra.mxu0 %v13711_v26  ;;  %10412 = vmatmul.mubr.f32.gmra.mxu1 %v17234_v13  ;;  %v17238_v26 = vand.u32 4294901760, %v13910_v7  ;;  %v6056_v13 = vld [vmem:[%s16355_s1 + $0x68] sm:$0xff] }
 0x328   :  { %10346 = vmatprep.mubr.f32.mxu0 %v13744_v29  ;;  %10414 = vmatprep.mubr.f32.mxu1 %v17235_v31  ;;  %v17240_v29 = vand.u32 4294901760, %v13889_v11 }
 0x329   :  { %10448 = vmatprep.subr.mxu0 %v17236_v38 }
 0x32a   :  { %10449 = vmatpush3.msra.mxu0 %v17236_v38 }
 0x32b   :  { %10347 = vmatmul.mubr.f32.gmra.mxu0 %v13741_v28  ;;  %10415 = vmatmul.mubr.f32.gmra.mxu1 %v17237_v0  ;;  %v17241_v28 = vand.u32 4294901760, %v13934_v43 }
 0x32c   :  { %10349 = vmatprep.mubr.f32.mxu0 %v13774_v40  ;;  %10417 = vmatprep.mubr.f32.mxu1 %v17238_v26  ;;  %v17242_v40 = vand.u32 4294901760, %v13929_v61 }
 0x32d   :  { %10450 = vmatprep.subr.mxu0 %v17239_v34 }
 0x32e   :  { %10451 = vmatpush3.msra.mxu0 %v17239_v34  ;;  %v6057_v34 = vld [vmem:[%s16355_s1 + $0x70] sm:$0xff] }
 0x32f   :  { %10350 = vmatmul.mubr.f32.gmra.mxu0 %v13805_v57  ;;  %10418 = vmatmul.mubr.f32.gmra.mxu1 %v17240_v29  ;;  %v17244_v57 = vand.u32 4294901760, %v13946_v35 }
 0x330   :  { %10352 = vmatprep.mubr.f32.mxu0 %v13834_v44  ;;  %10420 = vmatprep.mubr.f32.mxu1 %v17241_v28  ;;  %v17245_v44 = vand.u32 4294901760, %v13990_v60 }
 0x333   :  { %10353 = vmatmul.mubr.f32.gmra.mxu0 %v13822_v52  ;;  %10421 = vmatmul.mubr.f32.gmra.mxu1 %v17242_v40  ;;  %v17246_v52 = vand.u32 4294901760, %v13980_v45  ;;  %v6058_v40 = vld [vmem:[%s16355_s1 + $0x78] sm:$0xff] }
 0x334   :  { %10355 = vmatprep.mubr.f32.mxu0 %v13861_v39  ;;  %10423 = vmatprep.mubr.f32.mxu1 %v17243_v58  ;;  %v17247_v39 = vand.u32 4294901760, %v14011_v25 }
 0x337   :  { %10356 = vmatmul.mubr.f32.gmra.mxu0 %v13837_v41  ;;  %10424 = vmatmul.mubr.f32.gmra.mxu1 %v17244_v57  ;;  %v17248_v41 = vand.u32 4294901760, %v13998_v2 }
 0x338   :  { %10358 = vmatprep.mubr.f32.mxu0 %v13886_v20  ;;  %10426 = vmatprep.mubr.f32.mxu1 %v17245_v44  ;;  %v17249_v20 = vand.u32 4294901760, %v14028_v30 }
 0x33b   :  { %10359 = vmatmul.mubr.f32.gmra.mxu0 %v13872_v37  ;;  %10427 = vmatmul.mubr.f32.gmra.mxu1 %v17246_v52  ;;  %v17250_v37 = vand.u32 4294901760, %v14037_v55 }
 0x33c   :  { %10361 = vmatprep.mubr.f32.mxu0 %v13910_v7  ;;  %10429 = vmatprep.mubr.f32.mxu1 %v17247_v39  ;;  %v17251_v7 = vand.u32 4294901760, %v14051_v54 }
 0x33f   :  { %10362 = vmatmul.mubr.f32.gmra.mxu0 %v13889_v11  ;;  %10430 = vmatmul.mubr.f32.gmra.mxu1 %v17248_v41  ;;  %v17252_v11 = vand.u32 4294901760, %v14044_v21 }
 0x340   :  { %10364 = vmatprep.mubr.f32.mxu0 %v13934_v43  ;;  %10432 = vmatprep.mubr.f32.mxu1 %v17249_v20  ;;  %v17253_v43 = vand.u32 4294901760, %v14065_v33 }
 0x343   :  { %10365 = vmatmul.mubr.f32.gmra.mxu0 %v13929_v61  ;;  %10433 = vmatmul.mubr.f32.gmra.mxu1 %v17250_v37  ;;  %v17254_v61 = vld [vmem:[#allocation56_spill] sm:$0xff]  ;;  %v6059_v37 = vld [vmem:[%s16355_s1 + $0x80] sm:$0xff] }
 0x344   :  { %10367 = vmatprep.mubr.f32.mxu0 %v13964_v49  ;;  %10435 = vmatprep.mubr.f32.mxu1 %v17251_v7  ;;  %v17255_v49 = vld [vmem:[#allocation58_spill] sm:$0xff] }
 0x347   :  { %10368 = vmatmul.mubr.f32.gmra.mxu0 %v13946_v35  ;;  %10436 = vmatmul.mubr.f32.gmra.mxu1 %v17252_v11  ;;  %v17256_v35 = vld [vmem:[#allocation59_spill] sm:$0xff] }
 0x348   :  { %10370 = vmatprep.mubr.f32.mxu0 %v13990_v60  ;;  %10438 = vmatprep.mubr.f32.mxu1 %v17253_v43  ;;  %v17258_v60 = vld [vmem:[#allocation19_spill] sm:$0xff] }
 0x34b   :  { %10371 = vmatmul.mubr.f32.gmra.mxu0 %v13980_v45  ;;  %10439 = vmatmul.mubr.f32.gmra.mxu1 %v4522_v19  ;;  %v17257_v45 = vld [vmem:[#allocation11_spill] sm:$0xff]  ;;  %v6050_v19 = vld [vmem:[%s16355_s1 + $0x38] sm:$0xff] }
 0x34c   :  { %10373 = vmatprep.mubr.f32.mxu0 %v14011_v25  ;;  %10441 = vmatprep.mubr.f32.mxu1 %v4532_v1  ;;  %v17260_v25 = vld [vmem:[#allocation18_spill] sm:$0xff] }
 0x34d   :  { %v17269_v1 = vld [vmem:[#allocation42_spill] sm:$0xff] }
 0x34f   :  { %10374 = vmatmul.mubr.f32.gmra.mxu0 %v13998_v2  ;;  %10442 = vmatmul.mubr.f32.gmra.mxu1 %v4542_v15  ;;  %v17259_v2 = vld [vmem:[#allocation70_spill] sm:$0xff]  ;;  %v17265_v15 = vld [vmem:[#allocation71_spill] sm:$0xff] }
 0x350   :  { %10376 = vmatprep.mubr.f32.mxu0 %v14028_v30  ;;  %10508 = vmatprep.mubr.f32.mxu1 %v13664_v9  ;;  %v17261_v30 = vld [vmem:[#allocation14_spill] sm:$0xff] }
 0x353   :  { %10377 = vmatmul.mubr.f32.gmra.mxu0 %v14037_v55  ;;  %10509 = vmatmul.mubr.f32.vlgmr.msra.gmra.mxu1 %v13649_v27  ;;  %v6046_v55 = vld [vmem:[%s16355_s1 + $0x18] sm:$0xff] }
 0x354   :  { %10379 = vmatprep.mubr.f32.mxu0 %v14051_v54  ;;  %10511 = vmatprep.mubr.f32.mxu1 %v13700_v12  ;;  %v6047_v54 = vld [vmem:[%s16355_s1 + $0x20] sm:$0xff] }
 0x357   :  { %10380 = vmatmul.mubr.f32.gmra.mxu0 %v14044_v21  ;;  %10512 = vmatmul.mubr.f32.gmra.mxu1 %v13681_v63  ;;  %v17266_v21 = vld [vmem:[#allocation29_spill] sm:$0xff] }
 0x358   :  { %10382 = vmatprep.mubr.f32.mxu0 %v14065_v33  ;;  %10514 = vmatprep.mubr.f32.mxu1 %v13730_v8  ;;  %v17267_v33 = vld [vmem:[#allocation41_spill] sm:$0xff] }
 0x35b   :  { %10383 = vmatmul.mubr.f32.gmra.mxu0 %v14077_v22  ;;  %10515 = vmatmul.mubr.f32.gmra.mxu1 %v17254_v61  ;;  %v6048_v22 = vld [vmem:[%s16355_s1 + $0x28] sm:$0xff] }
 0x35c   :  { %10385 = vmatprep.mubr.f32.mxu0 %v14094_v16  ;;  %10517 = vmatprep.mubr.f32.mxu1 %v17255_v49  ;;  %v6049_v16 = vld [vmem:[%s16355_s1 + $0x30] sm:$0xff] }
 0x35f   :  { %10386 = vmatmul.mubr.f32.gmra.mxu0 %v14105_v53  ;;  %10518 = vmatmul.mubr.f32.gmra.mxu1 %v17256_v35  ;;  %v17268_v53 = vld [vmem:[#allocation17_spill] sm:$0xff] }
 0x360   :  { %10452 = vmatprep.mubr.f32.mxu0 %v13664_v9  ;;  %10520 = vmatprep.mubr.f32.mxu1 %v17257_v45  ;;  %v6044_v9 = vld [vmem:[%s16355_s1 + $0x8] sm:$0xff] }
 0x361   :  { %6173 = vadd.xlane.f32.xlu1 %v6044_v9 }
 0x363   :  { %10453 = vmatmul.mubr.f32.vlgmr.msra.gmra.mxu0 %v13649_v27  ;;  %10521 = vmatmul.mubr.f32.gmra.mxu1 %v17258_v60  ;;  %v17262_v27 = vld [vmem:[#allocation24_spill] sm:$0xff] }
 0x364   :  { %10455 = vmatprep.mubr.f32.mxu0 %v13700_v12  ;;  %10523 = vmatprep.mubr.f32.mxu1 %v17259_v2  ;;  %v17263_v12 = vld [vmem:[#allocation32_spill] sm:$0xff] }
 0x367   :  { %10456 = vmatmul.mubr.f32.gmra.mxu0 %v13681_v63  ;;  %10524 = vmatmul.mubr.f32.gmra.mxu1 %v17260_v25  ;;  %v6045_v63 = vld [vmem:[%s16355_s1 + $0x10] sm:$0xff] }
 0x368   :  { %10458 = vmatprep.mubr.f32.mxu0 %v13730_v8  ;;  %10526 = vmatprep.mubr.f32.mxu1 %v17261_v30  ;;  %v17264_v8 = vld [vmem:[#allocation22_spill] sm:$0xff] }
 0x369   :  { %6175 = vadd.xlane.f32.xlu1 %v6045_v63 }
 0x36b   :  { %10459 = vmatmul.mubr.f32.gmra.mxu0 %v17254_v61  ;;  %10527 = vmatmul.mubr.f32.gmra.mxu1 %v17262_v27  ;;  %v6043_v61 = vld [vmem:[%s16355_s1] sm:$0xff] }
 0x36c   :  { %10461 = vmatprep.mubr.f32.mxu0 %v17255_v49  ;;  %10529 = vmatprep.mubr.f32.mxu1 %v17263_v12 }
 0x36d   :  { %6177 = vadd.xlane.f32.xlu1 %v6046_v55  ;;  %6171 = vadd.xlane.f32.xlu0 %v6043_v61 }
 0x36f   :  { %10462 = vmatmul.mubr.f32.gmra.mxu0 %v17256_v35  ;;  %10530 = vmatmul.mubr.f32.gmra.mxu1 %v17264_v8 }
 0x370   :  { %10464 = vmatprep.mubr.f32.mxu0 %v17257_v45  ;;  %10532 = vmatprep.mubr.f32.mxu1 %v13901_v23 }
 0x371   :  { %6179 = vadd.xlane.f32.xlu1 %v6047_v54 }
 0x373   :  { %10465 = vmatmul.mubr.f32.gmra.mxu0 %v17258_v60  ;;  %10533 = vmatmul.mubr.f32.gmra.mxu1 %v17265_v15 }
 0x374   :  { %10467 = vmatprep.mubr.f32.mxu0 %v17259_v2  ;;  %10535 = vmatprep.mubr.f32.mxu1 %v17266_v21 }
 0x375   :  { %6181 = vadd.xlane.f32.xlu1 %v6048_v22 }
 0x377   :  { %10468 = vmatmul.mubr.f32.gmra.mxu0 %v17260_v25  ;;  %10536 = vmatmul.mubr.f32.gmra.mxu1 %v17267_v33 }
 0x378   :  { %10470 = vmatprep.mubr.f32.mxu0 %v17261_v30  ;;  %10538 = vmatprep.mubr.f32.mxu1 %v13953_v3 }
 0x379   :  { %6183 = vadd.xlane.f32.xlu1 %v6049_v16 }
 0x37b   :  { %10471 = vmatmul.mubr.f32.gmra.mxu0 %v17262_v27  ;;  %10539 = vmatmul.mubr.f32.gmra.mxu1 %v17268_v53 }
 0x37c   :  { %10473 = vmatprep.mubr.f32.mxu0 %v17263_v12  ;;  %10541 = vmatprep.mubr.f32.mxu1 %v13982_v32 }
 0x37d   :  { %6185 = vadd.xlane.f32.xlu1 %v6050_v19 }
 0x37f   :  { %10474 = vmatmul.mubr.f32.gmra.mxu0 %v17264_v8  ;;  %10542 = vmatmul.mubr.f32.gmra.mxu1 %v17269_v1 }
 0x380   :  { %10476 = vmatprep.mubr.f32.mxu0 %v13901_v23  ;;  %10544 = vmatprep.mubr.f32.mxu1 %v14005_v42  ;;  %v6051_v23 = vld [vmem:[%s16355_s1 + $0x40] sm:$0xff] }
 0x381   :  { %6187 = vadd.xlane.f32.xlu1 %v6051_v23 }
 0x383   :  { %10477 = vmatmul.mubr.f32.gmra.mxu0 %v17265_v15  ;;  %10545 = vmatmul.mubr.f32.gmra.mxu1 %v14003_v24 }
 0x384   :  { %10479 = vmatprep.mubr.f32.mxu0 %v17266_v21  ;;  %10547 = vmatprep.mubr.f32.mxu1 %v14030_v10 }
 0x385   :  { %6189 = vadd.xlane.f32.xlu1 %v6052_v47 }
 0x387   :  { %10480 = vmatmul.mubr.f32.gmra.mxu0 %v17267_v33  ;;  %10548 = vmatmul.mubr.f32.gmra.mxu1 %v14016_v56 }
 0x388   :  { %10482 = vmatprep.mubr.f32.mxu0 %v13953_v3  ;;  %10550 = vmatprep.mubr.f32.mxu1 %v17270_v46  ;;  %v6053_v3 = vld [vmem:[%s16355_s1 + $0x50] sm:$0xff] }
 0x389   :  { %6191 = vadd.xlane.f32.xlu1 %v6053_v3 }
 0x38b   :  { %10483 = vmatmul.mubr.f32.gmra.mxu0 %v17268_v53  ;;  %10551 = vmatmul.mubr.f32.gmra.mxu1 %v14046_v5 }
 0x38c   :  { %10485 = vmatprep.mubr.f32.mxu0 %v13982_v32  ;;  %10553 = vmatprep.mubr.f32.mxu1 %v14083_v62  ;;  %v6054_v32 = vld [vmem:[%s16355_s1 + $0x58] sm:$0xff] }
 0x38d   :  { %6193 = vadd.xlane.f32.xlu1 %v6054_v32 }
 0x38f   :  { %10486 = vmatmul.mubr.f32.gmra.mxu0 %v17269_v1  ;;  %10554 = vmatmul.mubr.f32.gmra.mxu1 %v17271_v18  ;;  %v10286_v59 = vpop.f32.mrf.mxu1 }
 0x390   :  { %10488 = vmatprep.mubr.f32.mxu0 %v14005_v42  ;;  %v6055_v42 = vld [vmem:[%s16355_s1 + $0x60] sm:$0xff] }
 0x391   :  { %v14316_v4 = vpop.f32.mrf.mxu1  ;;  %6195 = vadd.xlane.f32.xlu1 %v6055_v42 }
 0x393   :  { %10489 = vmatmul.mubr.f32.gmra.mxu0 %v14003_v24  ;;  %v10289_v51 = vpop.f32.mrf.mxu1 }
 0x394   :  { %10491 = vmatprep.mubr.f32.mxu0 %v14030_v10 }
 0x395   :  { %v14323_v6 = vpop.f32.mrf.mxu1  ;;  %6197 = vadd.xlane.f32.xlu1 %v6056_v13 }
 0x397   :  { %10492 = vmatmul.mubr.f32.gmra.mxu0 %v14016_v56  ;;  %v10230_v36 = vpop.f32.mrf.mxu0  ;;  %v10292_v14 = vpop.f32.mrf.mxu1 }
 0x398   :  { %10494 = vmatprep.mubr.f32.mxu0 %v17270_v46  ;;  %v4247_v24 = vadd.f32 %v10230_v36, %v14328_v50 }
 0x399   :  { %v14336_v10 = vpop.f32.mrf.mxu0  ;;  %v14338_v48 = vpop.f32.mrf.mxu1  ;;  %6199 = vadd.xlane.f32.xlu1 %v6057_v34 }
 0x39a   :  { %v14340_v17 = vadd.f32 %v10286_v59, %v4247_v24 }
 0x39b   :  { %10495 = vmatmul.mubr.f32.gmra.mxu0 %v14046_v5  ;;  %v10295_v56 = vpop.f32.mrf.mxu1 }
 0x39c   :  { %10497 = vmatprep.mubr.f32.mxu0 %v14083_v62  ;;  %v10233_v31 = vpop.f32.mrf.mxu0 }
 0x39d   :  { %v4267_v38 = vadd.f32 %v10233_v31, %v14328_v50  ;;  %v14348_v0 = vpop.f32.mrf.mxu1  ;;  %6201 = vadd.xlane.f32.xlu1 %v6058_v40 }
 0x39e   :  { %v14350_v26 = vpop.f32.mrf.mxu0 }
 0x39f   :  { %10498 = vmatmul.mubr.f32.gmra.mxu0 %v17271_v18  ;;  %v10298_v29 = vpop.f32.mrf.mxu1  ;;  %v14356_v28 = vadd.f32 %v10289_v51, %v4267_v38 }
 0x3a1   :  { %v14358_v5 = vpop.f32.mrf.mxu1  ;;  %6203 = vadd.xlane.f32.xlu1 %v6059_v37 }
 0x3a2   :  { %v10236_v62 = vpop.f32.mrf.mxu0 }
 0x3a3   :  { %v4287_v58 = vadd.f32 %v10236_v62, %v14328_v50  ;;  %v10301_v57 = vpop.f32.mrf.mxu1 }
 0x3a4   :  { %v14364_v44 = vpop.f32.mrf.mxu0 }
 0x3a5   :  { %v14366_v52 = vpop.f32.mrf.mxu1  ;;  %v14368_v39 = vadd.f32 %v10292_v14, %v4287_v58 }
 0x3a7   :  { %v10304_v41 = vpop.f32.mrf.mxu1 }
 0x3a8   :  { %v10239_v20 = vpop.f32.mrf.mxu0 }
 0x3a9   :  { %v4307_v7 = vadd.f32 %v10239_v20, %v14328_v50  ;;  %v14374_v11 = vpop.f32.mrf.mxu1 }
 0x3aa   :  { %v14376_v43 = vpop.f32.mrf.mxu0 }
 0x3ab   :  { %v10307_v49 = vpop.f32.mrf.mxu1  ;;  %v14381_v35 = vadd.f32 %v10295_v56, %v4307_v7 }
 0x3ad   :  { %v14383_v45 = vpop.f32.mrf.mxu1 }
 0x3ae   :  { %v10242_v60 = vpop.f32.mrf.mxu0 }
 0x3af   :  { %v4327_v2 = vadd.f32 %v10242_v60, %v14328_v50  ;;  %v10310_v25 = vpop.f32.mrf.mxu1 }
 0x3b0   :  { %v14386_v30 = vpop.f32.mrf.mxu0 }
 0x3b1   :  { %v14388_v9 = vpop.f32.mrf.mxu1  ;;  %v14390_v27 = vadd.f32 %v10298_v29, %v4327_v2 }
 0x3b3   :  { %v10245_v12 = vpop.f32.mrf.mxu0  ;;  %v10313_v63 = vpop.f32.mrf.mxu1 }
 0x3b4   :  { %v4347_v8 = vadd.f32 %v10245_v12, %v14328_v50 }
 0x3b5   :  { %v14393_v55 = vpop.f32.mrf.mxu0  ;;  %v14395_v15 = vpop.f32.mrf.mxu1 }
 0x3b6   :  { %v14397_v21 = vadd.f32 %v10301_v57, %v4347_v8 }
 0x3b8   :  { %v10248_v54 = vpop.f32.mrf.mxu0  ;;  %v10316_v33 = vpop.f32.mrf.mxu1 }
 0x3b9   :  { %v4367_v22 = vadd.f32 %v10248_v54, %v14328_v50 }
 0x3ba   :  { %v14400_v53 = vpop.f32.mrf.mxu0  ;;  %v14402_v16 = vpop.f32.mrf.mxu1 }
 0x3bb   :  { %v14404_v1 = vadd.f32 %v10304_v41, %v4367_v22 }
 0x3bc   :  { %v10319_v23 = vpop.f32.mrf.mxu1 }
 0x3bd   :  { %v10251_v19 = vpop.f32.mrf.mxu0 }
 0x3be   :  { %v4387_v46 = vadd.f32 %v10251_v19, %v14328_v50  ;;  %v14409_v3 = vpop.f32.mrf.mxu1 }
 0x3bf   :  { %v14407_v47 = vpop.f32.mrf.mxu0 }
 0x3c0   :  { %v14411_v18 = vadd.f32 %v10307_v49, %v4387_v46 }
 0x3c1   :  { %v10254_v59 = vpop.f32.mrf.mxu0  ;;  %v10322_v32 = vpop.f32.mrf.mxu1 }
 0x3c2   :  { %17272 = vst [vmem:[#allocation20_spill] sm:$0xff] %v14411_v18  ;;  %v4407_v51 = vadd.f32 %v10254_v59, %v14328_v50 }
 0x3c3   :  { %v14414_v42 = vpop.f32.mrf.mxu0  ;;  %v14416_v36 = vpop.f32.mrf.mxu1 }
 0x3c4   :  { %17273 = vst [vmem:[#allocation23_spill] sm:$0xff] %v14416_v36  ;;  %v14418_v14 = vadd.f32 %v10310_v25, %v4407_v51 }
 0x3c5   :  { %v10325_v13 = vpop.f32.mrf.mxu1 }
 0x3c6   :  { %17274 = vst [vmem:[#allocation47_spill] sm:$0xff] %v14418_v14  ;;  %v10257_v24 = vpop.f32.mrf.mxu0 }
 0x3c7   :  { %v4427_v56 = vadd.f32 %v10257_v24, %v14328_v50  ;;  %v14423_v38 = vpop.f32.mrf.mxu1 }
 0x3c8   :  { %v14421_v31 = vpop.f32.mrf.mxu0  ;;  %17275 = vst [vmem:[#allocation30_spill] sm:$0xff] %v14423_v38 }
 0x3c9   :  { %v14425_v34 = vadd.f32 %v10313_v63, %v4427_v56 }
 0x3ca   :  { %v10328_v29 = vpop.f32.mrf.mxu1  ;;  %v10260_v62 = vpop.f32.mrf.mxu0 }
 0x3cb   :  { %17276 = vst [vmem:[#allocation49_spill] sm:$0xff] %v14425_v34  ;;  %v4447_v40 = vadd.f32 %v10260_v62, %v14328_v50 }
 0x3cc   :  { %v14428_v58 = vpop.f32.mrf.mxu1  ;;  %v14430_v57 = vpop.f32.mrf.mxu0 }
 0x3cd   :  { %17277 = vst [vmem:[#allocation25_spill] sm:$0xff] %v14428_v58  ;;  %v14432_v41 = vadd.f32 %v10316_v33, %v4447_v40 }
 0x3ce   :  { %v10263_v20 = vpop.f32.mrf.mxu0 }
 0x3cf   :  { %17278 = vst [vmem:[#allocation36_spill] sm:$0xff] %v14432_v41  ;;  %v10331_v37 = vpop.f32.mrf.mxu1  ;;  %v4467_v7 = vadd.f32 %v10263_v20, %v14328_v50 }
 0x3d0   :  { %v14435_v61 = vpop.f32.mrf.mxu0 }
 0x3d1   :  { %v14437_v49 = vpop.f32.mrf.mxu1  ;;  %v14439_v60 = vadd.f32 %v10319_v23, %v4467_v7 }
 0x3d2   :  { %17279 = vst [vmem:[#allocation13_spill] sm:$0xff] %v14437_v49  ;;  %v10266_v2 = vpop.f32.mrf.mxu0 }
 0x3d3   :  { %17280 = vst [vmem:[#allocation48_spill] sm:$0xff] %v14439_v60  ;;  %v14441_v25 = vpop.f32.mrf.mxu1  ;;  %v4487_v12 = vadd.f32 %v10266_v2, %v14328_v50 }
 0x3d4   :  { %v14444_v63 = vpop.f32.mrf.mxu0 }
 0x3d5   :  { %17281 = vst [vmem:[#allocation26_spill] sm:$0xff] %v14444_v63  ;;  %v14446_v8 = vpop.f32.mrf.mxu1  ;;  %v14448_v54 = vadd.f32 %v10322_v32, %v4487_v12 }
 0x3d6   :  { %v10269_v33 = vpop.f32.mrf.mxu0 }
 0x3d7   :  { %17282 = vst [vmem:[#allocation27_spill] sm:$0xff] %v14448_v54  ;;  %v14450_v22 = vpop.f32.mrf.mxu1  ;;  %v4507_v19 = vadd.f32 %v10269_v33, %v14328_v50 }
 0x3d8   :  { %v14453_v46 = vpop.f32.mrf.mxu0 }
 0x3d9   :  { %17283 = vst [vmem:[#allocation51_spill] sm:$0xff] %v14453_v46  ;;  %v14455_v23 = vpop.f32.mrf.mxu1  ;;  %v14457_v59 = vadd.f32 %v10325_v13, %v4507_v19 }
 0x3da   :  { %v10272_v51 = vpop.f32.mrf.mxu0 }
 0x3db   :  { %17284 = vst [vmem:[#allocation31_spill] sm:$0xff] %v14457_v59  ;;  %v14459_v24 = vpop.f32.mrf.mxu1  ;;  %v4527_v56 = vadd.f32 %v10272_v51, %v14328_v50 }
 0x3dc   :  { %v14462_v62 = vpop.f32.mrf.mxu0 }
 0x3dd   :  { %17285 = vst [vmem:[#allocation33_spill] sm:$0xff] %v14462_v62  ;;  %v14464_v32 = vpop.f32.mrf.mxu1  ;;  %v14466_v40 = vadd.f32 %v10328_v29, %v4527_v56 }
 0x3de   :  { %v10275_v20 = vpop.f32.mrf.mxu0 }
 0x3df   :  { %17286 = vst [vmem:[#allocation16_spill] sm:$0xff] %v14466_v40  ;;  %v14468_v7 = vpop.f32.mrf.mxu1  ;;  %v4547_v2 = vadd.f32 %v10275_v20, %v14328_v50 }
 0x3e0   :  { %v14471_v12 = vpop.f32.mrf.mxu0 }
 0x3e1   :  { %17287 = vst [vmem:[#allocation52_spill] sm:$0xff] %v14471_v12  ;;  %v14473_v13 = vpop.f32.mrf.mxu1  ;;  %v14475_v33 = vadd.f32 %v10331_v37, %v4547_v2 }
 0x3e2   :  { %17288 = vst [vmem:[#allocation55_spill] sm:$0xff] %v14473_v13  ;;  %v14477_v19 = vpop.f32.mrf.mxu0 }
 0x3e3   :  { %17289 = vst [vmem:[#allocation73_spill] sm:$0xff] %v14475_v33  ;;  %v14479_v51 = vpop.f32.mrf.mxu1 }
 0x3e4   :  { %17290 = vst [vmem:[#allocation12_spill] sm:$0xff] %v14479_v51  ;;  %v14481_v49 = vpop.f32.mrf.mxu0 }
 0x3e5   :  { %v14483_v58 = vpop.f32.mrf.mxu1 }
 0x3e6   :  { %17291 = vst [vmem:[#allocation15_spill] sm:$0xff] %v14483_v58 }
 0x3e7   :  { %v14485_v29 = vpop.f32.mrf.mxu0  ;;  %v14487_v56 = vpop.f32.mrf.mxu1 }
 0x3e8   :  { %17292 = vst [vmem:[#allocation21_spill] sm:$0xff] %v14487_v56 }
 0x3e9   :  { %v14489_v40 = vpop.f32.mrf.mxu0  ;;  %v14491_v20 = vpop.f32.mrf.mxu1 }
 0x3ea   :  { %17293 = vst [vmem:[#allocation28_spill] sm:$0xff] %v14491_v20 }
 0x3eb   :  { %v14493_v12 = vpop.f32.mrf.mxu0  ;;  %v14495_v37 = vpop.f32.mrf.mxu1 }
 0x3ec   :  { %17294 = vst [vmem:[#allocation34_spill] sm:$0xff] %v14495_v37 }
 0x3ed   :  { %v14497_v2 = vpop.f32.mrf.mxu0  ;;  %v14499_v33 = vpop.f32.mrf.mxu1 }
 0x3ee   :  { %17295 = vst [vmem:[#allocation43_spill] sm:$0xff] %v14499_v33 }
 0x3ef   :  { %v14501_v59 = vpop.f32.mrf.mxu0  ;;  %v14503_v38 = vpop.f32.mrf.mxu1 }
 0x3f0   :  { %17296 = vst [vmem:[#allocation35_spill] sm:$0xff] %v14503_v38 }
 0x3f1   :  { %v14505_v62 = vpop.f32.mrf.mxu0  ;;  %v14507_v36 = vpop.f32.mrf.mxu1 }
 0x3f2   :  { %17297 = vst [vmem:[#allocation44_spill] sm:$0xff] %v14507_v36 }
 0x3f3   :  { %v14509_v54 = vpop.f32.mrf.mxu0  ;;  %v14511_v46 = vpop.f32.mrf.mxu1 }
 0x3f4   :  { %17298 = vst [vmem:[#allocation46_spill] sm:$0xff] %v14511_v46 }
 0x3f5   :  { %v14513_v60 = vpop.f32.mrf.mxu0  ;;  %v14515_v63 = vpop.f32.mrf.mxu1 }
 0x3f6   :  { %17299 = vst [vmem:[#allocation50_spill] sm:$0xff] %v14515_v63 }
 0x3f7   :  { %v14517_v41 = vpop.f32.mrf.mxu0  ;;  %v14519_v34 = vpop.f32.mrf.mxu1 }
 0x3f8   :  { %17300 = vst [vmem:[#allocation53_spill] sm:$0xff] %v14519_v34 }
 0x3f9   :  { %v14521_v14 = vpop.f32.mrf.mxu0  ;;  %v14523_v33 = vpop.f32.mrf.mxu1 }
 0x3fa   :  { %17301 = vst [vmem:[#allocation57_spill] sm:$0xff] %v14523_v33 }
 0x3fb   :  { %v14525_v38 = vpop.f32.mrf.mxu0  ;;  %v14527_v37 = vpop.f32.mrf.mxu1 }
 0x3fc   :  { %17302 = vst [vmem:[#allocation61_spill] sm:$0xff] %v14527_v37 }
 0x3fd   :  { %v14529_v36 = vpop.f32.mrf.mxu0  ;;  %v14531_v18 = vpop.f32.mrf.mxu1 }
 0x3fe   :  { %17303 = vst [vmem:[#allocation63_spill] sm:$0xff] %v14531_v18 }
 0x3ff   :  { %v14533_v46 = vpop.f32.mrf.mxu0  ;;  %v14535_v20 = vpop.f32.mrf.mxu1 }
 0x400   :  { %17304 = vst [vmem:[#allocation64_spill] sm:$0xff] %v14533_v46  ;;  %17305 = vst [vmem:[#allocation66_spill] sm:$0xff] %v14535_v20 }
 0x401   :  { %v14537_v63 = vpop.f32.mrf.mxu0  ;;  %v14539_v56 = vpop.f32.mrf.mxu1 }
 0x402   :  { %17306 = vst [vmem:[#allocation60_spill] sm:$0xff] %v14537_v63  ;;  %17307 = vst [vmem:[#allocation62_spill] sm:$0xff] %v14539_v56 }
 0x403   :  { %v14541_v34 = vpop.f32.mrf.mxu0  ;;  %v14543_v58 = vpop.f32.mrf.mxu1 }
 0x404   :  { %17308 = vst [vmem:[#allocation38_spill] sm:$0xff] %v14541_v34  ;;  %17309 = vst [vmem:[#allocation40_spill] sm:$0xff] %v14543_v58 }
 0x405   :  { %v14545_v33 = vpop.f32.mrf.mxu0  ;;  %v14547_v51 = vpop.f32.mrf.mxu1 }
 0x406   :  { %17310 = vst [vmem:[#allocation69_spill] sm:$0xff] %v14545_v33  ;;  %17311 = vst [vmem:[#allocation39_spill] sm:$0xff] %v14547_v51 }
 0x407   :  { %v14549_v37 = vpop.f32.mrf.mxu0  ;;  %v14551_v13 = vpop.f32.mrf.mxu1 }
 0x408   :  { %17312 = vst [vmem:[#allocation37_spill] sm:$0xff] %v14549_v37  ;;  %17313 = vst [vmem:[#allocation54_spill] sm:$0xff] %v14551_v13 }
 0x409   :  { %v14553_v18 = vpop.f32.mrf.mxu0  ;;  %v14555_v46 = vpop.f32.mrf.mxu1 }
 0x40a   :  { %17314 = vst [vmem:[#allocation65_spill] sm:$0xff] %v14553_v18  ;;  %17315 = vst [vmem:[#allocation67_spill] sm:$0xff] %v14555_v46 }
 0x40b   :  { %v14557_v20 = vpop.f32.mrf.mxu0  ;;  %v14559_v63 = vpop.f32.mrf.mxu1 }
 0x40c   :  { %17316 = vst [vmem:[#allocation68_spill] sm:$0xff] %v14557_v20  ;;  %17317 = vst [vmem:[#allocation56_spill] sm:$0xff] %v14559_v63  ;;  %v4237_v63 = vadd.f32 %v14328_v50, %v14336_v10  ;;  %v4377_v10 = vadd.f32 %v14328_v50, %v14407_v47 }
 0x40d   :  { %v14561_v56 = vpop.f32.mrf.mxu0  ;;  %v14563_v34 = vpop.f32.mrf.mxu1 }
 0x40e   :  { %17318 = vst [vmem:[#allocation58_spill] sm:$0xff] %v14561_v56  ;;  %17319 = vst [vmem:[#allocation59_spill] sm:$0xff] %v14563_v34  ;;  %v4257_v34 = vadd.f32 %v14328_v50, %v14350_v26 }
 0x40f   :  { %v14565_v58 = vpop.f32.mrf.mxu0  ;;  %v14567_v33 = vpop.f32.mrf.mxu1 }
 0x410   :  { %17320 = vst [vmem:[#allocation11_spill] sm:$0xff] %v14565_v58  ;;  %17321 = vst [vmem:[#allocation19_spill] sm:$0xff] %v14567_v33  ;;  %v4277_v33 = vadd.f32 %v14328_v50, %v14364_v44  ;;  %v4397_v44 = vadd.f32 %v14328_v50, %v14414_v42 }
 0x411   :  { %v14569_v51 = vpop.f32.mrf.mxu0  ;;  %v14571_v37 = vpop.f32.mrf.mxu1 }
 0x412   :  { %17322 = vst [vmem:[#allocation70_spill] sm:$0xff] %v14569_v51  ;;  %17323 = vst [vmem:[#allocation18_spill] sm:$0xff] %v14571_v37  ;;  %v4297_v37 = vadd.f32 %v14328_v50, %v14376_v43  ;;  %v4357_v51 = vadd.f32 %v14328_v50, %v14400_v53  ;;  %v4417_v43 = vadd.f32 %v14328_v50, %v14421_v31 }
 0x413   :  { %v14573_v13 = vpop.f32.mrf.mxu0  ;;  %v14575_v18 = vpop.f32.mrf.mxu1  ;;  %v4650_v53 = vadd.f32 %v14323_v6, %v4257_v34  ;;  %v4662_v47 = vadd.f32 %v14338_v48, %v4277_v33  ;;  %v14617_v31 = vadd.f32 %v14383_v45, %v4377_v10  ;;  %v4457_v6 = vadd.f32 %v14328_v50, %v14435_v61 }
 0x414   :  { %17324 = vst [vmem:[#allocation14_spill] sm:$0xff] %v14573_v13  ;;  %v4317_v13 = vadd.f32 %v14328_v50, %v14386_v30  ;;  %v4710_v42 = vadd.f32 %v14374_v11, %v4357_v51  ;;  %v4911_v48 = vadd.f32 %v14477_v19, %v14340_v17  ;;  %v14637_v45 = vadd.f32 %v14395_v15, %v4417_v43  ;;  %v17336_v19 = vld [vmem:[#allocation20_spill] sm:$0xff]  ;;  %v6375_v43 = vld [vmem:[%s16362_s8 + $0x60] sm:$0xff] }
 0x415   :  { %v14577_v46 = vpop.f32.mrf.mxu0  ;;  %v14579_v20 = vpop.f32.mrf.mxu1  ;;  %v4918_v11 = vadd.f32 %v14489_v40, %v4650_v53  ;;  %v4932_v17 = vadd.f32 %v14497_v2, %v4662_v47  ;;  %v4995_v40 = vadd.f32 %v14525_v38, %v14404_v1  ;;  %v17337_v51 = vld [vmem:[#allocation64_spill] sm:$0xff]  ;;  %v17339_v47 = vld [vmem:[#allocation43_spill] sm:$0xff] }
 0x416   :  { %17325 = vst [vmem:[#allocation24_spill] sm:$0xff] %v14577_v46  ;;  %17326 = vst [vmem:[#allocation32_spill] sm:$0xff] %v14579_v20  ;;  %v4337_v46 = vadd.f32 %v14328_v50, %v14393_v55  ;;  %v4638_v55 = vadd.f32 %v14316_v4, %v4237_v63  ;;  %v4437_v4 = vadd.f32 %v14328_v50, %v14430_v57 }
 0x417   :  { %v14597_v58 = vpop.f32.mrf.mxu0  ;;  %v14599_v26 = vpop.f32.mrf.mxu1  ;;  %v4939_v50 = vadd.f32 %v14493_v12, %v14368_v39  ;;  %v14680_v1 = vadd.f32 %v14464_v32, %v4932_v17  ;;  %v17335_v32 = vld [vmem:[#allocation28_spill] sm:$0xff] }
 0x418   :  { %17327 = vst [vmem:[#allocation22_spill] sm:$0xff] %v14597_v58  ;;  %17328 = vst [vmem:[#allocation71_spill] sm:$0xff] %v14599_v26  ;;  %v4674_v58 = vadd.f32 %v14348_v0, %v4297_v37  ;;  %v4686_v26 = vadd.f32 %v14358_v5, %v4317_v13  ;;  %v4698_v20 = vadd.f32 %v14366_v52, %v4337_v46  ;;  %v17338_v37 = vld [vmem:[#allocation34_spill] sm:$0xff] }
 0x419   :  { %v14605_v30 = vpop.f32.mrf.mxu0  ;;  %v14607_v56 = vpop.f32.mrf.mxu1  ;;  %v14630_v0 = vadd.f32 %v14388_v9, %v4397_v44  ;;  %v4904_v5 = vadd.f32 %v14481_v49, %v4638_v55  ;;  %v4925_v52 = vadd.f32 %v14485_v29, %v14356_v28  ;;  %v4953_v9 = vadd.f32 %v14501_v59, %v14381_v35  ;;  %v6376_v44 = vld [vmem:[%s16362_s8 + $0x68] sm:$0xff] }
 0x41a   :  { %17329 = vst [vmem:[#allocation29_spill] sm:$0xff] %v14605_v30  ;;  %17330 = vst [vmem:[#allocation41_spill] sm:$0xff] %v14607_v56  ;;  %v4946_v61 = vadd.f32 %v14505_v62, %v4674_v58  ;;  %v4967_v28 = vadd.f32 %v14509_v54, %v14390_v27  ;;  %v4960_v15 = vadd.f32 %v14513_v60, %v4686_v26  ;;  %v6377_v26 = vld [vmem:[%s16362_s8 + $0x70] sm:$0xff] }
 0x41b   :  { %v14619_v30 = vpop.f32.mrf.mxu0  ;;  %v14621_v56 = vpop.f32.mrf.mxu1  ;;  %v4981_v49 = vadd.f32 %v14517_v41, %v14397_v21  ;;  %v4974_v63 = vadd.f32 %v14521_v14, %v4698_v20  ;;  %v14662_v35 = vadd.f32 %v14402_v16, %v4437_v4  ;;  %v14665_v58 = vadd.f32 %v14409_v3, %v4457_v6 }
 0x41c   :  { %v5206_v27 = vadd.f32 %v14441_v25, %v4911_v48  ;;  %v4988_v60 = vadd.f32 %v14529_v36, %v4710_v42  ;;  %v5198_v14 = vadd.f32 %v14446_v8, %v4904_v5  ;;  %v5222_v41 = vadd.f32 %v14450_v22, %v4925_v52  ;;  %v17331_v36 = vld [vmem:[#allocation55_spill] sm:$0xff]  ;;  %v17332_v22 = vld [vmem:[#allocation12_spill] sm:$0xff]  ;;  %v6374_v5 = vld [vmem:[%s16362_s8 + $0x58] sm:$0xff] }
 0x41d   :  { %v14639_v34 = vpop.f32.mrf.mxu0  ;;  %v14641_v57 = vpop.f32.mrf.mxu1  ;;  %v5214_v54 = vadd.f32 %v14455_v23, %v4918_v11  ;;  %v14677_v16 = vadd.f32 %v14459_v24, %v4939_v50  ;;  %v14683_v3 = vadd.f32 %v14468_v7, %v4953_v9  ;;  %v14686_v38 = vadd.f32 %v17331_v36, %v4946_v61  ;;  %v17333_v23 = vld [vmem:[#allocation15_spill] sm:$0xff]  ;;  %v17334_v24 = vld [vmem:[#allocation21_spill] sm:$0xff]  ;;  %v17341_v9 = vld [vmem:[#allocation60_spill] sm:$0xff] }
 0x41e   :  { %v14691_v62 = vadd.f32 %v17332_v22, %v4967_v28  ;;  %v14694_v12 = vadd.f32 %v17333_v23, %v4960_v15  ;;  %v14697_v13 = vadd.f32 %v17334_v24, %v4981_v49  ;;  %v14700_v33 = vadd.f32 %v17335_v32, %v4974_v63  ;;  %v6378_v7 = vld [vmem:[%s16362_s8 + $0x78] sm:$0xff] }
 0x41f   :  { %v14655_v46 = vpop.f32.mrf.mxu0  ;;  %v14657_v39 = vpop.f32.mrf.mxu1  ;;  %v5009_v29 = vadd.f32 %v17337_v51, %v17336_v19  ;;  %v14708_v2 = vadd.f32 %v17338_v37, %v4995_v40  ;;  %v14710_v10 = vand.u32 4294901760, %v6378_v7  ;;  %v14724_v42 = vadd.f32 %v17339_v47, %v4988_v60 }
 0x420   :  { %v14726_v4 = vand.u32 4294901760, %v6377_v26  ;;  %v14728_v6 = vand.u32 4294901760, %v6376_v44  ;;  %v14730_v48 = vand.u32 4294901760, %v6375_v43  ;;  %v14740_v17 = vand.u32 4294901760, %v6374_v5 }
 0x421   :  { %v14669_v21 = vpop.f32.mrf.mxu0  ;;  %v14674_v59 = vpop.f32.mrf.mxu1  ;;  %v14737_v50 = vsub.f32 %v6378_v7, %v14710_v10  ;;  %10556 = vmatprep.subr.mxu0 %v14710_v10  ;;  %v5002_v61 = vadd.f32 %v17341_v9, %v14617_v31 }
 0x422   :  { %17340 = vst [vmem:[#allocation17_spill] sm:$0xff] %v14740_v17  ;;  %v14747_v49 = vsub.f32 %v6377_v26, %v14726_v4  ;;  %v14750_v63 = vsub.f32 %v6376_v44, %v14728_v6  ;;  %10557 = vmatpush3.msra.mxu0 %v14710_v10  ;;  %v14775_v32 = vsub.f32 %v6374_v5, %v14740_v17  ;;  %v17352_v44 = vld [vmem:[#allocation35_spill] sm:$0xff] }
 0x423   :  { %v10454_v25 = vpop.f32.mrf.mxu0  ;;  %v14688_v8 = vpop.f32.mrf.mxu1  ;;  %v14760_v31 = vand.u32 4294901760, %v14737_v50  ;;  %10558 = vmatprep.subr.mxu0 %v14726_v4 }
 0x424   :  { %v5535_v20 = vadd.f32 %v10454_v25, %v5206_v27  ;;  %17342 = vst [vmem:[#allocation42_spill] sm:$0xff] %v14747_v49  ;;  %17343 = vst [vmem:[#allocation72_spill] sm:$0xff] %v14750_v63  ;;  %v17345_v27 = vld [vmem:[#allocation32_spill] sm:$0xff]  ;;  %v14766_v22 = vand.u32 4294901760, %v14747_v49  ;;  %v14769_v23 = vand.u32 4294901760, %v14750_v63  ;;  %10559 = vmatpush3.msra.mxu0 %v14726_v4 }
 0x425   :  { %v5528_v55 = vpop.f32.mrf.mxu0  ;;  %v14721_v53 = vpop.f32.mrf.mxu1  ;;  %17346 = vst [vmem:[#allocation55_spill] sm:$0xff] %v14760_v31  ;;  %17350 = vst [vmem:[#allocation28_spill] sm:$0xff] %v14775_v32  ;;  %10560 = vmatprep.subr.mxu0 %v14728_v6 }
 0x426   :  { %v5796_v52 = vadd.f32 %v14575_v18, %v5535_v20  ;;  %v5529_v11 = vadd.f32 %v5528_v55, %v5198_v14  ;;  %v14753_v18 = vsub.f32 %v6375_v43, %v14730_v48  ;;  %17347 = vst [vmem:[#allocation12_spill] sm:$0xff] %v14766_v22  ;;  %17348 = vst [vmem:[#allocation15_spill] sm:$0xff] %v14769_v23  ;;  %v6060_v55 = vld [vmem:[%s16355_s1 + $0x88] sm:$0xff]  ;;  %10561 = vmatpush3.msra.mxu0 %v14728_v6 }
 0x427   :  { %v10457_v28 = vpop.f32.mrf.mxu0  ;;  %v14744_v15 = vpop.f32.mrf.mxu1  ;;  %v6784_v20 = vsub.f32 %v14737_v50, %v14760_v31  ;;  %v14789_v43 = vadd.f32 %v17352_v44, %v5009_v29  ;;  %v6798_v47 = vsub.f32 %v14750_v63, %v14769_v23  ;;  %10562 = vmatprep.subr.mxu0 %v14730_v48  ;;  %v17359_v23 = vld [vmem:[#allocation44_spill] sm:$0xff] }
 0x428   :  { %17344 = vst [vmem:[#allocation45_spill] sm:$0xff] %v14753_v18  ;;  %v14756_v40 = vand.u32 2147483647, %v5796_v52  ;;  %v5790_v60 = vadd.f32 %v17345_v27, %v5529_v11  ;;  %v5547_v14 = vadd.f32 %v10457_v28, %v5222_v41  ;;  %v14772_v24 = vand.u32 4294901760, %v14753_v18  ;;  %v17351_v41 = vld [vmem:[#allocation71_spill] sm:$0xff]  ;;  %v17353_v11 = vld [vmem:[#allocation41_spill] sm:$0xff]  ;;  %10563 = vmatpush3.msra.mxu0 %v14730_v48 }
 0x429   :  { %v5540_v36 = vpop.f32.mrf.mxu0  ;;  %v14763_v25 = vpop.f32.mrf.mxu1  ;;  %v6785_v28 = vand.u32 4294901760, %v6784_v20  ;;  %v17354_v27 = vld [vmem:[#allocation47_spill] sm:$0xff]  ;;  %10564 = vmatprep.subr.mxu0 %v14740_v17 }
 0x42a   :  { %17349 = vst [vmem:[#allocation21_spill] sm:$0xff] %v14772_v24  ;;  %6012 = vst [vmem:[#allocation5 + $0x8] sm:$0xff] %v14756_v40  ;;  %v5808_v7 = vadd.f32 %v17351_v41, %v5547_v14  ;;  %v5541_v19 = vadd.f32 %v5540_v36, %v5214_v54  ;;  %6077 = vadd.xlane.f32.xlu1 %v14756_v40  ;;  %v14781_v51 = vand.u32 2147483647, %v5790_v60  ;;  %v17355_v60 = vld [vmem:[#allocation38_spill] sm:$0xff]  ;;  %10565 = vmatpush3.msra.mxu0 %v14740_v17  ;;  %v6065_v17 = vld [vmem:[%s16355_s1 + $0xb0] sm:$0xff] }
 0x42b   :  { %v10460_v37 = vpop.f32.mrf.mxu0  ;;  %v14786_v26 = vpop.f32.mrf.mxu1  ;;  %v6791_v54 = vsub.f32 %v14747_v49, %v14766_v22  ;;  %v6805_v5 = vsub.f32 %v14753_v18, %v14772_v24  ;;  %v5023_v14 = vadd.f32 %v17355_v60, %v17354_v27  ;;  %v14813_v24 = vand.u32 4294901760, %v14775_v32  ;;  %10636 = vmatprep.subr.mxu1 %v6785_v28 }
 0x42c   :  { %v14801_v52 = vand.u32 2147483647, %v5808_v7  ;;  %v5802_v29 = vadd.f32 %v17353_v11, %v5541_v19  ;;  %v5559_v9 = vadd.f32 %v10460_v37, %v14677_v16  ;;  %6075 = vadd.xlane.f32.xlu0 %v14781_v51  ;;  %6011 = vst [vmem:[#allocation5] sm:$0xff] %v14781_v51  ;;  %v6799_v7 = vand.u32 4294901760, %v6798_v47  ;;  %v6373_v16 = vld [vmem:[%s16362_s8 + $0x50] sm:$0xff]  ;;  %v17358_v47 = vld [vmem:[#allocation69_spill] sm:$0xff]  ;;  %10637 = vmatpush3.msra.mxu1 %v6785_v28 }
 0x42d   :  { %v5552_v36 = vpop.f32.mrf.mxu0  ;;  %v14810_v41 = vpop.f32.mrf.mxu1  ;;  %v6792_v44 = vand.u32 4294901760, %v6791_v54  ;;  %17356 = vst [vmem:[#allocation20_spill] sm:$0xff] %v14813_v24  ;;  %v14824_v54 = vand.u32 4294901760, %v6373_v16  ;;  %v5016_v11 = vadd.f32 %v17358_v47, %v14630_v0  ;;  %v14831_v22 = vadd.f32 %v17359_v23, %v5002_v61  ;;  %v17362_v28 = vld [vmem:[#allocation37_spill] sm:$0xff] }
 0x42e   :  { %6014 = vst [vmem:[#allocation5 + $0x18] sm:$0xff] %v14801_v52  ;;  %v5820_v19 = vadd.f32 %v14621_v56, %v5559_v9  ;;  %v5553_v20 = vadd.f32 %v5552_v36, %v14680_v1  ;;  %v14822_v37 = vand.u32 2147483647, %v5802_v29  ;;  %6205 = vadd.xlane.f32.xlu1 %v6060_v55  ;;  %v6061_v56 = vld [vmem:[%s16355_s1 + $0x90] sm:$0xff]  ;;  %v6806_v1 = vand.u32 4294901760, %v6805_v5  ;;  %v6372_v29 = vld [vmem:[%s16362_s8 + $0x48] sm:$0xff] }
 0x42f   :  { %17357 = vst [vmem:[#allocation64_spill] sm:$0xff] %v14824_v54  ;;  %v10463_v27 = vpop.f32.mrf.mxu0  ;;  %v14828_v60 = vpop.f32.mrf.mxu1  ;;  %v6812_v55 = vsub.f32 %v14775_v32, %v14813_v24  ;;  %10638 = vmatprep.subr.mxu1 %v6792_v44  ;;  %v14849_v5 = vsub.f32 %v6373_v16, %v14824_v54  ;;  %v17361_v9 = vld [vmem:[#allocation49_spill] sm:$0xff]  ;;  %v17367_v32 = vld [vmem:[#allocation50_spill] sm:$0xff]  ;;  %10566 = vmatprep.subr.mxu0 %v14824_v54 }
 0x430   :  { %v14842_v0 = vand.u32 2147483647, %v5820_v19  ;;  %v5814_v61 = vadd.f32 %v14641_v57, %v5553_v20  ;;  %v5571_v23 = vadd.f32 %v10463_v27, %v14683_v3  ;;  %6081 = vadd.xlane.f32.xlu0 %v14801_v52  ;;  %6013 = vst [vmem:[#allocation5 + $0x10] sm:$0xff] %v14822_v37  ;;  %v5037_v36 = vadd.f32 %v17362_v28, %v17361_v9  ;;  %v17363_v19 = vld [vmem:[#allocation46_spill] sm:$0xff] }
 0x431   :  { %17360 = vst [vmem:[#allocation34_spill] sm:$0xff] %v14849_v5  ;;  %v5564_v47 = vpop.f32.mrf.mxu0  ;;  %v14853_v24 = vpop.f32.mrf.mxu1  ;;  %v14856_v31 = vadd.f32 %v17363_v19, %v5023_v14  ;;  %10639 = vmatpush3.msra.mxu1 %v6792_v44  ;;  %v6813_v57 = vand.u32 4294901760, %v6812_v55  ;;  %v14858_v3 = vand.u32 4294901760, %v6372_v29  ;;  %v6371_v20 = vld [vmem:[%s16362_s8 + $0x40] sm:$0xff]  ;;  %v14870_v14 = vand.u32 4294901760, %v14849_v5  ;;  %v17366_v44 = vld [vmem:[#allocation65_spill] sm:$0xff]  ;;  %10567 = vmatpush3.msra.mxu0 %v14824_v54 }
 0x432   :  { %6016 = vst [vmem:[#allocation5 + $0x28] sm:$0xff] %v14842_v0  ;;  %v5832_v16 = vadd.f32 %v14657_v39, %v5571_v23  ;;  %v5565_v27 = vadd.f32 %v5564_v47, %v14686_v38  ;;  %v14867_v9 = vand.u32 2147483647, %v5814_v61  ;;  %6207 = vadd.xlane.f32.xlu1 %v6061_v56  ;;  %10640 = vmatprep.subr.mxu1 %v6799_v7  ;;  %v6062_v39 = vld [vmem:[%s16355_s1 + $0x98] sm:$0xff]  ;;  %v14887_v56 = vand.u32 4294901760, %v6371_v20 }
 0x433   :  { %17364 = vst [vmem:[#allocation43_spill] sm:$0xff] %v14858_v3  ;;  %17365 = vst [vmem:[#allocation60_spill] sm:$0xff] %v14870_v14  ;;  %v14874_v55 = vadd.f32 %v17366_v44, %v14637_v45  ;;  %v10466_v28 = vpop.f32.mrf.mxu0  ;;  %v14876_v19 = vpop.f32.mrf.mxu1  ;;  %v14879_v18 = vadd.f32 %v17367_v32, %v5016_v11  ;;  %10641 = vmatpush3.msra.mxu1 %v6799_v7  ;;  %v14885_v38 = vsub.f32 %v6372_v29, %v14858_v3  ;;  %v6370_v45 = vld [vmem:[%s16362_s8 + $0x38] sm:$0xff] }
 0x434   :  { %17369 = vst [vmem:[#allocation71_spill] sm:$0xff] %v14887_v56  ;;  %v14893_v61 = vand.u32 2147483647, %v5832_v16  ;;  %v5826_v32 = vadd.f32 %v14674_v59, %v5565_v27  ;;  %v5583_v11 = vadd.f32 %v10466_v28, %v14691_v62  ;;  %6079 = vadd.xlane.f32.xlu0 %v14822_v37  ;;  %6015 = vst [vmem:[#allocation5 + $0x20] sm:$0xff] %v14867_v9  ;;  %10642 = vmatprep.subr.mxu1 %v6806_v1  ;;  %v17370_v47 = vld [vmem:[#allocation53_spill] sm:$0xff]  ;;  %v6369_v27 = vld [vmem:[%s16362_s8 + $0x30] sm:$0xff] }
 0x435   :  { %17368 = vst [vmem:[#allocation32_spill] sm:$0xff] %v14885_v38  ;;  %v6819_v7 = vsub.f32 %v14849_v5, %v14870_v14  ;;  %v5576_v29 = vpop.f32.mrf.mxu0  ;;  %v14901_v23 = vpop.f32.mrf.mxu1  ;;  %v14904_v44 = vadd.f32 %v17370_v47, %v5037_v36  ;;  %10643 = vmatpush3.msra.mxu1 %v6806_v1  ;;  %v14907_v16 = vand.u32 4294901760, %v14885_v38  ;;  %v14910_v59 = vsub.f32 %v6371_v20, %v14887_v56  ;;  %v6063_v5 = vld [vmem:[%s16355_s1 + $0xa0] sm:$0xff] }
 0x436   :  { %v14912_v62 = vand.u32 4294901760, %v6370_v45  ;;  %6018 = vst [vmem:[#allocation5 + $0x38] sm:$0xff] %v14893_v61  ;;  %v5844_v36 = vadd.f32 %v14688_v8, %v5583_v11  ;;  %v5577_v1 = vadd.f32 %v5576_v29, %v14694_v12  ;;  %v14921_v28 = vand.u32 2147483647, %v5826_v32  ;;  %6209 = vadd.xlane.f32.xlu1 %v6062_v39  ;;  %10644 = vmatprep.subr.mxu1 %v6813_v57  ;;  %v6368_v32 = vld [vmem:[%s16362_s8 + $0x28] sm:$0xff] }
 0x437   :  { %17371 = vst [vmem:[#allocation35_spill] sm:$0xff] %v14907_v16  ;;  %17372 = vst [vmem:[#allocation41_spill] sm:$0xff] %v14910_v59  ;;  %v6820_v20 = vand.u32 4294901760, %v6819_v7  ;;  %v10469_v47 = vpop.f32.mrf.mxu0  ;;  %v14923_v14 = vpop.f32.mrf.mxu1  ;;  %10645 = vmatpush3.msra.mxu1 %v6813_v57  ;;  %v6826_v54 = vsub.f32 %v14885_v38, %v14907_v16  ;;  %v14931_v8 = vand.u32 4294901760, %v14910_v59  ;;  %v14936_v39 = vand.u32 4294901760, %v6369_v27  ;;  %10568 = vmatprep.subr.mxu0 %v14858_v3 }
 0x438   :  { %17373 = vst [vmem:[#allocation47_spill] sm:$0xff] %v14912_v62  ;;  %v14934_v12 = vsub.f32 %v6370_v45, %v14912_v62  ;;  %v14942_v11 = vand.u32 2147483647, %v5844_v36  ;;  %v5838_v57 = vadd.f32 %v14721_v53, %v5577_v1  ;;  %v5595_v7 = vadd.f32 %v10469_v47, %v14697_v13  ;;  %6085 = vadd.xlane.f32.xlu0 %v14842_v0  ;;  %v6367_v53 = vld [vmem:[%s16362_s8 + $0x20] sm:$0xff] }
 0x439   :  { %17374 = vst [vmem:[#allocation38_spill] sm:$0xff] %v14931_v8  ;;  %17376 = vst [vmem:[#allocation44_spill] sm:$0xff] %v14936_v39  ;;  %10646 = vmatprep.subr.mxu1 %v6820_v20  ;;  %v14948_v45 = vand.u32 4294901760, %v6368_v32  ;;  %v5588_v29 = vpop.f32.mrf.mxu0  ;;  %v14950_v16 = vpop.f32.mrf.mxu1  ;;  %v6827_v38 = vand.u32 4294901760, %v6826_v54  ;;  %v6833_v36 = vsub.f32 %v14910_v59, %v14931_v8  ;;  %v14958_v13 = vsub.f32 %v6369_v27, %v14936_v39  ;;  %v6064_v59 = vld [vmem:[%s16355_s1 + $0xa8] sm:$0xff] }
 0x43a   :  { %17375 = vst [vmem:[#allocation69_spill] sm:$0xff] %v14934_v12  ;;  %6017 = vst [vmem:[#allocation5 + $0x30] sm:$0xff] %v14921_v28  ;;  %10647 = vmatpush3.msra.mxu1 %v6820_v20  ;;  %v14955_v63 = vand.u32 4294901760, %v14934_v12  ;;  %10569 = vmatpush3.msra.mxu0 %v14858_v3  ;;  %v5856_v1 = vadd.f32 %v14744_v15, %v5595_v7  ;;  %v5589_v54 = vadd.f32 %v5588_v29, %v14700_v33 }
 0x43b   :  { %17378 = vst [vmem:[#allocation37_spill] sm:$0xff] %v14958_v13  ;;  %6020 = vst [vmem:[#allocation5 + $0x48] sm:$0xff] %v14942_v11  ;;  %v14967_v20 = vand.u32 2147483647, %v5838_v57  ;;  %6211 = vadd.xlane.f32.xlu1 %v6063_v5  ;;  %v14970_v47 = vsub.f32 %v6368_v32, %v14948_v45  ;;  %10570 = vmatprep.subr.mxu0 %v14887_v56  ;;  %v10472_v27 = vpop.f32.mrf.mxu0  ;;  %v14973_v8 = vpop.f32.mrf.mxu1  ;;  %v6834_v3 = vand.u32 4294901760, %v6833_v36  ;;  %v14981_v15 = vand.u32 4294901760, %v14958_v13 }
 0x43c   :  { %17377 = vst [vmem:[#allocation49_spill] sm:$0xff] %v14955_v63  ;;  %10648 = vmatprep.subr.mxu1 %v6827_v38  ;;  %v6840_v33 = vsub.f32 %v14934_v12, %v14955_v63  ;;  %v14983_v5 = vand.u32 4294901760, %v6367_v53  ;;  %10571 = vmatpush3.msra.mxu0 %v14887_v56  ;;  %v6366_v32 = vld [vmem:[%s16362_s8 + $0x18] sm:$0xff]  ;;  %v14989_v57 = vand.u32 2147483647, %v5856_v1  ;;  %v5850_v7 = vadd.f32 %v14763_v25, %v5589_v54 }
 0x43d   :  { %17379 = vst [vmem:[#allocation46_spill] sm:$0xff] %v14970_v47  ;;  %17380 = vst [vmem:[#allocation65_spill] sm:$0xff] %v14981_v15  ;;  %v5607_v29 = vadd.f32 %v10472_v27, %v14708_v2  ;;  %6083 = vadd.xlane.f32.xlu0 %v14867_v9  ;;  %10649 = vmatpush3.msra.mxu1 %v6827_v38  ;;  %v14996_v36 = vand.u32 4294901760, %v14970_v47  ;;  %v5600_v63 = vpop.f32.mrf.mxu0  ;;  %v14998_v12 = vpop.f32.mrf.mxu1  ;;  %v6847_v1 = vsub.f32 %v14958_v13, %v14981_v15  ;;  %v6365_v38 = vld [vmem:[%s16362_s8 + $0x10] sm:$0xff] }
 0x43e   :  { %6019 = vst [vmem:[#allocation5 + $0x40] sm:$0xff] %v14967_v20  ;;  %10650 = vmatprep.subr.mxu1 %v6834_v3  ;;  %v6841_v56 = vand.u32 4294901760, %v6840_v33  ;;  %v15003_v25 = vsub.f32 %v6367_v53, %v14983_v5  ;;  %10572 = vmatprep.subr.mxu0 %v14912_v62  ;;  %v15006_v2 = vand.u32 4294901760, %v6366_v32  ;;  %6022 = vst [vmem:[#allocation5 + $0x58] sm:$0xff] %v14989_v57  ;;  %v15014_v33 = vand.u32 2147483647, %v5850_v7 }
 0x43f   :  { %17381 = vst [vmem:[#allocation50_spill] sm:$0xff] %v14996_v36  ;;  %v5868_v54 = vadd.f32 %v14786_v26, %v5607_v29  ;;  %v5601_v27 = vadd.f32 %v5600_v63, %v14724_v42  ;;  %6213 = vadd.xlane.f32.xlu1 %v6064_v59  ;;  %10651 = vmatpush3.msra.mxu1 %v6834_v3  ;;  %v10475_v15 = vpop.f32.mrf.mxu0  ;;  %v15018_v13 = vpop.f32.mrf.mxu1  ;;  %v6848_v49 = vand.u32 4294901760, %v6847_v1  ;;  %v15030_v63 = vand.u32 4294901760, %v6365_v38  ;;  %v6364_v3 = vld [vmem:[%s16362_s8 + $0x8] sm:$0xff] }
 0x440   :  { %17382 = vst [vmem:[#allocation53_spill] sm:$0xff] %v15003_v25  ;;  %v6854_v53 = vsub.f32 %v14970_v47, %v14996_v36  ;;  %10652 = vmatprep.subr.mxu1 %v6841_v56  ;;  %v15024_v26 = vand.u32 4294901760, %v15003_v25  ;;  %v15027_v42 = vsub.f32 %v6366_v32, %v15006_v2  ;;  %10573 = vmatpush3.msra.mxu0 %v14912_v62  ;;  %6021 = vst [vmem:[#allocation5 + $0x50] sm:$0xff] %v15014_v33 }
 0x441   :  { %17385 = vst [vmem:[#allocation76_spill] sm:$0xff] %v15030_v63  ;;  %v15035_v59 = vand.u32 2147483647, %v5868_v54  ;;  %v5862_v7 = vadd.f32 %v14810_v41, %v5601_v27  ;;  %v5619_v29 = vadd.f32 %v10475_v15, %v14789_v43  ;;  %6089 = vadd.xlane.f32.xlu0 %v14893_v61  ;;  %10653 = vmatpush3.msra.mxu1 %v6841_v56  ;;  %v5612_v1 = vpop.f32.mrf.mxu0  ;;  %v15050_v43 = vand.u32 4294901760, %v6364_v3  ;;  %v6363_v56 = vld [vmem:[%s16362_s8] sm:$0xff] }
 0x442   :  { %17383 = vst [vmem:[#allocation74_spill] sm:$0xff] %v15024_v26  ;;  %17384 = vst [vmem:[#allocation75_spill] sm:$0xff] %v15027_v42  ;;  %v6855_v32 = vand.u32 4294901760, %v6854_v53  ;;  %10654 = vmatprep.subr.mxu1 %v6848_v49  ;;  %v6861_v36 = vsub.f32 %v15003_v25, %v15024_v26  ;;  %v15044_v47 = vand.u32 4294901760, %v15027_v42  ;;  %10574 = vmatprep.subr.mxu0 %v14936_v39  ;;  %v15062_v53 = vand.u32 4294901760, %v6363_v56  ;;  %v15064_v26 = vpop.f32.mrf.mxu1  ;;  %v6066_v25 = vld [vmem:[%s16355_s1 + $0xb8] sm:$0xff] }
 0x443   :  { %v15048_v41 = vsub.f32 %v6365_v38, %v15030_v63  ;;  %17388 = vst [vmem:[#allocation79_spill] sm:$0xff] %v15050_v43  ;;  %6024 = vst [vmem:[#allocation5 + $0x68] sm:$0xff] %v15035_v59  ;;  %v15057_v15 = vadd.f32 %v14828_v60, %v5619_v29  ;;  %v5613_v54 = vadd.f32 %v5612_v1, %v14831_v22  ;;  %v15060_v27 = vand.u32 2147483647, %v5862_v7  ;;  %v10478_v38 = vpop.f32.mrf.mxu0  ;;  %v17393_v1 = vld [vmem:[#allocation36_spill] sm:$0xff] }
 0x444   :  { %17386 = vst [vmem:[#allocation77_spill] sm:$0xff] %v15044_v47  ;;  %6215 = vadd.xlane.f32.xlu1 %v6065_v17  ;;  %10655 = vmatpush3.msra.mxu1 %v6848_v49  ;;  %17389 = vst [vmem:[#allocation80_spill] sm:$0xff] %v15062_v53  ;;  %v6862_v62 = vand.u32 4294901760, %v6861_v36  ;;  %v6868_v60 = vsub.f32 %v15027_v42, %v15044_v47  ;;  %v15076_v17 = vsub.f32 %v6364_v3, %v15050_v43  ;;  %v17394_v47 = vld [vmem:[#allocation68_spill] sm:$0xff] }
 0x445   :  { %17387 = vst [vmem:[#allocation78_spill] sm:$0xff] %v15048_v41  ;;  %10656 = vmatprep.subr.mxu1 %v6855_v32  ;;  %v15072_v22 = vand.u32 4294901760, %v15048_v41  ;;  %10575 = vmatpush3.msra.mxu0 %v14936_v39  ;;  %v5874_v7 = vadd.f32 %v14853_v24, %v5613_v54  ;;  %v5631_v29 = vadd.f32 %v10478_v38, %v14856_v31  ;;  %6023 = vst [vmem:[#allocation5 + $0x60] sm:$0xff] %v15060_v27  ;;  %v5624_v39 = vpop.f32.mrf.mxu0  ;;  %v17398_v38 = vld [vmem:[#allocation58_spill] sm:$0xff] }
 0x446   :  { %17391 = vst [vmem:[#allocation82_spill] sm:$0xff] %v15076_v17  ;;  %6087 = vadd.xlane.f32.xlu0 %v14921_v28  ;;  %10657 = vmatpush3.msra.mxu1 %v6855_v32  ;;  %v15084_v36 = vsub.f32 %v6363_v56, %v15062_v53  ;;  %v5051_v42 = vadd.f32 %v17394_v47, %v17393_v1  ;;  %v6869_v3 = vand.u32 4294901760, %v6868_v60  ;;  %v15092_v31 = vand.u32 4294901760, %v15076_v17 }
 0x447   :  { %17390 = vst [vmem:[#allocation81_spill] sm:$0xff] %v15072_v22  ;;  %10658 = vmatprep.subr.mxu1 %v6862_v62  ;;  %v6875_v49 = vsub.f32 %v15048_v41, %v15072_v22  ;;  %10576 = vmatprep.subr.mxu0 %v14948_v45  ;;  %v17396_v24 = vand.u32 2147483647, %v15057_v15  ;;  %v15097_v32 = vadd.f32 %v14876_v19, %v5631_v29  ;;  %v15100_v47 = vand.u32 2147483647, %v5874_v7  ;;  %v10481_v1 = vpop.f32.mrf.mxu0  ;;  %v17399_v22 = vld [vmem:[#allocation57_spill] sm:$0xff] }
 0x448   :  { %17392 = vst [vmem:[#allocation83_spill] sm:$0xff] %v15084_v36  ;;  %17395 = vst [vmem:[#allocation36_spill] sm:$0xff] %v15092_v31  ;;  %v5625_v56 = vadd.f32 %v5624_v39, %v14879_v18  ;;  %6217 = vadd.xlane.f32.xlu1 %v6066_v25  ;;  %10659 = vmatpush3.msra.mxu1 %v6862_v62  ;;  %v15103_v54 = vand.u32 4294901760, %v15084_v36  ;;  %v5044_v60 = vadd.f32 %v17398_v38, %v14662_v35  ;;  %v6067_v18 = vld [vmem:[%s16355_s1 + $0xc0] sm:$0xff]  ;;  %v17402_v29 = vld [vmem:[#allocation11_spill] sm:$0xff] }
 0x449   :  { %6026 = vst [vmem:[#allocation5 + $0x78] sm:$0xff] %v17396_v24  ;;  %v5342_v41 = vadd.f32 %v17399_v22, %v14874_v55  ;;  %v15109_v24 = vpop.f32.mrf.mxu1  ;;  %10660 = vmatprep.subr.mxu1 %v6869_v3  ;;  %v6876_v19 = vand.u32 4294901760, %v6875_v49  ;;  %v6882_v62 = vsub.f32 %v15076_v17, %v15092_v31  ;;  %10577 = vmatpush3.msra.mxu0 %v14948_v45  ;;  %6025 = vst [vmem:[#allocation5 + $0x70] sm:$0xff] %v15100_v47  ;;  %v15129_v22 = vld [vmem:[%s16361_s7] ss:$0 sm:$0xff]  ;;  %v17403_v38 = vld [vmem:[#allocation61_spill] sm:$0xff] }
 0x44a   :  { %17397 = vst [vmem:[#allocation68_spill] sm:$0xff] %v15103_v54  ;;  %v15119_v35 = vadd.f32 %v14901_v23, %v5625_v56  ;;  %v5643_v55 = vadd.f32 %v10481_v1, %v14904_v44  ;;  %6093 = vadd.xlane.f32.xlu0 %v14942_v11  ;;  %10661 = vmatpush3.msra.mxu1 %v6869_v3  ;;  %v17400_v49 = vld [vmem:[#allocation26_spill] sm:$0xff]  ;;  %v17401_v23 = vld [vmem:[#allocation48_spill] sm:$0xff]  ;;  %v5636_v44 = vpop.f32.mrf.mxu0  ;;  %v17404_v3 = vand.u32 2147483647, %v15097_v32 }
 0x44b   :  { %v6889_v25 = vsub.f32 %v15084_v36, %v15103_v54  ;;  %v4477_v7 = vadd.f32 %v15129_v22, %v17400_v49  ;;  %v5065_v56 = vadd.f32 %v17402_v29, %v17401_v23  ;;  %v5366_v1 = vadd.f32 %v17403_v38, %v5051_v42  ;;  %10662 = vmatprep.subr.mxu1 %v6876_v19  ;;  %v17405_v29 = vld [vmem:[#allocation63_spill] sm:$0xff]  ;;  %v15144_v42 = vpop.f32.mrf.mxu1  ;;  %v17406_v38 = vld [vmem:[#allocation70_spill] sm:$0xff] }
 0x44c   :  { %v6883_v39 = vand.u32 4294901760, %v6882_v62  ;;  %10578 = vmatprep.subr.mxu0 %v14983_v5  ;;  %6028 = vst [vmem:[#allocation5 + $0x88] sm:$0xff] %v17404_v3  ;;  %v16705_v54 = vand.u32 2147483647, %v15119_v35  ;;  %v15141_v31 = vadd.f32 %v14923_v14, %v5643_v55  ;;  %v5637_v36 = vadd.f32 %v5636_v44, %v5342_v41  ;;  %6219 = vadd.xlane.f32.xlu1 %v6067_v18  ;;  %v10484_v23 = vpop.f32.mrf.mxu0  ;;  %v6068_v62 = vld [vmem:[%s16355_s1 + $0xc8] sm:$0xff]  ;;  %v17409_v44 = vld [vmem:[#allocation14_spill] sm:$0xff] }
 0x44d   :  { %10663 = vmatpush3.msra.mxu1 %v6876_v19  ;;  %v6890_v49 = vand.u32 4294901760, %v6889_v25  ;;  %v5358_v17 = vadd.f32 %v17405_v29, %v5044_v60  ;;  %10579 = vmatpush3.msra.mxu0 %v14983_v5  ;;  %v5058_v14 = vadd.f32 %v17406_v38, %v14665_v58  ;;  %v5655_v60 = vadd.f32 %v10484_v23, %v5366_v1  ;;  %v17407_v19 = vld [vmem:[#allocation51_spill] sm:$0xff]  ;;  %v17411_v1 = vld [vmem:[#allocation66_spill] sm:$0xff] }
 0x44e   :  { %10664 = vmatprep.subr.mxu1 %v6883_v39  ;;  %6027 = vst [vmem:[#allocation5 + $0x80] sm:$0xff] %v16705_v54  ;;  %v16703_v41 = vand.u32 2147483647, %v15141_v31  ;;  %v15156_v18 = vadd.f32 %v14950_v16, %v5637_v36  ;;  %6091 = vadd.xlane.f32.xlu0 %v14967_v20  ;;  %v4497_v55 = vadd.f32 %v15129_v22, %v17407_v19  ;;  %v17408_v25 = vld [vmem:[#allocation27_spill] sm:$0xff]  ;;  %v5648_v38 = vpop.f32.mrf.mxu0  ;;  %v17412_v19 = vld [vmem:[#allocation24_spill] sm:$0xff] }
 0x44f   :  { %10665 = vmatpush3.msra.mxu1 %v6883_v39  ;;  %v5079_v3 = vadd.f32 %v17409_v44, %v17408_v25  ;;  %v17410_v29 = vld [vmem:[#allocation23_spill] sm:$0xff]  ;;  %10580 = vmatprep.subr.mxu0 %v15006_v2  ;;  %v15169_v36 = vadd.f32 %v14973_v8, %v5655_v60  ;;  %v5649_v39 = vadd.f32 %v5648_v38, %v5358_v17  ;;  %v15173_v44 = vpop.f32.mrf.mxu1  ;;  %v17414_v60 = vld [vmem:[#allocation33_spill] sm:$0xff]  ;;  %v17415_v38 = vld [vmem:[#allocation30_spill] sm:$0xff] }
 0x450   :  { %v4782_v58 = vadd.f32 %v17410_v29, %v4477_v7  ;;  %10666 = vmatprep.subr.mxu1 %v6890_v49  ;;  %6030 = vst [vmem:[#allocation5 + $0x98] sm:$0xff] %v16703_v41  ;;  %v16704_v16 = vand.u32 2147483647, %v15156_v18  ;;  %v5382_v23 = vadd.f32 %v17411_v1, %v5065_v56  ;;  %6221 = vadd.xlane.f32.xlu1 %v6068_v62  ;;  %v10487_v7 = vpop.f32.mrf.mxu0  ;;  %v6069_v29 = vld [vmem:[%s16355_s1 + $0xd0] sm:$0xff]  ;;  %v17417_v54 = vld [vmem:[#allocation31_spill] sm:$0xff] }
 0x451   :  { %10667 = vmatpush3.msra.mxu1 %v6890_v49  ;;  %10581 = vmatpush3.msra.mxu0 %v15006_v2  ;;  %v16706_v8 = vand.u32 2147483647, %v15169_v36  ;;  %v15184_v17 = vadd.f32 %v14998_v12, %v5649_v39  ;;  %v17413_v49 = vld [vmem:[#allocation62_spill] sm:$0xff]  ;;  %v4794_v1 = vadd.f32 %v17415_v38, %v4497_v55  ;;  %v17416_v41 = vld [vmem:[#allocation40_spill] sm:$0xff]  ;;  %v17420_v38 = vld [vmem:[#allocation29_spill] sm:$0xff] }
 0x452   :  { %v5072_v25 = vadd.f32 %v17412_v19, %v4782_v58  ;;  %10796 = vmatprep.subr.mxu1 %v14710_v10  ;;  %6029 = vst [vmem:[#allocation5 + $0x90] sm:$0xff] %v16704_v16  ;;  %v5667_v56 = vadd.f32 %v10487_v7, %v5382_v23  ;;  %6097 = vadd.xlane.f32.xlu0 %v14989_v57  ;;  %v5660_v19 = vpop.f32.mrf.mxu0  ;;  %v17418_v12 = vld [vmem:[#allocation22_spill] sm:$0xff] }
 0x453   :  { %v5374_v62 = vadd.f32 %v17413_v49, %v5058_v14  ;;  %10582 = vmatprep.subr.mxu0 %v15030_v63  ;;  %v4517_v58 = vadd.f32 %v15129_v22, %v17414_v60  ;;  %v5398_v16 = vadd.f32 %v17416_v41, %v5079_v3  ;;  %v5093_v39 = vadd.f32 %v17418_v12, %v17417_v54  ;;  %v15202_v49 = vpop.xlane.xlu1 %6173  ;;  %v5945_v41 = vpop.f32.mrf.mxu1  ;;  %v17419_v3 = vld [vmem:[#allocation39_spill] sm:$0xff]  ;;  %v6070_v54 = vld [vmem:[%s16355_s1 + $0xd8] sm:$0xff] }
 0x454   :  { %10583 = vmatpush3.msra.mxu0 %v15030_v63  ;;  %6032 = vst [vmem:[#allocation5 + $0xa8] sm:$0xff] %v16706_v8  ;;  %v16707_v14 = vand.u32 2147483647, %v15184_v17  ;;  %v15200_v23 = vadd.f32 %v15018_v13, %v5667_v56  ;;  %6223 = vadd.xlane.f32.xlu1 %v6069_v29  ;;  %v10490_v55 = vpop.f32.mrf.mxu0  ;;  %v5390_v60 = vadd.f32 %v17419_v3, %v5072_v25  ;;  %v17421_v25 = vld [vmem:[#allocation52_spill] sm:$0xff]  ;;  %11045 = vrcp.f32 %v15202_v49  ;;  %v11174_v49 = vld [vmem:[%s16355_s1 + $0x8] sm:$0xff] }
 0x455   :  { %v5661_v7 = vadd.f32 %v5660_v19, %v5374_v62  ;;  %10584 = vmatprep.subr.mxu0 %v15050_v43  ;;  %v5086_v12 = vadd.f32 %v17420_v38, %v4794_v1  ;;  %v5679_v56 = vadd.f32 %v10490_v55, %v5398_v16  ;;  %v4537_v62 = vadd.f32 %v15129_v22, %v17421_v25  ;;  %v17422_v19 = vld [vmem:[#allocation16_spill] sm:$0xff]  ;;  %v17423_v1 = vld [vmem:[#allocation25_spill] sm:$0xff]  ;;  %v17424_v55 = vld [vmem:[#allocation54_spill] sm:$0xff]  ;;  %v10552_v22 = vpop.f32.mrf.mxu1 }
 0x456   :  { %10585 = vmatpush3.msra.mxu0 %v15050_v43  ;;  %6031 = vst [vmem:[#allocation5 + $0xa0] sm:$0xff] %v16707_v14  ;;  %v16708_v13 = vand.u32 2147483647, %v15200_v23  ;;  %6095 = vadd.xlane.f32.xlu0 %v15014_v33  ;;  %v5107_v3 = vadd.f32 %v14619_v30, %v17422_v19  ;;  %v4806_v38 = vadd.f32 %v17423_v1, %v4517_v58  ;;  %v5672_v8 = vpop.f32.mrf.mxu0  ;;  %v6071_v25 = vld [vmem:[%s16355_s1 + $0xe0] sm:$0xff] }
 0x457   :  { %v15215_v29 = vadd.f32 %v15064_v26, %v5661_v7  ;;  %10586 = vmatprep.subr.mxu0 %v15062_v53  ;;  %v15229_v16 = vadd.f32 %v15109_v24, %v5679_v56  ;;  %v5673_v7 = vadd.f32 %v5672_v8, %v5390_v60  ;;  %v5414_v14 = vadd.f32 %v17424_v55, %v5093_v39  ;;  %v17425_v60 = vld [vmem:[#allocation67_spill] sm:$0xff]  ;;  %v17426_v56 = vld [vmem:[#allocation13_spill] sm:$0xff] }
 0x458   :  { %10587 = vmatpush3.msra.mxu0 %v15062_v53  ;;  %6034 = vst [vmem:[#allocation5 + $0xb8] sm:$0xff] %v16708_v13  ;;  %6225 = vadd.xlane.f32.xlu1 %v6070_v54  ;;  %v5100_v30 = vadd.f32 %v14639_v34, %v4806_v38  ;;  %v10493_v58 = vpop.f32.mrf.mxu0  ;;  %v5406_v54 = vadd.f32 %v17425_v60, %v5086_v12  ;;  %v15245_v34 = vpop.xlane.xlu1 %6175  ;;  %v17427_v38 = vld [vmem:[#allocation56_spill] sm:$0xff]  ;;  %v17428_v13 = vld [vmem:[#allocation73_spill] sm:$0xff]  ;;  %v17429_v60 = vld [vmem:[#allocation59_spill] sm:$0xff] }
 0x459   :  { %v16709_v26 = vand.u32 2147483647, %v15215_v29  ;;  %10716 = vmatprep.subr.mxu0 %v14737_v50  ;;  %v16710_v24 = vand.u32 2147483647, %v15229_v16  ;;  %v15241_v8 = vadd.f32 %v15144_v42, %v5673_v7  ;;  %v5691_v39 = vadd.f32 %v10493_v58, %v5414_v14  ;;  %v5957_v12 = vpop.f32.mrf.mxu1 }
 0x45a   :  { %6101 = vadd.xlane.f32.xlu0 %v15035_v59  ;;  %v4818_v19 = vadd.f32 %v17426_v56, %v4537_v62  ;;  %v5684_v1 = vpop.f32.mrf.mxu0  ;;  %v5430_v55 = vadd.f32 %v17427_v38, %v5107_v3  ;;  %v5422_v62 = vadd.f32 %v17429_v60, %v5100_v30  ;;  %v6072_v3 = vld [vmem:[%s16355_s1 + $0xe8] sm:$0xff] }
 0x45b   :  { %6033 = vst [vmem:[#allocation5 + $0xb0] sm:$0xff] %v16709_v26  ;;  %v5121_v26 = vadd.f32 %v14655_v46, %v17428_v13  ;;  %6036 = vst [vmem:[#allocation5 + $0xc8] sm:$0xff] %v16710_v24  ;;  %v6003_v42 = vand.u32 2147483647, %v15241_v8  ;;  %v15255_v14 = vadd.f32 %v15173_v44, %v5691_v39  ;;  %v5685_v7 = vadd.f32 %v5684_v1, %v5406_v54  ;;  %v17430_v1 = vld [vmem:[#allocation19_spill] sm:$0xff]  ;;  %v10555_v60 = vpop.f32.mrf.mxu1 }
 0x45c   :  { %6227 = vadd.xlane.f32.xlu1 %v6071_v25  ;;  %v10496_v58 = vpop.f32.mrf.mxu0  ;;  %v5114_v46 = vadd.f32 %v14669_v21, %v4818_v19  ;;  %v6178_v38 = vpop.xlane.xlu1 %6177  ;;  %v6073_v21 = vld [vmem:[%s16355_s1 + $0xf0] sm:$0xff] }
 0x45d   :  { %6035 = vst [vmem:[#allocation5 + $0xc0] sm:$0xff] %v6003_v42  ;;  %v6006_v13 = vand.u32 2147483647, %v15255_v14  ;;  %v5946_v56 = vadd.f32 %v5945_v41, %v5685_v7  ;;  %v5703_v8 = vadd.f32 %v10496_v58, %v5430_v55  ;;  %v5446_v30 = vadd.f32 %v17430_v1, %v5121_v26  ;;  %v17432_v7 = vld [vmem:[#allocation18_spill] sm:$0xff] }
 0x45e   :  { %6099 = vadd.xlane.f32.xlu0 %v15060_v27  ;;  %v5696_v44 = vpop.f32.mrf.mxu0  ;;  %v17431_v14 = vand.u32 2147483647, %v15057_v15  ;;  %v17435_v1 = vand.u32 2147483647, %v15141_v31  ;;  %v17440_v31 = vand.u32 2147483647, %v15215_v29 }
 0x45f   :  { %6038 = vst [vmem:[#allocation5 + $0xd8] sm:$0xff] %v6006_v13  ;;  %v6005_v25 = vand.u32 2147483647, %v5946_v56  ;;  %v5964_v39 = vadd.f32 %v10552_v22, %v5703_v8  ;;  %v5697_v54 = vadd.f32 %v5696_v44, %v5422_v62  ;;  %v5438_v22 = vadd.f32 %v17432_v7, %v5114_v46  ;;  %v5969_v56 = vpop.f32.mrf.mxu1  ;;  %v6074_v8 = vld [vmem:[%s16355_s1 + $0xf8] sm:$0xff] }
 0x460   :  { %6229 = vadd.xlane.f32.xlu1 %v6072_v3  ;;  %v10499_v24 = vpop.f32.mrf.mxu0  ;;  %v6180_v15 = vpop.xlane.xlu1 %6179  ;;  %v17433_v46 = vand.u32 2147483647, %v15097_v32 }
 0x461   :  { %6037 = vst [vmem:[#allocation5 + $0xd0] sm:$0xff] %v6005_v25  ;;  %v6008_v41 = vand.u32 2147483647, %v5964_v39  ;;  %v5958_v19 = vadd.f32 %v5957_v12, %v5697_v54  ;;  %v5715_v55 = vadd.f32 %v10499_v24, %v5446_v30  ;;  %v17434_v54 = vand.u32 2147483647, %v15119_v35 }
 0x462   :  { %6105 = vadd.xlane.f32.xlu0 %v17431_v14  ;;  %v5708_v58 = vpop.f32.mrf.mxu0  ;;  %v17439_v35 = vand.u32 2147483647, %v15200_v23 }
 0x463   :  { %6040 = vst [vmem:[#allocation5 + $0xe8] sm:$0xff] %v6008_v41  ;;  %v6007_v26 = vand.u32 2147483647, %v5958_v19  ;;  %v5976_v62 = vadd.f32 %v10555_v60, %v5715_v55  ;;  %v5709_v3 = vadd.f32 %v5708_v58, %v5438_v22  ;;  %v17436_v60 = vand.u32 2147483647, %v15156_v18  ;;  %v6172_v58 = vpop.xlane.xlu0 %6171 }
 0x464   :  { %6231 = vadd.xlane.f32.xlu1 %v6073_v21  ;;  %v6182_v39 = vpop.xlane.xlu1 %6181  ;;  %v17437_v19 = vand.u32 2147483647, %v15169_v36  ;;  %v17438_v55 = vand.u32 2147483647, %v15184_v17  ;;  %v17441_v18 = vand.u32 2147483647, %v15229_v16  ;;  %11047 = vrcp.f32 %v6172_v58 }
 0x465   :  { %6039 = vst [vmem:[#allocation5 + $0xe0] sm:$0xff] %v6007_v26  ;;  %v6010_v44 = vand.u32 2147483647, %v5976_v62  ;;  %v5970_v12 = vadd.f32 %v5969_v56, %v5709_v3 }
 0x466   :  { %6103 = vadd.xlane.f32.xlu0 %v15100_v47 }
 0x467   :  { %6042 = vst [vmem:[#allocation5 + $0xf8] sm:$0xff] %v6010_v44  ;;  %v6009_v24 = vand.u32 2147483647, %v5970_v12 }
 0x468   :  { %6233 = vadd.xlane.f32.xlu1 %v6074_v8  ;;  %v15281_v30 = vpop.xlane.xlu1 %6183 }
 0x469   :  { %6041 = vst [vmem:[#allocation5 + $0xf0] sm:$0xff] %v6009_v24 }
 0x46a   :  { %6109 = vadd.xlane.f32.xlu0 %v17433_v46  ;;  %v11175_v46 = vld [vmem:[%s16355_s1] sm:$0xff] }
 0x46c   :  { %v6186_v21 = vpop.xlane.xlu1 %6185 }
 0x46e   :  { %6107 = vadd.xlane.f32.xlu0 %v17434_v54 }
 0x470   :  { %v15289_v32 = vpop.xlane.xlu1 %6187 }
 0x472   :  { %6113 = vadd.xlane.f32.xlu0 %v17435_v1 }
 0x474   :  { %v15293_v14 = vpop.xlane.xlu1 %6189 }
 0x476   :  { %6111 = vadd.xlane.f32.xlu0 %v17436_v60 }
 0x478   :  { %v15299_v7 = vpop.xlane.xlu1 %6191 }
 0x47a   :  { %6117 = vadd.xlane.f32.xlu0 %v17437_v19 }
 0x47c   :  { %v15301_v36 = vpop.xlane.xlu1 %6193 }
 0x47e   :  { %6115 = vadd.xlane.f32.xlu0 %v17438_v55 }
 0x480   :  { %v15303_v17 = vpop.xlane.xlu1 %6195 }
 0x482   :  { %6121 = vadd.xlane.f32.xlu0 %v17439_v35 }
 0x484   :  { %v15305_v23 = vpop.xlane.xlu1 %6197 }
 0x486   :  { %6119 = vadd.xlane.f32.xlu0 %v17440_v31 }
 0x488   :  { %v15307_v22 = vpop.xlane.xlu1 %6199 }
 0x48a   :  { %6125 = vadd.xlane.f32.xlu0 %v17441_v18 }
 0x48c   :  { %v15309_v29 = vpop.xlane.xlu1 %6201 }
 0x48e   :  { %6123 = vadd.xlane.f32.xlu0 %v6003_v42 }
 0x490   :  { %v15311_v16 = vpop.xlane.xlu1 %6203 }
 0x492   :  { %6129 = vadd.xlane.f32.xlu0 %v6006_v13 }
 0x496   :  { %6127 = vadd.xlane.f32.xlu0 %v6005_v25 }
 0x49a   :  { %6133 = vadd.xlane.f32.xlu0 %v6008_v41 }
 0x49e   :  { %6131 = vadd.xlane.f32.xlu0 %v6007_v26  ;;  %v11046_v26 = vpop.eup %11045 }
 0x49f   :  { %v11048_v62 = vpop.eup %11047  ;;  %v6300_v8 = vmul.f32 %v11174_v49, %v11046_v26 }
 0x4a2   :  { %6135 = vadd.xlane.f32.xlu0 %v6009_v24 }
 0x4a6   :  { %6137 = vadd.xlane.f32.xlu0 %v6010_v44 }
 0x4b3   :  { %v6078_v42 = vpop.xlane.xlu1 %6077 }
 0x4b4   :  { %11049 = vrcp.f32 %v6078_v42 }
 0x4b5   :  { %v6076_v13 = vpop.xlane.xlu0 %6075 }
 0x4b6   :  { %11051 = vrcp.f32 %v6076_v13 }
 0x4b7   :  { %11053 = vrcp.f32 %v6178_v38 }
 0x4b9   :  { %v6082_v25 = vpop.xlane.xlu0 %6081 }
 0x4ba   :  { %11055 = vrcp.f32 %v6082_v25 }
 0x4bb   :  { %11057 = vrcp.f32 %v15245_v34 }
 0x4bc   :  { %11059 = vrcp.f32 %v6182_v39  ;;  %v6299_v39 = vmul.f32 %v11175_v46, %v11048_v62  ;;  %v11177_v62 = vld [vmem:[%s16355_s1 + $0x10] sm:$0xff] }
 0x4bd   :  { %v6080_v41 = vpop.xlane.xlu0 %6079 }
 0x4be   :  { %11061 = vrcp.f32 %v6080_v41 }
 0x4c1   :  { %v11050_v3 = vpop.eup %11049  ;;  %v6086_v56 = vpop.xlane.xlu0 %6085 }
 0x4c2   :  { %v6268_v44 = vmul.f32 %v11050_v3, %v14756_v40  ;;  %11063 = vrcp.f32 %v6086_v56  ;;  %v11176_v40 = vld [vmem:[%s16355_s1 + $0x18] sm:$0xff] }
 0x4c3   :  { %v11052_v38 = vpop.eup %11051  ;;  %11065 = vrcp.f32 %v6180_v15 }
 0x4c4   :  { %v11054_v12 = vpop.eup %11053  ;;  %v6332_v24 = vsub.f32 %v6268_v44, %v6300_v8  ;;  %v6267_v34 = vmul.f32 %v11052_v38, %v14781_v51 }
 0x4c5   :  { %v6302_v15 = vmul.f32 %v11176_v40, %v11054_v12 }
 0x4c6   :  { %v6084_v54 = vpop.xlane.xlu0 %6083  ;;  %v6331_v1 = vsub.f32 %v6267_v34, %v6299_v39  ;;  %v15323_v60 = vand.u32 4294901760, %v6332_v24  ;;  %v8426_v56 = vmul.f32 %v6332_v24, %v6332_v24 }
 0x4c7   :  { %11067 = vrcp.f32 %v6084_v54  ;;  %v11056_v19 = vpop.eup %11055 }
 0x4c8   :  { %17442 = vst [vmem:[#allocation58_spill] sm:$0xff] %v15323_v60  ;;  %11069 = vrcp.f32 %v6186_v21  ;;  %v15328_v55 = vand.u32 4294901760, %v6331_v1  ;;  %v15331_v51 = vsub.f32 %v6332_v24, %v15323_v60  ;;  %v6270_v35 = vmul.f32 %v11056_v19, %v14801_v52  ;;  %v11058_v31 = vpop.eup %11057 }
 0x4c9   :  { %v11060_v58 = vpop.eup %11059  ;;  %v8425_v25 = vmul.f32 %v6331_v1, %v6331_v1  ;;  %v6301_v3 = vmul.f32 %v11177_v62, %v11058_v31 }
 0x4ca   :  { %17443 = vst [vmem:[#allocation57_spill] sm:$0xff] %v15328_v55  ;;  %v6090_v18 = vpop.xlane.xlu0 %6089  ;;  %10668 = vmatprep.mubr.f32.mxu1 %v15328_v55  ;;  %v15336_v21 = vsub.f32 %v6331_v1, %v15328_v55  ;;  %v16715_v42 = vand.u32 4294901760, %v15331_v51  ;;  %v6334_v41 = vsub.f32 %v6270_v35, %v6302_v15 }
 0x4cb   :  { %11071 = vrcp.f32 %v6090_v18  ;;  %v11062_v13 = vpop.eup %11061  ;;  %10669 = vmatmul.mubr.f32.vlgmr.msra.gmra.mxu1 %v15323_v60  ;;  %v8457_v24 = vadd.f32 %v8426_v56, %v8425_v25  ;;  %v15375_v25 = vpop.xlane.xlu1 %6205  ;;  %v11204_v60 = vld [vmem:[#allocation5 + $0xb8] sm:$0xff] }
 0x4cc   :  { %11073 = vrcp.f32 %v15281_v30  ;;  %v16718_v52 = vand.u32 4294901760, %v15336_v21  ;;  %v6269_v26 = vmul.f32 %v11062_v13, %v14822_v37  ;;  %10797 = vmatpush3.msra.mxu1 %v14710_v10  ;;  %v6473_v8 = vsub.f32 %v15331_v51, %v16715_v42 }
 0x4cd   :  { %11075 = vrcp.f32 %v15293_v14  ;;  %v15351_v30 = vand.u32 4294901760, %v6334_v41  ;;  %10798 = vmatprep.subr.mxu1 %v14726_v4  ;;  %v11178_v14 = vld [vmem:[%s16355_s1 + $0x28] sm:$0xff]  ;;  %v8428_v35 = vmul.f32 %v6334_v41, %v6334_v41 }
 0x4ce   :  { %v6463_v37 = vsub.f32 %v15336_v21, %v16718_v52  ;;  %v6333_v44 = vsub.f32 %v6269_v26, %v6301_v3  ;;  %v6304_v38 = vmul.f32 %v11178_v14, %v11060_v58  ;;  %10799 = vmatpush3.msra.mxu1 %v14726_v4  ;;  %v6474_v15 = vand.u32 4294901760, %v6473_v8  ;;  %v17448_v14 = vld [vmem:[#allocation17_spill] sm:$0xff] }
 0x4cf   :  { %v6088_v49 = vpop.xlane.xlu0 %6087  ;;  %17444 = vst [vmem:[#allocation26_spill] sm:$0xff] %v15351_v30  ;;  %v11064_v12 = vpop.eup %11063  ;;  %v15362_v34 = vsub.f32 %v6334_v41, %v15351_v30  ;;  %10800 = vmatprep.subr.mxu1 %v14728_v6  ;;  %v11179_v41 = vld [vmem:[%s16355_s1 + $0x20] sm:$0xff] }
 0x4d0   :  { %11077 = vrcp.f32 %v6088_v49  ;;  %v11066_v46 = vpop.eup %11065  ;;  %v6464_v39 = vand.u32 4294901760, %v6463_v37  ;;  %v15365_v54 = vand.u32 4294901760, %v6333_v44  ;;  %v8427_v1 = vmul.f32 %v6333_v44, %v6333_v44  ;;  %10801 = vmatpush3.msra.mxu1 %v14728_v6 }
 0x4d1   :  { %v6272_v19 = vmul.f32 %v11064_v12, %v14842_v0  ;;  %v16713_v31 = vand.u32 4294901760, %v15362_v34  ;;  %10802 = vmatprep.subr.mxu1 %v14730_v48  ;;  %v6303_v26 = vmul.f32 %v11179_v41, %v11066_v46 }
 0x4d2   :  { %17445 = vst [vmem:[#allocation48_spill] sm:$0xff] %v15365_v54  ;;  %10588 = vmatprep.mubr.f32.mxu0 %v6464_v39  ;;  %10671 = vmatprep.mubr.f32.mxu1 %v15365_v54  ;;  %v8458_v18 = vadd.f32 %v8457_v24, %v8427_v1  ;;  %v15373_v58 = vsub.f32 %v6333_v44, %v15365_v54  ;;  %v17447_v44 = vld [vmem:[#allocation42_spill] sm:$0xff]  ;;  %v11180_v24 = vld [vmem:[%s16355_s1 + $0x38] sm:$0xff]  ;;  %v17449_v39 = vld [vmem:[#allocation72_spill] sm:$0xff] }
 0x4d3   :  { %v6094_v40 = vpop.xlane.xlu0 %6093  ;;  %v6336_v13 = vsub.f32 %v6272_v19, %v6304_v38  ;;  %10589 = vmatmul.mubr.f32.vlgmr.msra.gmra.mxu0 %v6474_v15  ;;  %10672 = vmatmul.mubr.f32.gmra.mxu1 %v15351_v30  ;;  %v6493_v37 = vsub.f32 %v15362_v34, %v16713_v31  ;;  %v17450_v1 = vld [vmem:[#allocation64_spill] sm:$0xff] }
 0x4d4   :  { %11079 = vrcp.f32 %v6094_v40  ;;  %v11068_v0 = vpop.eup %11067  ;;  %v8459_v3 = vadd.f32 %v8458_v18, %v8428_v35  ;;  %v16714_v56 = vand.u32 4294901760, %v15373_v58  ;;  %10717 = vmatpush3.msra.mxu0 %v14737_v50  ;;  %10803 = vmatpush3.msra.mxu1 %v14730_v48  ;;  %v15409_v35 = vpop.xlane.xlu1 %6207  ;;  %v17460_v31 = vld [vmem:[#allocation32_spill] sm:$0xff] }
 0x4d5   :  { %11081 = vrcp.f32 %v15289_v32  ;;  %v11070_v62 = vpop.eup %11069  ;;  %v6271_v49 = vmul.f32 %v11068_v0, %v14867_v9  ;;  %v15384_v8 = vand.u32 4294901760, %v6336_v13  ;;  %10718 = vmatprep.subr.mxu0 %v17447_v44  ;;  %10804 = vmatprep.subr.mxu1 %v17448_v14  ;;  %v6494_v0 = vand.u32 4294901760, %v6493_v37 }
 0x4d6   :  { %v6483_v9 = vsub.f32 %v15373_v58, %v16714_v56  ;;  %10719 = vmatpush3.msra.mxu0 %v17447_v44  ;;  %10805 = vmatpush3.msra.mxu1 %v17448_v14  ;;  %v6306_v46 = vmul.f32 %v11180_v24, %v11070_v62  ;;  %v17452_v62 = vld [vmem:[#allocation45_spill] sm:$0xff]  ;;  %v17461_v56 = vld [vmem:[#allocation44_spill] sm:$0xff] }
 0x4d7   :  { %17446 = vst [vmem:[#allocation11_spill] sm:$0xff] %v15384_v8  ;;  %v6092_v32 = vpop.xlane.xlu0 %6091  ;;  %v6335_v38 = vsub.f32 %v6271_v49, %v6303_v26  ;;  %v15397_v12 = vsub.f32 %v6336_v13, %v15384_v8  ;;  %10720 = vmatprep.subr.mxu0 %v17449_v39  ;;  %10806 = vmatprep.subr.mxu1 %v17450_v1  ;;  %v17453_v49 = vld [vmem:[#allocation43_spill] sm:$0xff] }
 0x4d8   :  { %11083 = vrcp.f32 %v6092_v32  ;;  %v11072_v50 = vpop.eup %11071  ;;  %v6484_v19 = vand.u32 4294901760, %v6483_v9  ;;  %10721 = vmatpush3.msra.mxu0 %v17449_v39  ;;  %10807 = vmatpush3.msra.mxu1 %v17450_v1  ;;  %v8430_v9 = vmul.f32 %v6336_v13, %v6336_v13 }
 0x4d9   :  { %11085 = vrcp.f32 %v15301_v36  ;;  %v15407_v40 = vand.u32 4294901760, %v6335_v38  ;;  %v8429_v15 = vmul.f32 %v6335_v38, %v6335_v38  ;;  %v11074_v36 = vpop.eup %11073  ;;  %v16711_v41 = vand.u32 4294901760, %v15397_v12  ;;  %10722 = vmatprep.subr.mxu0 %v17452_v62  ;;  %10808 = vmatprep.subr.mxu1 %v17453_v49 }
 0x4da   :  { %v6274_v26 = vmul.f32 %v11072_v50, %v14893_v61  ;;  %v11076_v32 = vpop.eup %11075  ;;  %10591 = vmatprep.mubr.f32.mxu0 %v6484_v19  ;;  %10723 = vmatpush3.msra.mxu0 %v17452_v62  ;;  %v17455_v19 = vld [vmem:[#allocation28_spill] sm:$0xff] }
 0x4db   :  { %17451 = vst [vmem:[#allocation61_spill] sm:$0xff] %v15407_v40  ;;  %v6098_v18 = vpop.xlane.xlu0 %6097  ;;  %10674 = vmatprep.mubr.f32.mxu1 %v15407_v40  ;;  %v8460_v44 = vadd.f32 %v8459_v3, %v8429_v15  ;;  %v15419_v24 = vsub.f32 %v6335_v38, %v15407_v40  ;;  %10592 = vmatmul.mubr.f32.gmra.mxu0 %v6494_v0  ;;  %v11181_v3 = vld [vmem:[%s16355_s1 + $0x30] sm:$0xff] }
 0x4dc   :  { %11087 = vrcp.f32 %v6098_v18  ;;  %10675 = vmatmul.mubr.f32.gmra.mxu1 %v15384_v8  ;;  %v6338_v61 = vsub.f32 %v6274_v26, %v6306_v46  ;;  %v6305_v13 = vmul.f32 %v11181_v3, %v11074_v36  ;;  %v6513_v38 = vsub.f32 %v15397_v12, %v16711_v41  ;;  %10724 = vmatprep.subr.mxu0 %v17455_v19  ;;  %v15444_v26 = vpop.xlane.xlu1 %6209 }
 0x4dd   :  { %v11078_v39 = vpop.eup %11077  ;;  %11089 = vrcp.f32 %v15299_v7  ;;  %v8461_v37 = vadd.f32 %v8460_v44, %v8430_v9  ;;  %v16712_v50 = vand.u32 4294901760, %v15419_v24  ;;  %10809 = vmatpush3.msra.mxu1 %v17453_v49  ;;  %10725 = vmatpush3.msra.mxu0 %v17455_v19  ;;  %v17457_v9 = vld [vmem:[#allocation34_spill] sm:$0xff] }
 0x4de   :  { %v6273_v18 = vmul.f32 %v11078_v39, %v14921_v28  ;;  %11091 = vrcp.f32 %v15305_v23  ;;  %v15434_v46 = vand.u32 4294901760, %v6338_v61  ;;  %v17456_v28 = vld [vmem:[#allocation71_spill] sm:$0xff]  ;;  %10726 = vmatprep.subr.mxu0 %v17457_v9  ;;  %v8432_v41 = vmul.f32 %v6338_v61, %v6338_v61 }
 0x4df   :  { %v6096_v7 = vpop.xlane.xlu0 %6095  ;;  %10810 = vmatprep.subr.mxu1 %v17456_v28  ;;  %v6503_v15 = vsub.f32 %v15419_v24, %v16712_v50  ;;  %v11182_v23 = vld [vmem:[%s16355_s1 + $0x48] sm:$0xff]  ;;  %10727 = vmatpush3.msra.mxu0 %v17457_v9 }
 0x4e0   :  { %17454 = vst [vmem:[#allocation63_spill] sm:$0xff] %v15434_v46  ;;  %11093 = vrcp.f32 %v6096_v7  ;;  %v6337_v36 = vsub.f32 %v6273_v18, %v6305_v13  ;;  %v6308_v0 = vmul.f32 %v11182_v23, %v11076_v32  ;;  %10811 = vmatpush3.msra.mxu1 %v17456_v28  ;;  %v15449_v44 = vsub.f32 %v6338_v61, %v15434_v46  ;;  %v17458_v39 = vld [vmem:[#allocation47_spill] sm:$0xff]  ;;  %v11183_v61 = vld [vmem:[%s16355_s1 + $0x40] sm:$0xff] }
 0x4e1   :  { %v11080_v62 = vpop.eup %11079  ;;  %10812 = vmatprep.subr.mxu1 %v17458_v39  ;;  %v6504_v3 = vand.u32 4294901760, %v6503_v15  ;;  %v6514_v23 = vand.u32 4294901760, %v6513_v38  ;;  %10728 = vmatprep.subr.mxu0 %v17460_v31 }
 0x4e2   :  { %v11082_v18 = vpop.eup %11081  ;;  %v15453_v13 = vand.u32 4294901760, %v6337_v36  ;;  %v8431_v7 = vmul.f32 %v6337_v36, %v6337_v36  ;;  %v6276_v32 = vmul.f32 %v11080_v62, %v14942_v11  ;;  %10813 = vmatpush3.msra.mxu1 %v17458_v39  ;;  %v16716_v50 = vand.u32 4294901760, %v15449_v44  ;;  %10729 = vmatpush3.msra.mxu0 %v17460_v31 }
 0x4e3   :  { %v6102_v19 = vpop.xlane.xlu0 %6101  ;;  %10814 = vmatprep.subr.mxu1 %v17461_v56  ;;  %10594 = vmatprep.mubr.f32.mxu0 %v6504_v3  ;;  %v6307_v38 = vmul.f32 %v11183_v61, %v11082_v18  ;;  %v17463_v18 = vld [vmem:[#allocation41_spill] sm:$0xff] }
 0x4e4   :  { %17459 = vst [vmem:[#allocation70_spill] sm:$0xff] %v15453_v13  ;;  %11095 = vrcp.f32 %v6102_v19  ;;  %10677 = vmatprep.mubr.f32.mxu1 %v15453_v13  ;;  %v8462_v15 = vadd.f32 %v8461_v37, %v8431_v7  ;;  %v15463_v11 = vsub.f32 %v6337_v36, %v15453_v13  ;;  %v6340_v62 = vsub.f32 %v6276_v32, %v6308_v0  ;;  %v15474_v0 = vpop.xlane.xlu1 %6211 }
 0x4e5   :  { %v11084_v9 = vpop.eup %11083  ;;  %11097 = vrcp.f32 %v15303_v17  ;;  %10595 = vmatmul.mubr.f32.gmra.mxu0 %v6514_v23  ;;  %10678 = vmatmul.mubr.f32.gmra.mxu1 %v15434_v46  ;;  %v6533_v7 = vsub.f32 %v15449_v44, %v16716_v50  ;;  %v11184_v23 = vld [vmem:[%s16355_s1 + $0x58] sm:$0xff] }
 0x4e6   :  { %v11086_v19 = vpop.eup %11085  ;;  %v8463_v3 = vadd.f32 %v8462_v15, %v8432_v41  ;;  %v16717_v42 = vand.u32 4294901760, %v15463_v11  ;;  %v6275_v37 = vmul.f32 %v11084_v9, %v14967_v20  ;;  %v15472_v36 = vand.u32 4294901760, %v6340_v62  ;;  %10815 = vmatpush3.msra.mxu1 %v17461_v56  ;;  %10730 = vmatprep.subr.mxu0 %v17463_v18  ;;  %v17464_v9 = vld [vmem:[#allocation69_spill] sm:$0xff] }
 0x4e7   :  { %v6100_v17 = vpop.xlane.xlu0 %6099  ;;  %10816 = vmatprep.subr.mxu1 %v14948_v45  ;;  %10731 = vmatpush3.msra.mxu0 %v17463_v18  ;;  %v6310_v15 = vmul.f32 %v11184_v23, %v11086_v19  ;;  %v17466_v19 = vld [vmem:[#allocation37_spill] sm:$0xff]  ;;  %v8434_v52 = vmul.f32 %v6340_v62, %v6340_v62 }
 0x4e8   :  { %17462 = vst [vmem:[#allocation51_spill] sm:$0xff] %v15472_v36  ;;  %11099 = vrcp.f32 %v6100_v17  ;;  %v6523_v20 = vsub.f32 %v15463_v11, %v16717_v42  ;;  %v6339_v41 = vsub.f32 %v6275_v37, %v6307_v38  ;;  %v15487_v32 = vsub.f32 %v6340_v62, %v15472_v36  ;;  %10817 = vmatpush3.msra.mxu1 %v14948_v45  ;;  %v15509_v46 = vpop.xlane.xlu1 %6213  ;;  %v11185_v62 = vld [vmem:[%s16355_s1 + $0x50] sm:$0xff] }
 0x4e9   :  { %v11088_v31 = vpop.eup %11087  ;;  %11101 = vrcp.f32 %v15309_v29  ;;  %10732 = vmatprep.subr.mxu0 %v17464_v9  ;;  %10818 = vmatprep.subr.mxu1 %v14983_v5  ;;  %v6534_v29 = vand.u32 4294901760, %v6533_v7 }
 0x4ea   :  { %v11090_v61 = vpop.eup %11089  ;;  %v6524_v38 = vand.u32 4294901760, %v6523_v20  ;;  %v15497_v37 = vand.u32 4294901760, %v6339_v41  ;;  %v8433_v17 = vmul.f32 %v6339_v41, %v6339_v41  ;;  %10733 = vmatpush3.msra.mxu0 %v17464_v9  ;;  %10819 = vmatpush3.msra.mxu1 %v14983_v5  ;;  %v16721_v50 = vand.u32 4294901760, %v15487_v32 }
 0x4eb   :  { %v6106_v18 = vpop.xlane.xlu0 %6105  ;;  %v6278_v42 = vmul.f32 %v11088_v31, %v14989_v57  ;;  %10734 = vmatprep.subr.mxu0 %v17466_v19  ;;  %10820 = vmatprep.subr.mxu1 %v15006_v2  ;;  %v11092_v23 = vpop.eup %11091 }
 0x4ec   :  { %17465 = vst [vmem:[#allocation27_spill] sm:$0xff] %v15497_v37  ;;  %11103 = vrcp.f32 %v6106_v18  ;;  %10597 = vmatprep.mubr.f32.mxu0 %v6524_v38  ;;  %10680 = vmatprep.mubr.f32.mxu1 %v15497_v37  ;;  %v8464_v20 = vadd.f32 %v8463_v3, %v8433_v17  ;;  %v15507_v9 = vsub.f32 %v6339_v41, %v15497_v37 }
 0x4ed   :  { %v11094_v7 = vpop.eup %11093  ;;  %11105 = vrcp.f32 %v15307_v22  ;;  %10598 = vmatmul.mubr.f32.gmra.mxu0 %v6534_v29  ;;  %10681 = vmatmul.mubr.f32.gmra.mxu1 %v15472_v36  ;;  %v6342_v57 = vsub.f32 %v6278_v42, %v6310_v15  ;;  %v6309_v3 = vmul.f32 %v11185_v62, %v11090_v61  ;;  %v6553_v22 = vsub.f32 %v15487_v32, %v16721_v50  ;;  %v17477_v36 = vld [vmem:[#allocation83_spill] sm:$0xff] }
 0x4ee   :  { %v8465_v31 = vadd.f32 %v8464_v20, %v8434_v52  ;;  %v16722_v18 = vand.u32 4294901760, %v15507_v9  ;;  %v6277_v38 = vmul.f32 %v11094_v7, %v15014_v33  ;;  %10735 = vmatpush3.msra.mxu0 %v17466_v19  ;;  %10821 = vmatpush3.msra.mxu1 %v15006_v2  ;;  %11107 = vrcp.f32 %v15375_v25  ;;  %v17468_v52 = vld [vmem:[#allocation46_spill] sm:$0xff]  ;;  %v11186_v25 = vld [vmem:[%s16355_s1 + $0x68] sm:$0xff]  ;;  %v17469_v19 = vld [vmem:[#allocation53_spill] sm:$0xff] }
 0x4ef   :  { %v6104_v41 = vpop.xlane.xlu0 %6103  ;;  %v15524_v42 = vand.u32 4294901760, %v6342_v57  ;;  %10736 = vmatprep.subr.mxu0 %v17468_v52  ;;  %10822 = vmatprep.subr.mxu1 %v15030_v63  ;;  %v6312_v61 = vmul.f32 %v11186_v25, %v11092_v23  ;;  %v15544_v23 = vpop.xlane.xlu1 %6215  ;;  %v8436_v25 = vmul.f32 %v6342_v57, %v6342_v57 }
 0x4f0   :  { %11109 = vrcp.f32 %v6104_v41  ;;  %v6543_v33 = vsub.f32 %v15507_v9, %v16722_v18  ;;  %v6341_v15 = vsub.f32 %v6277_v38, %v6309_v3  ;;  %10737 = vmatpush3.msra.mxu0 %v17468_v52  ;;  %10823 = vmatpush3.msra.mxu1 %v15030_v63  ;;  %v6554_v52 = vand.u32 4294901760, %v6553_v22  ;;  %v17471_v18 = vld [vmem:[#allocation75_spill] sm:$0xff] }
 0x4f1   :  { %17467 = vst [vmem:[#allocation14_spill] sm:$0xff] %v15524_v42  ;;  %v11096_v17 = vpop.eup %11095  ;;  %v15537_v29 = vsub.f32 %v6342_v57, %v15524_v42  ;;  %10738 = vmatprep.subr.mxu0 %v17469_v19  ;;  %10824 = vmatprep.subr.mxu1 %v15050_v43  ;;  %v11187_v57 = vld [vmem:[%s16355_s1 + $0x60] sm:$0xff] }
 0x4f2   :  { %v11098_v20 = vpop.eup %11097  ;;  %v6544_v7 = vand.u32 4294901760, %v6543_v33  ;;  %v15541_v38 = vand.u32 4294901760, %v6341_v15  ;;  %v8435_v62 = vmul.f32 %v6341_v15, %v6341_v15  ;;  %v6280_v3 = vmul.f32 %v11096_v17, %v15035_v59  ;;  %10739 = vmatpush3.msra.mxu0 %v17469_v19  ;;  %10825 = vmatpush3.msra.mxu1 %v15050_v43 }
 0x4f3   :  { %v6110_v41 = vpop.xlane.xlu0 %6109  ;;  %10740 = vmatprep.subr.mxu0 %v17471_v18  ;;  %10826 = vmatprep.subr.mxu1 %v15062_v53  ;;  %v6311_v22 = vmul.f32 %v11187_v57, %v11098_v20  ;;  %v17475_v57 = vld [vmem:[#allocation82_spill] sm:$0xff] }
 0x4f4   :  { %17470 = vst [vmem:[#allocation23_spill] sm:$0xff] %v15541_v38  ;;  %11111 = vrcp.f32 %v6110_v41  ;;  %10600 = vmatprep.mubr.f32.mxu0 %v6544_v7  ;;  %10683 = vmatprep.mubr.f32.mxu1 %v15541_v38  ;;  %v8466_v59 = vadd.f32 %v8465_v31, %v8435_v62  ;;  %v15553_v33 = vsub.f32 %v6341_v15, %v15541_v38  ;;  %v11189_v38 = vld [vmem:[#allocation5 + $0x78] sm:$0xff] }
 0x4f5   :  { %v6344_v17 = vsub.f32 %v6280_v3, %v6312_v61  ;;  %v11100_v19 = vpop.eup %11099  ;;  %11113 = vrcp.f32 %v15311_v16  ;;  %10601 = vmatmul.mubr.f32.gmra.mxu0 %v6554_v52  ;;  %10684 = vmatmul.mubr.f32.gmra.mxu1 %v15524_v42  ;;  %v17473_v61 = vand.u32 4294901760, %v15537_v29  ;;  %v17474_v3 = vld [vmem:[#allocation78_spill] sm:$0xff] }
 0x4f6   :  { %v11102_v41 = vpop.eup %11101  ;;  %v8467_v7 = vadd.f32 %v8466_v59, %v8436_v25  ;;  %v16723_v50 = vand.u32 4294901760, %v15553_v33  ;;  %v6279_v31 = vmul.f32 %v11100_v19, %v15060_v27  ;;  %10741 = vmatpush3.msra.mxu0 %v17471_v18  ;;  %10827 = vmatpush3.msra.mxu1 %v15062_v53  ;;  %v15577_v18 = vpop.xlane.xlu1 %6217  ;;  %v11188_v59 = vld [vmem:[%s16355_s1 + $0x78] sm:$0xff] }
 0x4f7   :  { %v15562_v15 = vand.u32 4294901760, %v6344_v17  ;;  %v6108_v16 = vpop.xlane.xlu0 %6107  ;;  %v6573_v62 = vsub.f32 %v15537_v29, %v17473_v61  ;;  %10742 = vmatprep.subr.mxu0 %v17474_v3  ;;  %10956 = vmatprep.subr.mxu1 %v14710_v10  ;;  %v6314_v19 = vmul.f32 %v11188_v59, %v11102_v41 }
 0x4f8   :  { %11115 = vrcp.f32 %v6108_v16  ;;  %v6563_v27 = vsub.f32 %v15553_v33, %v16723_v50  ;;  %v6343_v20 = vsub.f32 %v6279_v31, %v6311_v22  ;;  %10743 = vmatpush3.msra.mxu0 %v17474_v3 }
 0x4f9   :  { %17472 = vst [vmem:[#allocation66_spill] sm:$0xff] %v15562_v15  ;;  %v15575_v52 = vsub.f32 %v6344_v17, %v15562_v15  ;;  %v11104_v25 = vpop.eup %11103  ;;  %11117 = vrcp.f32 %v15444_v26  ;;  %10744 = vmatprep.subr.mxu0 %v17475_v57  ;;  %v6574_v42 = vand.u32 4294901760, %v6573_v62 }
 0x4fa   :  { %v11106_v16 = vpop.eup %11105  ;;  %v6564_v61 = vand.u32 4294901760, %v6563_v27  ;;  %v15585_v22 = vand.u32 4294901760, %v6343_v20  ;;  %v8437_v31 = vmul.f32 %v6343_v20, %v6343_v20  ;;  %10745 = vmatpush3.msra.mxu0 %v17475_v57  ;;  %v6282_v26 = vmul.f32 %v11189_v38, %v11104_v25  ;;  %v11190_v38 = vld [vmem:[%s16355_s1 + $0x70] sm:$0xff] }
 0x4fb   :  { %v6114_v50 = vpop.xlane.xlu0 %6113  ;;  %v16734_v3 = vand.u32 4294901760, %v15575_v52  ;;  %10746 = vmatprep.subr.mxu0 %v17477_v36  ;;  %v11108_v37 = vpop.eup %11107  ;;  %v8438_v27 = vmul.f32 %v6344_v17, %v6344_v17  ;;  %v6313_v62 = vmul.f32 %v11190_v38, %v11106_v16  ;;  %v11192_v38 = vld [vmem:[#allocation5 + $0x88] sm:$0xff] }
 0x4fc   :  { %17476 = vst [vmem:[#allocation24_spill] sm:$0xff] %v15585_v22  ;;  %11119 = vrcp.f32 %v6114_v50  ;;  %10603 = vmatprep.mubr.f32.mxu0 %v6564_v61  ;;  %10686 = vmatprep.mubr.f32.mxu1 %v15585_v22  ;;  %v8468_v41 = vadd.f32 %v8467_v7, %v8437_v31  ;;  %v15592_v59 = vsub.f32 %v6343_v20, %v15585_v22  ;;  %v15601_v7 = vpop.xlane.xlu1 %6219 }
 0x4fd   :  { %v11110_v13 = vpop.eup %11109  ;;  %10604 = vmatmul.mubr.f32.gmra.mxu0 %v6574_v42  ;;  %10687 = vmatmul.mubr.f32.gmra.mxu1 %v15562_v15  ;;  %v6346_v25 = vsub.f32 %v6282_v26, %v6314_v19  ;;  %11121 = vrcp.f32 %v15409_v35  ;;  %v6593_v20 = vsub.f32 %v15575_v52, %v16734_v3  ;;  %v17479_v19 = vld [vmem:[#allocation55_spill] sm:$0xff] }
 0x4fe   :  { %v8469_v50 = vadd.f32 %v8468_v41, %v8438_v27  ;;  %v16737_v57 = vand.u32 4294901760, %v15592_v59  ;;  %v6281_v17 = vmul.f32 %v11110_v13, %v15100_v47  ;;  %10747 = vmatpush3.msra.mxu0 %v17477_v36  ;;  %11123 = vrcp.f32 %v15509_v46  ;;  %v11191_v13 = vld [vmem:[%s16355_s1 + $0x88] sm:$0xff] }
 0x4ff   :  { %v6112_v42 = vpop.xlane.xlu0 %6111  ;;  %v15608_v16 = vand.u32 4294901760, %v6346_v25  ;;  %10876 = vmatprep.subr.mxu0 %v17479_v19  ;;  %v6316_v36 = vmul.f32 %v11191_v13, %v11108_v37  ;;  %v6594_v15 = vand.u32 4294901760, %v6593_v20 }
 0x500   :  { %11125 = vrcp.f32 %v6112_v42  ;;  %v6583_v47 = vsub.f32 %v15592_v59, %v16737_v57  ;;  %v6345_v35 = vsub.f32 %v6281_v17, %v6313_v62  ;;  %v8440_v57 = vmul.f32 %v6346_v25, %v6346_v25 }
 0x501   :  { %17478 = vst [vmem:[#allocation62_spill] sm:$0xff] %v15608_v16  ;;  %v11112_v46 = vpop.eup %11111  ;;  %v15618_v61 = vsub.f32 %v6346_v25, %v15608_v16 }
 0x502   :  { %v11114_v31 = vpop.eup %11113  ;;  %v6584_v26 = vand.u32 4294901760, %v6583_v47  ;;  %v15620_v41 = vand.u32 4294901760, %v6345_v35  ;;  %v8439_v27 = vmul.f32 %v6345_v35, %v6345_v35  ;;  %v6284_v42 = vmul.f32 %v11192_v38, %v11112_v46  ;;  %v6222_v47 = vpop.xlane.xlu1 %6221 }
 0x503   :  { %v6118_v3 = vpop.xlane.xlu0 %6117  ;;  %v16740_v62 = vand.u32 4294901760, %v15618_v61 }
 0x504   :  { %17480 = vst [vmem:[#allocation33_spill] sm:$0xff] %v15620_v41  ;;  %11127 = vrcp.f32 %v6118_v3  ;;  %10606 = vmatprep.mubr.f32.mxu0 %v6584_v26  ;;  %10689 = vmatprep.mubr.f32.mxu1 %v15620_v41  ;;  %v8470_v37 = vadd.f32 %v8469_v50, %v8439_v27  ;;  %v15625_v17 = vsub.f32 %v6345_v35, %v15620_v41  ;;  %v11193_v3 = vld [vmem:[%s16355_s1 + $0x80] sm:$0xff] }
 0x505   :  { %v15627_v13 = vsub.f32 %v6284_v42, %v6316_v36  ;;  %v11116_v22 = vpop.eup %11115  ;;  %11129 = vrcp.f32 %v15474_v0  ;;  %10607 = vmatmul.mubr.f32.gmra.mxu0 %v6594_v15  ;;  %10690 = vmatmul.mubr.f32.gmra.mxu1 %v15608_v16  ;;  %v6315_v25 = vmul.f32 %v11193_v3, %v11114_v31  ;;  %v11194_v35 = vld [vmem:[#allocation5 + $0x80] sm:$0xff]  ;;  %v6613_v0 = vsub.f32 %v15618_v61, %v16740_v62  ;;  %v11196_v16 = vld [vmem:[#allocation5 + $0x98] sm:$0xff] }
 0x506   :  { %v11118_v20 = vpop.eup %11117  ;;  %v8471_v46 = vadd.f32 %v8470_v37, %v8440_v57  ;;  %v16741_v50 = vand.u32 4294901760, %v15625_v17  ;;  %v6283_v26 = vmul.f32 %v11194_v35, %v11116_v22  ;;  %v11195_v22 = vld [vmem:[%s16355_s1 + $0x98] sm:$0xff] }
 0x507   :  { %v15636_v36 = vand.u32 4294901760, %v15627_v13  ;;  %v6116_v27 = vpop.xlane.xlu0 %6115  ;;  %v6318_v42 = vmul.f32 %v11195_v22, %v11118_v20 }
 0x508   :  { %11131 = vrcp.f32 %v6116_v27  ;;  %v6603_v15 = vsub.f32 %v15625_v17, %v16741_v50  ;;  %v6347_v31 = vsub.f32 %v6283_v26, %v6315_v25  ;;  %v15654_v27 = vpop.xlane.xlu1 %6223  ;;  %v6614_v26 = vand.u32 4294901760, %v6613_v0  ;;  %v11197_v0 = vld [vmem:[#allocation5 + $0x90] sm:$0xff] }
 0x509   :  { %17481 = vst [vmem:[#allocation30_spill] sm:$0xff] %v15636_v36  ;;  %v15646_v57 = vsub.f32 %v15627_v13, %v15636_v36  ;;  %v11120_v38 = vpop.eup %11119  ;;  %11133 = vrcp.f32 %v15577_v18 }
 0x50a   :  { %v6604_v37 = vand.u32 4294901760, %v6603_v15  ;;  %v15652_v3 = vand.u32 4294901760, %v6347_v31  ;;  %v8441_v35 = vmul.f32 %v6347_v31, %v6347_v31  ;;  %v11122_v62 = vpop.eup %11121  ;;  %v6286_v41 = vmul.f32 %v11196_v16, %v11120_v38 }
 0x50b   :  { %v6122_v25 = vpop.xlane.xlu0 %6121  ;;  %v16748_v50 = vand.u32 4294901760, %v15646_v57  ;;  %v11124_v8 = vpop.eup %11123 }
 0x50c   :  { %17482 = vst [vmem:[#allocation40_spill] sm:$0xff] %v15652_v3  ;;  %11135 = vrcp.f32 %v6122_v25  ;;  %10609 = vmatprep.mubr.f32.mxu0 %v6604_v37  ;;  %10692 = vmatprep.mubr.f32.mxu1 %v15652_v3  ;;  %v15658_v18 = vadd.f32 %v8471_v46, %v8441_v35  ;;  %v15661_v20 = vsub.f32 %v6347_v31, %v15652_v3  ;;  %v11198_v46 = vld [vmem:[%s16355_s1 + $0x90] sm:$0xff]  ;;  %v6226_v25 = vpop.xlane.xlu1 %6225 }
 0x50d   :  { %v11126_v15 = vpop.eup %11125  ;;  %10610 = vmatmul.mubr.f32.gmra.mxu0 %v6614_v26  ;;  %10693 = vmatmul.mubr.f32.gmra.mxu1 %v15636_v36  ;;  %v15664_v22 = vsub.f32 %v6286_v41, %v6318_v42  ;;  %11137 = vrcp.f32 %v15544_v23  ;;  %v6317_v37 = vmul.f32 %v11198_v46, %v11122_v62  ;;  %v6633_v31 = vsub.f32 %v15646_v57, %v16748_v50  ;;  %v11199_v62 = vld [vmem:[%s16355_s1 + $0xa8] sm:$0xff] }
 0x50e   :  { %v16753_v16 = vand.u32 4294901760, %v15661_v20  ;;  %v6285_v38 = vmul.f32 %v11197_v0, %v11126_v15  ;;  %11139 = vrcp.f32 %v6222_v47  ;;  %v6320_v26 = vmul.f32 %v11199_v62, %v11124_v8 }
 0x50f   :  { %v6120_v35 = vpop.xlane.xlu0 %6119  ;;  %v15675_v41 = vand.u32 4294901760, %v15664_v22 }
 0x510   :  { %11141 = vrcp.f32 %v6120_v35  ;;  %v6623_v23 = vsub.f32 %v15661_v20, %v16753_v16  ;;  %v6349_v42 = vsub.f32 %v6285_v38, %v6317_v37  ;;  %v11200_v35 = vld [vmem:[#allocation5 + $0xa8] sm:$0xff]  ;;  %v6634_v16 = vand.u32 4294901760, %v6633_v31 }
 0x511   :  { %17483 = vst [vmem:[#allocation31_spill] sm:$0xff] %v15675_v41  ;;  %v11128_v47 = vpop.eup %11127  ;;  %v15685_v15 = vsub.f32 %v15664_v22, %v15675_v41 }
 0x512   :  { %v11130_v0 = vpop.eup %11129  ;;  %v6624_v46 = vand.u32 4294901760, %v6623_v23  ;;  %v15687_v50 = vand.u32 4294901760, %v6349_v42  ;;  %v6288_v36 = vmul.f32 %v11200_v35, %v11128_v47  ;;  %v11201_v47 = vld [vmem:[#allocation5 + $0xa0] sm:$0xff] }
 0x513   :  { %v6126_v3 = vpop.xlane.xlu0 %6125 }
 0x514   :  { %17484 = vst [vmem:[#allocation22_spill] sm:$0xff] %v15687_v50  ;;  %11143 = vrcp.f32 %v6126_v3  ;;  %10612 = vmatprep.mubr.f32.mxu0 %v6624_v46  ;;  %10695 = vmatprep.mubr.f32.mxu1 %v15687_v50  ;;  %v15692_v8 = vsub.f32 %v6349_v42, %v15687_v50  ;;  %v15694_v37 = vsub.f32 %v6288_v36, %v6320_v26  ;;  %v11202_v3 = vld [vmem:[%s16355_s1 + $0xa0] sm:$0xff]  ;;  %v15705_v36 = vpop.xlane.xlu1 %6227 }
 0x515   :  { %v11132_v62 = vpop.eup %11131  ;;  %11145 = vrcp.f32 %v15601_v7  ;;  %10613 = vmatmul.mubr.f32.gmra.mxu0 %v6634_v16  ;;  %10696 = vmatmul.mubr.f32.gmra.mxu1 %v15675_v41  ;;  %v6319_v46 = vmul.f32 %v11202_v3, %v11130_v0  ;;  %v17486_v7 = vand.u32 4294901760, %v15685_v15  ;;  %v11203_v3 = vld [vmem:[%s16355_s1 + $0xb8] sm:$0xff] }
 0x516   :  { %v11134_v23 = vpop.eup %11133  ;;  %v16762_v31 = vand.u32 4294901760, %v15692_v8  ;;  %v6287_v35 = vmul.f32 %v11201_v47, %v11132_v62  ;;  %v15703_v38 = vand.u32 4294901760, %v15694_v37 }
 0x517   :  { %v6124_v26 = vpop.xlane.xlu0 %6123  ;;  %v6653_v16 = vsub.f32 %v15685_v15, %v17486_v7  ;;  %v6322_v50 = vmul.f32 %v11203_v3, %v11134_v23  ;;  %v8442_v7 = vmul.f32 %v15627_v13, %v15627_v13 }
 0x518   :  { %17485 = vst [vmem:[#allocation39_spill] sm:$0xff] %v15703_v38  ;;  %11147 = vrcp.f32 %v6124_v26  ;;  %v6643_v62 = vsub.f32 %v15692_v8, %v16762_v31  ;;  %v6351_v47 = vsub.f32 %v6287_v35, %v6319_v46  ;;  %v15715_v41 = vsub.f32 %v15694_v37, %v15703_v38  ;;  %v6230_v23 = vpop.xlane.xlu1 %6229 }
 0x519   :  { %v11136_v0 = vpop.eup %11135  ;;  %11149 = vrcp.f32 %v6226_v25  ;;  %v8443_v31 = vmul.f32 %v6349_v42, %v6349_v42  ;;  %v6654_v46 = vand.u32 4294901760, %v6653_v16  ;;  %v11205_v16 = vld [vmem:[#allocation5 + $0xb0] sm:$0xff] }
 0x51a   :  { %v6644_v26 = vand.u32 4294901760, %v6643_v62  ;;  %v15722_v40 = vand.u32 4294901760, %v6351_v47  ;;  %v11138_v30 = vpop.eup %11137  ;;  %v6290_v55 = vmul.f32 %v11204_v60, %v11136_v0  ;;  %v8473_v62 = vadd.f32 %v15658_v18, %v8442_v7 }
 0x51b   :  { %v6130_v35 = vpop.xlane.xlu0 %6129  ;;  %v11140_v25 = vpop.eup %11139  ;;  %v17488_v18 = vand.u32 4294901760, %v15715_v41 }
 0x51c   :  { %17487 = vst [vmem:[#allocation29_spill] sm:$0xff] %v15722_v40  ;;  %11151 = vrcp.f32 %v6130_v35  ;;  %10615 = vmatprep.mubr.f32.mxu0 %v6644_v26  ;;  %10698 = vmatprep.mubr.f32.mxu1 %v15722_v40  ;;  %v15727_v3 = vsub.f32 %v6351_v47, %v15722_v40  ;;  %v15731_v42 = vsub.f32 %v6290_v55, %v6322_v50  ;;  %v11206_v26 = vld [vmem:[%s16355_s1 + $0xb0] sm:$0xff] }
 0x51d   :  { %v11142_v13 = vpop.eup %11141  ;;  %10616 = vmatmul.mubr.f32.gmra.mxu0 %v6654_v46  ;;  %10699 = vmatmul.mubr.f32.gmra.mxu1 %v15703_v38  ;;  %11153 = vrcp.f32 %v15654_v27  ;;  %v6321_v35 = vmul.f32 %v11206_v26, %v11138_v30  ;;  %v8474_v54 = vadd.f32 %v8473_v62, %v8443_v31  ;;  %v6673_v7 = vsub.f32 %v15715_v41, %v17488_v18  ;;  %v11207_v30 = vld [vmem:[%s16355_s1 + $0xc8] sm:$0xff]  ;;  %v6232_v62 = vpop.xlane.xlu1 %6231 }
 0x51e   :  { %v16771_v60 = vand.u32 4294901760, %v15727_v3  ;;  %v6289_v0 = vmul.f32 %v11205_v16, %v11142_v13  ;;  %11155 = vrcp.f32 %v6230_v23  ;;  %v15742_v55 = vand.u32 4294901760, %v15731_v42 }
 0x51f   :  { %v6128_v40 = vpop.xlane.xlu0 %6127  ;;  %v6324_v31 = vmul.f32 %v11207_v30, %v11140_v25  ;;  %v8444_v23 = vmul.f32 %v15664_v22, %v15664_v22  ;;  %v8445_v13 = vmul.f32 %v6351_v47, %v6351_v47  ;;  %v6674_v53 = vand.u32 4294901760, %v6673_v7 }
 0x520   :  { %17489 = vst [vmem:[#allocation52_spill] sm:$0xff] %v15742_v55  ;;  %11157 = vrcp.f32 %v6128_v40  ;;  %v6663_v50 = vsub.f32 %v15727_v3, %v16771_v60  ;;  %v6353_v27 = vsub.f32 %v6289_v0, %v6321_v35  ;;  %v15754_v16 = vsub.f32 %v15731_v42, %v15742_v55  ;;  %v11208_v0 = vld [vmem:[#allocation5 + $0xc8] sm:$0xff] }
 0x521   :  { %v11144_v46 = vpop.eup %11143  ;;  %v8475_v60 = vadd.f32 %v8474_v54, %v8444_v23  ;;  %v11209_v54 = vld [vmem:[%s16355_s1 + $0xc0] sm:$0xff] }
 0x522   :  { %v11146_v40 = vpop.eup %11145  ;;  %v6664_v26 = vand.u32 4294901760, %v6663_v50  ;;  %v15756_v18 = vand.u32 4294901760, %v6353_v27  ;;  %v6292_v35 = vmul.f32 %v11208_v0, %v11144_v46  ;;  %v16776_v25 = vand.u32 4294901760, %v15754_v16  ;;  %v11210_v23 = vld [vmem:[#allocation5 + $0xc0] sm:$0xff]  ;;  %v6234_v0 = vpop.xlane.xlu1 %6233 }
 0x523   :  { %v6134_v38 = vpop.xlane.xlu0 %6133  ;;  %v8476_v50 = vadd.f32 %v8475_v60, %v8445_v13  ;;  %v6323_v7 = vmul.f32 %v11209_v54, %v11146_v40  ;;  %v8447_v60 = vmul.f32 %v6353_v27, %v6353_v27 }
 0x524   :  { %17490 = vst [vmem:[#allocation16_spill] sm:$0xff] %v15756_v18  ;;  %11159 = vrcp.f32 %v6134_v38  ;;  %10618 = vmatprep.mubr.f32.mxu0 %v6664_v26  ;;  %10701 = vmatprep.mubr.f32.mxu1 %v15756_v18  ;;  %v15761_v22 = vsub.f32 %v6353_v27, %v15756_v18  ;;  %v15763_v47 = vsub.f32 %v6292_v35, %v6324_v31  ;;  %v11211_v27 = vld [vmem:[%s16355_s1 + $0xd8] sm:$0xff] }
 0x525   :  { %v11148_v30 = vpop.eup %11147  ;;  %10619 = vmatmul.mubr.f32.gmra.mxu0 %v6674_v53  ;;  %10702 = vmatmul.mubr.f32.gmra.mxu1 %v15742_v55  ;;  %11161 = vrcp.f32 %v15705_v36  ;;  %v8446_v53 = vmul.f32 %v15694_v37, %v15694_v37  ;;  %v6693_v40 = vsub.f32 %v15754_v16, %v16776_v25 }
 0x526   :  { %v11150_v46 = vpop.eup %11149  ;;  %v16781_v38 = vand.u32 4294901760, %v15761_v22  ;;  %v6291_v26 = vmul.f32 %v11210_v23, %v11148_v30  ;;  %v15772_v31 = vand.u32 4294901760, %v15763_v47  ;;  %11163 = vrcp.f32 %v6232_v62 }
 0x527   :  { %v6132_v13 = vpop.xlane.xlu0 %6131  ;;  %v8477_v37 = vadd.f32 %v8476_v50, %v8446_v53  ;;  %v6326_v62 = vmul.f32 %v11211_v27, %v11150_v46  ;;  %v8448_v53 = vmul.f32 %v15731_v42, %v15731_v42 }
 0x528   :  { %17491 = vst [vmem:[#allocation25_spill] sm:$0xff] %v15772_v31  ;;  %11165 = vrcp.f32 %v6132_v13  ;;  %v6683_v36 = vsub.f32 %v15761_v22, %v16781_v38  ;;  %v6355_v35 = vsub.f32 %v6291_v26, %v6323_v7  ;;  %v15784_v30 = vsub.f32 %v15763_v47, %v15772_v31  ;;  %v11212_v26 = vld [vmem:[#allocation5 + $0xd8] sm:$0xff] }
 0x529   :  { %v11152_v54 = vpop.eup %11151  ;;  %11167 = vrcp.f32 %v6234_v0  ;;  %v8478_v55 = vadd.f32 %v8477_v37, %v8447_v60  ;;  %v6694_v38 = vand.u32 4294901760, %v6693_v40 }
 0x52a   :  { %v6684_v23 = vand.u32 4294901760, %v6683_v36  ;;  %v15789_v25 = vand.u32 4294901760, %v6355_v35  ;;  %v11154_v13 = vpop.eup %11153  ;;  %v16786_v7 = vand.u32 4294901760, %v15784_v30  ;;  %v6294_v43 = vmul.f32 %v11212_v26, %v11152_v54  ;;  %v11213_v36 = vld [vmem:[#allocation5 + $0xd0] sm:$0xff] }
 0x52b   :  { %v6136_v18 = vpop.xlane.xlu0 %6135  ;;  %v11156_v63 = vpop.eup %11155  ;;  %v8449_v0 = vmul.f32 %v6355_v35, %v6355_v35 }
 0x52c   :  { %17492 = vst [vmem:[#allocation54_spill] sm:$0xff] %v15789_v25  ;;  %11169 = vrcp.f32 %v6136_v18  ;;  %10621 = vmatprep.mubr.f32.mxu0 %v6684_v23  ;;  %10704 = vmatprep.mubr.f32.mxu1 %v15789_v25  ;;  %v15794_v50 = vsub.f32 %v6355_v35, %v15789_v25  ;;  %v6358_v60 = vsub.f32 %v6294_v43, %v6326_v62  ;;  %v11214_v18 = vld [vmem:[%s16355_s1 + $0xd0] sm:$0xff]  ;;  %v11215_v62 = vld [vmem:[%s16355_s1 + $0xe8] sm:$0xff] }
 0x52d   :  { %v11158_v46 = vpop.eup %11157  ;;  %10622 = vmatmul.mubr.f32.gmra.mxu0 %v6694_v38  ;;  %10705 = vmatmul.mubr.f32.gmra.mxu1 %v15772_v31  ;;  %v6325_v37 = vmul.f32 %v11214_v18, %v11154_v13  ;;  %v6713_v23 = vsub.f32 %v15784_v30, %v16786_v7  ;;  %v8479_v38 = vadd.f32 %v8478_v55, %v8448_v53  ;;  %v11216_v55 = vld [vmem:[#allocation5 + $0xe8] sm:$0xff] }
 0x52e   :  { %v16789_v40 = vand.u32 4294901760, %v15794_v50  ;;  %v6293_v54 = vmul.f32 %v11213_v36, %v11158_v46  ;;  %v15806_v42 = vand.u32 4294901760, %v6358_v60  ;;  %v6328_v26 = vmul.f32 %v11215_v62, %v11156_v63  ;;  %v11217_v62 = vld [vmem:[#allocation5 + $0xe0] sm:$0xff] }
 0x52f   :  { %v6138_v27 = vpop.xlane.xlu0 %6137  ;;  %v8480_v36 = vadd.f32 %v8479_v38, %v8449_v0  ;;  %v6714_v31 = vand.u32 4294901760, %v6713_v23 }
 0x530   :  { %17493 = vst [vmem:[#allocation67_spill] sm:$0xff] %v15806_v42  ;;  %11171 = vrcp.f32 %v6138_v27  ;;  %v6703_v43 = vsub.f32 %v15794_v50, %v16789_v40  ;;  %v6357_v35 = vsub.f32 %v6293_v54, %v6325_v37  ;;  %v15815_v46 = vsub.f32 %v6358_v60, %v15806_v42 }
 0x531   :  { %v11160_v13 = vpop.eup %11159  ;;  %v8450_v54 = vmul.f32 %v15763_v47, %v15763_v47  ;;  %v11218_v47 = vld [vmem:[%s16355_s1 + $0xe0] sm:$0xff] }
 0x532   :  { %17494 = vst [vmem:[#allocation13_spill] sm:$0xff] %v15815_v46  ;;  %v6704_v18 = vand.u32 4294901760, %v6703_v43  ;;  %v15817_v7 = vand.u32 4294901760, %v6357_v35  ;;  %v6296_v53 = vmul.f32 %v11216_v55, %v11160_v13  ;;  %v11162_v27 = vpop.eup %11161  ;;  %v8451_v37 = vmul.f32 %v6357_v35, %v6357_v35 }
 0x533   :  { %v11164_v25 = vpop.eup %11163  ;;  %v8481_v43 = vadd.f32 %v8480_v36, %v8450_v54  ;;  %v11219_v54 = vld [vmem:[%s16355_s1 + $0xf0] sm:$0xff] }
 0x534   :  { %17495 = vst [vmem:[#allocation56_spill] sm:$0xff] %v15817_v7  ;;  %10624 = vmatprep.mubr.f32.mxu0 %v6704_v18  ;;  %10707 = vmatprep.mubr.f32.mxu1 %v15817_v7  ;;  %v15824_v63 = vsub.f32 %v6357_v35, %v15817_v7  ;;  %v6360_v0 = vsub.f32 %v6296_v53, %v6328_v26  ;;  %v17496_v35 = vand.u32 4294901760, %v15815_v46 }
 0x535   :  { %v11166_v38 = vpop.eup %11165  ;;  %10625 = vmatmul.mubr.f32.gmra.mxu0 %v6714_v31  ;;  %10708 = vmatmul.mubr.f32.gmra.mxu1 %v15806_v42  ;;  %v6327_v18 = vmul.f32 %v11218_v47, %v11162_v27  ;;  %v8482_v31 = vadd.f32 %v8481_v43, %v8451_v37  ;;  %v8452_v47 = vmul.f32 %v6358_v60, %v6358_v60  ;;  %v11221_v60 = vld [vmem:[%s16355_s1 + $0xf8] sm:$0xff]  ;;  %s11292_s1 = smov [#allocation5]  }
 0x536   :  { %v16798_v23 = vand.u32 4294901760, %v15824_v63  ;;  %v6295_v13 = vmul.f32 %v11217_v62, %v11166_v38  ;;  %v15831_v55 = vand.u32 4294901760, %v6360_v0  ;;  %v11168_v40 = vpop.eup %11167  ;;  %v6733_v26 = vsub.f32 %v15815_v46, %v17496_v35  ;;  %v11220_v35 = vld [vmem:[#allocation5 + $0xf0] sm:$0xff]  ;;  %s8511_s7 = sshll.u32 %s11292_s1, 4  ;;  %s8512_s7 = int_to_ptr.vmem [resolvable:$true] %s8511_s7 }
 0x537   :  { %v6329_v38 = vmul.f32 %v11219_v54, %v11164_v25  ;;  %s11243_s20 = scalar_lea.vmem %s8512_s7, 4096  ;;  %p11248_p6 = scmp.lt.s32.totalorder %s8512_s7, %s8512_s7 }
 0x538   :  { %v6723_v36 = vsub.f32 %v15824_v63, %v16798_v23  ;;  %v6359_v53 = vsub.f32 %v6295_v13, %v6327_v18  ;;  %v15843_v27 = vsub.f32 %v6360_v0, %v15831_v55  ;;  %v6734_v43 = vand.u32 4294901760, %v6733_v26  ;;  %p11244_p5 = scmp.ne.s32.totalorder %s8512_s7, %s11243_s20  ;;  %p11249_p7 = scmp.lt.s32.totalorder %s11243_s20, %s11243_s20 }
 0x539   :  { %v11170_v62 = vpop.eup %11169  ;;  %v8483_v13 = vadd.f32 %v8482_v31, %v8452_v47  ;;  %v8454_v26 = vmul.f32 %v6360_v0, %v6360_v0  ;;  %v11222_v31 = vld [vmem:[#allocation5 + $0xf8] sm:$0xff] }
 0x53a   :  { %v6724_v42 = vand.u32 4294901760, %v6723_v36  ;;  %v15845_v7 = vand.u32 4294901760, %v6359_v53  ;;  %v6297_v37 = vmul.f32 %v11220_v35, %v11170_v62  ;;  %v16799_v46 = vand.u32 4294901760, %v15843_v27  ;;  %p11250_p8 = por %p11249_p7, %p11248_p6 }
 0x53b   :  { %v8453_v23 = vmul.f32 %v6359_v53, %v6359_v53  ;;  %v6330_v36 = vmul.f32 %v11221_v60, %v11168_v40 }
 0x53c   :  { %10627 = vmatprep.mubr.f32.mxu0 %v6724_v42  ;;  %10710 = vmatprep.mubr.f32.mxu1 %v15845_v7  ;;  %v6361_v18 = vsub.f32 %v6297_v37, %v6329_v38  ;;  %v15850_v25 = vsub.f32 %v6359_v53, %v15845_v7  ;;  %v6753_v53 = vsub.f32 %v15843_v27, %v16799_v46  ;;  %p11251_p9 = pnand %p11250_p8, %p11244_p5 }
 0x53d   :  { %v11172_v54 = vpop.eup %11171  ;;  %10628 = vmatmul.mubr.f32.gmra.mxu0 %v6734_v43  ;;  %10711 = vmatmul.mubr.f32.gmra.mxu1 %v15831_v55  ;;  %v8484_v62 = vadd.f32 %v8483_v13, %v8453_v23 }
 0x53e   :  { %v15856_v35 = vand.u32 4294901760, %v6361_v18  ;;  %v6742_v42 = vand.u32 4294901760, %v15850_v25  ;;  %v6298_v38 = vmul.f32 %v11222_v31, %v11172_v54  ;;  %v8455_v47 = vmul.f32 %v6361_v18, %v6361_v18 }
 0x53f   :  { %v8485_v37 = vadd.f32 %v8484_v62, %v8454_v26  ;;  %v6754_v46 = vand.u32 4294901760, %v6753_v53  ;;  %v17498_v53 = vand.u32 4294901760, %v15331_v51 }
 0x540   :  { %10713 = vmatprep.mubr.f32.mxu1 %v15856_v35  ;;  %v6743_v40 = vsub.f32 %v15850_v25, %v6742_v42  ;;  %v6362_v0 = vsub.f32 %v6298_v38, %v6330_v36  ;;  %v15867_v23 = vsub.f32 %v6361_v18, %v15856_v35  ;;  %v17497_v18 = vand.u32 4294901760, %v15336_v21 }
 0x541   :  { %v8486_v43 = vadd.f32 %v8485_v37, %v8455_v47 }
 0x542   :  { %v6744_v13 = vand.u32 4294901760, %v6743_v40  ;;  %v15869_v60 = vand.u32 4294901760, %v6362_v0  ;;  %v8456_v54 = vmul.f32 %v6362_v0, %v6362_v0  ;;  %v6762_v31 = vand.u32 4294901760, %v15867_v23 }
 0x543   :  { %v17499_v40 = vand.u32 4294901760, %v15373_v58 }
 0x544   :  { %10630 = vmatprep.mubr.f32.mxu0 %v6744_v13  ;;  %10714 = vmatmul.mubr.f32.gmra.mxu1 %v15869_v60  ;;  %v8487_v26 = vadd.f32 %v8486_v43, %v8456_v54  ;;  %v6763_v62 = vsub.f32 %v15867_v23, %v6762_v31  ;;  %v15877_v36 = vsub.f32 %v6362_v0, %v15869_v60  ;;  %v17500_v0 = vand.u32 4294901760, %v15362_v34  ;;  %v17539_v13 = vld [vmem:[#allocation77_spill] sm:$0xff]  ;;  %v17545_v54 = vld [vmem:[#allocation58_spill] sm:$0xff] }
 0x545   :  { %10631 = vmatmul.mubr.f32.gmra.mxu0 %v6754_v46  ;;  %10828 = vmatprep.mubr.f32.mxu1 %v17497_v18  ;;  %v17501_v43 = vand.u32 4294901760, %v15419_v24 }
 0x546   :  { %8488 = vadd.xlane.f32.xlu1 %v8487_v26  ;;  %v6764_v38 = vand.u32 4294901760, %v6763_v62  ;;  %v6772_v47 = vand.u32 4294901760, %v15877_v36  ;;  %v17547_v26 = vld [vmem:[#allocation68_spill] sm:$0xff]  ;;  %v17549_v62 = vld [vmem:[#allocation61_spill] sm:$0xff] }
 0x548   :  { %10633 = vmatprep.mubr.f32.mxu0 %v6764_v38  ;;  %10829 = vmatmul.mubr.f32.vlgmr.msra.gmra.mxu1 %v17498_v53  ;;  %v6773_v37 = vsub.f32 %v15877_v36, %v6772_v47  ;;  %v17552_v38 = vld [vmem:[#allocation63_spill] sm:$0xff] }
 0x549   :  { %10831 = vmatprep.mubr.f32.mxu1 %v17499_v40  ;;  %10957 = vmatpush3.msra.mxu1 %v14710_v10  ;;  %v17502_v10 = vand.u32 4294901760, %v15397_v12 }
 0x54a   :  { %v6774_v46 = vand.u32 4294901760, %v6773_v37  ;;  %10958 = vmatprep.subr.mxu1 %v14726_v4 }
 0x54b   :  { %10959 = vmatpush3.msra.mxu1 %v14726_v4  ;;  %v17503_v4 = vand.u32 4294901760, %v15463_v11 }
 0x54c   :  { %10634 = vmatmul.mubr.f32.gmra.mxu0 %v6774_v46  ;;  %10832 = vmatmul.mubr.f32.gmra.mxu1 %v17500_v0  ;;  %v17554_v0 = vld [vmem:[#allocation51_spill] sm:$0xff] }
 0x54d   :  { %10748 = vmatprep.mubr.f32.mxu0 %v15336_v21  ;;  %10834 = vmatprep.mubr.f32.mxu1 %v17501_v43  ;;  %v17504_v21 = vld [vmem:[#allocation12_spill] sm:$0xff]  ;;  %v17555_v43 = vld [vmem:[#allocation23_spill] sm:$0xff] }
 0x54e   :  { %10960 = vmatprep.subr.mxu1 %v14728_v6 }
 0x54f   :  { %10961 = vmatpush3.msra.mxu1 %v14728_v6  ;;  %v17505_v6 = vand.u32 4294901760, %v15449_v44 }
 0x550   :  { %10749 = vmatmul.mubr.f32.vlgmr.msra.gmra.mxu0 %v15331_v51  ;;  %10835 = vmatmul.mubr.f32.gmra.mxu1 %v17502_v10  ;;  %v17506_v51 = vand.u32 4294901760, %v15507_v9 }
 0x551   :  { %10751 = vmatprep.mubr.f32.mxu0 %v15373_v58  ;;  %10837 = vmatprep.mubr.f32.mxu1 %v17503_v4  ;;  %v17507_v58 = vld [vmem:[#allocation15_spill] sm:$0xff]  ;;  %v17556_v4 = vld [vmem:[#allocation14_spill] sm:$0xff] }
 0x552   :  { %10877 = vmatpush3.msra.mxu0 %v17479_v19  ;;  %10962 = vmatprep.subr.mxu1 %v14730_v48  ;;  %v17525_v19 = vld [vmem:[#allocation49_spill] sm:$0xff] }
 0x553   :  { %10878 = vmatprep.subr.mxu0 %v17504_v21  ;;  %10963 = vmatpush3.msra.mxu1 %v14730_v48  ;;  %v17508_v48 = vand.u32 4294901760, %v15487_v32 }
 0x554   :  { %10752 = vmatmul.mubr.f32.gmra.mxu0 %v15362_v34  ;;  %10838 = vmatmul.mubr.f32.gmra.mxu1 %v17505_v6  ;;  %v17509_v34 = vand.u32 4294901760, %v15553_v33  ;;  %v17557_v6 = vld [vmem:[#allocation24_spill] sm:$0xff] }
 0x555   :  { %10754 = vmatprep.mubr.f32.mxu0 %v15419_v24  ;;  %10840 = vmatprep.mubr.f32.mxu1 %v17506_v51  ;;  %v17510_v24 = vld [vmem:[#allocation21_spill] sm:$0xff] }
 0x556   :  { %10879 = vmatpush3.msra.mxu0 %v17504_v21  ;;  %10964 = vmatprep.subr.mxu1 %v17448_v14 }
 0x557   :  { %10880 = vmatprep.subr.mxu0 %v17507_v58  ;;  %10965 = vmatpush3.msra.mxu1 %v17448_v14  ;;  %v17511_v14 = vand.u32 4294901760, %v15537_v29 }
 0x558   :  { %10755 = vmatmul.mubr.f32.gmra.mxu0 %v15397_v12  ;;  %10841 = vmatmul.mubr.f32.gmra.mxu1 %v17508_v48  ;;  %v17512_v12 = vand.u32 4294901760, %v15592_v59 }
 0x559   :  { %10757 = vmatprep.mubr.f32.mxu0 %v15463_v11  ;;  %10843 = vmatprep.mubr.f32.mxu1 %v17509_v34  ;;  %v17513_v11 = vld [vmem:[#allocation20_spill] sm:$0xff] }
 0x55a   :  { %10881 = vmatpush3.msra.mxu0 %v17507_v58  ;;  %10966 = vmatprep.subr.mxu1 %v17450_v1 }
 0x55b   :  { %10882 = vmatprep.subr.mxu0 %v17510_v24  ;;  %10967 = vmatpush3.msra.mxu1 %v17450_v1  ;;  %v17514_v1 = vand.u32 4294901760, %v15575_v52 }
 0x55c   :  { %10758 = vmatmul.mubr.f32.gmra.mxu0 %v15449_v44  ;;  %10844 = vmatmul.mubr.f32.gmra.mxu1 %v17511_v14  ;;  %v17515_v44 = vand.u32 4294901760, %v15625_v17  ;;  %v17559_v14 = vld [vmem:[#allocation33_spill] sm:$0xff] }
 0x55d   :  { %10760 = vmatprep.mubr.f32.mxu0 %v15507_v9  ;;  %10846 = vmatprep.mubr.f32.mxu1 %v17512_v12  ;;  %v17516_v9 = vld [vmem:[#allocation60_spill] sm:$0xff] }
 0x55e   :  { %10883 = vmatpush3.msra.mxu0 %v17510_v24  ;;  %10968 = vmatprep.subr.mxu1 %v17453_v49  ;;  %v17558_v24 = vld [vmem:[#allocation66_spill] sm:$0xff] }
 0x55f   :  { %10884 = vmatprep.subr.mxu0 %v17513_v11  ;;  %10969 = vmatpush3.msra.mxu1 %v17453_v49  ;;  %v17517_v49 = vand.u32 4294901760, %v15618_v61 }
 0x560   :  { %10761 = vmatmul.mubr.f32.gmra.mxu0 %v15487_v32  ;;  %10847 = vmatmul.mubr.f32.gmra.mxu1 %v17514_v1  ;;  %v17518_v32 = vand.u32 4294901760, %v15661_v20 }
 0x561   :  { %10763 = vmatprep.mubr.f32.mxu0 %v15553_v33  ;;  %10849 = vmatprep.mubr.f32.mxu1 %v17515_v44  ;;  %v17519_v33 = vld [vmem:[#allocation35_spill] sm:$0xff]  ;;  %v17561_v44 = vld [vmem:[#allocation40_spill] sm:$0xff] }
 0x562   :  { %10885 = vmatpush3.msra.mxu0 %v17513_v11  ;;  %10970 = vmatprep.subr.mxu1 %v17456_v28  ;;  %v17560_v11 = vld [vmem:[#allocation62_spill] sm:$0xff] }
 0x563   :  { %10886 = vmatprep.subr.mxu0 %v17516_v9  ;;  %10971 = vmatpush3.msra.mxu1 %v17456_v28  ;;  %v17520_v28 = vand.u32 4294901760, %v15646_v57 }
 0x564   :  { %10764 = vmatmul.mubr.f32.gmra.mxu0 %v15537_v29  ;;  %10850 = vmatmul.mubr.f32.gmra.mxu1 %v17517_v49  ;;  %v17521_v29 = vand.u32 4294901760, %v15692_v8 }
 0x565   :  { %10766 = vmatprep.mubr.f32.mxu0 %v15592_v59  ;;  %10852 = vmatprep.mubr.f32.mxu1 %v17518_v32  ;;  %v17522_v59 = vld [vmem:[#allocation38_spill] sm:$0xff] }
 0x566   :  { %10887 = vmatpush3.msra.mxu0 %v17516_v9  ;;  %10972 = vmatprep.subr.mxu1 %v17458_v39 }
 0x567   :  { %10888 = vmatprep.subr.mxu0 %v17519_v33  ;;  %10973 = vmatpush3.msra.mxu1 %v17458_v39  ;;  %v17523_v39 = vand.u32 4294901760, %v15685_v15 }
 0x568   :  { %10767 = vmatmul.mubr.f32.gmra.mxu0 %v15575_v52  ;;  %10853 = vmatmul.mubr.f32.gmra.mxu1 %v17520_v28  ;;  %v17524_v52 = vand.u32 4294901760, %v15727_v3  ;;  %v17562_v28 = vld [vmem:[#allocation30_spill] sm:$0xff] }
 0x569   :  { %10769 = vmatprep.mubr.f32.mxu0 %v15625_v17  ;;  %10855 = vmatprep.mubr.f32.mxu1 %v17521_v29  ;;  %v17528_v17 = vld [vmem:[#allocation65_spill] sm:$0xff]  ;;  %v17563_v29 = vld [vmem:[#allocation22_spill] sm:$0xff] }
 0x56a   :  { %10889 = vmatpush3.msra.mxu0 %v17519_v33  ;;  %10974 = vmatprep.subr.mxu1 %v17461_v56 }
 0x56b   :  { %10890 = vmatprep.subr.mxu0 %v17522_v59  ;;  %10975 = vmatpush3.msra.mxu1 %v17461_v56  ;;  %v17526_v56 = vand.u32 4294901760, %v15715_v41 }
 0x56c   :  { %10770 = vmatmul.mubr.f32.gmra.mxu0 %v15618_v61  ;;  %10856 = vmatmul.mubr.f32.gmra.mxu1 %v17523_v39  ;;  %v17527_v61 = vand.u32 4294901760, %v15761_v22  ;;  %v17564_v39 = vld [vmem:[#allocation31_spill] sm:$0xff] }
 0x56d   :  { %10772 = vmatprep.mubr.f32.mxu0 %v15661_v20  ;;  %10858 = vmatprep.mubr.f32.mxu1 %v17524_v52  ;;  %v17531_v20 = vld [vmem:[#allocation50_spill] sm:$0xff] }
 0x56e   :  { %10891 = vmatpush3.msra.mxu0 %v17522_v59  ;;  %10976 = vmatprep.subr.mxu1 %v14948_v45 }
 0x56f   :  { %10892 = vmatprep.subr.mxu0 %v17525_v19  ;;  %10977 = vmatpush3.msra.mxu1 %v14948_v45  ;;  %v17529_v45 = vand.u32 4294901760, %v15754_v16 }
 0x570   :  { %10773 = vmatmul.mubr.f32.gmra.mxu0 %v15646_v57  ;;  %10859 = vmatmul.mubr.f32.gmra.mxu1 %v17526_v56  ;;  %v17530_v57 = vand.u32 4294901760, %v15794_v50 }
 0x571   :  { %10775 = vmatprep.mubr.f32.mxu0 %v15692_v8  ;;  %10861 = vmatprep.mubr.f32.mxu1 %v17527_v61  ;;  %v17534_v8 = vld [vmem:[#allocation76_spill] sm:$0xff] }
 0x572   :  { %10893 = vmatpush3.msra.mxu0 %v17525_v19  ;;  %10978 = vmatprep.subr.mxu1 %v14983_v5  ;;  %v17565_v19 = vld [vmem:[#allocation29_spill] sm:$0xff] }
 0x573   :  { %10894 = vmatprep.subr.mxu0 %v17528_v17  ;;  %10979 = vmatpush3.msra.mxu1 %v14983_v5  ;;  %v17532_v5 = vand.u32 4294901760, %v15784_v30 }
 0x574   :  { %10776 = vmatmul.mubr.f32.gmra.mxu0 %v15685_v15  ;;  %10862 = vmatmul.mubr.f32.gmra.mxu1 %v17529_v45  ;;  %v17533_v15 = vand.u32 4294901760, %v15824_v63 }
 0x575   :  { %10778 = vmatprep.mubr.f32.mxu0 %v15727_v3  ;;  %10864 = vmatprep.mubr.f32.mxu1 %v17530_v57  ;;  %v17535_v3 = vld [vmem:[#allocation74_spill] sm:$0xff]  ;;  %v17566_v57 = vld [vmem:[#allocation39_spill] sm:$0xff] }
 0x576   :  { %10895 = vmatpush3.msra.mxu0 %v17528_v17  ;;  %10980 = vmatprep.subr.mxu1 %v15006_v2 }
 0x577   :  { %10896 = vmatprep.subr.mxu0 %v17531_v20  ;;  %10981 = vmatpush3.msra.mxu1 %v15006_v2  ;;  %v17536_v2 = vld [vmem:[#allocation13_spill] sm:$0xff] }
 0x578   :  { %10779 = vmatmul.mubr.f32.gmra.mxu0 %v15715_v41  ;;  %10865 = vmatmul.mubr.f32.gmra.mxu1 %v17532_v5  ;;  %v17537_v41 = vand.u32 4294901760, %v17536_v2 }
 0x579   :  { %10781 = vmatprep.mubr.f32.mxu0 %v15761_v22  ;;  %10867 = vmatprep.mubr.f32.mxu1 %v17533_v15  ;;  %v17538_v22 = vld [vmem:[#allocation79_spill] sm:$0xff]  ;;  %v17568_v15 = vld [vmem:[#allocation52_spill] sm:$0xff] }
 0x57a   :  { %10897 = vmatpush3.msra.mxu0 %v17531_v20  ;;  %10982 = vmatprep.subr.mxu1 %v17534_v8  ;;  %v17567_v20 = vld [vmem:[#allocation16_spill] sm:$0xff] }
 0x57b   :  { %10898 = vmatprep.subr.mxu0 %v17535_v3  ;;  %10983 = vmatpush3.msra.mxu1 %v17534_v8 }
 0x57c   :  { %10782 = vmatmul.mubr.f32.gmra.mxu0 %v15754_v16  ;;  %10868 = vmatmul.mubr.f32.gmra.mxu1 %v17537_v41  ;;  %v17540_v16 = vand.u32 4294901760, %v15843_v27 }
 0x57d   :  { %10784 = vmatprep.mubr.f32.mxu0 %v15794_v50  ;;  %10870 = vmatprep.mubr.f32.mxu1 %v6742_v42  ;;  %v17541_v50 = vld [vmem:[#allocation80_spill] sm:$0xff]  ;;  %v17542_v42 = vld [vmem:[#allocation81_spill] sm:$0xff] }
 0x57e   :  { %10899 = vmatpush3.msra.mxu0 %v17535_v3  ;;  %10984 = vmatprep.subr.mxu1 %v17538_v22  ;;  %v17569_v3 = vld [vmem:[#allocation54_spill] sm:$0xff] }
 0x57f   :  { %10900 = vmatprep.subr.mxu0 %v17539_v13  ;;  %10985 = vmatpush3.msra.mxu1 %v17538_v22 }
 0x580   :  { %10785 = vmatmul.mubr.f32.gmra.mxu0 %v15784_v30  ;;  %10871 = vmatmul.mubr.f32.gmra.mxu1 %v17540_v16  ;;  %v17543_v30 = vld [vmem:[#allocation57_spill] sm:$0xff] }
 0x581   :  { %10787 = vmatprep.mubr.f32.mxu0 %v15824_v63  ;;  %10873 = vmatprep.mubr.f32.mxu1 %v6762_v31  ;;  %v17544_v63 = vld [vmem:[#allocation36_spill] sm:$0xff]  ;;  %v17570_v16 = vld [vmem:[#allocation25_spill] sm:$0xff] }
 0x582   :  { %10901 = vmatpush3.msra.mxu0 %v17539_v13  ;;  %10986 = vmatprep.subr.mxu1 %v17541_v50  ;;  %v17546_v31 = vld [vmem:[#allocation48_spill] sm:$0xff] }
 0x583   :  { %10902 = vmatprep.subr.mxu0 %v17542_v42  ;;  %10987 = vmatpush3.msra.mxu1 %v17541_v50  ;;  %v17571_v50 = vld [vmem:[#allocation56_spill] sm:$0xff] }
 0x584   :  { %10788 = vmatmul.mubr.f32.gmra.mxu0 %v17536_v2  ;;  %10874 = vmatmul.mubr.f32.gmra.mxu1 %v6772_v47  ;;  %v17553_v47 = vld [vmem:[#allocation27_spill] sm:$0xff] }
 0x585   :  { %10790 = vmatprep.mubr.f32.mxu0 %v15850_v25  ;;  %10903 = vmatpush3.msra.mxu0 %v17542_v42  ;;  %v17548_v25 = vld [vmem:[#allocation26_spill] sm:$0xff] }
 0x586   :  { %10988 = vmatprep.mubr.f32.mxu1 %v17543_v30  ;;  %10904 = vmatprep.subr.mxu0 %v17544_v63 }
 0x587   :  { %10905 = vmatpush3.msra.mxu0 %v17544_v63 }
 0x588   :  { %10791 = vmatmul.mubr.f32.gmra.mxu0 %v15843_v27  ;;  %10989 = vmatmul.mubr.f32.vlgmr.msra.gmra.mxu1 %v17545_v54  ;;  %v17550_v27 = vld [vmem:[#allocation11_spill] sm:$0xff] }
 0x589   :  { %10793 = vmatprep.mubr.f32.mxu0 %v15867_v23  ;;  %10991 = vmatprep.mubr.f32.mxu1 %v17546_v31  ;;  %v17551_v23 = vld [vmem:[#allocation70_spill] sm:$0xff] }
 0x58a   :  { %10906 = vmatprep.subr.mxu0 %v17547_v26 }
 0x58b   :  { %10907 = vmatpush3.msra.mxu0 %v17547_v26  ;;  %v10670_v18 = vpop.f32.mrf.mxu1 }
 0x58c   :  { %10794 = vmatmul.mubr.f32.gmra.mxu0 %v15877_v36  ;;  %10992 = vmatmul.mubr.f32.gmra.mxu1 %v17548_v25 }
 0x58d   :  { %10908 = vmatprep.mubr.f32.mxu0 %v17543_v30  ;;  %10994 = vmatprep.mubr.f32.mxu1 %v17549_v62  ;;  %v6927_v37 = vpop.f32.mrf.mxu1  ;;  %v17572_v30 = vld [vmem:[#allocation67_spill] sm:$0xff] }
 0x590   :  { %10909 = vmatmul.mubr.f32.vlgmr.msra.gmra.mxu0 %v17545_v54  ;;  %10995 = vmatmul.mubr.f32.gmra.mxu1 %v17550_v27 }
 0x591   :  { %10911 = vmatprep.mubr.f32.mxu0 %v17546_v31  ;;  %10997 = vmatprep.mubr.f32.mxu1 %v17551_v23 }
 0x593   :  { %v10590_v36 = vpop.f32.mrf.mxu0  ;;  %v10673_v10 = vpop.f32.mrf.mxu1 }
 0x594   :  { %10912 = vmatmul.mubr.f32.gmra.mxu0 %v17548_v25  ;;  %10998 = vmatmul.mubr.f32.gmra.mxu1 %v17552_v38  ;;  %v16055_v53 = vadd.f32 %v10670_v18, %v10590_v36 }
 0x595   :  { %10914 = vmatprep.mubr.f32.mxu0 %v17549_v62  ;;  %11000 = vmatprep.mubr.f32.mxu1 %v17553_v47  ;;  %v6466_v40 = vpop.f32.mrf.mxu0  ;;  %v6939_v58 = vpop.f32.mrf.mxu1 }
 0x596   :  { %v16057_v46 = vadd.f32 %v6927_v37, %v6466_v40 }
 0x598   :  { %10915 = vmatmul.mubr.f32.gmra.mxu0 %v17550_v27  ;;  %11001 = vmatmul.mubr.f32.gmra.mxu1 %v17554_v0 }
 0x599   :  { %10917 = vmatprep.mubr.f32.mxu0 %v17551_v23  ;;  %11003 = vmatprep.mubr.f32.mxu1 %v17555_v43 }
 0x59b   :  { %v10593_v21 = vpop.f32.mrf.mxu0 }
 0x59c   :  { %10918 = vmatmul.mubr.f32.gmra.mxu0 %v17552_v38  ;;  %11004 = vmatmul.mubr.f32.gmra.mxu1 %v17556_v4  ;;  %v16067_v51 = vadd.f32 %v10673_v10, %v10593_v21  ;;  %v10676_v12 = vpop.f32.mrf.mxu1 }
 0x59d   :  { %10920 = vmatprep.mubr.f32.mxu0 %v17553_v47  ;;  %11006 = vmatprep.mubr.f32.mxu1 %v17557_v6  ;;  %v6486_v48 = vpop.f32.mrf.mxu0 }
 0x59e   :  { %v16069_v34 = vadd.f32 %v6939_v58, %v6486_v48  ;;  %v6951_v49 = vpop.f32.mrf.mxu1 }
 0x5a0   :  { %10921 = vmatmul.mubr.f32.gmra.mxu0 %v17554_v0  ;;  %11007 = vmatmul.mubr.f32.gmra.mxu1 %v17558_v24 }
 0x5a1   :  { %10923 = vmatprep.mubr.f32.mxu0 %v17555_v43  ;;  %11009 = vmatprep.mubr.f32.mxu1 %v17559_v14 }
 0x5a4   :  { %10924 = vmatmul.mubr.f32.gmra.mxu0 %v17556_v4  ;;  %11010 = vmatmul.mubr.f32.gmra.mxu1 %v17560_v11 }
 0x5a5   :  { %v10596_v1 = vpop.f32.mrf.mxu0  ;;  %10926 = vmatprep.mubr.f32.mxu0 %v17557_v6  ;;  %11012 = vmatprep.mubr.f32.mxu1 %v17561_v44  ;;  %v10679_v59 = vpop.f32.mrf.mxu1 }
 0x5a6   :  { %v16079_v9 = vadd.f32 %v10676_v12, %v10596_v1 }
 0x5a7   :  { %v6506_v32 = vpop.f32.mrf.mxu0  ;;  %v6963_v61 = vpop.f32.mrf.mxu1 }
 0x5a8   :  { %v16081_v33 = vadd.f32 %v6951_v49, %v6506_v32  ;;  %10927 = vmatmul.mubr.f32.gmra.mxu0 %v17558_v24  ;;  %11013 = vmatmul.mubr.f32.gmra.mxu1 %v17562_v28 }
 0x5a9   :  { %10929 = vmatprep.mubr.f32.mxu0 %v17559_v14  ;;  %11015 = vmatprep.mubr.f32.mxu1 %v17563_v29 }
 0x5ac   :  { %10930 = vmatmul.mubr.f32.gmra.mxu0 %v17560_v11  ;;  %11016 = vmatmul.mubr.f32.gmra.mxu1 %v17564_v39 }
 0x5ad   :  { %v10599_v52 = vpop.f32.mrf.mxu0  ;;  %10932 = vmatprep.mubr.f32.mxu0 %v17561_v44  ;;  %11018 = vmatprep.mubr.f32.mxu1 %v17565_v19  ;;  %v10682_v5 = vpop.f32.mrf.mxu1 }
 0x5ae   :  { %v16091_v56 = vadd.f32 %v10679_v59, %v10599_v52 }
 0x5af   :  { %v6526_v17 = vpop.f32.mrf.mxu0  ;;  %v6975_v41 = vpop.f32.mrf.mxu1 }
 0x5b0   :  { %v16093_v45 = vadd.f32 %v6963_v61, %v6526_v17  ;;  %10933 = vmatmul.mubr.f32.gmra.mxu0 %v17562_v28  ;;  %11019 = vmatmul.mubr.f32.gmra.mxu1 %v17566_v57 }
 0x5b1   :  { %10935 = vmatprep.mubr.f32.mxu0 %v17563_v29  ;;  %11021 = vmatprep.mubr.f32.mxu1 %v17567_v20 }
 0x5b4   :  { %10936 = vmatmul.mubr.f32.gmra.mxu0 %v17564_v39  ;;  %11022 = vmatmul.mubr.f32.gmra.mxu1 %v17568_v15 }
 0x5b5   :  { %v10602_v8 = vpop.f32.mrf.mxu0  ;;  %10938 = vmatprep.mubr.f32.mxu0 %v17565_v19  ;;  %11024 = vmatprep.mubr.f32.mxu1 %v17569_v3  ;;  %v10685_v42 = vpop.f32.mrf.mxu1 }
 0x5b6   :  { %v16103_v2 = vadd.f32 %v10682_v5, %v10602_v8 }
 0x5b7   :  { %v6546_v22 = vpop.f32.mrf.mxu0  ;;  %v6987_v31 = vpop.f32.mrf.mxu1 }
 0x5b8   :  { %v16105_v13 = vadd.f32 %v6975_v41, %v6546_v22  ;;  %10939 = vmatmul.mubr.f32.gmra.mxu0 %v17566_v57  ;;  %11025 = vmatmul.mubr.f32.gmra.mxu1 %v17570_v16 }
 0x5b9   :  { %10941 = vmatprep.mubr.f32.mxu0 %v17567_v20  ;;  %11027 = vmatprep.mubr.f32.mxu1 %v17571_v50 }
 0x5bc   :  { %10942 = vmatmul.mubr.f32.gmra.mxu0 %v17568_v15  ;;  %11028 = vmatmul.mubr.f32.gmra.mxu1 %v17572_v30 }
 0x5bd   :  { %v10605_v63 = vpop.f32.mrf.mxu0  ;;  %10944 = vmatprep.mubr.f32.mxu0 %v17569_v3  ;;  %11030 = vmatprep.mubr.f32.mxu1 %v15845_v7  ;;  %v10688_v62 = vpop.f32.mrf.mxu1 }
 0x5be   :  { %v16115_v54 = vadd.f32 %v10685_v42, %v10605_v63 }
 0x5bf   :  { %v6566_v26 = vpop.f32.mrf.mxu0  ;;  %v6999_v18 = vpop.f32.mrf.mxu1 }
 0x5c0   :  { %v16117_v25 = vadd.f32 %v6987_v31, %v6566_v26  ;;  %10945 = vmatmul.mubr.f32.gmra.mxu0 %v17570_v16  ;;  %11031 = vmatmul.mubr.f32.gmra.mxu1 %v15831_v55 }
 0x5c1   :  { %10947 = vmatprep.mubr.f32.mxu0 %v17571_v50  ;;  %11033 = vmatprep.mubr.f32.mxu1 %v15856_v35 }
 0x5c4   :  { %10948 = vmatmul.mubr.f32.gmra.mxu0 %v17572_v30  ;;  %11034 = vmatmul.mubr.f32.gmra.mxu1 %v15869_v60 }
 0x5c5   :  { %v10608_v27 = vpop.f32.mrf.mxu0  ;;  %10950 = vmatprep.mubr.f32.mxu0 %v15845_v7  ;;  %v10691_v47 = vpop.f32.mrf.mxu1 }
 0x5c6   :  { %v16126_v23 = vadd.f32 %v10688_v62, %v10608_v27 }
 0x5c7   :  { %v6586_v38 = vpop.f32.mrf.mxu0  ;;  %v7011_v0 = vpop.f32.mrf.mxu1 }
 0x5c8   :  { %v16128_v36 = vadd.f32 %v6999_v18, %v6586_v38  ;;  %10951 = vmatmul.mubr.f32.gmra.mxu0 %v15831_v55 }
 0x5c9   :  { %10953 = vmatprep.mubr.f32.mxu0 %v15856_v35 }
 0x5cc   :  { %10954 = vmatmul.mubr.f32.gmra.mxu0 %v15869_v60 }
 0x5cd   :  { %v10611_v37 = vpop.f32.mrf.mxu0  ;;  %v10694_v7 = vpop.f32.mrf.mxu1 }
 0x5ce   :  { %v16133_v40 = vadd.f32 %v10691_v47, %v10611_v37 }
 0x5cf   :  { %v6606_v43 = vpop.f32.mrf.mxu0  ;;  %v7023_v6 = vpop.f32.mrf.mxu1 }
 0x5d0   :  { %v16135_v10 = vadd.f32 %v7011_v0, %v6606_v43 }
 0x5d5   :  { %v10614_v4 = vpop.f32.mrf.mxu0  ;;  %v10697_v55 = vpop.f32.mrf.mxu1 }
 0x5d6   :  { %v16137_v21 = vadd.f32 %v10694_v7, %v10614_v4 }
 0x5d7   :  { %v6626_v58 = vpop.f32.mrf.mxu0  ;;  %v7035_v60 = vpop.f32.mrf.mxu1 }
 0x5d8   :  { %v16139_v48 = vadd.f32 %v7023_v6, %v6626_v58 }
 0x5dd   :  { %v10617_v35 = vpop.f32.mrf.mxu0  ;;  %v10700_v11 = vpop.f32.mrf.mxu1 }
 0x5de   :  { %v16141_v24 = vadd.f32 %v10697_v55, %v10617_v35 }
 0x5df   :  { %v6646_v14 = vpop.f32.mrf.mxu0  ;;  %v7047_v49 = vpop.f32.mrf.mxu1 }
 0x5e0   :  { %v16143_v12 = vadd.f32 %v7035_v60, %v6646_v14 }
 0x5e5   :  { %v10620_v1 = vpop.f32.mrf.mxu0  ;;  %v10703_v29 = vpop.f32.mrf.mxu1 }
 0x5e6   :  { %v16145_v44 = vadd.f32 %v10700_v11, %v10620_v1 }
 0x5e7   :  { %v6666_v32 = vpop.f32.mrf.mxu0  ;;  %v7059_v52 = vpop.f32.mrf.mxu1 }
 0x5e8   :  { %v16147_v28 = vadd.f32 %v7047_v49, %v6666_v32 }
 0x5ed   :  { %v10623_v59 = vpop.f32.mrf.mxu0  ;;  %v10706_v17 = vpop.f32.mrf.mxu1 }
 0x5ee   :  { %v16149_v39 = vadd.f32 %v10703_v29, %v10623_v59 }
 0x5ef   :  { %v6686_v19 = vpop.f32.mrf.mxu0  ;;  %v7071_v20 = vpop.f32.mrf.mxu1 }
 0x5f0   :  { %v16151_v61 = vadd.f32 %v7059_v52, %v6686_v19 }
 0x5f2   :  { %17573 = vst [vmem:[#allocation73_spill] sm:$0xff] %v16151_v61 }
 0x5f5   :  { %v10626_v57 = vpop.f32.mrf.mxu0  ;;  %v10709_v8 = vpop.f32.mrf.mxu1 }
 0x5f6   :  { %v16153_v5 = vadd.f32 %v10706_v17, %v10626_v57 }
 0x5f7   :  { %v6706_v15 = vpop.f32.mrf.mxu0  ;;  %v7083_v41 = vpop.f32.mrf.mxu1 }
 0x5f8   :  { %v16155_v3 = vadd.f32 %v7071_v20, %v6706_v15 }
 0x5fa   :  { %17574 = vst [vmem:[#allocation59_spill] sm:$0xff] %v16155_v3 }
 0x5fd   :  { %v10629_v22 = vpop.f32.mrf.mxu0  ;;  %v10712_v50 = vpop.f32.mrf.mxu1 }
 0x5fe   :  { %v16157_v16 = vadd.f32 %v10709_v8, %v10629_v22 }
 0x5ff   :  { %v6726_v42 = vpop.f32.mrf.mxu0  ;;  %v7095_v63 = vpop.f32.mrf.mxu1 }
 0x600   :  { %v16159_v30 = vadd.f32 %v7083_v41, %v6726_v42 }
 0x602   :  { %17575 = vst [vmem:[#allocation19_spill] sm:$0xff] %v16159_v30 }
 0x604   :  { %v10715_v31 = vpop.f32.mrf.mxu1 }
 0x605   :  { %v10632_v26 = vpop.f32.mrf.mxu0 }
 0x606   :  { %v16161_v62 = vadd.f32 %v10712_v50, %v10632_v26  ;;  %v7107_v27 = vpop.f32.mrf.mxu1 }
 0x607   :  { %v6746_v18 = vpop.f32.mrf.mxu0 }
 0x608   :  { %v16163_v38 = vadd.f32 %v7095_v63, %v6746_v18  ;;  %v10830_v47 = vpop.f32.mrf.mxu1 }
 0x60a   :  { %17576 = vst [vmem:[#allocation18_spill] sm:$0xff] %v16163_v38  ;;  %v16165_v37 = vpop.f32.mrf.mxu1 }
 0x60c   :  { %v10635_v0 = vpop.f32.mrf.mxu0  ;;  %v10833_v43 = vpop.f32.mrf.mxu1 }
 0x60d   :  { %v16167_v7 = vadd.f32 %v10715_v31, %v10635_v0 }
 0x60e   :  { %v6766_v4 = vpop.f32.mrf.mxu0  ;;  %v16169_v6 = vpop.f32.mrf.mxu1 }
 0x60f   :  { %v16171_v58 = vadd.f32 %v7107_v27, %v6766_v4 }
 0x610   :  { %v10750_v55 = vpop.f32.mrf.mxu0  ;;  %v10836_v35 = vpop.f32.mrf.mxu1 }
 0x611   :  { %17577 = vst [vmem:[#allocation42_spill] sm:$0xff] %v16171_v58  ;;  %v7225_v60 = vadd.f32 %v10750_v55, %v16055_v53 }
 0x612   :  { %v16174_v14 = vpop.f32.mrf.mxu0  ;;  %v16176_v11 = vpop.f32.mrf.mxu1 }
 0x613   :  { %v16178_v1 = vadd.f32 %v10830_v47, %v7225_v60 }
 0x614   :  { %v10753_v49 = vpop.f32.mrf.mxu0  ;;  %v10839_v32 = vpop.f32.mrf.mxu1 }
 0x615   :  { %v7239_v29 = vadd.f32 %v10753_v49, %v16067_v51 }
 0x616   :  { %v16181_v59 = vpop.f32.mrf.mxu0  ;;  %v16183_v52 = vpop.f32.mrf.mxu1 }
 0x617   :  { %v16185_v19 = vadd.f32 %v10833_v43, %v7239_v29 }
 0x618   :  { %v10756_v17 = vpop.f32.mrf.mxu0  ;;  %v10842_v57 = vpop.f32.mrf.mxu1 }
 0x619   :  { %v7253_v53 = vadd.f32 %v10756_v17, %v16079_v9 }
 0x61a   :  { %v16188_v20 = vpop.f32.mrf.mxu0  ;;  %v16190_v15 = vpop.f32.mrf.mxu1 }
 0x61b   :  { %v16192_v8 = vadd.f32 %v10836_v35, %v7253_v53 }
 0x61c   :  { %v10759_v41 = vpop.f32.mrf.mxu0  ;;  %v10845_v22 = vpop.f32.mrf.mxu1 }
 0x61d   :  { %v7267_v51 = vadd.f32 %v10759_v41, %v16091_v56 }
 0x61e   :  { %v16195_v50 = vpop.f32.mrf.mxu0  ;;  %v16197_v42 = vpop.f32.mrf.mxu1 }
 0x61f   :  { %v16199_v63 = vadd.f32 %v10839_v32, %v7267_v51 }
 0x620   :  { %v10762_v31 = vpop.f32.mrf.mxu0  ;;  %v10848_v26 = vpop.f32.mrf.mxu1 }
 0x621   :  { %v7281_v9 = vadd.f32 %v10762_v31, %v16103_v2 }
 0x622   :  { %v16202_v27 = vpop.f32.mrf.mxu0  ;;  %v16204_v18 = vpop.f32.mrf.mxu1 }
 0x623   :  { %v16206_v47 = vadd.f32 %v10842_v57, %v7281_v9 }
 0x624   :  { %v10765_v0 = vpop.f32.mrf.mxu0  ;;  %v10851_v43 = vpop.f32.mrf.mxu1 }
 0x625   :  { %v7295_v56 = vadd.f32 %v10765_v0, %v16115_v54 }
 0x626   :  { %v16209_v4 = vpop.f32.mrf.mxu0  ;;  %v16211_v55 = vpop.f32.mrf.mxu1 }
 0x627   :  { %v16213_v35 = vadd.f32 %v10845_v22, %v7295_v56 }
 0x628   :  { %v10768_v60 = vpop.f32.mrf.mxu0  ;;  %v10854_v49 = vpop.f32.mrf.mxu1 }
 0x629   :  { %v7309_v2 = vadd.f32 %v10768_v60, %v16126_v23 }
 0x62a   :  { %v16216_v32 = vpop.f32.mrf.mxu0  ;;  %v16218_v29 = vpop.f32.mrf.mxu1 }
 0x62b   :  { %v16220_v17 = vadd.f32 %v10848_v26, %v7309_v2 }
 0x62c   :  { %v10771_v57 = vpop.f32.mrf.mxu0  ;;  %v10857_v53 = vpop.f32.mrf.mxu1 }
 0x62d   :  { %v7323_v54 = vadd.f32 %v10771_v57, %v16133_v40 }
 0x62e   :  { %v16223_v41 = vpop.f32.mrf.mxu0  ;;  %v16225_v51 = vpop.f32.mrf.mxu1 }
 0x62f   :  { %v16227_v22 = vadd.f32 %v10851_v43, %v7323_v54 }
 0x630   :  { %v10774_v31 = vpop.f32.mrf.mxu0  ;;  %v10860_v9 = vpop.f32.mrf.mxu1 }
 0x631   :  { %v7337_v23 = vadd.f32 %v10774_v31, %v16137_v21 }
 0x632   :  { %v16230_v0 = vpop.f32.mrf.mxu0  ;;  %v16232_v56 = vpop.f32.mrf.mxu1 }
 0x633   :  { %17578 = vst [vmem:[#allocation17_spill] sm:$0xff] %v16232_v56  ;;  %v16234_v26 = vadd.f32 %v10854_v49, %v7337_v23 }
 0x634   :  { %v10777_v60 = vpop.f32.mrf.mxu0  ;;  %v10863_v2 = vpop.f32.mrf.mxu1 }
 0x635   :  { %v7351_v40 = vadd.f32 %v10777_v60, %v16141_v24 }
 0x636   :  { %v16237_v57 = vpop.f32.mrf.mxu0  ;;  %v16239_v58 = vpop.f32.mrf.mxu1 }
 0x637   :  { %17579 = vst [vmem:[#allocation72_spill] sm:$0xff] %v16239_v58  ;;  %v16241_v43 = vadd.f32 %v10857_v53, %v7351_v40 }
 0x638   :  { %v10780_v54 = vpop.f32.mrf.mxu0  ;;  %v10866_v38 = vpop.f32.mrf.mxu1 }
 0x639   :  { %v7365_v21 = vadd.f32 %v10780_v54, %v16145_v44 }
 0x63a   :  { %v16244_v31 = vpop.f32.mrf.mxu0  ;;  %v16246_v30 = vpop.f32.mrf.mxu1 }
 0x63b   :  { %17580 = vst [vmem:[#allocation64_spill] sm:$0xff] %v16246_v30  ;;  %v16248_v49 = vadd.f32 %v10860_v9, %v7365_v21 }
 0x63c   :  { %v10783_v23 = vpop.f32.mrf.mxu0  ;;  %v10869_v3 = vpop.f32.mrf.mxu1 }
 0x63d   :  { %17581 = vst [vmem:[#allocation45_spill] sm:$0xff] %v16248_v49  ;;  %v7379_v24 = vadd.f32 %v10783_v23, %v16149_v39 }
 0x63e   :  { %v16251_v60 = vpop.f32.mrf.mxu0  ;;  %v16253_v56 = vpop.f32.mrf.mxu1 }
 0x63f   :  { %17582 = vst [vmem:[#allocation43_spill] sm:$0xff] %v16253_v56  ;;  %v16255_v53 = vadd.f32 %v10863_v2, %v7379_v24 }
 0x640   :  { %v10786_v40 = vpop.f32.mrf.mxu0  ;;  %v10872_v58 = vpop.f32.mrf.mxu1 }
 0x641   :  { %17583 = vst [vmem:[#allocation28_spill] sm:$0xff] %v16255_v53  ;;  %v7393_v44 = vadd.f32 %v10786_v40, %v16153_v5 }
 0x642   :  { %v16258_v54 = vpop.f32.mrf.mxu0  ;;  %v16260_v61 = vpop.f32.mrf.mxu1 }
 0x643   :  { %17584 = vst [vmem:[#allocation71_spill] sm:$0xff] %v16260_v61  ;;  %v16262_v9 = vadd.f32 %v10866_v38, %v7393_v44 }
 0x644   :  { %v10789_v21 = vpop.f32.mrf.mxu0  ;;  %v10875_v30 = vpop.f32.mrf.mxu1 }
 0x645   :  { %17585 = vst [vmem:[#allocation34_spill] sm:$0xff] %v16262_v9  ;;  %v7407_v39 = vadd.f32 %v10789_v21, %v16157_v16  ;;  %v7218_v16 = vadd.f32 %v16174_v14, %v16057_v46 }
 0x646   :  { %v16265_v23 = vpop.f32.mrf.mxu0  ;;  %v16267_v49 = vpop.f32.mrf.mxu1 }
 0x647   :  { %17586 = vst [vmem:[#allocation47_spill] sm:$0xff] %v16267_v49  ;;  %v16269_v2 = vadd.f32 %v10869_v3, %v7407_v39 }
 0x648   :  { %v10792_v24 = vpop.f32.mrf.mxu0  ;;  %v10990_v56 = vpop.f32.mrf.mxu1 }
 0x649   :  { %17587 = vst [vmem:[#allocation32_spill] sm:$0xff] %v16269_v2  ;;  %v7421_v5 = vadd.f32 %v10792_v24, %v16161_v62  ;;  %v7232_v62 = vadd.f32 %v16181_v59, %v16069_v34  ;;  %v7524_v24 = vadd.f32 %v16165_v37, %v7218_v16  ;;  %v7260_v37 = vadd.f32 %v16195_v50, %v16093_v45 }
 0x64a   :  { %v16272_v40 = vpop.f32.mrf.mxu0  ;;  %v8163_v53 = vpop.f32.mrf.mxu1 }
 0x64b   :  { %17588 = vst [vmem:[#allocation44_spill] sm:$0xff] %v16272_v40  ;;  %v16274_v61 = vadd.f32 %v10872_v58, %v7421_v5  ;;  %v7572_v45 = vadd.f32 %v16183_v52, %v7260_v37 }
 0x64c   :  { %v10795_v38 = vpop.f32.mrf.mxu0  ;;  %v10993_v44 = vpop.f32.mrf.mxu1 }
 0x64d   :  { %17589 = vst [vmem:[#allocation41_spill] sm:$0xff] %v16274_v61  ;;  %v7435_v21 = vadd.f32 %v10795_v38, %v16167_v7  ;;  %v7246_v38 = vadd.f32 %v16188_v20, %v16081_v33 }
 0x64e   :  { %v16279_v9 = vpop.f32.mrf.mxu0  ;;  %v8175_v3 = vpop.f32.mrf.mxu1 }
 0x64f   :  { %17590 = vst [vmem:[#allocation69_spill] sm:$0xff] %v16279_v9  ;;  %v16281_v39 = vadd.f32 %v10875_v30, %v7435_v21  ;;  %v7556_v20 = vadd.f32 %v16176_v11, %v7246_v38 }
 0x650   :  { %v10910_v49 = vpop.f32.mrf.mxu0  ;;  %v10996_v2 = vpop.f32.mrf.mxu1 }
 0x651   :  { %17591 = vst [vmem:[#allocation37_spill] sm:$0xff] %v16281_v39  ;;  %v7897_v58 = vadd.f32 %v10910_v49, %v16178_v1  ;;  %v7540_v39 = vadd.f32 %v16169_v6, %v7232_v62 }
 0x652   :  { %v7890_v5 = vpop.f32.mrf.mxu0  ;;  %v8187_v61 = vpop.f32.mrf.mxu1 }
 0x653   :  { %v8170_v40 = vadd.f32 %v10990_v56, %v7897_v58  ;;  %v7891_v46 = vadd.f32 %v7890_v5, %v7524_v24 }
 0x654   :  { %v10913_v14 = vpop.f32.mrf.mxu0  ;;  %v10999_v7 = vpop.f32.mrf.mxu1 }
 0x655   :  { %v8164_v30 = vadd.f32 %v8163_v53, %v7891_v46  ;;  %v7909_v21 = vadd.f32 %v10913_v14, %v16185_v19  ;;  %v8354_v59 = vand.u32 2147483647, %v8170_v40  ;;  %v7274_v40 = vadd.f32 %v16202_v27, %v16105_v13 }
 0x656   :  { %v7902_v9 = vpop.f32.mrf.mxu0  ;;  %v8199_v34 = vpop.f32.mrf.mxu1 }
 0x657   :  { %v8353_v1 = vand.u32 2147483647, %v8164_v30  ;;  %v7903_v49 = vadd.f32 %v7902_v9, %v7540_v39  ;;  %v8182_v56 = vadd.f32 %v10993_v44, %v7909_v21 }
 0x658   :  { %v10916_v16 = vpop.f32.mrf.mxu0  ;;  %v11002_v58 = vpop.f32.mrf.mxu1 }
 0x659   :  { %v8385_v24 = vadd.f32 %v8354_v59, %v8353_v1  ;;  %v8176_v5 = vadd.f32 %v8175_v3, %v7903_v49  ;;  %v7921_v33 = vadd.f32 %v10916_v16, %v16192_v8  ;;  %v8356_v9 = vand.u32 2147483647, %v8182_v56 }
 0x65a   :  { %v7914_v19 = vpop.f32.mrf.mxu0  ;;  %v8211_v53 = vpop.f32.mrf.mxu1  ;;  %v7288_v59 = vadd.f32 %v16209_v4, %v16117_v25  ;;  %v7588_v49 = vadd.f32 %v16190_v15, %v7274_v40 }
 0x65b   :  { %v8355_v6 = vand.u32 2147483647, %v8176_v5  ;;  %v7915_v62 = vadd.f32 %v7914_v19, %v7556_v20  ;;  %v8194_v44 = vadd.f32 %v10996_v2, %v7921_v33  ;;  %v7302_v33 = vadd.f32 %v16216_v32, %v16128_v36 }
 0x65c   :  { %v10919_v39 = vpop.f32.mrf.mxu0  ;;  %v11005_v46 = vpop.f32.mrf.mxu1 }
 0x65d   :  { %v8386_v50 = vadd.f32 %v8385_v24, %v8355_v6  ;;  %v8188_v14 = vadd.f32 %v8187_v61, %v7915_v62  ;;  %v7933_v3 = vadd.f32 %v10919_v39, %v16199_v63  ;;  %v8358_v56 = vand.u32 2147483647, %v8194_v44 }
 0x65e   :  { %v7926_v8 = vpop.f32.mrf.mxu0  ;;  %v8223_v30 = vpop.f32.mrf.mxu1  ;;  %v7620_v44 = vadd.f32 %v16204_v18, %v7302_v33 }
 0x65f   :  { %v8357_v11 = vand.u32 2147483647, %v8188_v14  ;;  %v8387_v38 = vadd.f32 %v8386_v50, %v8356_v9  ;;  %v7927_v21 = vadd.f32 %v7926_v8, %v7572_v45  ;;  %v8206_v1 = vadd.f32 %v10999_v7, %v7933_v3 }
 0x660   :  { %v10922_v13 = vpop.f32.mrf.mxu0  ;;  %v11008_v27 = vpop.f32.mrf.mxu1  ;;  %v7604_v7 = vadd.f32 %v16197_v42, %v7288_v59  ;;  %v7316_v45 = vadd.f32 %v16223_v41, %v16135_v10 }
 0x661   :  { %v8388_v52 = vadd.f32 %v8387_v38, %v8357_v11  ;;  %v8200_v37 = vadd.f32 %v8199_v34, %v7927_v21  ;;  %v7945_v61 = vadd.f32 %v10922_v13, %v16206_v47  ;;  %v8360_v20 = vand.u32 2147483647, %v8206_v1 }
 0x662   :  { %v7938_v2 = vpop.f32.mrf.mxu0  ;;  %v8235_v63 = vpop.f32.mrf.mxu1  ;;  %v7330_v21 = vadd.f32 %v16230_v0, %v16139_v48 }
 0x663   :  { %v8359_v16 = vand.u32 2147483647, %v8200_v37  ;;  %v8389_v24 = vadd.f32 %v8388_v52, %v8358_v56  ;;  %v7939_v5 = vadd.f32 %v7938_v2, %v7588_v49  ;;  %v8218_v15 = vadd.f32 %v11002_v58, %v7945_v61 }
 0x664   :  { %v10925_v25 = vpop.f32.mrf.mxu0  ;;  %v11011_v4 = vpop.f32.mrf.mxu1  ;;  %v7344_v61 = vadd.f32 %v16237_v57, %v16143_v12 }
 0x665   :  { %v8390_v19 = vadd.f32 %v8389_v24, %v8359_v16  ;;  %v8212_v6 = vadd.f32 %v8211_v53, %v7939_v5  ;;  %v7957_v34 = vadd.f32 %v10925_v25, %v16213_v35  ;;  %v8362_v14 = vand.u32 2147483647, %v8218_v15 }
 0x666   :  { %v7950_v62 = vpop.f32.mrf.mxu0  ;;  %v8247_v47 = vpop.f32.mrf.mxu1  ;;  %v7652_v16 = vadd.f32 %v16218_v29, %v7330_v21 }
 0x667   :  { %v8361_v40 = vand.u32 2147483647, %v8212_v6  ;;  %v8391_v9 = vadd.f32 %v8390_v19, %v8360_v20  ;;  %v7951_v39 = vadd.f32 %v7950_v62, %v7604_v7  ;;  %v8230_v50 = vadd.f32 %v11005_v46, %v7957_v34 }
 0x668   :  { %v10928_v36 = vpop.f32.mrf.mxu0  ;;  %v11014_v32 = vpop.f32.mrf.mxu1  ;;  %v7636_v46 = vadd.f32 %v16211_v55, %v7316_v45  ;;  %v7358_v7 = vadd.f32 %v16244_v31, %v16147_v28 }
 0x669   :  { %v8392_v42 = vadd.f32 %v8391_v9, %v8361_v40  ;;  %v8224_v3 = vadd.f32 %v8223_v30, %v7951_v39  ;;  %v7969_v58 = vadd.f32 %v10928_v36, %v16220_v17  ;;  %v8364_v59 = vand.u32 2147483647, %v8230_v50  ;;  %v17592_v39 = vld [vmem:[#allocation73_spill] sm:$0xff] }
 0x66a   :  { %v7962_v53 = vpop.f32.mrf.mxu0  ;;  %v8259_v35 = vpop.f32.mrf.mxu1  ;;  %v7372_v45 = vadd.f32 %v16251_v60, %v17592_v39  ;;  %v17593_v36 = vld [vmem:[#allocation17_spill] sm:$0xff] }
 0x66b   :  { %v8363_v8 = vand.u32 2147483647, %v8224_v3  ;;  %v8393_v11 = vadd.f32 %v8392_v42, %v8362_v14  ;;  %v7963_v38 = vadd.f32 %v7962_v53, %v7620_v44  ;;  %v8242_v18 = vadd.f32 %v11008_v27, %v7969_v58 }
 0x66c   :  { %v10931_v10 = vpop.f32.mrf.mxu0  ;;  %v11017_v41 = vpop.f32.mrf.mxu1  ;;  %v7684_v44 = vadd.f32 %v17593_v36, %v7358_v7  ;;  %v17601_v7 = vld [vmem:[#allocation18_spill] sm:$0xff] }
 0x66d   :  { %v8394_v1 = vadd.f32 %v8393_v11, %v8363_v8  ;;  %v8236_v13 = vadd.f32 %v8235_v63, %v7963_v38  ;;  %v7981_v30 = vadd.f32 %v10931_v10, %v16227_v22  ;;  %v8366_v24 = vand.u32 2147483647, %v8242_v18  ;;  %v17595_v11 = vld [vmem:[#allocation59_spill] sm:$0xff]  ;;  %v17596_v10 = vld [vmem:[#allocation72_spill] sm:$0xff] }
 0x66e   :  { %v7974_v49 = vpop.f32.mrf.mxu0  ;;  %v8271_v17 = vpop.f32.mrf.mxu1  ;;  %v7386_v38 = vadd.f32 %v16258_v54, %v17595_v11 }
 0x66f   :  { %v8365_v56 = vand.u32 2147483647, %v8236_v13  ;;  %v8395_v52 = vadd.f32 %v8394_v1, %v8364_v59  ;;  %v7975_v37 = vadd.f32 %v7974_v49, %v7636_v46  ;;  %v8254_v2 = vadd.f32 %v11011_v4, %v7981_v30  ;;  %v17597_v13 = vld [vmem:[#allocation28_spill] sm:$0xff] }
 0x670   :  { %v10934_v48 = vpop.f32.mrf.mxu0  ;;  %v11020_v0 = vpop.f32.mrf.mxu1  ;;  %v7668_v4 = vadd.f32 %v16225_v51, %v7344_v61 }
 0x671   :  { %v8396_v55 = vadd.f32 %v8395_v52, %v8365_v56  ;;  %v8248_v5 = vadd.f32 %v8247_v47, %v7975_v37  ;;  %v7993_v27 = vadd.f32 %v10934_v48, %v16234_v26  ;;  %v8368_v19 = vand.u32 2147483647, %v8254_v2  ;;  %v17598_v37 = vld [vmem:[#allocation19_spill] sm:$0xff] }
 0x672   :  { %v7986_v63 = vpop.f32.mrf.mxu0  ;;  %v8283_v22 = vpop.f32.mrf.mxu1  ;;  %v7400_v61 = vadd.f32 %v16265_v23, %v17598_v37 }
 0x673   :  { %v8367_v33 = vand.u32 2147483647, %v8248_v5  ;;  %v8397_v20 = vadd.f32 %v8396_v55, %v8366_v24  ;;  %v7987_v25 = vadd.f32 %v7986_v63, %v7652_v16  ;;  %v8266_v29 = vadd.f32 %v11014_v32, %v7993_v27  ;;  %v17594_v32 = vld [vmem:[#allocation45_spill] sm:$0xff]  ;;  %v17599_v16 = vld [vmem:[#allocation64_spill] sm:$0xff]  ;;  %v17600_v63 = vld [vmem:[#allocation34_spill] sm:$0xff] }
 0x674   :  { %v10937_v12 = vpop.f32.mrf.mxu0  ;;  %v11023_v57 = vpop.f32.mrf.mxu1  ;;  %v7716_v24 = vadd.f32 %v17599_v16, %v7386_v38 }
 0x675   :  { %v8398_v15 = vadd.f32 %v8397_v20, %v8367_v33  ;;  %v8260_v6 = vadd.f32 %v8259_v35, %v7987_v25  ;;  %v8005_v34 = vadd.f32 %v10937_v12, %v16241_v43  ;;  %v8370_v14 = vand.u32 2147483647, %v8266_v29 }
 0x676   :  { %v7998_v62 = vpop.f32.mrf.mxu0  ;;  %v8295_v26 = vpop.f32.mrf.mxu1 }
 0x677   :  { %v8369_v47 = vand.u32 2147483647, %v8260_v6  ;;  %v8399_v40 = vadd.f32 %v8398_v15, %v8368_v19  ;;  %v7999_v9 = vadd.f32 %v7998_v62, %v7668_v4  ;;  %v8278_v50 = vadd.f32 %v11017_v41, %v8005_v34  ;;  %v17602_v19 = vld [vmem:[#allocation44_spill] sm:$0xff] }
 0x678   :  { %v10940_v28 = vpop.f32.mrf.mxu0  ;;  %v11026_v31 = vpop.f32.mrf.mxu1  ;;  %v7700_v41 = vadd.f32 %v17596_v10, %v7372_v45  ;;  %v7414_v12 = vadd.f32 %v17602_v19, %v17601_v7 }
 0x679   :  { %v8400_v51 = vadd.f32 %v8399_v40, %v8369_v47  ;;  %v8272_v42 = vadd.f32 %v8271_v17, %v7999_v9  ;;  %v8017_v3 = vadd.f32 %v10940_v28, %v17594_v32  ;;  %v8372_v21 = vand.u32 2147483647, %v8278_v50  ;;  %v17604_v47 = vld [vmem:[#allocation32_spill] sm:$0xff]  ;;  %v17605_v50 = vld [vmem:[#allocation42_spill] sm:$0xff]  ;;  %v17606_v28 = vld [vmem:[#allocation69_spill] sm:$0xff] }
 0x67a   :  { %v8010_v58 = vpop.f32.mrf.mxu0  ;;  %v8307_v43 = vpop.f32.mrf.mxu1  ;;  %v7428_v36 = vadd.f32 %v17606_v28, %v17605_v50 }
 0x67b   :  { %v8371_v53 = vand.u32 2147483647, %v8272_v42  ;;  %v8401_v35 = vadd.f32 %v8400_v51, %v8370_v14  ;;  %v8011_v8 = vadd.f32 %v8010_v58, %v7684_v44  ;;  %v8290_v1 = vadd.f32 %v11020_v0, %v8017_v3  ;;  %v17607_v42 = vld [vmem:[#allocation71_spill] sm:$0xff] }
 0x67c   :  { %v10943_v60 = vpop.f32.mrf.mxu0  ;;  %v11029_v59 = vpop.f32.mrf.mxu1  ;;  %v7748_v32 = vadd.f32 %v17607_v42, %v7414_v12 }
 0x67d   :  { %v8402_v46 = vadd.f32 %v8401_v35, %v8371_v53  ;;  %v8284_v18 = vadd.f32 %v8283_v22, %v8011_v8  ;;  %v8029_v30 = vadd.f32 %v10943_v60, %v17597_v13  ;;  %v8374_v55 = vand.u32 2147483647, %v8290_v1  ;;  %v17608_v35 = vld [vmem:[#allocation41_spill] sm:$0xff] }
 0x67e   :  { %v8022_v49 = vpop.f32.mrf.mxu0  ;;  %v8319_v48 = vpop.f32.mrf.mxu1  ;;  %v17610_v13 = vld [vmem:[#allocation37_spill] sm:$0xff] }
 0x67f   :  { %v8373_v17 = vand.u32 2147483647, %v8284_v18  ;;  %v8403_v56 = vadd.f32 %v8402_v46, %v8372_v21  ;;  %v8023_v52 = vadd.f32 %v8022_v49, %v7700_v41  ;;  %v8302_v2 = vadd.f32 %v11023_v57, %v8029_v30  ;;  %v17603_v57 = vld [vmem:[#allocation43_spill] sm:$0xff] }
 0x680   :  { %v10946_v54 = vpop.f32.mrf.mxu0  ;;  %v11032_v15 = vpop.f32.mrf.mxu1  ;;  %v7732_v29 = vadd.f32 %v17603_v57, %v7400_v61  ;;  %v17609_v41 = vld [vmem:[#allocation47_spill] sm:$0xff] }
 0x681   :  { %v8404_v5 = vadd.f32 %v8403_v56, %v8373_v17  ;;  %v8296_v27 = vadd.f32 %v8295_v26, %v8023_v52  ;;  %v8041_v0 = vadd.f32 %v10946_v54, %v17600_v63  ;;  %v8376_v4 = vand.u32 2147483647, %v8302_v2 }
 0x682   :  { %v8034_v22 = vpop.f32.mrf.mxu0  ;;  %v8331_v44 = vpop.f32.mrf.mxu1  ;;  %v7764_v46 = vadd.f32 %v17609_v41, %v7428_v36 }
 0x683   :  { %v8375_v33 = vand.u32 2147483647, %v8296_v27  ;;  %v8405_v20 = vadd.f32 %v8404_v5, %v8374_v55  ;;  %v8035_v25 = vadd.f32 %v8034_v22, %v7716_v24  ;;  %v8314_v34 = vadd.f32 %v11026_v31, %v8041_v0 }
 0x684   :  { %v10949_v23 = vpop.f32.mrf.mxu0  ;;  %v11035_v60 = vpop.f32.mrf.mxu1 }
 0x685   :  { %v8406_v6 = vadd.f32 %v8405_v20, %v8375_v33  ;;  %v8308_v62 = vadd.f32 %v8307_v43, %v8035_v25  ;;  %v8053_v40 = vadd.f32 %v10949_v23, %v17604_v47  ;;  %v8378_v3 = vand.u32 2147483647, %v8314_v34 }
 0x686   :  { %v8046_v26 = vpop.f32.mrf.mxu0  ;;  %v8343_v37 = vpop.f32.mrf.mxu1 }
 0x687   :  { %v8377_v9 = vand.u32 2147483647, %v8308_v62  ;;  %v8407_v39 = vadd.f32 %v8406_v6, %v8376_v4  ;;  %v8047_v45 = vadd.f32 %v8046_v26, %v7732_v29  ;;  %v8326_v14 = vadd.f32 %v11029_v59, %v8053_v40 }
 0x688   :  { %v10952_v51 = vpop.f32.mrf.mxu0 }
 0x689   :  { %v8408_v58 = vadd.f32 %v8407_v39, %v8377_v9  ;;  %v8320_v53 = vadd.f32 %v8319_v48, %v8047_v45  ;;  %v8065_v31 = vadd.f32 %v10952_v51, %v17608_v35  ;;  %v8380_v21 = vand.u32 2147483647, %v8326_v14 }
 0x68a   :  { %v8058_v43 = vpop.f32.mrf.mxu0 }
 0x68b   :  { %v8379_v8 = vand.u32 2147483647, %v8320_v53  ;;  %v8409_v11 = vadd.f32 %v8408_v58, %v8378_v3  ;;  %v8059_v38 = vadd.f32 %v8058_v43, %v7748_v32  ;;  %v8338_v18 = vadd.f32 %v11032_v15, %v8065_v31 }
 0x68c   :  { %v10955_v10 = vpop.f32.mrf.mxu0 }
 0x68d   :  { %v8410_v1 = vadd.f32 %v8409_v11, %v8379_v8  ;;  %v8332_v59 = vadd.f32 %v8331_v44, %v8059_v38  ;;  %v8077_v30 = vadd.f32 %v10955_v10, %v17610_v13  ;;  %v8382_v61 = vand.u32 2147483647, %v8338_v18 }
 0x68e   :  { %v8070_v49 = vpop.f32.mrf.mxu0 }
 0x68f   :  { %v8381_v17 = vand.u32 2147483647, %v8332_v59  ;;  %v8411_v56 = vadd.f32 %v8410_v1, %v8380_v21  ;;  %v8071_v52 = vadd.f32 %v8070_v49, %v7764_v46  ;;  %v8350_v48 = vadd.f32 %v11035_v60, %v8077_v30 }
 0x691   :  { %v8412_v2 = vadd.f32 %v8411_v56, %v8381_v17  ;;  %v8344_v54 = vadd.f32 %v8343_v37, %v8071_v52  ;;  %v8384_v55 = vand.u32 2147483647, %v8350_v48 }
 0x693   :  { %v8383_v16 = vand.u32 2147483647, %v8344_v54  ;;  %v8413_v24 = vadd.f32 %v8412_v2, %v8382_v61 }
 0x695   :  { %v8414_v5 = vadd.f32 %v8413_v24, %v8383_v16 }
 0x697   :  { %v8415_v27 = vadd.f32 %v8414_v5, %v8384_v55 }
 0x699   :  { %8416 = vadd.xlane.f32.xlu0 %v8415_v27 }
 0x69a   :  { %11254 = shalt.err (!%p11251_p9)
}
 0x69b   :  { %8517 = dma.vmem_to_hbm [thread:$0]  %s8512_s7, 4096, %s16363_s9, [#allocation4], %s11290_s16, %s11290_s16, %s11291_s17   ;;  %v8489_v63 = vpop.xlane.xlu1 %8488  ;;  %v8497_v6 = vlaneseq }
 0x69c   :  { %v8490_v0 = vrot.slane %v8489_v63, 4  ;;  %s11293_s9 = smov [#allocation6]  }
 0x69d   :  { %v8498_v34 = vand.u32 127, %v8497_v6  ;;  %s8524_s16 = sshll.u32 %s11293_s9, 4  ;;  %s8525_s16 = int_to_ptr.vmem [resolvable:$true] %s8524_s16 }
 0x69e   :  { %v8491_v22 = vadd.f32 %v8490_v0, %v8489_v63  ;;  %s11263_s24 = scalar_lea.vmem %s8525_s16, 128  ;;  %p11268_p11 = scmp.lt.s32.totalorder %s8525_s16, %s8525_s16 }
 0x69f   :  { %vm8502_vm2 = vcmp.eq.s32.totalorder %v8498_v34, 1  ;;  %vm8501_vm3 = vcmp.eq.s32.totalorder %v8498_v34, 0  ;;  %p11264_p10 = scmp.ne.s32.totalorder %s8525_s16, %s11263_s24  ;;  %p11269_p12 = scmp.lt.s32.totalorder %s11263_s24, %s11263_s24 }
 0x6a0   :  { %v8492_v33 = vrot.slane %v8491_v22, 2 }
 0x6a1   :  { %p11270_p13 = por %p11269_p12, %p11268_p11 }
 0x6a2   :  { %v8493_v19 = vadd.f32 %v8492_v33, %v8491_v22 }
 0x6a3   :  { %p11271_p0 = pnand %p11270_p13, %p11264_p10 }
 0x6a4   :  { %v8494_v15 = vrot.slane %v8493_v19, 1 }
 0x6a6   :  { %v8495_v29 = vadd.f32 %v8494_v15, %v8493_v19 }
 0x722   :  { %v8417_v20 = vpop.xlane.xlu0 %8416 }
 0x723   :  { %v8418_v25 = vrot.slane %v8417_v20, 4 }
 0x725   :  { %v8419_v7 = vadd.f32 %v8418_v25, %v8417_v20 }
 0x727   :  { %v8420_v12 = vrot.slane %v8419_v7, 2 }
 0x729   :  { %v8421_v4 = vadd.f32 %v8420_v12, %v8419_v7 }
 0x72b   :  { %v8422_v23 = vrot.slane %v8421_v4, 1 }
 0x72d   :  { %v8423_v57 = vadd.f32 %v8422_v23, %v8421_v4 }
 0x72f   :  { %11036 = vpush %v8423_v57 }
 0x730   :  { %11038 = vpush %v8495_v29 }
 0x760   :  { %s11037_s23 = spop %11036 }
 0x761   :  { %v8499_v62 = vstv %s11037_s23  ;;  %s11039_s17 = spop %11038 }
 0x762   :  { %v8500_v47 = vstv %s11039_s17 }
 0x763   :  { %v8503_v40 = vsel %vm8502_vm2, %v8500_v47, 0.0 }
 0x764   :  { %v8504_v26 = vsel %vm8501_vm3, %v8499_v62, %v8503_v40 }
 0x765   :  { %8505 = vst [vmem:[#allocation6] sm:$0xff] %v8504_v26 }
 0x766   :  { %11274 = shalt.err (!%p11271_p0)
}
 0x767   :  { %8527 = dma.vmem_to_hbm [thread:$0]  %s8525_s16, 128, %s16364_s10, [#allocation7]  }
 0x768   :  { %11285 = dma.done.wait [#allocation4], 4096  }
 0x769   :  { %11286 = vsyncadd [#allocation4], 4294963200 }
 0x76a   :  { %11287 = dma.done.wait [#allocation7], 128  }
 0x76b   :  { %11288 = vsyncadd [#allocation7], 4294967168 }
 0x76c   :  { %8534 = vsyncpa [#allocation3], 1 }
 0x76d   :  { %8535 = vsyncpa [#allocation4], 1 }
 0x76e   :  { %8536 = vsyncpa [#allocation7], 1 }

</bundles_post_ra>
